<compile_context>
chip_gen: v7x
topology: tpu7x:2x2x1
jax: 0.10.0
libtpu: 0.0.40
codegen_flags: <defaults>
</compile_context>

<pallas_src>
import jax
import jax.numpy as jnp
import numpy as np
from jax.experimental import pallas as pl
from jax.experimental.pallas import tpu as pltpu

BN_EPS = 1e-5


# ----------------------------- fused Pallas kernel -----------------------------

def _decoder_edge_block_kernel(de_ref, en1_ref, en2_ref, p_ref, o_ref):
    # de_ref : (Cde, H, W)     low-res decoder feature (one batch element), NCHW plane set
    # en*_ref: (Cen, H2, W2)   encoder features, H2 = 2H, W2 = 2W
    # p_ref  : (P,) f32 SMEM   packed BN-folded weights + biases (see _pack_params)
    # o_ref  : (Cout, H2, W2)
    Cde, H, W = de_ref.shape
    Cen, H2, W2 = en1_ref.shape
    Cout = o_ref.shape[0]
    mid = Cout // 2
    f32 = jnp.float32

    # ---- static offsets into the packed SMEM parameter vector ----
    off_w1 = 0
    off_b1 = off_w1 + (Cde + 2 * Cen) * Cout
    off_w2 = off_b1 + Cout
    off_b2 = off_w2 + 9 * mid * mid
    off_w3 = off_b2 + mid
    off_b3 = off_w3 + 9 * Cout * Cout

    def w1_at(ci, co):                       # ci over fused (de_up | en1 | en2) channels
        return p_ref[off_w1 + ci * Cout + co]

    def w2_at(ky, kx, ci, co):
        return p_ref[off_w2 + ((ky * 3 + kx) * mid + ci) * mid + co]

    def w3_at(ky, kx, ci, co):               # ci over [x1c (mid) | x2 (mid)] channels
        return p_ref[off_w3 + ((ky * 3 + kx) * Cout + ci) * Cout + co]

    # ---- constant 0/1 selection matrices (MXU operands), built once per grid step ----
    def _sel(shape, cond):
        r = jax.lax.broadcasted_iota(jnp.int32, shape, 0)
        c = jax.lax.broadcasted_iota(jnp.int32, shape, 1)
        return jnp.where(cond(r, c), 1.0, 0.0).astype(f32)

    # nearest-2x upsample:  (E_h @ x)[i,j] = x[i//2, j];  (x @ E_w)[i,j] = x[i, j//2]
    e_h = _sel((H2, H), lambda r, c: (r == 2 * c) | (r == 2 * c + 1))
    e_w = _sel((W, W2), lambda r, c: (c == 2 * r) | (c == 2 * r + 1))
    # zero-padded unit shifts: (Sh_m @ x)[i,j]=x[i-1,j], (Sh_p @ x)[i,j]=x[i+1,j]
    #                          (x @ Sw_m)[i,j]=x[i,j-1], (x @ Sw_p)[i,j]=x[i,j+1]
    sh_m = _sel((H2, H2), lambda r, c: c == r - 1)
    sh_p = _sel((H2, H2), lambda r, c: c == r + 1)
    sw_m = _sel((W2, W2), lambda r, c: r == c - 1)
    sw_p = _sel((W2, W2), lambda r, c: r == c + 1)

    def dot32(a, b):
        return jnp.dot(a, b, preferred_element_type=f32)

    def _split(x):
        # bf16-exact part + residual: keeps the 0/1-selection matmuls f32-accurate
        # even if the backend runs f32 matmuls as reduced-precision MXU passes.
        hi = x.astype(jnp.bfloat16).astype(f32)
        return hi, x - hi

    def upsample2x(x):
        # nearest 2x upsample (H, W) -> (H2, W2) on the MXU; exact (see _split).
        hi, lo = _split(x)
        return dot32(dot32(e_h, hi), e_w) + dot32(dot32(e_h, lo), e_w)

    def make_taps(x):
        # all 9 zero-padded shifts of x: taps[(dy,dx)][i,j] = x[i+dy, j+dx]
        hi, lo = _split(x)
        rows = {0: (hi, lo),
                -1: (dot32(sh_m, hi), dot32(sh_m, lo)),
                1: (dot32(sh_p, hi), dot32(sh_p, lo))}
        taps = {}
        for dy in (-1, 0, 1):
            rh, rl = rows[dy]
            taps[(dy, 0)] = rh + rl
            taps[(dy, -1)] = dot32(rh, sw_m) + dot32(rl, sw_m)
            taps[(dy, 1)] = dot32(rh, sw_p) + dot32(rl, sw_p)
        return taps

    def tree_sum(terms):
        # balanced reduction -> independent partials for the 4 VALU slots
        terms = list(terms)
        while len(terms) > 1:
            nxt = [terms[i] + terms[i + 1] for i in range(0, len(terms) - 1, 2)]
            if len(terms) % 2:
                nxt.append(terms[-1])
            terms = nxt
        return terms[0]

    # ---------------- fuse[0:3]: 1x1 conv (BN folded) + ReLU ----------------
    de_planes = [de_ref[ci].astype(f32) for ci in range(Cde)]
    en1_planes = [en1_ref[ci].astype(f32) for ci in range(Cen)]
    en2_planes = [en2_ref[ci].astype(f32) for ci in range(Cen)]

    y = []
    for co in range(Cout):
        # 1x1 conv of `de` at LOW resolution (1x1 conv commutes with nearest upsample)
        yd = tree_sum([de_planes[ci] * w1_at(ci, co) for ci in range(Cde)])
        terms = [upsample2x(yd)]
        terms += [en1_planes[ci] * w1_at(Cde + ci, co) for ci in range(Cen)]
        terms += [en2_planes[ci] * w1_at(Cde + Cen + ci, co) for ci in range(Cen)]
        y.append(jnp.maximum(tree_sum(terms) + p_ref[off_b1 + co], 0.0))

    # ---------------- CGSU: channel_split -> even / odd channel planes ----------------
    x1 = [y[2 * c] for c in range(mid)]
    x2 = [y[2 * c + 1] for c in range(mid)]

    def conv3x3(planes, w_at, ci_base, n_out):
        # SAME 3x3 conv over per-channel planes; taps reused across output channels.
        terms = [[] for _ in range(n_out)]
        for ci, x in enumerate(planes):
            taps = make_taps(x)
            for dy in (-1, 0, 1):
                for dx in (-1, 0, 1):
                    t = taps[(dy, dx)]
                    for co in range(n_out):
                        terms[co].append(t * w_at(dy + 1, dx + 1, ci_base + ci, co))
        return [tree_sum(ts) for ts in terms]

    # CGSU conv1 (3x3, BN folded) + ReLU; Dropout is identity in eval mode.
    x1c = conv3x3(x1, w2_at, 0, mid)
    x1c = [jnp.maximum(x1c[co] + p_ref[off_b2 + co], 0.0) for co in range(mid)]

    # final Conv_BN_ReLU on cat([x1c, x2]) -> w3 split over input channels (no concat)
    oa = conv3x3(x1c, w3_at, 0, Cout)
    ob = conv3x3(x2, w3_at, mid, Cout)
    for co in range(Cout):
        val = jnp.maximum(oa[co] + ob[co] + p_ref[off_b3 + co], 0.0)
        o_ref[co] = val.astype(o_ref.dtype)     # (H2, W2): lane-dense, unmasked store


# ----------------------------- wrapper -----------------------------

def fold_bn(gamma, beta, mean, var):
    scale = gamma / jnp.sqrt(var + BN_EPS)
    bias = beta - mean * scale
    return scale, bias


def _pack_params(params):
    """Fold BN into the conv weights and pack everything into one flat f32 vector."""
    Cout = params["w1"].shape[0]
    mid = Cout // 2
    s1, b1 = fold_bn(*params["bn1"])
    s2, b2 = fold_bn(*params["bn2"])
    s3, b3 = fold_bn(*params["bn3"])
    w1f = params["w1"] * s1[:, None]                    # (Cout, Cin_fuse)
    w2f = params["w2"] * s2[:, None, None, None]        # (mid, mid, 3, 3)   OIHW
    w3f = params["w3"] * s3[:, None, None, None]        # (Cout, Cout, 3, 3) OIHW
    pieces = [
        jnp.transpose(w1f, (1, 0)).reshape(-1),         # index: ci*Cout + co
        b1,
        jnp.transpose(w2f, (2, 3, 1, 0)).reshape(-1),   # index: ((ky*3+kx)*mid+ci)*mid+co
        b2,
        jnp.transpose(w3f, (2, 3, 1, 0)).reshape(-1),   # index: ((ky*3+kx)*Cout+ci)*Cout+co
        b3,
    ]
    return jnp.concatenate([p.astype(jnp.float32) for p in pieces])


def decoder_edge_block_forward(de, en1, en2, params):
    """NCHW. de: (B, Cde, H, W); en1/en2: (B, Cen, 2H, 2W) -> (B, Cout, 2H, 2W)."""
    B, Cde, H, W = de.shape
    _, Cen, H2, W2 = en1.shape
    assert H2 == 2 * H and W2 == 2 * W
    assert en2.shape == en1.shape
    Cout = params["w1"].shape[0]

    packed = _pack_params(params)

    return pl.pallas_call(
        _decoder_edge_block_kernel,
        out_shape=jax.ShapeDtypeStruct((B, Cout, H2, W2), de.dtype),
        grid=(B,),
        in_specs=[
            pl.BlockSpec((None, Cde, H, W), lambda b: (b, 0, 0, 0)),
            pl.BlockSpec((None, Cen, H2, W2), lambda b: (b, 0, 0, 0)),
            pl.BlockSpec((None, Cen, H2, W2), lambda b: (b, 0, 0, 0)),
            pl.BlockSpec(memory_space=pltpu.MemorySpace.SMEM),   # packed weights/biases
        ],
        out_specs=pl.BlockSpec((None, Cout, H2, W2), lambda b: (b, 0, 0, 0)),
        compiler_params=pltpu.CompilerParams(
            dimension_semantics=("parallel",)),   # B>=2 -> both v7x TensorCores busy
    )(de, en1, en2, packed)


# ----------------------------- params / pure-JAX reference -----------------------------

def _bn_init(key, c):
    k1, k2, k3, k4 = jax.random.split(key, 4)
    gamma = 1.0 + 0.1 * jax.random.normal(k1, (c,), jnp.float32)
    beta = 0.1 * jax.random.normal(k2, (c,), jnp.float32)
    mean = 0.1 * jax.random.normal(k3, (c,), jnp.float32)
    var = 0.5 + jnp.abs(jax.random.normal(k4, (c,), jnp.float32))
    return (gamma, beta, mean, var)


def init_params(key, de_in, en_in, out_c):
    assert out_c == de_in // 2, "the out_channel is not in_channel//2 in decoder block"
    assert out_c % 4 == 0  # required by channel_split inside CGSU
    cin_fuse = de_in + en_in + en_in
    mid = out_c // 2
    ks = jax.random.split(key, 6)
    return {
        "w1": 0.2 * jax.random.normal(ks[0], (out_c, cin_fuse), jnp.float32),      # 1x1 (O, I)
        "bn1": _bn_init(ks[1], out_c),
        "w2": 0.2 * jax.random.normal(ks[2], (mid, mid, 3, 3), jnp.float32),       # OIHW
        "bn2": _bn_init(ks[3], mid),
        "w3": 0.2 * jax.random.normal(ks[4], (out_c, out_c, 3, 3), jnp.float32),   # OIHW
        "bn3": _bn_init(ks[5], out_c),
    }


def _ref_conv3x3(x, w, scale, bias):
    y = jax.lax.conv_general_dilated(
        x, w, window_strides=(1, 1), padding="SAME",
        dimension_numbers=("NCHW", "OIHW", "NCHW"),
        precision=jax.lax.Precision.HIGHEST)
    return jnp.maximum(y * scale[None, :, None, None] + bias[None, :, None, None], 0.0)


def ref_forward(de, en1, en2, params):
    """Unfused reference following the PyTorch module exactly (NCHW)."""
    de_up = jnp.repeat(jnp.repeat(de, 2, axis=2), 2, axis=3)
    x = jnp.concatenate([de_up, en1, en2], axis=1)
    s1, b1 = fold_bn(*params["bn1"])
    y = jnp.einsum("oc,bchw->bohw", params["w1"], x,
                   precision=jax.lax.Precision.HIGHEST)
    y = jnp.maximum(y * s1[None, :, None, None] + b1[None, :, None, None], 0.0)
    x1, x2 = y[:, 0::2], y[:, 1::2]                      # channel_split: even / odd
    s2, b2 = fold_bn(*params["bn2"])
    x1 = _ref_conv3x3(x1, params["w2"], s2, b2)
    y2 = jnp.concatenate([x1, x2], axis=1)
    s3, b3 = fold_bn(*params["bn3"])
    return _ref_conv3x3(y2, params["w3"], s3, b3)


# ----------------------------- main -----------------------------

if __name__ == "__main__":
    key = jax.random.PRNGKey(0)
    B = 2
    de_in, en_in, out_c = 8, 4, 4          # out_channel == de_in_channel // 2
    H, W = 8, 64                           # encoder/output spatial is (16, 128): lane-dense

    k_de, k_e1, k_e2, k_p = jax.random.split(key, 4)
    de = jax.random.normal(k_de, (B, de_in, H, W), jnp.float32)
    en1 = jax.random.normal(k_e1, (B, en_in, 2 * H, 2 * W), jnp.float32)
    en2 = jax.random.normal(k_e2, (B, en_in, 2 * H, 2 * W), jnp.float32)
    params = init_params(k_p, de_in, en_in, out_c)

    fwd = jax.jit(decoder_edge_block_forward)
    out = jax.block_until_ready(fwd(de, en1, en2, params))
    assert out.shape == (B, out_c, 2 * H, 2 * W)

    ref = ref_forward(de, en1, en2, params)
    np.testing.assert_allclose(np.asarray(out), np.asarray(ref), rtol=2e-4, atol=2e-4)

    print("KERNEL_OK")
</pallas_src>

<mosaic_0001>
module attributes {stable_mosaic.version = 11 : i64} {
  func.func @_decoder_edge_block_kernel(%arg0: i32, %arg1: memref<1x8x8x64xf32, #tpu.memory_space<vmem>>, %arg2: memref<1x4x16x128xf32, #tpu.memory_space<vmem>>, %arg3: memref<1x4x16x128xf32, #tpu.memory_space<vmem>>, %arg4: memref<254xf32, #tpu.memory_space<smem>>, %arg5: memref<1x4x16x128xf32, #tpu.memory_space<vmem>>) attributes {dimension_semantics = [#tpu.dimension_semantics<parallel>], iteration_bounds = array<i64: 2>, scalar_prefetch = 0 : i64, scratch_operands = 0 : i64, tpu.core_type = #tpu.core_type<tc>, window_params = [{transform_indices = @transform_0, window_bounds = array<i64: 1, 8, 8, 64>}, {transform_indices = @transform_1, window_bounds = array<i64: 1, 4, 16, 128>}, {transform_indices = @transform_2, window_bounds = array<i64: 1, 4, 16, 128>}, {transform_indices = @transform_3, window_bounds = array<i64: 254>}, {transform_indices = @transform_4, window_bounds = array<i64: 1, 4, 16, 128>}]} {
    %0 = tpu.iota {dimensions = array<i32: 0>} : vector<16x8xi32>
    %1 = tpu.iota {dimensions = array<i32: 1>} : vector<16x8xi32>
    %c2_i32 = arith.constant 2 : i32
    %2 = vector.broadcast %c2_i32 : i32 to vector<16x8xi32>
    %3 = arith.muli %2, %1 : vector<16x8xi32>
    %4 = arith.cmpi eq, %0, %3 : vector<16x8xi32>
    %c2_i32_0 = arith.constant 2 : i32
    %5 = vector.broadcast %c2_i32_0 : i32 to vector<16x8xi32>
    %6 = arith.muli %5, %1 : vector<16x8xi32>
    %c1_i32 = arith.constant 1 : i32
    %7 = vector.broadcast %c1_i32 : i32 to vector<16x8xi32>
    %8 = arith.addi %6, %7 : vector<16x8xi32>
    %9 = arith.cmpi eq, %0, %8 : vector<16x8xi32>
    %10 = arith.ori %4, %9 : vector<16x8xi1>
    %cst = arith.constant 1.000000e+00 : f32
    %cst_1 = arith.constant 0.000000e+00 : f32
    %11 = vector.broadcast %cst : f32 to vector<16x8xf32>
    %12 = vector.broadcast %cst_1 : f32 to vector<16x8xf32>
    %13 = arith.select %10, %11, %12 : vector<16x8xi1>, vector<16x8xf32>
    %14 = tpu.iota {dimensions = array<i32: 0>} : vector<64x128xi32>
    %15 = tpu.iota {dimensions = array<i32: 1>} : vector<64x128xi32>
    %c2_i32_2 = arith.constant 2 : i32
    %16 = vector.broadcast %c2_i32_2 : i32 to vector<64x128xi32>
    %17 = arith.muli %16, %14 : vector<64x128xi32>
    %18 = arith.cmpi eq, %15, %17 : vector<64x128xi32>
    %c2_i32_3 = arith.constant 2 : i32
    %19 = vector.broadcast %c2_i32_3 : i32 to vector<64x128xi32>
    %20 = arith.muli %19, %14 : vector<64x128xi32>
    %c1_i32_4 = arith.constant 1 : i32
    %21 = vector.broadcast %c1_i32_4 : i32 to vector<64x128xi32>
    %22 = arith.addi %20, %21 : vector<64x128xi32>
    %23 = arith.cmpi eq, %15, %22 : vector<64x128xi32>
    %24 = arith.ori %18, %23 : vector<64x128xi1>
    %cst_5 = arith.constant 1.000000e+00 : f32
    %cst_6 = arith.constant 0.000000e+00 : f32
    %25 = vector.broadcast %cst_5 : f32 to vector<64x128xf32>
    %26 = vector.broadcast %cst_6 : f32 to vector<64x128xf32>
    %27 = arith.select %24, %25, %26 : vector<64x128xi1>, vector<64x128xf32>
    %28 = tpu.iota {dimensions = array<i32: 0>} : vector<16x16xi32>
    %29 = tpu.iota {dimensions = array<i32: 1>} : vector<16x16xi32>
    %c1_i32_7 = arith.constant 1 : i32
    %30 = vector.broadcast %c1_i32_7 : i32 to vector<16x16xi32>
    %31 = arith.subi %28, %30 : vector<16x16xi32>
    %32 = arith.cmpi eq, %29, %31 : vector<16x16xi32>
    %cst_8 = arith.constant 1.000000e+00 : f32
    %cst_9 = arith.constant 0.000000e+00 : f32
    %33 = vector.broadcast %cst_8 : f32 to vector<16x16xf32>
    %34 = vector.broadcast %cst_9 : f32 to vector<16x16xf32>
    %35 = arith.select %32, %33, %34 : vector<16x16xi1>, vector<16x16xf32>
    %36 = tpu.iota {dimensions = array<i32: 0>} : vector<16x16xi32>
    %37 = tpu.iota {dimensions = array<i32: 1>} : vector<16x16xi32>
    %c1_i32_10 = arith.constant 1 : i32
    %38 = vector.broadcast %c1_i32_10 : i32 to vector<16x16xi32>
    %39 = arith.addi %36, %38 : vector<16x16xi32>
    %40 = arith.cmpi eq, %37, %39 : vector<16x16xi32>
    %cst_11 = arith.constant 1.000000e+00 : f32
    %cst_12 = arith.constant 0.000000e+00 : f32
    %41 = vector.broadcast %cst_11 : f32 to vector<16x16xf32>
    %42 = vector.broadcast %cst_12 : f32 to vector<16x16xf32>
    %43 = arith.select %40, %41, %42 : vector<16x16xi1>, vector<16x16xf32>
    %44 = tpu.iota {dimensions = array<i32: 0>} : vector<128x128xi32>
    %45 = tpu.iota {dimensions = array<i32: 1>} : vector<128x128xi32>
    %c1_i32_13 = arith.constant 1 : i32
    %46 = vector.broadcast %c1_i32_13 : i32 to vector<128x128xi32>
    %47 = arith.subi %45, %46 : vector<128x128xi32>
    %48 = arith.cmpi eq, %44, %47 : vector<128x128xi32>
    %cst_14 = arith.constant 1.000000e+00 : f32
    %cst_15 = arith.constant 0.000000e+00 : f32
    %49 = vector.broadcast %cst_14 : f32 to vector<128x128xf32>
    %50 = vector.broadcast %cst_15 : f32 to vector<128x128xf32>
    %51 = arith.select %48, %49, %50 : vector<128x128xi1>, vector<128x128xf32>
    %52 = tpu.iota {dimensions = array<i32: 0>} : vector<128x128xi32>
    %53 = tpu.iota {dimensions = array<i32: 1>} : vector<128x128xi32>
    %c1_i32_16 = arith.constant 1 : i32
    %54 = vector.broadcast %c1_i32_16 : i32 to vector<128x128xi32>
    %55 = arith.addi %53, %54 : vector<128x128xi32>
    %56 = arith.cmpi eq, %52, %55 : vector<128x128xi32>
    %cst_17 = arith.constant 1.000000e+00 : f32
    %cst_18 = arith.constant 0.000000e+00 : f32
    %57 = vector.broadcast %cst_17 : f32 to vector<128x128xf32>
    %58 = vector.broadcast %cst_18 : f32 to vector<128x128xf32>
    %59 = arith.select %56, %57, %58 : vector<128x128xi1>, vector<128x128xf32>
    %c0 = arith.constant 0 : index
    %c0_19 = arith.constant 0 : index
    %c0_20 = arith.constant 0 : index
    %c0_21 = arith.constant 0 : index
    %60 = vector.load %arg1[%c0, %c0_19, %c0_20, %c0_21] : memref<1x8x8x64xf32, #tpu.memory_space<vmem>>, vector<1x1x8x64xf32>
    %61 = vector.shape_cast %60 : vector<1x1x8x64xf32> to vector<8x64xf32>
    %c0_22 = arith.constant 0 : index
    %c1 = arith.constant 1 : index
    %c0_23 = arith.constant 0 : index
    %c0_24 = arith.constant 0 : index
    %62 = vector.load %arg1[%c0_22, %c1, %c0_23, %c0_24] : memref<1x8x8x64xf32, #tpu.memory_space<vmem>>, vector<1x1x8x64xf32>
    %63 = vector.shape_cast %62 : vector<1x1x8x64xf32> to vector<8x64xf32>
    %c0_25 = arith.constant 0 : index
    %c2 = arith.constant 2 : index
    %c0_26 = arith.constant 0 : index
    %c0_27 = arith.constant 0 : index
    %64 = vector.load %arg1[%c0_25, %c2, %c0_26, %c0_27] : memref<1x8x8x64xf32, #tpu.memory_space<vmem>>, vector<1x1x8x64xf32>
    %65 = vector.shape_cast %64 : vector<1x1x8x64xf32> to vector<8x64xf32>
    %c0_28 = arith.constant 0 : index
    %c3 = arith.constant 3 : index
    %c0_29 = arith.constant 0 : index
    %c0_30 = arith.constant 0 : index
    %66 = vector.load %arg1[%c0_28, %c3, %c0_29, %c0_30] : memref<1x8x8x64xf32, #tpu.memory_space<vmem>>, vector<1x1x8x64xf32>
    %67 = vector.shape_cast %66 : vector<1x1x8x64xf32> to vector<8x64xf32>
    %c0_31 = arith.constant 0 : index
    %c4 = arith.constant 4 : index
    %c0_32 = arith.constant 0 : index
    %c0_33 = arith.constant 0 : index
    %68 = vector.load %arg1[%c0_31, %c4, %c0_32, %c0_33] : memref<1x8x8x64xf32, #tpu.memory_space<vmem>>, vector<1x1x8x64xf32>
    %69 = vector.shape_cast %68 : vector<1x1x8x64xf32> to vector<8x64xf32>
    %c0_34 = arith.constant 0 : index
    %c5 = arith.constant 5 : index
    %c0_35 = arith.constant 0 : index
    %c0_36 = arith.constant 0 : index
    %70 = vector.load %arg1[%c0_34, %c5, %c0_35, %c0_36] : memref<1x8x8x64xf32, #tpu.memory_space<vmem>>, vector<1x1x8x64xf32>
    %71 = vector.shape_cast %70 : vector<1x1x8x64xf32> to vector<8x64xf32>
    %c0_37 = arith.constant 0 : index
    %c6 = arith.constant 6 : index
    %c0_38 = arith.constant 0 : index
    %c0_39 = arith.constant 0 : index
    %72 = vector.load %arg1[%c0_37, %c6, %c0_38, %c0_39] : memref<1x8x8x64xf32, #tpu.memory_space<vmem>>, vector<1x1x8x64xf32>
    %73 = vector.shape_cast %72 : vector<1x1x8x64xf32> to vector<8x64xf32>
    %c0_40 = arith.constant 0 : index
    %c7 = arith.constant 7 : index
    %c0_41 = arith.constant 0 : index
    %c0_42 = arith.constant 0 : index
    %74 = vector.load %arg1[%c0_40, %c7, %c0_41, %c0_42] : memref<1x8x8x64xf32, #tpu.memory_space<vmem>>, vector<1x1x8x64xf32>
    %75 = vector.shape_cast %74 : vector<1x1x8x64xf32> to vector<8x64xf32>
    %c0_43 = arith.constant 0 : index
    %c0_44 = arith.constant 0 : index
    %c0_45 = arith.constant 0 : index
    %c0_46 = arith.constant 0 : index
    %76 = vector.load %arg2[%c0_43, %c0_44, %c0_45, %c0_46] : memref<1x4x16x128xf32, #tpu.memory_space<vmem>>, vector<1x1x16x128xf32>
    %77 = vector.shape_cast %76 : vector<1x1x16x128xf32> to vector<16x128xf32>
    %c0_47 = arith.constant 0 : index
    %c1_48 = arith.constant 1 : index
    %c0_49 = arith.constant 0 : index
    %c0_50 = arith.constant 0 : index
    %78 = vector.load %arg2[%c0_47, %c1_48, %c0_49, %c0_50] : memref<1x4x16x128xf32, #tpu.memory_space<vmem>>, vector<1x1x16x128xf32>
    %79 = vector.shape_cast %78 : vector<1x1x16x128xf32> to vector<16x128xf32>
    %c0_51 = arith.constant 0 : index
    %c2_52 = arith.constant 2 : index
    %c0_53 = arith.constant 0 : index
    %c0_54 = arith.constant 0 : index
    %80 = vector.load %arg2[%c0_51, %c2_52, %c0_53, %c0_54] : memref<1x4x16x128xf32, #tpu.memory_space<vmem>>, vector<1x1x16x128xf32>
    %81 = vector.shape_cast %80 : vector<1x1x16x128xf32> to vector<16x128xf32>
    %c0_55 = arith.constant 0 : index
    %c3_56 = arith.constant 3 : index
    %c0_57 = arith.constant 0 : index
    %c0_58 = arith.constant 0 : index
    %82 = vector.load %arg2[%c0_55, %c3_56, %c0_57, %c0_58] : memref<1x4x16x128xf32, #tpu.memory_space<vmem>>, vector<1x1x16x128xf32>
    %83 = vector.shape_cast %82 : vector<1x1x16x128xf32> to vector<16x128xf32>
    %c0_59 = arith.constant 0 : index
    %c0_60 = arith.constant 0 : index
    %c0_61 = arith.constant 0 : index
    %c0_62 = arith.constant 0 : index
    %84 = vector.load %arg3[%c0_59, %c0_60, %c0_61, %c0_62] : memref<1x4x16x128xf32, #tpu.memory_space<vmem>>, vector<1x1x16x128xf32>
    %85 = vector.shape_cast %84 : vector<1x1x16x128xf32> to vector<16x128xf32>
    %c0_63 = arith.constant 0 : index
    %c1_64 = arith.constant 1 : index
    %c0_65 = arith.constant 0 : index
    %c0_66 = arith.constant 0 : index
    %86 = vector.load %arg3[%c0_63, %c1_64, %c0_65, %c0_66] : memref<1x4x16x128xf32, #tpu.memory_space<vmem>>, vector<1x1x16x128xf32>
    %87 = vector.shape_cast %86 : vector<1x1x16x128xf32> to vector<16x128xf32>
    %c0_67 = arith.constant 0 : index
    %c2_68 = arith.constant 2 : index
    %c0_69 = arith.constant 0 : index
    %c0_70 = arith.constant 0 : index
    %88 = vector.load %arg3[%c0_67, %c2_68, %c0_69, %c0_70] : memref<1x4x16x128xf32, #tpu.memory_space<vmem>>, vector<1x1x16x128xf32>
    %89 = vector.shape_cast %88 : vector<1x1x16x128xf32> to vector<16x128xf32>
    %c0_71 = arith.constant 0 : index
    %c3_72 = arith.constant 3 : index
    %c0_73 = arith.constant 0 : index
    %c0_74 = arith.constant 0 : index
    %90 = vector.load %arg3[%c0_71, %c3_72, %c0_73, %c0_74] : memref<1x4x16x128xf32, #tpu.memory_space<vmem>>, vector<1x1x16x128xf32>
    %91 = vector.shape_cast %90 : vector<1x1x16x128xf32> to vector<16x128xf32>
    %c0_75 = arith.constant 0 : index
    %92 = memref.load %arg4[%c0_75] : memref<254xf32, #tpu.memory_space<smem>>
    %93 = vector.broadcast %92 : f32 to vector<8x64xf32>
    %94 = arith.mulf %61, %93 : vector<8x64xf32>
    %c4_76 = arith.constant 4 : index
    %95 = memref.load %arg4[%c4_76] : memref<254xf32, #tpu.memory_space<smem>>
    %96 = vector.broadcast %95 : f32 to vector<8x64xf32>
    %97 = arith.mulf %63, %96 : vector<8x64xf32>
    %c8 = arith.constant 8 : index
    %98 = memref.load %arg4[%c8] : memref<254xf32, #tpu.memory_space<smem>>
    %99 = vector.broadcast %98 : f32 to vector<8x64xf32>
    %100 = arith.mulf %65, %99 : vector<8x64xf32>
    %c12 = arith.constant 12 : index
    %101 = memref.load %arg4[%c12] : memref<254xf32, #tpu.memory_space<smem>>
    %102 = vector.broadcast %101 : f32 to vector<8x64xf32>
    %103 = arith.mulf %67, %102 : vector<8x64xf32>
    %c16 = arith.constant 16 : index
    %104 = memref.load %arg4[%c16] : memref<254xf32, #tpu.memory_space<smem>>
    %105 = vector.broadcast %104 : f32 to vector<8x64xf32>
    %106 = arith.mulf %69, %105 : vector<8x64xf32>
    %c20 = arith.constant 20 : index
    %107 = memref.load %arg4[%c20] : memref<254xf32, #tpu.memory_space<smem>>
    %108 = vector.broadcast %107 : f32 to vector<8x64xf32>
    %109 = arith.mulf %71, %108 : vector<8x64xf32>
    %c24 = arith.constant 24 : index
    %110 = memref.load %arg4[%c24] : memref<254xf32, #tpu.memory_space<smem>>
    %111 = vector.broadcast %110 : f32 to vector<8x64xf32>
    %112 = arith.mulf %73, %111 : vector<8x64xf32>
    %c28 = arith.constant 28 : index
    %113 = memref.load %arg4[%c28] : memref<254xf32, #tpu.memory_space<smem>>
    %114 = vector.broadcast %113 : f32 to vector<8x64xf32>
    %115 = arith.mulf %75, %114 : vector<8x64xf32>
    %116 = arith.addf %94, %97 : vector<8x64xf32>
    %117 = arith.addf %100, %103 : vector<8x64xf32>
    %118 = arith.addf %106, %109 : vector<8x64xf32>
    %119 = arith.addf %112, %115 : vector<8x64xf32>
    %120 = arith.addf %116, %117 : vector<8x64xf32>
    %121 = arith.addf %118, %119 : vector<8x64xf32>
    %122 = arith.addf %120, %121 : vector<8x64xf32>
    %123 = arith.truncf %122 : vector<8x64xf32> to vector<8x64xbf16>
    %124 = arith.extf %123 : vector<8x64xbf16> to vector<8x64xf32>
    %125 = arith.subf %122, %124 : vector<8x64xf32>
    %cst_77 = arith.constant dense<0.000000e+00> : vector<16x64xf32>
    %126 = tpu.matmul %13, %124, %cst_77 {dimension_numbers = #tpu.dot_dimension_numbers<[1], [0], [0], [1], [0, 0, 1, 1], [], []>} : vector<16x8xf32>, vector<8x64xf32>, vector<16x64xf32> -> vector<16x64xf32>
    %cst_78 = arith.constant dense<0.000000e+00> : vector<16x128xf32>
    %127 = tpu.matmul %126, %27, %cst_78 {dimension_numbers = #tpu.dot_dimension_numbers<[1], [0], [0], [1], [0, 0, 1, 1], [], []>} : vector<16x64xf32>, vector<64x128xf32>, vector<16x128xf32> -> vector<16x128xf32>
    %cst_79 = arith.constant dense<0.000000e+00> : vector<16x64xf32>
    %128 = tpu.matmul %13, %125, %cst_79 {dimension_numbers = #tpu.dot_dimension_numbers<[1], [0], [0], [1], [0, 0, 1, 1], [], []>} : vector<16x8xf32>, vector<8x64xf32>, vector<16x64xf32> -> vector<16x64xf32>
    %cst_80 = arith.constant dense<0.000000e+00> : vector<16x128xf32>
    %129 = tpu.matmul %128, %27, %cst_80 {dimension_numbers = #tpu.dot_dimension_numbers<[1], [0], [0], [1], [0, 0, 1, 1], [], []>} : vector<16x64xf32>, vector<64x128xf32>, vector<16x128xf32> -> vector<16x128xf32>
    %130 = arith.addf %127, %129 : vector<16x128xf32>
    %c32 = arith.constant 32 : index
    %131 = memref.load %arg4[%c32] : memref<254xf32, #tpu.memory_space<smem>>
    %132 = vector.broadcast %131 : f32 to vector<16x128xf32>
    %133 = arith.mulf %77, %132 : vector<16x128xf32>
    %c36 = arith.constant 36 : index
    %134 = memref.load %arg4[%c36] : memref<254xf32, #tpu.memory_space<smem>>
    %135 = vector.broadcast %134 : f32 to vector<16x128xf32>
    %136 = arith.mulf %79, %135 : vector<16x128xf32>
    %c40 = arith.constant 40 : index
    %137 = memref.load %arg4[%c40] : memref<254xf32, #tpu.memory_space<smem>>
    %138 = vector.broadcast %137 : f32 to vector<16x128xf32>
    %139 = arith.mulf %81, %138 : vector<16x128xf32>
    %c44 = arith.constant 44 : index
    %140 = memref.load %arg4[%c44] : memref<254xf32, #tpu.memory_space<smem>>
    %141 = vector.broadcast %140 : f32 to vector<16x128xf32>
    %142 = arith.mulf %83, %141 : vector<16x128xf32>
    %c48 = arith.constant 48 : index
    %143 = memref.load %arg4[%c48] : memref<254xf32, #tpu.memory_space<smem>>
    %144 = vector.broadcast %143 : f32 to vector<16x128xf32>
    %145 = arith.mulf %85, %144 : vector<16x128xf32>
    %c52 = arith.constant 52 : index
    %146 = memref.load %arg4[%c52] : memref<254xf32, #tpu.memory_space<smem>>
    %147 = vector.broadcast %146 : f32 to vector<16x128xf32>
    %148 = arith.mulf %87, %147 : vector<16x128xf32>
    %c56 = arith.constant 56 : index
    %149 = memref.load %arg4[%c56] : memref<254xf32, #tpu.memory_space<smem>>
    %150 = vector.broadcast %149 : f32 to vector<16x128xf32>
    %151 = arith.mulf %89, %150 : vector<16x128xf32>
    %c60 = arith.constant 60 : index
    %152 = memref.load %arg4[%c60] : memref<254xf32, #tpu.memory_space<smem>>
    %153 = vector.broadcast %152 : f32 to vector<16x128xf32>
    %154 = arith.mulf %91, %153 : vector<16x128xf32>
    %155 = arith.addf %130, %133 : vector<16x128xf32>
    %156 = arith.addf %136, %139 : vector<16x128xf32>
    %157 = arith.addf %142, %145 : vector<16x128xf32>
    %158 = arith.addf %148, %151 : vector<16x128xf32>
    %159 = arith.addf %155, %156 : vector<16x128xf32>
    %160 = arith.addf %157, %158 : vector<16x128xf32>
    %161 = arith.addf %159, %160 : vector<16x128xf32>
    %162 = arith.addf %161, %154 : vector<16x128xf32>
    %c64 = arith.constant 64 : index
    %163 = memref.load %arg4[%c64] : memref<254xf32, #tpu.memory_space<smem>>
    %164 = vector.broadcast %163 : f32 to vector<16x128xf32>
    %165 = arith.addf %162, %164 : vector<16x128xf32>
    %cst_81 = arith.constant 0.000000e+00 : f32
    %166 = vector.broadcast %cst_81 : f32 to vector<16x128xf32>
    %167 = arith.maximumf %165, %166 : vector<16x128xf32>
    %c1_82 = arith.constant 1 : index
    %168 = memref.load %arg4[%c1_82] : memref<254xf32, #tpu.memory_space<smem>>
    %169 = vector.broadcast %168 : f32 to vector<8x64xf32>
    %170 = arith.mulf %61, %169 : vector<8x64xf32>
    %c5_83 = arith.constant 5 : index
    %171 = memref.load %arg4[%c5_83] : memref<254xf32, #tpu.memory_space<smem>>
    %172 = vector.broadcast %171 : f32 to vector<8x64xf32>
    %173 = arith.mulf %63, %172 : vector<8x64xf32>
    %c9 = arith.constant 9 : index
    %174 = memref.load %arg4[%c9] : memref<254xf32, #tpu.memory_space<smem>>
    %175 = vector.broadcast %174 : f32 to vector<8x64xf32>
    %176 = arith.mulf %65, %175 : vector<8x64xf32>
    %c13 = arith.constant 13 : index
    %177 = memref.load %arg4[%c13] : memref<254xf32, #tpu.memory_space<smem>>
    %178 = vector.broadcast %177 : f32 to vector<8x64xf32>
    %179 = arith.mulf %67, %178 : vector<8x64xf32>
    %c17 = arith.constant 17 : index
    %180 = memref.load %arg4[%c17] : memref<254xf32, #tpu.memory_space<smem>>
    %181 = vector.broadcast %180 : f32 to vector<8x64xf32>
    %182 = arith.mulf %69, %181 : vector<8x64xf32>
    %c21 = arith.constant 21 : index
    %183 = memref.load %arg4[%c21] : memref<254xf32, #tpu.memory_space<smem>>
    %184 = vector.broadcast %183 : f32 to vector<8x64xf32>
    %185 = arith.mulf %71, %184 : vector<8x64xf32>
    %c25 = arith.constant 25 : index
    %186 = memref.load %arg4[%c25] : memref<254xf32, #tpu.memory_space<smem>>
    %187 = vector.broadcast %186 : f32 to vector<8x64xf32>
    %188 = arith.mulf %73, %187 : vector<8x64xf32>
    %c29 = arith.constant 29 : index
    %189 = memref.load %arg4[%c29] : memref<254xf32, #tpu.memory_space<smem>>
    %190 = vector.broadcast %189 : f32 to vector<8x64xf32>
    %191 = arith.mulf %75, %190 : vector<8x64xf32>
    %192 = arith.addf %170, %173 : vector<8x64xf32>
    %193 = arith.addf %176, %179 : vector<8x64xf32>
    %194 = arith.addf %182, %185 : vector<8x64xf32>
    %195 = arith.addf %188, %191 : vector<8x64xf32>
    %196 = arith.addf %192, %193 : vector<8x64xf32>
    %197 = arith.addf %194, %195 : vector<8x64xf32>
    %198 = arith.addf %196, %197 : vector<8x64xf32>
    %199 = arith.truncf %198 : vector<8x64xf32> to vector<8x64xbf16>
    %200 = arith.extf %199 : vector<8x64xbf16> to vector<8x64xf32>
    %201 = arith.subf %198, %200 : vector<8x64xf32>
    %cst_84 = arith.constant dense<0.000000e+00> : vector<16x64xf32>
    %202 = tpu.matmul %13, %200, %cst_84 {dimension_numbers = #tpu.dot_dimension_numbers<[1], [0], [0], [1], [0, 0, 1, 1], [], []>} : vector<16x8xf32>, vector<8x64xf32>, vector<16x64xf32> -> vector<16x64xf32>
    %cst_85 = arith.constant dense<0.000000e+00> : vector<16x128xf32>
    %203 = tpu.matmul %202, %27, %cst_85 {dimension_numbers = #tpu.dot_dimension_numbers<[1], [0], [0], [1], [0, 0, 1, 1], [], []>} : vector<16x64xf32>, vector<64x128xf32>, vector<16x128xf32> -> vector<16x128xf32>
    %cst_86 = arith.constant dense<0.000000e+00> : vector<16x64xf32>
    %204 = tpu.matmul %13, %201, %cst_86 {dimension_numbers = #tpu.dot_dimension_numbers<[1], [0], [0], [1], [0, 0, 1, 1], [], []>} : vector<16x8xf32>, vector<8x64xf32>, vector<16x64xf32> -> vector<16x64xf32>
    %cst_87 = arith.constant dense<0.000000e+00> : vector<16x128xf32>
    %205 = tpu.matmul %204, %27, %cst_87 {dimension_numbers = #tpu.dot_dimension_numbers<[1], [0], [0], [1], [0, 0, 1, 1], [], []>} : vector<16x64xf32>, vector<64x128xf32>, vector<16x128xf32> -> vector<16x128xf32>
    %206 = arith.addf %203, %205 : vector<16x128xf32>
    %c33 = arith.constant 33 : index
    %207 = memref.load %arg4[%c33] : memref<254xf32, #tpu.memory_space<smem>>
    %208 = vector.broadcast %207 : f32 to vector<16x128xf32>
    %209 = arith.mulf %77, %208 : vector<16x128xf32>
    %c37 = arith.constant 37 : index
    %210 = memref.load %arg4[%c37] : memref<254xf32, #tpu.memory_space<smem>>
    %211 = vector.broadcast %210 : f32 to vector<16x128xf32>
    %212 = arith.mulf %79, %211 : vector<16x128xf32>
    %c41 = arith.constant 41 : index
    %213 = memref.load %arg4[%c41] : memref<254xf32, #tpu.memory_space<smem>>
    %214 = vector.broadcast %213 : f32 to vector<16x128xf32>
    %215 = arith.mulf %81, %214 : vector<16x128xf32>
    %c45 = arith.constant 45 : index
    %216 = memref.load %arg4[%c45] : memref<254xf32, #tpu.memory_space<smem>>
    %217 = vector.broadcast %216 : f32 to vector<16x128xf32>
    %218 = arith.mulf %83, %217 : vector<16x128xf32>
    %c49 = arith.constant 49 : index
    %219 = memref.load %arg4[%c49] : memref<254xf32, #tpu.memory_space<smem>>
    %220 = vector.broadcast %219 : f32 to vector<16x128xf32>
    %221 = arith.mulf %85, %220 : vector<16x128xf32>
    %c53 = arith.constant 53 : index
    %222 = memref.load %arg4[%c53] : memref<254xf32, #tpu.memory_space<smem>>
    %223 = vector.broadcast %222 : f32 to vector<16x128xf32>
    %224 = arith.mulf %87, %223 : vector<16x128xf32>
    %c57 = arith.constant 57 : index
    %225 = memref.load %arg4[%c57] : memref<254xf32, #tpu.memory_space<smem>>
    %226 = vector.broadcast %225 : f32 to vector<16x128xf32>
    %227 = arith.mulf %89, %226 : vector<16x128xf32>
    %c61 = arith.constant 61 : index
    %228 = memref.load %arg4[%c61] : memref<254xf32, #tpu.memory_space<smem>>
    %229 = vector.broadcast %228 : f32 to vector<16x128xf32>
    %230 = arith.mulf %91, %229 : vector<16x128xf32>
    %231 = arith.addf %206, %209 : vector<16x128xf32>
    %232 = arith.addf %212, %215 : vector<16x128xf32>
    %233 = arith.addf %218, %221 : vector<16x128xf32>
    %234 = arith.addf %224, %227 : vector<16x128xf32>
    %235 = arith.addf %231, %232 : vector<16x128xf32>
    %236 = arith.addf %233, %234 : vector<16x128xf32>
    %237 = arith.addf %235, %236 : vector<16x128xf32>
    %238 = arith.addf %237, %230 : vector<16x128xf32>
    %c65 = arith.constant 65 : index
    %239 = memref.load %arg4[%c65] : memref<254xf32, #tpu.memory_space<smem>>
    %240 = vector.broadcast %239 : f32 to vector<16x128xf32>
    %241 = arith.addf %238, %240 : vector<16x128xf32>
    %cst_88 = arith.constant 0.000000e+00 : f32
    %242 = vector.broadcast %cst_88 : f32 to vector<16x128xf32>
    %243 = arith.maximumf %241, %242 : vector<16x128xf32>
    %c2_89 = arith.constant 2 : index
    %244 = memref.load %arg4[%c2_89] : memref<254xf32, #tpu.memory_space<smem>>
    %245 = vector.broadcast %244 : f32 to vector<8x64xf32>
    %246 = arith.mulf %61, %245 : vector<8x64xf32>
    %c6_90 = arith.constant 6 : index
    %247 = memref.load %arg4[%c6_90] : memref<254xf32, #tpu.memory_space<smem>>
    %248 = vector.broadcast %247 : f32 to vector<8x64xf32>
    %249 = arith.mulf %63, %248 : vector<8x64xf32>
    %c10 = arith.constant 10 : index
    %250 = memref.load %arg4[%c10] : memref<254xf32, #tpu.memory_space<smem>>
    %251 = vector.broadcast %250 : f32 to vector<8x64xf32>
    %252 = arith.mulf %65, %251 : vector<8x64xf32>
    %c14 = arith.constant 14 : index
    %253 = memref.load %arg4[%c14] : memref<254xf32, #tpu.memory_space<smem>>
    %254 = vector.broadcast %253 : f32 to vector<8x64xf32>
    %255 = arith.mulf %67, %254 : vector<8x64xf32>
    %c18 = arith.constant 18 : index
    %256 = memref.load %arg4[%c18] : memref<254xf32, #tpu.memory_space<smem>>
    %257 = vector.broadcast %256 : f32 to vector<8x64xf32>
    %258 = arith.mulf %69, %257 : vector<8x64xf32>
    %c22 = arith.constant 22 : index
    %259 = memref.load %arg4[%c22] : memref<254xf32, #tpu.memory_space<smem>>
    %260 = vector.broadcast %259 : f32 to vector<8x64xf32>
    %261 = arith.mulf %71, %260 : vector<8x64xf32>
    %c26 = arith.constant 26 : index
    %262 = memref.load %arg4[%c26] : memref<254xf32, #tpu.memory_space<smem>>
    %263 = vector.broadcast %262 : f32 to vector<8x64xf32>
    %264 = arith.mulf %73, %263 : vector<8x64xf32>
    %c30 = arith.constant 30 : index
    %265 = memref.load %arg4[%c30] : memref<254xf32, #tpu.memory_space<smem>>
    %266 = vector.broadcast %265 : f32 to vector<8x64xf32>
    %267 = arith.mulf %75, %266 : vector<8x64xf32>
    %268 = arith.addf %246, %249 : vector<8x64xf32>
    %269 = arith.addf %252, %255 : vector<8x64xf32>
    %270 = arith.addf %258, %261 : vector<8x64xf32>
    %271 = arith.addf %264, %267 : vector<8x64xf32>
    %272 = arith.addf %268, %269 : vector<8x64xf32>
    %273 = arith.addf %270, %271 : vector<8x64xf32>
    %274 = arith.addf %272, %273 : vector<8x64xf32>
    %275 = arith.truncf %274 : vector<8x64xf32> to vector<8x64xbf16>
    %276 = arith.extf %275 : vector<8x64xbf16> to vector<8x64xf32>
    %277 = arith.subf %274, %276 : vector<8x64xf32>
    %cst_91 = arith.constant dense<0.000000e+00> : vector<16x64xf32>
    %278 = tpu.matmul %13, %276, %cst_91 {dimension_numbers = #tpu.dot_dimension_numbers<[1], [0], [0], [1], [0, 0, 1, 1], [], []>} : vector<16x8xf32>, vector<8x64xf32>, vector<16x64xf32> -> vector<16x64xf32>
    %cst_92 = arith.constant dense<0.000000e+00> : vector<16x128xf32>
    %279 = tpu.matmul %278, %27, %cst_92 {dimension_numbers = #tpu.dot_dimension_numbers<[1], [0], [0], [1], [0, 0, 1, 1], [], []>} : vector<16x64xf32>, vector<64x128xf32>, vector<16x128xf32> -> vector<16x128xf32>
    %cst_93 = arith.constant dense<0.000000e+00> : vector<16x64xf32>
    %280 = tpu.matmul %13, %277, %cst_93 {dimension_numbers = #tpu.dot_dimension_numbers<[1], [0], [0], [1], [0, 0, 1, 1], [], []>} : vector<16x8xf32>, vector<8x64xf32>, vector<16x64xf32> -> vector<16x64xf32>
    %cst_94 = arith.constant dense<0.000000e+00> : vector<16x128xf32>
    %281 = tpu.matmul %280, %27, %cst_94 {dimension_numbers = #tpu.dot_dimension_numbers<[1], [0], [0], [1], [0, 0, 1, 1], [], []>} : vector<16x64xf32>, vector<64x128xf32>, vector<16x128xf32> -> vector<16x128xf32>
    %282 = arith.addf %279, %281 : vector<16x128xf32>
    %c34 = arith.constant 34 : index
    %283 = memref.load %arg4[%c34] : memref<254xf32, #tpu.memory_space<smem>>
    %284 = vector.broadcast %283 : f32 to vector<16x128xf32>
    %285 = arith.mulf %77, %284 : vector<16x128xf32>
    %c38 = arith.constant 38 : index
    %286 = memref.load %arg4[%c38] : memref<254xf32, #tpu.memory_space<smem>>
    %287 = vector.broadcast %286 : f32 to vector<16x128xf32>
    %288 = arith.mulf %79, %287 : vector<16x128xf32>
    %c42 = arith.constant 42 : index
    %289 = memref.load %arg4[%c42] : memref<254xf32, #tpu.memory_space<smem>>
    %290 = vector.broadcast %289 : f32 to vector<16x128xf32>
    %291 = arith.mulf %81, %290 : vector<16x128xf32>
    %c46 = arith.constant 46 : index
    %292 = memref.load %arg4[%c46] : memref<254xf32, #tpu.memory_space<smem>>
    %293 = vector.broadcast %292 : f32 to vector<16x128xf32>
    %294 = arith.mulf %83, %293 : vector<16x128xf32>
    %c50 = arith.constant 50 : index
    %295 = memref.load %arg4[%c50] : memref<254xf32, #tpu.memory_space<smem>>
    %296 = vector.broadcast %295 : f32 to vector<16x128xf32>
    %297 = arith.mulf %85, %296 : vector<16x128xf32>
    %c54 = arith.constant 54 : index
    %298 = memref.load %arg4[%c54] : memref<254xf32, #tpu.memory_space<smem>>
    %299 = vector.broadcast %298 : f32 to vector<16x128xf32>
    %300 = arith.mulf %87, %299 : vector<16x128xf32>
    %c58 = arith.constant 58 : index
    %301 = memref.load %arg4[%c58] : memref<254xf32, #tpu.memory_space<smem>>
    %302 = vector.broadcast %301 : f32 to vector<16x128xf32>
    %303 = arith.mulf %89, %302 : vector<16x128xf32>
    %c62 = arith.constant 62 : index
    %304 = memref.load %arg4[%c62] : memref<254xf32, #tpu.memory_space<smem>>
    %305 = vector.broadcast %304 : f32 to vector<16x128xf32>
    %306 = arith.mulf %91, %305 : vector<16x128xf32>
    %307 = arith.addf %282, %285 : vector<16x128xf32>
    %308 = arith.addf %288, %291 : vector<16x128xf32>
    %309 = arith.addf %294, %297 : vector<16x128xf32>
    %310 = arith.addf %300, %303 : vector<16x128xf32>
    %311 = arith.addf %307, %308 : vector<16x128xf32>
    %312 = arith.addf %309, %310 : vector<16x128xf32>
    %313 = arith.addf %311, %312 : vector<16x128xf32>
    %314 = arith.addf %313, %306 : vector<16x128xf32>
    %c66 = arith.constant 66 : index
    %315 = memref.load %arg4[%c66] : memref<254xf32, #tpu.memory_space<smem>>
    %316 = vector.broadcast %315 : f32 to vector<16x128xf32>
    %317 = arith.addf %314, %316 : vector<16x128xf32>
    %cst_95 = arith.constant 0.000000e+00 : f32
    %318 = vector.broadcast %cst_95 : f32 to vector<16x128xf32>
    %319 = arith.maximumf %317, %318 : vector<16x128xf32>
    %c3_96 = arith.constant 3 : index
    %320 = memref.load %arg4[%c3_96] : memref<254xf32, #tpu.memory_space<smem>>
    %321 = vector.broadcast %320 : f32 to vector<8x64xf32>
    %322 = arith.mulf %61, %321 : vector<8x64xf32>
    %c7_97 = arith.constant 7 : index
    %323 = memref.load %arg4[%c7_97] : memref<254xf32, #tpu.memory_space<smem>>
    %324 = vector.broadcast %323 : f32 to vector<8x64xf32>
    %325 = arith.mulf %63, %324 : vector<8x64xf32>
    %c11 = arith.constant 11 : index
    %326 = memref.load %arg4[%c11] : memref<254xf32, #tpu.memory_space<smem>>
    %327 = vector.broadcast %326 : f32 to vector<8x64xf32>
    %328 = arith.mulf %65, %327 : vector<8x64xf32>
    %c15 = arith.constant 15 : index
    %329 = memref.load %arg4[%c15] : memref<254xf32, #tpu.memory_space<smem>>
    %330 = vector.broadcast %329 : f32 to vector<8x64xf32>
    %331 = arith.mulf %67, %330 : vector<8x64xf32>
    %c19 = arith.constant 19 : index
    %332 = memref.load %arg4[%c19] : memref<254xf32, #tpu.memory_space<smem>>
    %333 = vector.broadcast %332 : f32 to vector<8x64xf32>
    %334 = arith.mulf %69, %333 : vector<8x64xf32>
    %c23 = arith.constant 23 : index
    %335 = memref.load %arg4[%c23] : memref<254xf32, #tpu.memory_space<smem>>
    %336 = vector.broadcast %335 : f32 to vector<8x64xf32>
    %337 = arith.mulf %71, %336 : vector<8x64xf32>
    %c27 = arith.constant 27 : index
    %338 = memref.load %arg4[%c27] : memref<254xf32, #tpu.memory_space<smem>>
    %339 = vector.broadcast %338 : f32 to vector<8x64xf32>
    %340 = arith.mulf %73, %339 : vector<8x64xf32>
    %c31 = arith.constant 31 : index
    %341 = memref.load %arg4[%c31] : memref<254xf32, #tpu.memory_space<smem>>
    %342 = vector.broadcast %341 : f32 to vector<8x64xf32>
    %343 = arith.mulf %75, %342 : vector<8x64xf32>
    %344 = arith.addf %322, %325 : vector<8x64xf32>
    %345 = arith.addf %328, %331 : vector<8x64xf32>
    %346 = arith.addf %334, %337 : vector<8x64xf32>
    %347 = arith.addf %340, %343 : vector<8x64xf32>
    %348 = arith.addf %344, %345 : vector<8x64xf32>
    %349 = arith.addf %346, %347 : vector<8x64xf32>
    %350 = arith.addf %348, %349 : vector<8x64xf32>
    %351 = arith.truncf %350 : vector<8x64xf32> to vector<8x64xbf16>
    %352 = arith.extf %351 : vector<8x64xbf16> to vector<8x64xf32>
    %353 = arith.subf %350, %352 : vector<8x64xf32>
    %cst_98 = arith.constant dense<0.000000e+00> : vector<16x64xf32>
    %354 = tpu.matmul %13, %352, %cst_98 {dimension_numbers = #tpu.dot_dimension_numbers<[1], [0], [0], [1], [0, 0, 1, 1], [], []>} : vector<16x8xf32>, vector<8x64xf32>, vector<16x64xf32> -> vector<16x64xf32>
    %cst_99 = arith.constant dense<0.000000e+00> : vector<16x128xf32>
    %355 = tpu.matmul %354, %27, %cst_99 {dimension_numbers = #tpu.dot_dimension_numbers<[1], [0], [0], [1], [0, 0, 1, 1], [], []>} : vector<16x64xf32>, vector<64x128xf32>, vector<16x128xf32> -> vector<16x128xf32>
    %cst_100 = arith.constant dense<0.000000e+00> : vector<16x64xf32>
    %356 = tpu.matmul %13, %353, %cst_100 {dimension_numbers = #tpu.dot_dimension_numbers<[1], [0], [0], [1], [0, 0, 1, 1], [], []>} : vector<16x8xf32>, vector<8x64xf32>, vector<16x64xf32> -> vector<16x64xf32>
    %cst_101 = arith.constant dense<0.000000e+00> : vector<16x128xf32>
    %357 = tpu.matmul %356, %27, %cst_101 {dimension_numbers = #tpu.dot_dimension_numbers<[1], [0], [0], [1], [0, 0, 1, 1], [], []>} : vector<16x64xf32>, vector<64x128xf32>, vector<16x128xf32> -> vector<16x128xf32>
    %358 = arith.addf %355, %357 : vector<16x128xf32>
    %c35 = arith.constant 35 : index
    %359 = memref.load %arg4[%c35] : memref<254xf32, #tpu.memory_space<smem>>
    %360 = vector.broadcast %359 : f32 to vector<16x128xf32>
    %361 = arith.mulf %77, %360 : vector<16x128xf32>
    %c39 = arith.constant 39 : index
    %362 = memref.load %arg4[%c39] : memref<254xf32, #tpu.memory_space<smem>>
    %363 = vector.broadcast %362 : f32 to vector<16x128xf32>
    %364 = arith.mulf %79, %363 : vector<16x128xf32>
    %c43 = arith.constant 43 : index
    %365 = memref.load %arg4[%c43] : memref<254xf32, #tpu.memory_space<smem>>
    %366 = vector.broadcast %365 : f32 to vector<16x128xf32>
    %367 = arith.mulf %81, %366 : vector<16x128xf32>
    %c47 = arith.constant 47 : index
    %368 = memref.load %arg4[%c47] : memref<254xf32, #tpu.memory_space<smem>>
    %369 = vector.broadcast %368 : f32 to vector<16x128xf32>
    %370 = arith.mulf %83, %369 : vector<16x128xf32>
    %c51 = arith.constant 51 : index
    %371 = memref.load %arg4[%c51] : memref<254xf32, #tpu.memory_space<smem>>
    %372 = vector.broadcast %371 : f32 to vector<16x128xf32>
    %373 = arith.mulf %85, %372 : vector<16x128xf32>
    %c55 = arith.constant 55 : index
    %374 = memref.load %arg4[%c55] : memref<254xf32, #tpu.memory_space<smem>>
    %375 = vector.broadcast %374 : f32 to vector<16x128xf32>
    %376 = arith.mulf %87, %375 : vector<16x128xf32>
    %c59 = arith.constant 59 : index
    %377 = memref.load %arg4[%c59] : memref<254xf32, #tpu.memory_space<smem>>
    %378 = vector.broadcast %377 : f32 to vector<16x128xf32>
    %379 = arith.mulf %89, %378 : vector<16x128xf32>
    %c63 = arith.constant 63 : index
    %380 = memref.load %arg4[%c63] : memref<254xf32, #tpu.memory_space<smem>>
    %381 = vector.broadcast %380 : f32 to vector<16x128xf32>
    %382 = arith.mulf %91, %381 : vector<16x128xf32>
    %383 = arith.addf %358, %361 : vector<16x128xf32>
    %384 = arith.addf %364, %367 : vector<16x128xf32>
    %385 = arith.addf %370, %373 : vector<16x128xf32>
    %386 = arith.addf %376, %379 : vector<16x128xf32>
    %387 = arith.addf %383, %384 : vector<16x128xf32>
    %388 = arith.addf %385, %386 : vector<16x128xf32>
    %389 = arith.addf %387, %388 : vector<16x128xf32>
    %390 = arith.addf %389, %382 : vector<16x128xf32>
    %c67 = arith.constant 67 : index
    %391 = memref.load %arg4[%c67] : memref<254xf32, #tpu.memory_space<smem>>
    %392 = vector.broadcast %391 : f32 to vector<16x128xf32>
    %393 = arith.addf %390, %392 : vector<16x128xf32>
    %cst_102 = arith.constant 0.000000e+00 : f32
    %394 = vector.broadcast %cst_102 : f32 to vector<16x128xf32>
    %395 = arith.maximumf %393, %394 : vector<16x128xf32>
    %396 = arith.truncf %167 : vector<16x128xf32> to vector<16x128xbf16>
    %397 = arith.extf %396 : vector<16x128xbf16> to vector<16x128xf32>
    %398 = arith.subf %167, %397 : vector<16x128xf32>
    %cst_103 = arith.constant dense<0.000000e+00> : vector<16x128xf32>
    %399 = tpu.matmul %35, %397, %cst_103 {dimension_numbers = #tpu.dot_dimension_numbers<[1], [0], [0], [1], [0, 0, 1, 1], [], []>} : vector<16x16xf32>, vector<16x128xf32>, vector<16x128xf32> -> vector<16x128xf32>
    %cst_104 = arith.constant dense<0.000000e+00> : vector<16x128xf32>
    %400 = tpu.matmul %35, %398, %cst_104 {dimension_numbers = #tpu.dot_dimension_numbers<[1], [0], [0], [1], [0, 0, 1, 1], [], []>} : vector<16x16xf32>, vector<16x128xf32>, vector<16x128xf32> -> vector<16x128xf32>
    %cst_105 = arith.constant dense<0.000000e+00> : vector<16x128xf32>
    %401 = tpu.matmul %43, %397, %cst_105 {dimension_numbers = #tpu.dot_dimension_numbers<[1], [0], [0], [1], [0, 0, 1, 1], [], []>} : vector<16x16xf32>, vector<16x128xf32>, vector<16x128xf32> -> vector<16x128xf32>
    %cst_106 = arith.constant dense<0.000000e+00> : vector<16x128xf32>
    %402 = tpu.matmul %43, %398, %cst_106 {dimension_numbers = #tpu.dot_dimension_numbers<[1], [0], [0], [1], [0, 0, 1, 1], [], []>} : vector<16x16xf32>, vector<16x128xf32>, vector<16x128xf32> -> vector<16x128xf32>
    %403 = arith.addf %399, %400 : vector<16x128xf32>
    %cst_107 = arith.constant dense<0.000000e+00> : vector<16x128xf32>
    %404 = tpu.matmul %399, %51, %cst_107 {dimension_numbers = #tpu.dot_dimension_numbers<[1], [0], [0], [1], [0, 0, 1, 1], [], []>} : vector<16x128xf32>, vector<128x128xf32>, vector<16x128xf32> -> vector<16x128xf32>
    %cst_108 = arith.constant dense<0.000000e+00> : vector<16x128xf32>
    %405 = tpu.matmul %400, %51, %cst_108 {dimension_numbers = #tpu.dot_dimension_numbers<[1], [0], [0], [1], [0, 0, 1, 1], [], []>} : vector<16x128xf32>, vector<128x128xf32>, vector<16x128xf32> -> vector<16x128xf32>
    %406 = arith.addf %404, %405 : vector<16x128xf32>
    %cst_109 = arith.constant dense<0.000000e+00> : vector<16x128xf32>
    %407 = tpu.matmul %399, %59, %cst_109 {dimension_numbers = #tpu.dot_dimension_numbers<[1], [0], [0], [1], [0, 0, 1, 1], [], []>} : vector<16x128xf32>, vector<128x128xf32>, vector<16x128xf32> -> vector<16x128xf32>
    %cst_110 = arith.constant dense<0.000000e+00> : vector<16x128xf32>
    %408 = tpu.matmul %400, %59, %cst_110 {dimension_numbers = #tpu.dot_dimension_numbers<[1], [0], [0], [1], [0, 0, 1, 1], [], []>} : vector<16x128xf32>, vector<128x128xf32>, vector<16x128xf32> -> vector<16x128xf32>
    %409 = arith.addf %407, %408 : vector<16x128xf32>
    %410 = arith.addf %397, %398 : vector<16x128xf32>
    %cst_111 = arith.constant dense<0.000000e+00> : vector<16x128xf32>
    %411 = tpu.matmul %397, %51, %cst_111 {dimension_numbers = #tpu.dot_dimension_numbers<[1], [0], [0], [1], [0, 0, 1, 1], [], []>} : vector<16x128xf32>, vector<128x128xf32>, vector<16x128xf32> -> vector<16x128xf32>
    %cst_112 = arith.constant dense<0.000000e+00> : vector<16x128xf32>
    %412 = tpu.matmul %398, %51, %cst_112 {dimension_numbers = #tpu.dot_dimension_numbers<[1], [0], [0], [1], [0, 0, 1, 1], [], []>} : vector<16x128xf32>, vector<128x128xf32>, vector<16x128xf32> -> vector<16x128xf32>
    %413 = arith.addf %411, %412 : vector<16x128xf32>
    %cst_113 = arith.constant dense<0.000000e+00> : vector<16x128xf32>
    %414 = tpu.matmul %397, %59, %cst_113 {dimension_numbers = #tpu.dot_dimension_numbers<[1], [0], [0], [1], [0, 0, 1, 1], [], []>} : vector<16x128xf32>, vector<128x128xf32>, vector<16x128xf32> -> vector<16x128xf32>
    %cst_114 = arith.constant dense<0.000000e+00> : vector<16x128xf32>
    %415 = tpu.matmul %398, %59, %cst_114 {dimension_numbers = #tpu.dot_dimension_numbers<[1], [0], [0], [1], [0, 0, 1, 1], [], []>} : vector<16x128xf32>, vector<128x128xf32>, vector<16x128xf32> -> vector<16x128xf32>
    %416 = arith.addf %414, %415 : vector<16x128xf32>
    %417 = arith.addf %401, %402 : vector<16x128xf32>
    %cst_115 = arith.constant dense<0.000000e+00> : vector<16x128xf32>
    %418 = tpu.matmul %401, %51, %cst_115 {dimension_numbers = #tpu.dot_dimension_numbers<[1], [0], [0], [1], [0, 0, 1, 1], [], []>} : vector<16x128xf32>, vector<128x128xf32>, vector<16x128xf32> -> vector<16x128xf32>
    %cst_116 = arith.constant dense<0.000000e+00> : vector<16x128xf32>
    %419 = tpu.matmul %402, %51, %cst_116 {dimension_numbers = #tpu.dot_dimension_numbers<[1], [0], [0], [1], [0, 0, 1, 1], [], []>} : vector<16x128xf32>, vector<128x128xf32>, vector<16x128xf32> -> vector<16x128xf32>
    %420 = arith.addf %418, %419 : vector<16x128xf32>
    %cst_117 = arith.constant dense<0.000000e+00> : vector<16x128xf32>
    %421 = tpu.matmul %401, %59, %cst_117 {dimension_numbers = #tpu.dot_dimension_numbers<[1], [0], [0], [1], [0, 0, 1, 1], [], []>} : vector<16x128xf32>, vector<128x128xf32>, vector<16x128xf32> -> vector<16x128xf32>
    %cst_118 = arith.constant dense<0.000000e+00> : vector<16x128xf32>
    %422 = tpu.matmul %402, %59, %cst_118 {dimension_numbers = #tpu.dot_dimension_numbers<[1], [0], [0], [1], [0, 0, 1, 1], [], []>} : vector<16x128xf32>, vector<128x128xf32>, vector<16x128xf32> -> vector<16x128xf32>
    %423 = arith.addf %421, %422 : vector<16x128xf32>
    %c68 = arith.constant 68 : index
    %424 = memref.load %arg4[%c68] : memref<254xf32, #tpu.memory_space<smem>>
    %425 = vector.broadcast %424 : f32 to vector<16x128xf32>
    %426 = arith.mulf %406, %425 : vector<16x128xf32>
    %c69 = arith.constant 69 : index
    %427 = memref.load %arg4[%c69] : memref<254xf32, #tpu.memory_space<smem>>
    %428 = vector.broadcast %427 : f32 to vector<16x128xf32>
    %429 = arith.mulf %406, %428 : vector<16x128xf32>
    %c72 = arith.constant 72 : index
    %430 = memref.load %arg4[%c72] : memref<254xf32, #tpu.memory_space<smem>>
    %431 = vector.broadcast %430 : f32 to vector<16x128xf32>
    %432 = arith.mulf %403, %431 : vector<16x128xf32>
    %c73 = arith.constant 73 : index
    %433 = memref.load %arg4[%c73] : memref<254xf32, #tpu.memory_space<smem>>
    %434 = vector.broadcast %433 : f32 to vector<16x128xf32>
    %435 = arith.mulf %403, %434 : vector<16x128xf32>
    %c76 = arith.constant 76 : index
    %436 = memref.load %arg4[%c76] : memref<254xf32, #tpu.memory_space<smem>>
    %437 = vector.broadcast %436 : f32 to vector<16x128xf32>
    %438 = arith.mulf %409, %437 : vector<16x128xf32>
    %c77 = arith.constant 77 : index
    %439 = memref.load %arg4[%c77] : memref<254xf32, #tpu.memory_space<smem>>
    %440 = vector.broadcast %439 : f32 to vector<16x128xf32>
    %441 = arith.mulf %409, %440 : vector<16x128xf32>
    %c80 = arith.constant 80 : index
    %442 = memref.load %arg4[%c80] : memref<254xf32, #tpu.memory_space<smem>>
    %443 = vector.broadcast %442 : f32 to vector<16x128xf32>
    %444 = arith.mulf %413, %443 : vector<16x128xf32>
    %c81 = arith.constant 81 : index
    %445 = memref.load %arg4[%c81] : memref<254xf32, #tpu.memory_space<smem>>
    %446 = vector.broadcast %445 : f32 to vector<16x128xf32>
    %447 = arith.mulf %413, %446 : vector<16x128xf32>
    %c84 = arith.constant 84 : index
    %448 = memref.load %arg4[%c84] : memref<254xf32, #tpu.memory_space<smem>>
    %449 = vector.broadcast %448 : f32 to vector<16x128xf32>
    %450 = arith.mulf %410, %449 : vector<16x128xf32>
    %c85 = arith.constant 85 : index
    %451 = memref.load %arg4[%c85] : memref<254xf32, #tpu.memory_space<smem>>
    %452 = vector.broadcast %451 : f32 to vector<16x128xf32>
    %453 = arith.mulf %410, %452 : vector<16x128xf32>
    %c88 = arith.constant 88 : index
    %454 = memref.load %arg4[%c88] : memref<254xf32, #tpu.memory_space<smem>>
    %455 = vector.broadcast %454 : f32 to vector<16x128xf32>
    %456 = arith.mulf %416, %455 : vector<16x128xf32>
    %c89 = arith.constant 89 : index
    %457 = memref.load %arg4[%c89] : memref<254xf32, #tpu.memory_space<smem>>
    %458 = vector.broadcast %457 : f32 to vector<16x128xf32>
    %459 = arith.mulf %416, %458 : vector<16x128xf32>
    %c92 = arith.constant 92 : index
    %460 = memref.load %arg4[%c92] : memref<254xf32, #tpu.memory_space<smem>>
    %461 = vector.broadcast %460 : f32 to vector<16x128xf32>
    %462 = arith.mulf %420, %461 : vector<16x128xf32>
    %c93 = arith.constant 93 : index
    %463 = memref.load %arg4[%c93] : memref<254xf32, #tpu.memory_space<smem>>
    %464 = vector.broadcast %463 : f32 to vector<16x128xf32>
    %465 = arith.mulf %420, %464 : vector<16x128xf32>
    %c96 = arith.constant 96 : index
    %466 = memref.load %arg4[%c96] : memref<254xf32, #tpu.memory_space<smem>>
    %467 = vector.broadcast %466 : f32 to vector<16x128xf32>
    %468 = arith.mulf %417, %467 : vector<16x128xf32>
    %c97 = arith.constant 97 : index
    %469 = memref.load %arg4[%c97] : memref<254xf32, #tpu.memory_space<smem>>
    %470 = vector.broadcast %469 : f32 to vector<16x128xf32>
    %471 = arith.mulf %417, %470 : vector<16x128xf32>
    %c100 = arith.constant 100 : index
    %472 = memref.load %arg4[%c100] : memref<254xf32, #tpu.memory_space<smem>>
    %473 = vector.broadcast %472 : f32 to vector<16x128xf32>
    %474 = arith.mulf %423, %473 : vector<16x128xf32>
    %c101 = arith.constant 101 : index
    %475 = memref.load %arg4[%c101] : memref<254xf32, #tpu.memory_space<smem>>
    %476 = vector.broadcast %475 : f32 to vector<16x128xf32>
    %477 = arith.mulf %423, %476 : vector<16x128xf32>
    %478 = arith.truncf %319 : vector<16x128xf32> to vector<16x128xbf16>
    %479 = arith.extf %478 : vector<16x128xbf16> to vector<16x128xf32>
    %480 = arith.subf %319, %479 : vector<16x128xf32>
    %cst_119 = arith.constant dense<0.000000e+00> : vector<16x128xf32>
    %481 = tpu.matmul %35, %479, %cst_119 {dimension_numbers = #tpu.dot_dimension_numbers<[1], [0], [0], [1], [0, 0, 1, 1], [], []>} : vector<16x16xf32>, vector<16x128xf32>, vector<16x128xf32> -> vector<16x128xf32>
    %cst_120 = arith.constant dense<0.000000e+00> : vector<16x128xf32>
    %482 = tpu.matmul %35, %480, %cst_120 {dimension_numbers = #tpu.dot_dimension_numbers<[1], [0], [0], [1], [0, 0, 1, 1], [], []>} : vector<16x16xf32>, vector<16x128xf32>, vector<16x128xf32> -> vector<16x128xf32>
    %cst_121 = arith.constant dense<0.000000e+00> : vector<16x128xf32>
    %483 = tpu.matmul %43, %479, %cst_121 {dimension_numbers = #tpu.dot_dimension_numbers<[1], [0], [0], [1], [0, 0, 1, 1], [], []>} : vector<16x16xf32>, vector<16x128xf32>, vector<16x128xf32> -> vector<16x128xf32>
    %cst_122 = arith.constant dense<0.000000e+00> : vector<16x128xf32>
    %484 = tpu.matmul %43, %480, %cst_122 {dimension_numbers = #tpu.dot_dimension_numbers<[1], [0], [0], [1], [0, 0, 1, 1], [], []>} : vector<16x16xf32>, vector<16x128xf32>, vector<16x128xf32> -> vector<16x128xf32>
    %485 = arith.addf %481, %482 : vector<16x128xf32>
    %cst_123 = arith.constant dense<0.000000e+00> : vector<16x128xf32>
    %486 = tpu.matmul %481, %51, %cst_123 {dimension_numbers = #tpu.dot_dimension_numbers<[1], [0], [0], [1], [0, 0, 1, 1], [], []>} : vector<16x128xf32>, vector<128x128xf32>, vector<16x128xf32> -> vector<16x128xf32>
    %cst_124 = arith.constant dense<0.000000e+00> : vector<16x128xf32>
    %487 = tpu.matmul %482, %51, %cst_124 {dimension_numbers = #tpu.dot_dimension_numbers<[1], [0], [0], [1], [0, 0, 1, 1], [], []>} : vector<16x128xf32>, vector<128x128xf32>, vector<16x128xf32> -> vector<16x128xf32>
    %488 = arith.addf %486, %487 : vector<16x128xf32>
    %cst_125 = arith.constant dense<0.000000e+00> : vector<16x128xf32>
    %489 = tpu.matmul %481, %59, %cst_125 {dimension_numbers = #tpu.dot_dimension_numbers<[1], [0], [0], [1], [0, 0, 1, 1], [], []>} : vector<16x128xf32>, vector<128x128xf32>, vector<16x128xf32> -> vector<16x128xf32>
    %cst_126 = arith.constant dense<0.000000e+00> : vector<16x128xf32>
    %490 = tpu.matmul %482, %59, %cst_126 {dimension_numbers = #tpu.dot_dimension_numbers<[1], [0], [0], [1], [0, 0, 1, 1], [], []>} : vector<16x128xf32>, vector<128x128xf32>, vector<16x128xf32> -> vector<16x128xf32>
    %491 = arith.addf %489, %490 : vector<16x128xf32>
    %492 = arith.addf %479, %480 : vector<16x128xf32>
    %cst_127 = arith.constant dense<0.000000e+00> : vector<16x128xf32>
    %493 = tpu.matmul %479, %51, %cst_127 {dimension_numbers = #tpu.dot_dimension_numbers<[1], [0], [0], [1], [0, 0, 1, 1], [], []>} : vector<16x128xf32>, vector<128x128xf32>, vector<16x128xf32> -> vector<16x128xf32>
    %cst_128 = arith.constant dense<0.000000e+00> : vector<16x128xf32>
    %494 = tpu.matmul %480, %51, %cst_128 {dimension_numbers = #tpu.dot_dimension_numbers<[1], [0], [0], [1], [0, 0, 1, 1], [], []>} : vector<16x128xf32>, vector<128x128xf32>, vector<16x128xf32> -> vector<16x128xf32>
    %495 = arith.addf %493, %494 : vector<16x128xf32>
    %cst_129 = arith.constant dense<0.000000e+00> : vector<16x128xf32>
    %496 = tpu.matmul %479, %59, %cst_129 {dimension_numbers = #tpu.dot_dimension_numbers<[1], [0], [0], [1], [0, 0, 1, 1], [], []>} : vector<16x128xf32>, vector<128x128xf32>, vector<16x128xf32> -> vector<16x128xf32>
    %cst_130 = arith.constant dense<0.000000e+00> : vector<16x128xf32>
    %497 = tpu.matmul %480, %59, %cst_130 {dimension_numbers = #tpu.dot_dimension_numbers<[1], [0], [0], [1], [0, 0, 1, 1], [], []>} : vector<16x128xf32>, vector<128x128xf32>, vector<16x128xf32> -> vector<16x128xf32>
    %498 = arith.addf %496, %497 : vector<16x128xf32>
    %499 = arith.addf %483, %484 : vector<16x128xf32>
    %cst_131 = arith.constant dense<0.000000e+00> : vector<16x128xf32>
    %500 = tpu.matmul %483, %51, %cst_131 {dimension_numbers = #tpu.dot_dimension_numbers<[1], [0], [0], [1], [0, 0, 1, 1], [], []>} : vector<16x128xf32>, vector<128x128xf32>, vector<16x128xf32> -> vector<16x128xf32>
    %cst_132 = arith.constant dense<0.000000e+00> : vector<16x128xf32>
    %501 = tpu.matmul %484, %51, %cst_132 {dimension_numbers = #tpu.dot_dimension_numbers<[1], [0], [0], [1], [0, 0, 1, 1], [], []>} : vector<16x128xf32>, vector<128x128xf32>, vector<16x128xf32> -> vector<16x128xf32>
    %502 = arith.addf %500, %501 : vector<16x128xf32>
    %cst_133 = arith.constant dense<0.000000e+00> : vector<16x128xf32>
    %503 = tpu.matmul %483, %59, %cst_133 {dimension_numbers = #tpu.dot_dimension_numbers<[1], [0], [0], [1], [0, 0, 1, 1], [], []>} : vector<16x128xf32>, vector<128x128xf32>, vector<16x128xf32> -> vector<16x128xf32>
    %cst_134 = arith.constant dense<0.000000e+00> : vector<16x128xf32>
    %504 = tpu.matmul %484, %59, %cst_134 {dimension_numbers = #tpu.dot_dimension_numbers<[1], [0], [0], [1], [0, 0, 1, 1], [], []>} : vector<16x128xf32>, vector<128x128xf32>, vector<16x128xf32> -> vector<16x128xf32>
    %505 = arith.addf %503, %504 : vector<16x128xf32>
    %c70 = arith.constant 70 : index
    %506 = memref.load %arg4[%c70] : memref<254xf32, #tpu.memory_space<smem>>
    %507 = vector.broadcast %506 : f32 to vector<16x128xf32>
    %508 = arith.mulf %488, %507 : vector<16x128xf32>
    %c71 = arith.constant 71 : index
    %509 = memref.load %arg4[%c71] : memref<254xf32, #tpu.memory_space<smem>>
    %510 = vector.broadcast %509 : f32 to vector<16x128xf32>
    %511 = arith.mulf %488, %510 : vector<16x128xf32>
    %c74 = arith.constant 74 : index
    %512 = memref.load %arg4[%c74] : memref<254xf32, #tpu.memory_space<smem>>
    %513 = vector.broadcast %512 : f32 to vector<16x128xf32>
    %514 = arith.mulf %485, %513 : vector<16x128xf32>
    %c75 = arith.constant 75 : index
    %515 = memref.load %arg4[%c75] : memref<254xf32, #tpu.memory_space<smem>>
    %516 = vector.broadcast %515 : f32 to vector<16x128xf32>
    %517 = arith.mulf %485, %516 : vector<16x128xf32>
    %c78 = arith.constant 78 : index
    %518 = memref.load %arg4[%c78] : memref<254xf32, #tpu.memory_space<smem>>
    %519 = vector.broadcast %518 : f32 to vector<16x128xf32>
    %520 = arith.mulf %491, %519 : vector<16x128xf32>
    %c79 = arith.constant 79 : index
    %521 = memref.load %arg4[%c79] : memref<254xf32, #tpu.memory_space<smem>>
    %522 = vector.broadcast %521 : f32 to vector<16x128xf32>
    %523 = arith.mulf %491, %522 : vector<16x128xf32>
    %c82 = arith.constant 82 : index
    %524 = memref.load %arg4[%c82] : memref<254xf32, #tpu.memory_space<smem>>
    %525 = vector.broadcast %524 : f32 to vector<16x128xf32>
    %526 = arith.mulf %495, %525 : vector<16x128xf32>
    %c83 = arith.constant 83 : index
    %527 = memref.load %arg4[%c83] : memref<254xf32, #tpu.memory_space<smem>>
    %528 = vector.broadcast %527 : f32 to vector<16x128xf32>
    %529 = arith.mulf %495, %528 : vector<16x128xf32>
    %c86 = arith.constant 86 : index
    %530 = memref.load %arg4[%c86] : memref<254xf32, #tpu.memory_space<smem>>
    %531 = vector.broadcast %530 : f32 to vector<16x128xf32>
    %532 = arith.mulf %492, %531 : vector<16x128xf32>
    %c87 = arith.constant 87 : index
    %533 = memref.load %arg4[%c87] : memref<254xf32, #tpu.memory_space<smem>>
    %534 = vector.broadcast %533 : f32 to vector<16x128xf32>
    %535 = arith.mulf %492, %534 : vector<16x128xf32>
    %c90 = arith.constant 90 : index
    %536 = memref.load %arg4[%c90] : memref<254xf32, #tpu.memory_space<smem>>
    %537 = vector.broadcast %536 : f32 to vector<16x128xf32>
    %538 = arith.mulf %498, %537 : vector<16x128xf32>
    %c91 = arith.constant 91 : index
    %539 = memref.load %arg4[%c91] : memref<254xf32, #tpu.memory_space<smem>>
    %540 = vector.broadcast %539 : f32 to vector<16x128xf32>
    %541 = arith.mulf %498, %540 : vector<16x128xf32>
    %c94 = arith.constant 94 : index
    %542 = memref.load %arg4[%c94] : memref<254xf32, #tpu.memory_space<smem>>
    %543 = vector.broadcast %542 : f32 to vector<16x128xf32>
    %544 = arith.mulf %502, %543 : vector<16x128xf32>
    %c95 = arith.constant 95 : index
    %545 = memref.load %arg4[%c95] : memref<254xf32, #tpu.memory_space<smem>>
    %546 = vector.broadcast %545 : f32 to vector<16x128xf32>
    %547 = arith.mulf %502, %546 : vector<16x128xf32>
    %c98 = arith.constant 98 : index
    %548 = memref.load %arg4[%c98] : memref<254xf32, #tpu.memory_space<smem>>
    %549 = vector.broadcast %548 : f32 to vector<16x128xf32>
    %550 = arith.mulf %499, %549 : vector<16x128xf32>
    %c99 = arith.constant 99 : index
    %551 = memref.load %arg4[%c99] : memref<254xf32, #tpu.memory_space<smem>>
    %552 = vector.broadcast %551 : f32 to vector<16x128xf32>
    %553 = arith.mulf %499, %552 : vector<16x128xf32>
    %c102 = arith.constant 102 : index
    %554 = memref.load %arg4[%c102] : memref<254xf32, #tpu.memory_space<smem>>
    %555 = vector.broadcast %554 : f32 to vector<16x128xf32>
    %556 = arith.mulf %505, %555 : vector<16x128xf32>
    %c103 = arith.constant 103 : index
    %557 = memref.load %arg4[%c103] : memref<254xf32, #tpu.memory_space<smem>>
    %558 = vector.broadcast %557 : f32 to vector<16x128xf32>
    %559 = arith.mulf %505, %558 : vector<16x128xf32>
    %560 = arith.addf %426, %432 : vector<16x128xf32>
    %561 = arith.addf %438, %444 : vector<16x128xf32>
    %562 = arith.addf %450, %456 : vector<16x128xf32>
    %563 = arith.addf %462, %468 : vector<16x128xf32>
    %564 = arith.addf %474, %508 : vector<16x128xf32>
    %565 = arith.addf %514, %520 : vector<16x128xf32>
    %566 = arith.addf %526, %532 : vector<16x128xf32>
    %567 = arith.addf %538, %544 : vector<16x128xf32>
    %568 = arith.addf %550, %556 : vector<16x128xf32>
    %569 = arith.addf %560, %561 : vector<16x128xf32>
    %570 = arith.addf %562, %563 : vector<16x128xf32>
    %571 = arith.addf %564, %565 : vector<16x128xf32>
    %572 = arith.addf %566, %567 : vector<16x128xf32>
    %573 = arith.addf %569, %570 : vector<16x128xf32>
    %574 = arith.addf %571, %572 : vector<16x128xf32>
    %575 = arith.addf %573, %574 : vector<16x128xf32>
    %576 = arith.addf %575, %568 : vector<16x128xf32>
    %577 = arith.addf %429, %435 : vector<16x128xf32>
    %578 = arith.addf %441, %447 : vector<16x128xf32>
    %579 = arith.addf %453, %459 : vector<16x128xf32>
    %580 = arith.addf %465, %471 : vector<16x128xf32>
    %581 = arith.addf %477, %511 : vector<16x128xf32>
    %582 = arith.addf %517, %523 : vector<16x128xf32>
    %583 = arith.addf %529, %535 : vector<16x128xf32>
    %584 = arith.addf %541, %547 : vector<16x128xf32>
    %585 = arith.addf %553, %559 : vector<16x128xf32>
    %586 = arith.addf %577, %578 : vector<16x128xf32>
    %587 = arith.addf %579, %580 : vector<16x128xf32>
    %588 = arith.addf %581, %582 : vector<16x128xf32>
    %589 = arith.addf %583, %584 : vector<16x128xf32>
    %590 = arith.addf %586, %587 : vector<16x128xf32>
    %591 = arith.addf %588, %589 : vector<16x128xf32>
    %592 = arith.addf %590, %591 : vector<16x128xf32>
    %593 = arith.addf %592, %585 : vector<16x128xf32>
    %c104 = arith.constant 104 : index
    %594 = memref.load %arg4[%c104] : memref<254xf32, #tpu.memory_space<smem>>
    %595 = vector.broadcast %594 : f32 to vector<16x128xf32>
    %596 = arith.addf %576, %595 : vector<16x128xf32>
    %cst_135 = arith.constant 0.000000e+00 : f32
    %597 = vector.broadcast %cst_135 : f32 to vector<16x128xf32>
    %598 = arith.maximumf %596, %597 : vector<16x128xf32>
    %c105 = arith.constant 105 : index
    %599 = memref.load %arg4[%c105] : memref<254xf32, #tpu.memory_space<smem>>
    %600 = vector.broadcast %599 : f32 to vector<16x128xf32>
    %601 = arith.addf %593, %600 : vector<16x128xf32>
    %cst_136 = arith.constant 0.000000e+00 : f32
    %602 = vector.broadcast %cst_136 : f32 to vector<16x128xf32>
    %603 = arith.maximumf %601, %602 : vector<16x128xf32>
    %604 = arith.truncf %598 : vector<16x128xf32> to vector<16x128xbf16>
    %605 = arith.extf %604 : vector<16x128xbf16> to vector<16x128xf32>
    %606 = arith.subf %598, %605 : vector<16x128xf32>
    %cst_137 = arith.constant dense<0.000000e+00> : vector<16x128xf32>
    %607 = tpu.matmul %35, %605, %cst_137 {dimension_numbers = #tpu.dot_dimension_numbers<[1], [0], [0], [1], [0, 0, 1, 1], [], []>} : vector<16x16xf32>, vector<16x128xf32>, vector<16x128xf32> -> vector<16x128xf32>
    %cst_138 = arith.constant dense<0.000000e+00> : vector<16x128xf32>
    %608 = tpu.matmul %35, %606, %cst_138 {dimension_numbers = #tpu.dot_dimension_numbers<[1], [0], [0], [1], [0, 0, 1, 1], [], []>} : vector<16x16xf32>, vector<16x128xf32>, vector<16x128xf32> -> vector<16x128xf32>
    %cst_139 = arith.constant dense<0.000000e+00> : vector<16x128xf32>
    %609 = tpu.matmul %43, %605, %cst_139 {dimension_numbers = #tpu.dot_dimension_numbers<[1], [0], [0], [1], [0, 0, 1, 1], [], []>} : vector<16x16xf32>, vector<16x128xf32>, vector<16x128xf32> -> vector<16x128xf32>
    %cst_140 = arith.constant dense<0.000000e+00> : vector<16x128xf32>
    %610 = tpu.matmul %43, %606, %cst_140 {dimension_numbers = #tpu.dot_dimension_numbers<[1], [0], [0], [1], [0, 0, 1, 1], [], []>} : vector<16x16xf32>, vector<16x128xf32>, vector<16x128xf32> -> vector<16x128xf32>
    %611 = arith.addf %607, %608 : vector<16x128xf32>
    %cst_141 = arith.constant dense<0.000000e+00> : vector<16x128xf32>
    %612 = tpu.matmul %607, %51, %cst_141 {dimension_numbers = #tpu.dot_dimension_numbers<[1], [0], [0], [1], [0, 0, 1, 1], [], []>} : vector<16x128xf32>, vector<128x128xf32>, vector<16x128xf32> -> vector<16x128xf32>
    %cst_142 = arith.constant dense<0.000000e+00> : vector<16x128xf32>
    %613 = tpu.matmul %608, %51, %cst_142 {dimension_numbers = #tpu.dot_dimension_numbers<[1], [0], [0], [1], [0, 0, 1, 1], [], []>} : vector<16x128xf32>, vector<128x128xf32>, vector<16x128xf32> -> vector<16x128xf32>
    %614 = arith.addf %612, %613 : vector<16x128xf32>
    %cst_143 = arith.constant dense<0.000000e+00> : vector<16x128xf32>
    %615 = tpu.matmul %607, %59, %cst_143 {dimension_numbers = #tpu.dot_dimension_numbers<[1], [0], [0], [1], [0, 0, 1, 1], [], []>} : vector<16x128xf32>, vector<128x128xf32>, vector<16x128xf32> -> vector<16x128xf32>
    %cst_144 = arith.constant dense<0.000000e+00> : vector<16x128xf32>
    %616 = tpu.matmul %608, %59, %cst_144 {dimension_numbers = #tpu.dot_dimension_numbers<[1], [0], [0], [1], [0, 0, 1, 1], [], []>} : vector<16x128xf32>, vector<128x128xf32>, vector<16x128xf32> -> vector<16x128xf32>
    %617 = arith.addf %615, %616 : vector<16x128xf32>
    %618 = arith.addf %605, %606 : vector<16x128xf32>
    %cst_145 = arith.constant dense<0.000000e+00> : vector<16x128xf32>
    %619 = tpu.matmul %605, %51, %cst_145 {dimension_numbers = #tpu.dot_dimension_numbers<[1], [0], [0], [1], [0, 0, 1, 1], [], []>} : vector<16x128xf32>, vector<128x128xf32>, vector<16x128xf32> -> vector<16x128xf32>
    %cst_146 = arith.constant dense<0.000000e+00> : vector<16x128xf32>
    %620 = tpu.matmul %606, %51, %cst_146 {dimension_numbers = #tpu.dot_dimension_numbers<[1], [0], [0], [1], [0, 0, 1, 1], [], []>} : vector<16x128xf32>, vector<128x128xf32>, vector<16x128xf32> -> vector<16x128xf32>
    %621 = arith.addf %619, %620 : vector<16x128xf32>
    %cst_147 = arith.constant dense<0.000000e+00> : vector<16x128xf32>
    %622 = tpu.matmul %605, %59, %cst_147 {dimension_numbers = #tpu.dot_dimension_numbers<[1], [0], [0], [1], [0, 0, 1, 1], [], []>} : vector<16x128xf32>, vector<128x128xf32>, vector<16x128xf32> -> vector<16x128xf32>
    %cst_148 = arith.constant dense<0.000000e+00> : vector<16x128xf32>
    %623 = tpu.matmul %606, %59, %cst_148 {dimension_numbers = #tpu.dot_dimension_numbers<[1], [0], [0], [1], [0, 0, 1, 1], [], []>} : vector<16x128xf32>, vector<128x128xf32>, vector<16x128xf32> -> vector<16x128xf32>
    %624 = arith.addf %622, %623 : vector<16x128xf32>
    %625 = arith.addf %609, %610 : vector<16x128xf32>
    %cst_149 = arith.constant dense<0.000000e+00> : vector<16x128xf32>
    %626 = tpu.matmul %609, %51, %cst_149 {dimension_numbers = #tpu.dot_dimension_numbers<[1], [0], [0], [1], [0, 0, 1, 1], [], []>} : vector<16x128xf32>, vector<128x128xf32>, vector<16x128xf32> -> vector<16x128xf32>
    %cst_150 = arith.constant dense<0.000000e+00> : vector<16x128xf32>
    %627 = tpu.matmul %610, %51, %cst_150 {dimension_numbers = #tpu.dot_dimension_numbers<[1], [0], [0], [1], [0, 0, 1, 1], [], []>} : vector<16x128xf32>, vector<128x128xf32>, vector<16x128xf32> -> vector<16x128xf32>
    %628 = arith.addf %626, %627 : vector<16x128xf32>
    %cst_151 = arith.constant dense<0.000000e+00> : vector<16x128xf32>
    %629 = tpu.matmul %609, %59, %cst_151 {dimension_numbers = #tpu.dot_dimension_numbers<[1], [0], [0], [1], [0, 0, 1, 1], [], []>} : vector<16x128xf32>, vector<128x128xf32>, vector<16x128xf32> -> vector<16x128xf32>
    %cst_152 = arith.constant dense<0.000000e+00> : vector<16x128xf32>
    %630 = tpu.matmul %610, %59, %cst_152 {dimension_numbers = #tpu.dot_dimension_numbers<[1], [0], [0], [1], [0, 0, 1, 1], [], []>} : vector<16x128xf32>, vector<128x128xf32>, vector<16x128xf32> -> vector<16x128xf32>
    %631 = arith.addf %629, %630 : vector<16x128xf32>
    %c106 = arith.constant 106 : index
    %632 = memref.load %arg4[%c106] : memref<254xf32, #tpu.memory_space<smem>>
    %633 = vector.broadcast %632 : f32 to vector<16x128xf32>
    %634 = arith.mulf %614, %633 : vector<16x128xf32>
    %c107 = arith.constant 107 : index
    %635 = memref.load %arg4[%c107] : memref<254xf32, #tpu.memory_space<smem>>
    %636 = vector.broadcast %635 : f32 to vector<16x128xf32>
    %637 = arith.mulf %614, %636 : vector<16x128xf32>
    %c108 = arith.constant 108 : index
    %638 = memref.load %arg4[%c108] : memref<254xf32, #tpu.memory_space<smem>>
    %639 = vector.broadcast %638 : f32 to vector<16x128xf32>
    %640 = arith.mulf %614, %639 : vector<16x128xf32>
    %c109 = arith.constant 109 : index
    %641 = memref.load %arg4[%c109] : memref<254xf32, #tpu.memory_space<smem>>
    %642 = vector.broadcast %641 : f32 to vector<16x128xf32>
    %643 = arith.mulf %614, %642 : vector<16x128xf32>
    %c122 = arith.constant 122 : index
    %644 = memref.load %arg4[%c122] : memref<254xf32, #tpu.memory_space<smem>>
    %645 = vector.broadcast %644 : f32 to vector<16x128xf32>
    %646 = arith.mulf %611, %645 : vector<16x128xf32>
    %c123 = arith.constant 123 : index
    %647 = memref.load %arg4[%c123] : memref<254xf32, #tpu.memory_space<smem>>
    %648 = vector.broadcast %647 : f32 to vector<16x128xf32>
    %649 = arith.mulf %611, %648 : vector<16x128xf32>
    %c124 = arith.constant 124 : index
    %650 = memref.load %arg4[%c124] : memref<254xf32, #tpu.memory_space<smem>>
    %651 = vector.broadcast %650 : f32 to vector<16x128xf32>
    %652 = arith.mulf %611, %651 : vector<16x128xf32>
    %c125 = arith.constant 125 : index
    %653 = memref.load %arg4[%c125] : memref<254xf32, #tpu.memory_space<smem>>
    %654 = vector.broadcast %653 : f32 to vector<16x128xf32>
    %655 = arith.mulf %611, %654 : vector<16x128xf32>
    %c138 = arith.constant 138 : index
    %656 = memref.load %arg4[%c138] : memref<254xf32, #tpu.memory_space<smem>>
    %657 = vector.broadcast %656 : f32 to vector<16x128xf32>
    %658 = arith.mulf %617, %657 : vector<16x128xf32>
    %c139 = arith.constant 139 : index
    %659 = memref.load %arg4[%c139] : memref<254xf32, #tpu.memory_space<smem>>
    %660 = vector.broadcast %659 : f32 to vector<16x128xf32>
    %661 = arith.mulf %617, %660 : vector<16x128xf32>
    %c140 = arith.constant 140 : index
    %662 = memref.load %arg4[%c140] : memref<254xf32, #tpu.memory_space<smem>>
    %663 = vector.broadcast %662 : f32 to vector<16x128xf32>
    %664 = arith.mulf %617, %663 : vector<16x128xf32>
    %c141 = arith.constant 141 : index
    %665 = memref.load %arg4[%c141] : memref<254xf32, #tpu.memory_space<smem>>
    %666 = vector.broadcast %665 : f32 to vector<16x128xf32>
    %667 = arith.mulf %617, %666 : vector<16x128xf32>
    %c154 = arith.constant 154 : index
    %668 = memref.load %arg4[%c154] : memref<254xf32, #tpu.memory_space<smem>>
    %669 = vector.broadcast %668 : f32 to vector<16x128xf32>
    %670 = arith.mulf %621, %669 : vector<16x128xf32>
    %c155 = arith.constant 155 : index
    %671 = memref.load %arg4[%c155] : memref<254xf32, #tpu.memory_space<smem>>
    %672 = vector.broadcast %671 : f32 to vector<16x128xf32>
    %673 = arith.mulf %621, %672 : vector<16x128xf32>
    %c156 = arith.constant 156 : index
    %674 = memref.load %arg4[%c156] : memref<254xf32, #tpu.memory_space<smem>>
    %675 = vector.broadcast %674 : f32 to vector<16x128xf32>
    %676 = arith.mulf %621, %675 : vector<16x128xf32>
    %c157 = arith.constant 157 : index
    %677 = memref.load %arg4[%c157] : memref<254xf32, #tpu.memory_space<smem>>
    %678 = vector.broadcast %677 : f32 to vector<16x128xf32>
    %679 = arith.mulf %621, %678 : vector<16x128xf32>
    %c170 = arith.constant 170 : index
    %680 = memref.load %arg4[%c170] : memref<254xf32, #tpu.memory_space<smem>>
    %681 = vector.broadcast %680 : f32 to vector<16x128xf32>
    %682 = arith.mulf %618, %681 : vector<16x128xf32>
    %c171 = arith.constant 171 : index
    %683 = memref.load %arg4[%c171] : memref<254xf32, #tpu.memory_space<smem>>
    %684 = vector.broadcast %683 : f32 to vector<16x128xf32>
    %685 = arith.mulf %618, %684 : vector<16x128xf32>
    %c172 = arith.constant 172 : index
    %686 = memref.load %arg4[%c172] : memref<254xf32, #tpu.memory_space<smem>>
    %687 = vector.broadcast %686 : f32 to vector<16x128xf32>
    %688 = arith.mulf %618, %687 : vector<16x128xf32>
    %c173 = arith.constant 173 : index
    %689 = memref.load %arg4[%c173] : memref<254xf32, #tpu.memory_space<smem>>
    %690 = vector.broadcast %689 : f32 to vector<16x128xf32>
    %691 = arith.mulf %618, %690 : vector<16x128xf32>
    %c186 = arith.constant 186 : index
    %692 = memref.load %arg4[%c186] : memref<254xf32, #tpu.memory_space<smem>>
    %693 = vector.broadcast %692 : f32 to vector<16x128xf32>
    %694 = arith.mulf %624, %693 : vector<16x128xf32>
    %c187 = arith.constant 187 : index
    %695 = memref.load %arg4[%c187] : memref<254xf32, #tpu.memory_space<smem>>
    %696 = vector.broadcast %695 : f32 to vector<16x128xf32>
    %697 = arith.mulf %624, %696 : vector<16x128xf32>
    %c188 = arith.constant 188 : index
    %698 = memref.load %arg4[%c188] : memref<254xf32, #tpu.memory_space<smem>>
    %699 = vector.broadcast %698 : f32 to vector<16x128xf32>
    %700 = arith.mulf %624, %699 : vector<16x128xf32>
    %c189 = arith.constant 189 : index
    %701 = memref.load %arg4[%c189] : memref<254xf32, #tpu.memory_space<smem>>
    %702 = vector.broadcast %701 : f32 to vector<16x128xf32>
    %703 = arith.mulf %624, %702 : vector<16x128xf32>
    %c202 = arith.constant 202 : index
    %704 = memref.load %arg4[%c202] : memref<254xf32, #tpu.memory_space<smem>>
    %705 = vector.broadcast %704 : f32 to vector<16x128xf32>
    %706 = arith.mulf %628, %705 : vector<16x128xf32>
    %c203 = arith.constant 203 : index
    %707 = memref.load %arg4[%c203] : memref<254xf32, #tpu.memory_space<smem>>
    %708 = vector.broadcast %707 : f32 to vector<16x128xf32>
    %709 = arith.mulf %628, %708 : vector<16x128xf32>
    %c204 = arith.constant 204 : index
    %710 = memref.load %arg4[%c204] : memref<254xf32, #tpu.memory_space<smem>>
    %711 = vector.broadcast %710 : f32 to vector<16x128xf32>
    %712 = arith.mulf %628, %711 : vector<16x128xf32>
    %c205 = arith.constant 205 : index
    %713 = memref.load %arg4[%c205] : memref<254xf32, #tpu.memory_space<smem>>
    %714 = vector.broadcast %713 : f32 to vector<16x128xf32>
    %715 = arith.mulf %628, %714 : vector<16x128xf32>
    %c218 = arith.constant 218 : index
    %716 = memref.load %arg4[%c218] : memref<254xf32, #tpu.memory_space<smem>>
    %717 = vector.broadcast %716 : f32 to vector<16x128xf32>
    %718 = arith.mulf %625, %717 : vector<16x128xf32>
    %c219 = arith.constant 219 : index
    %719 = memref.load %arg4[%c219] : memref<254xf32, #tpu.memory_space<smem>>
    %720 = vector.broadcast %719 : f32 to vector<16x128xf32>
    %721 = arith.mulf %625, %720 : vector<16x128xf32>
    %c220 = arith.constant 220 : index
    %722 = memref.load %arg4[%c220] : memref<254xf32, #tpu.memory_space<smem>>
    %723 = vector.broadcast %722 : f32 to vector<16x128xf32>
    %724 = arith.mulf %625, %723 : vector<16x128xf32>
    %c221 = arith.constant 221 : index
    %725 = memref.load %arg4[%c221] : memref<254xf32, #tpu.memory_space<smem>>
    %726 = vector.broadcast %725 : f32 to vector<16x128xf32>
    %727 = arith.mulf %625, %726 : vector<16x128xf32>
    %c234 = arith.constant 234 : index
    %728 = memref.load %arg4[%c234] : memref<254xf32, #tpu.memory_space<smem>>
    %729 = vector.broadcast %728 : f32 to vector<16x128xf32>
    %730 = arith.mulf %631, %729 : vector<16x128xf32>
    %c235 = arith.constant 235 : index
    %731 = memref.load %arg4[%c235] : memref<254xf32, #tpu.memory_space<smem>>
    %732 = vector.broadcast %731 : f32 to vector<16x128xf32>
    %733 = arith.mulf %631, %732 : vector<16x128xf32>
    %c236 = arith.constant 236 : index
    %734 = memref.load %arg4[%c236] : memref<254xf32, #tpu.memory_space<smem>>
    %735 = vector.broadcast %734 : f32 to vector<16x128xf32>
    %736 = arith.mulf %631, %735 : vector<16x128xf32>
    %c237 = arith.constant 237 : index
    %737 = memref.load %arg4[%c237] : memref<254xf32, #tpu.memory_space<smem>>
    %738 = vector.broadcast %737 : f32 to vector<16x128xf32>
    %739 = arith.mulf %631, %738 : vector<16x128xf32>
    %740 = arith.truncf %603 : vector<16x128xf32> to vector<16x128xbf16>
    %741 = arith.extf %740 : vector<16x128xbf16> to vector<16x128xf32>
    %742 = arith.subf %603, %741 : vector<16x128xf32>
    %cst_153 = arith.constant dense<0.000000e+00> : vector<16x128xf32>
    %743 = tpu.matmul %35, %741, %cst_153 {dimension_numbers = #tpu.dot_dimension_numbers<[1], [0], [0], [1], [0, 0, 1, 1], [], []>} : vector<16x16xf32>, vector<16x128xf32>, vector<16x128xf32> -> vector<16x128xf32>
    %cst_154 = arith.constant dense<0.000000e+00> : vector<16x128xf32>
    %744 = tpu.matmul %35, %742, %cst_154 {dimension_numbers = #tpu.dot_dimension_numbers<[1], [0], [0], [1], [0, 0, 1, 1], [], []>} : vector<16x16xf32>, vector<16x128xf32>, vector<16x128xf32> -> vector<16x128xf32>
    %cst_155 = arith.constant dense<0.000000e+00> : vector<16x128xf32>
    %745 = tpu.matmul %43, %741, %cst_155 {dimension_numbers = #tpu.dot_dimension_numbers<[1], [0], [0], [1], [0, 0, 1, 1], [], []>} : vector<16x16xf32>, vector<16x128xf32>, vector<16x128xf32> -> vector<16x128xf32>
    %cst_156 = arith.constant dense<0.000000e+00> : vector<16x128xf32>
    %746 = tpu.matmul %43, %742, %cst_156 {dimension_numbers = #tpu.dot_dimension_numbers<[1], [0], [0], [1], [0, 0, 1, 1], [], []>} : vector<16x16xf32>, vector<16x128xf32>, vector<16x128xf32> -> vector<16x128xf32>
    %747 = arith.addf %743, %744 : vector<16x128xf32>
    %cst_157 = arith.constant dense<0.000000e+00> : vector<16x128xf32>
    %748 = tpu.matmul %743, %51, %cst_157 {dimension_numbers = #tpu.dot_dimension_numbers<[1], [0], [0], [1], [0, 0, 1, 1], [], []>} : vector<16x128xf32>, vector<128x128xf32>, vector<16x128xf32> -> vector<16x128xf32>
    %cst_158 = arith.constant dense<0.000000e+00> : vector<16x128xf32>
    %749 = tpu.matmul %744, %51, %cst_158 {dimension_numbers = #tpu.dot_dimension_numbers<[1], [0], [0], [1], [0, 0, 1, 1], [], []>} : vector<16x128xf32>, vector<128x128xf32>, vector<16x128xf32> -> vector<16x128xf32>
    %750 = arith.addf %748, %749 : vector<16x128xf32>
    %cst_159 = arith.constant dense<0.000000e+00> : vector<16x128xf32>
    %751 = tpu.matmul %743, %59, %cst_159 {dimension_numbers = #tpu.dot_dimension_numbers<[1], [0], [0], [1], [0, 0, 1, 1], [], []>} : vector<16x128xf32>, vector<128x128xf32>, vector<16x128xf32> -> vector<16x128xf32>
    %cst_160 = arith.constant dense<0.000000e+00> : vector<16x128xf32>
    %752 = tpu.matmul %744, %59, %cst_160 {dimension_numbers = #tpu.dot_dimension_numbers<[1], [0], [0], [1], [0, 0, 1, 1], [], []>} : vector<16x128xf32>, vector<128x128xf32>, vector<16x128xf32> -> vector<16x128xf32>
    %753 = arith.addf %751, %752 : vector<16x128xf32>
    %754 = arith.addf %741, %742 : vector<16x128xf32>
    %cst_161 = arith.constant dense<0.000000e+00> : vector<16x128xf32>
    %755 = tpu.matmul %741, %51, %cst_161 {dimension_numbers = #tpu.dot_dimension_numbers<[1], [0], [0], [1], [0, 0, 1, 1], [], []>} : vector<16x128xf32>, vector<128x128xf32>, vector<16x128xf32> -> vector<16x128xf32>
    %cst_162 = arith.constant dense<0.000000e+00> : vector<16x128xf32>
    %756 = tpu.matmul %742, %51, %cst_162 {dimension_numbers = #tpu.dot_dimension_numbers<[1], [0], [0], [1], [0, 0, 1, 1], [], []>} : vector<16x128xf32>, vector<128x128xf32>, vector<16x128xf32> -> vector<16x128xf32>
    %757 = arith.addf %755, %756 : vector<16x128xf32>
    %cst_163 = arith.constant dense<0.000000e+00> : vector<16x128xf32>
    %758 = tpu.matmul %741, %59, %cst_163 {dimension_numbers = #tpu.dot_dimension_numbers<[1], [0], [0], [1], [0, 0, 1, 1], [], []>} : vector<16x128xf32>, vector<128x128xf32>, vector<16x128xf32> -> vector<16x128xf32>
    %cst_164 = arith.constant dense<0.000000e+00> : vector<16x128xf32>
    %759 = tpu.matmul %742, %59, %cst_164 {dimension_numbers = #tpu.dot_dimension_numbers<[1], [0], [0], [1], [0, 0, 1, 1], [], []>} : vector<16x128xf32>, vector<128x128xf32>, vector<16x128xf32> -> vector<16x128xf32>
    %760 = arith.addf %758, %759 : vector<16x128xf32>
    %761 = arith.addf %745, %746 : vector<16x128xf32>
    %cst_165 = arith.constant dense<0.000000e+00> : vector<16x128xf32>
    %762 = tpu.matmul %745, %51, %cst_165 {dimension_numbers = #tpu.dot_dimension_numbers<[1], [0], [0], [1], [0, 0, 1, 1], [], []>} : vector<16x128xf32>, vector<128x128xf32>, vector<16x128xf32> -> vector<16x128xf32>
    %cst_166 = arith.constant dense<0.000000e+00> : vector<16x128xf32>
    %763 = tpu.matmul %746, %51, %cst_166 {dimension_numbers = #tpu.dot_dimension_numbers<[1], [0], [0], [1], [0, 0, 1, 1], [], []>} : vector<16x128xf32>, vector<128x128xf32>, vector<16x128xf32> -> vector<16x128xf32>
    %764 = arith.addf %762, %763 : vector<16x128xf32>
    %cst_167 = arith.constant dense<0.000000e+00> : vector<16x128xf32>
    %765 = tpu.matmul %745, %59, %cst_167 {dimension_numbers = #tpu.dot_dimension_numbers<[1], [0], [0], [1], [0, 0, 1, 1], [], []>} : vector<16x128xf32>, vector<128x128xf32>, vector<16x128xf32> -> vector<16x128xf32>
    %cst_168 = arith.constant dense<0.000000e+00> : vector<16x128xf32>
    %766 = tpu.matmul %746, %59, %cst_168 {dimension_numbers = #tpu.dot_dimension_numbers<[1], [0], [0], [1], [0, 0, 1, 1], [], []>} : vector<16x128xf32>, vector<128x128xf32>, vector<16x128xf32> -> vector<16x128xf32>
    %767 = arith.addf %765, %766 : vector<16x128xf32>
    %c110 = arith.constant 110 : index
    %768 = memref.load %arg4[%c110] : memref<254xf32, #tpu.memory_space<smem>>
    %769 = vector.broadcast %768 : f32 to vector<16x128xf32>
    %770 = arith.mulf %750, %769 : vector<16x128xf32>
    %c111 = arith.constant 111 : index
    %771 = memref.load %arg4[%c111] : memref<254xf32, #tpu.memory_space<smem>>
    %772 = vector.broadcast %771 : f32 to vector<16x128xf32>
    %773 = arith.mulf %750, %772 : vector<16x128xf32>
    %c112 = arith.constant 112 : index
    %774 = memref.load %arg4[%c112] : memref<254xf32, #tpu.memory_space<smem>>
    %775 = vector.broadcast %774 : f32 to vector<16x128xf32>
    %776 = arith.mulf %750, %775 : vector<16x128xf32>
    %c113 = arith.constant 113 : index
    %777 = memref.load %arg4[%c113] : memref<254xf32, #tpu.memory_space<smem>>
    %778 = vector.broadcast %777 : f32 to vector<16x128xf32>
    %779 = arith.mulf %750, %778 : vector<16x128xf32>
    %c126 = arith.constant 126 : index
    %780 = memref.load %arg4[%c126] : memref<254xf32, #tpu.memory_space<smem>>
    %781 = vector.broadcast %780 : f32 to vector<16x128xf32>
    %782 = arith.mulf %747, %781 : vector<16x128xf32>
    %c127 = arith.constant 127 : index
    %783 = memref.load %arg4[%c127] : memref<254xf32, #tpu.memory_space<smem>>
    %784 = vector.broadcast %783 : f32 to vector<16x128xf32>
    %785 = arith.mulf %747, %784 : vector<16x128xf32>
    %c128 = arith.constant 128 : index
    %786 = memref.load %arg4[%c128] : memref<254xf32, #tpu.memory_space<smem>>
    %787 = vector.broadcast %786 : f32 to vector<16x128xf32>
    %788 = arith.mulf %747, %787 : vector<16x128xf32>
    %c129 = arith.constant 129 : index
    %789 = memref.load %arg4[%c129] : memref<254xf32, #tpu.memory_space<smem>>
    %790 = vector.broadcast %789 : f32 to vector<16x128xf32>
    %791 = arith.mulf %747, %790 : vector<16x128xf32>
    %c142 = arith.constant 142 : index
    %792 = memref.load %arg4[%c142] : memref<254xf32, #tpu.memory_space<smem>>
    %793 = vector.broadcast %792 : f32 to vector<16x128xf32>
    %794 = arith.mulf %753, %793 : vector<16x128xf32>
    %c143 = arith.constant 143 : index
    %795 = memref.load %arg4[%c143] : memref<254xf32, #tpu.memory_space<smem>>
    %796 = vector.broadcast %795 : f32 to vector<16x128xf32>
    %797 = arith.mulf %753, %796 : vector<16x128xf32>
    %c144 = arith.constant 144 : index
    %798 = memref.load %arg4[%c144] : memref<254xf32, #tpu.memory_space<smem>>
    %799 = vector.broadcast %798 : f32 to vector<16x128xf32>
    %800 = arith.mulf %753, %799 : vector<16x128xf32>
    %c145 = arith.constant 145 : index
    %801 = memref.load %arg4[%c145] : memref<254xf32, #tpu.memory_space<smem>>
    %802 = vector.broadcast %801 : f32 to vector<16x128xf32>
    %803 = arith.mulf %753, %802 : vector<16x128xf32>
    %c158 = arith.constant 158 : index
    %804 = memref.load %arg4[%c158] : memref<254xf32, #tpu.memory_space<smem>>
    %805 = vector.broadcast %804 : f32 to vector<16x128xf32>
    %806 = arith.mulf %757, %805 : vector<16x128xf32>
    %c159 = arith.constant 159 : index
    %807 = memref.load %arg4[%c159] : memref<254xf32, #tpu.memory_space<smem>>
    %808 = vector.broadcast %807 : f32 to vector<16x128xf32>
    %809 = arith.mulf %757, %808 : vector<16x128xf32>
    %c160 = arith.constant 160 : index
    %810 = memref.load %arg4[%c160] : memref<254xf32, #tpu.memory_space<smem>>
    %811 = vector.broadcast %810 : f32 to vector<16x128xf32>
    %812 = arith.mulf %757, %811 : vector<16x128xf32>
    %c161 = arith.constant 161 : index
    %813 = memref.load %arg4[%c161] : memref<254xf32, #tpu.memory_space<smem>>
    %814 = vector.broadcast %813 : f32 to vector<16x128xf32>
    %815 = arith.mulf %757, %814 : vector<16x128xf32>
    %c174 = arith.constant 174 : index
    %816 = memref.load %arg4[%c174] : memref<254xf32, #tpu.memory_space<smem>>
    %817 = vector.broadcast %816 : f32 to vector<16x128xf32>
    %818 = arith.mulf %754, %817 : vector<16x128xf32>
    %c175 = arith.constant 175 : index
    %819 = memref.load %arg4[%c175] : memref<254xf32, #tpu.memory_space<smem>>
    %820 = vector.broadcast %819 : f32 to vector<16x128xf32>
    %821 = arith.mulf %754, %820 : vector<16x128xf32>
    %c176 = arith.constant 176 : index
    %822 = memref.load %arg4[%c176] : memref<254xf32, #tpu.memory_space<smem>>
    %823 = vector.broadcast %822 : f32 to vector<16x128xf32>
    %824 = arith.mulf %754, %823 : vector<16x128xf32>
    %c177 = arith.constant 177 : index
    %825 = memref.load %arg4[%c177] : memref<254xf32, #tpu.memory_space<smem>>
    %826 = vector.broadcast %825 : f32 to vector<16x128xf32>
    %827 = arith.mulf %754, %826 : vector<16x128xf32>
    %c190 = arith.constant 190 : index
    %828 = memref.load %arg4[%c190] : memref<254xf32, #tpu.memory_space<smem>>
    %829 = vector.broadcast %828 : f32 to vector<16x128xf32>
    %830 = arith.mulf %760, %829 : vector<16x128xf32>
    %c191 = arith.constant 191 : index
    %831 = memref.load %arg4[%c191] : memref<254xf32, #tpu.memory_space<smem>>
    %832 = vector.broadcast %831 : f32 to vector<16x128xf32>
    %833 = arith.mulf %760, %832 : vector<16x128xf32>
    %c192 = arith.constant 192 : index
    %834 = memref.load %arg4[%c192] : memref<254xf32, #tpu.memory_space<smem>>
    %835 = vector.broadcast %834 : f32 to vector<16x128xf32>
    %836 = arith.mulf %760, %835 : vector<16x128xf32>
    %c193 = arith.constant 193 : index
    %837 = memref.load %arg4[%c193] : memref<254xf32, #tpu.memory_space<smem>>
    %838 = vector.broadcast %837 : f32 to vector<16x128xf32>
    %839 = arith.mulf %760, %838 : vector<16x128xf32>
    %c206 = arith.constant 206 : index
    %840 = memref.load %arg4[%c206] : memref<254xf32, #tpu.memory_space<smem>>
    %841 = vector.broadcast %840 : f32 to vector<16x128xf32>
    %842 = arith.mulf %764, %841 : vector<16x128xf32>
    %c207 = arith.constant 207 : index
    %843 = memref.load %arg4[%c207] : memref<254xf32, #tpu.memory_space<smem>>
    %844 = vector.broadcast %843 : f32 to vector<16x128xf32>
    %845 = arith.mulf %764, %844 : vector<16x128xf32>
    %c208 = arith.constant 208 : index
    %846 = memref.load %arg4[%c208] : memref<254xf32, #tpu.memory_space<smem>>
    %847 = vector.broadcast %846 : f32 to vector<16x128xf32>
    %848 = arith.mulf %764, %847 : vector<16x128xf32>
    %c209 = arith.constant 209 : index
    %849 = memref.load %arg4[%c209] : memref<254xf32, #tpu.memory_space<smem>>
    %850 = vector.broadcast %849 : f32 to vector<16x128xf32>
    %851 = arith.mulf %764, %850 : vector<16x128xf32>
    %c222 = arith.constant 222 : index
    %852 = memref.load %arg4[%c222] : memref<254xf32, #tpu.memory_space<smem>>
    %853 = vector.broadcast %852 : f32 to vector<16x128xf32>
    %854 = arith.mulf %761, %853 : vector<16x128xf32>
    %c223 = arith.constant 223 : index
    %855 = memref.load %arg4[%c223] : memref<254xf32, #tpu.memory_space<smem>>
    %856 = vector.broadcast %855 : f32 to vector<16x128xf32>
    %857 = arith.mulf %761, %856 : vector<16x128xf32>
    %c224 = arith.constant 224 : index
    %858 = memref.load %arg4[%c224] : memref<254xf32, #tpu.memory_space<smem>>
    %859 = vector.broadcast %858 : f32 to vector<16x128xf32>
    %860 = arith.mulf %761, %859 : vector<16x128xf32>
    %c225 = arith.constant 225 : index
    %861 = memref.load %arg4[%c225] : memref<254xf32, #tpu.memory_space<smem>>
    %862 = vector.broadcast %861 : f32 to vector<16x128xf32>
    %863 = arith.mulf %761, %862 : vector<16x128xf32>
    %c238 = arith.constant 238 : index
    %864 = memref.load %arg4[%c238] : memref<254xf32, #tpu.memory_space<smem>>
    %865 = vector.broadcast %864 : f32 to vector<16x128xf32>
    %866 = arith.mulf %767, %865 : vector<16x128xf32>
    %c239 = arith.constant 239 : index
    %867 = memref.load %arg4[%c239] : memref<254xf32, #tpu.memory_space<smem>>
    %868 = vector.broadcast %867 : f32 to vector<16x128xf32>
    %869 = arith.mulf %767, %868 : vector<16x128xf32>
    %c240 = arith.constant 240 : index
    %870 = memref.load %arg4[%c240] : memref<254xf32, #tpu.memory_space<smem>>
    %871 = vector.broadcast %870 : f32 to vector<16x128xf32>
    %872 = arith.mulf %767, %871 : vector<16x128xf32>
    %c241 = arith.constant 241 : index
    %873 = memref.load %arg4[%c241] : memref<254xf32, #tpu.memory_space<smem>>
    %874 = vector.broadcast %873 : f32 to vector<16x128xf32>
    %875 = arith.mulf %767, %874 : vector<16x128xf32>
    %876 = arith.addf %634, %646 : vector<16x128xf32>
    %877 = arith.addf %658, %670 : vector<16x128xf32>
    %878 = arith.addf %682, %694 : vector<16x128xf32>
    %879 = arith.addf %706, %718 : vector<16x128xf32>
    %880 = arith.addf %730, %770 : vector<16x128xf32>
    %881 = arith.addf %782, %794 : vector<16x128xf32>
    %882 = arith.addf %806, %818 : vector<16x128xf32>
    %883 = arith.addf %830, %842 : vector<16x128xf32>
    %884 = arith.addf %854, %866 : vector<16x128xf32>
    %885 = arith.addf %876, %877 : vector<16x128xf32>
    %886 = arith.addf %878, %879 : vector<16x128xf32>
    %887 = arith.addf %880, %881 : vector<16x128xf32>
    %888 = arith.addf %882, %883 : vector<16x128xf32>
    %889 = arith.addf %885, %886 : vector<16x128xf32>
    %890 = arith.addf %887, %888 : vector<16x128xf32>
    %891 = arith.addf %889, %890 : vector<16x128xf32>
    %892 = arith.addf %891, %884 : vector<16x128xf32>
    %893 = arith.addf %637, %649 : vector<16x128xf32>
    %894 = arith.addf %661, %673 : vector<16x128xf32>
    %895 = arith.addf %685, %697 : vector<16x128xf32>
    %896 = arith.addf %709, %721 : vector<16x128xf32>
    %897 = arith.addf %733, %773 : vector<16x128xf32>
    %898 = arith.addf %785, %797 : vector<16x128xf32>
    %899 = arith.addf %809, %821 : vector<16x128xf32>
    %900 = arith.addf %833, %845 : vector<16x128xf32>
    %901 = arith.addf %857, %869 : vector<16x128xf32>
    %902 = arith.addf %893, %894 : vector<16x128xf32>
    %903 = arith.addf %895, %896 : vector<16x128xf32>
    %904 = arith.addf %897, %898 : vector<16x128xf32>
    %905 = arith.addf %899, %900 : vector<16x128xf32>
    %906 = arith.addf %902, %903 : vector<16x128xf32>
    %907 = arith.addf %904, %905 : vector<16x128xf32>
    %908 = arith.addf %906, %907 : vector<16x128xf32>
    %909 = arith.addf %908, %901 : vector<16x128xf32>
    %910 = arith.addf %640, %652 : vector<16x128xf32>
    %911 = arith.addf %664, %676 : vector<16x128xf32>
    %912 = arith.addf %688, %700 : vector<16x128xf32>
    %913 = arith.addf %712, %724 : vector<16x128xf32>
    %914 = arith.addf %736, %776 : vector<16x128xf32>
    %915 = arith.addf %788, %800 : vector<16x128xf32>
    %916 = arith.addf %812, %824 : vector<16x128xf32>
    %917 = arith.addf %836, %848 : vector<16x128xf32>
    %918 = arith.addf %860, %872 : vector<16x128xf32>
    %919 = arith.addf %910, %911 : vector<16x128xf32>
    %920 = arith.addf %912, %913 : vector<16x128xf32>
    %921 = arith.addf %914, %915 : vector<16x128xf32>
    %922 = arith.addf %916, %917 : vector<16x128xf32>
    %923 = arith.addf %919, %920 : vector<16x128xf32>
    %924 = arith.addf %921, %922 : vector<16x128xf32>
    %925 = arith.addf %923, %924 : vector<16x128xf32>
    %926 = arith.addf %925, %918 : vector<16x128xf32>
    %927 = arith.addf %643, %655 : vector<16x128xf32>
    %928 = arith.addf %667, %679 : vector<16x128xf32>
    %929 = arith.addf %691, %703 : vector<16x128xf32>
    %930 = arith.addf %715, %727 : vector<16x128xf32>
    %931 = arith.addf %739, %779 : vector<16x128xf32>
    %932 = arith.addf %791, %803 : vector<16x128xf32>
    %933 = arith.addf %815, %827 : vector<16x128xf32>
    %934 = arith.addf %839, %851 : vector<16x128xf32>
    %935 = arith.addf %863, %875 : vector<16x128xf32>
    %936 = arith.addf %927, %928 : vector<16x128xf32>
    %937 = arith.addf %929, %930 : vector<16x128xf32>
    %938 = arith.addf %931, %932 : vector<16x128xf32>
    %939 = arith.addf %933, %934 : vector<16x128xf32>
    %940 = arith.addf %936, %937 : vector<16x128xf32>
    %941 = arith.addf %938, %939 : vector<16x128xf32>
    %942 = arith.addf %940, %941 : vector<16x128xf32>
    %943 = arith.addf %942, %935 : vector<16x128xf32>
    %944 = arith.truncf %243 : vector<16x128xf32> to vector<16x128xbf16>
    %945 = arith.extf %944 : vector<16x128xbf16> to vector<16x128xf32>
    %946 = arith.subf %243, %945 : vector<16x128xf32>
    %cst_169 = arith.constant dense<0.000000e+00> : vector<16x128xf32>
    %947 = tpu.matmul %35, %945, %cst_169 {dimension_numbers = #tpu.dot_dimension_numbers<[1], [0], [0], [1], [0, 0, 1, 1], [], []>} : vector<16x16xf32>, vector<16x128xf32>, vector<16x128xf32> -> vector<16x128xf32>
    %cst_170 = arith.constant dense<0.000000e+00> : vector<16x128xf32>
    %948 = tpu.matmul %35, %946, %cst_170 {dimension_numbers = #tpu.dot_dimension_numbers<[1], [0], [0], [1], [0, 0, 1, 1], [], []>} : vector<16x16xf32>, vector<16x128xf32>, vector<16x128xf32> -> vector<16x128xf32>
    %cst_171 = arith.constant dense<0.000000e+00> : vector<16x128xf32>
    %949 = tpu.matmul %43, %945, %cst_171 {dimension_numbers = #tpu.dot_dimension_numbers<[1], [0], [0], [1], [0, 0, 1, 1], [], []>} : vector<16x16xf32>, vector<16x128xf32>, vector<16x128xf32> -> vector<16x128xf32>
    %cst_172 = arith.constant dense<0.000000e+00> : vector<16x128xf32>
    %950 = tpu.matmul %43, %946, %cst_172 {dimension_numbers = #tpu.dot_dimension_numbers<[1], [0], [0], [1], [0, 0, 1, 1], [], []>} : vector<16x16xf32>, vector<16x128xf32>, vector<16x128xf32> -> vector<16x128xf32>
    %951 = arith.addf %947, %948 : vector<16x128xf32>
    %cst_173 = arith.constant dense<0.000000e+00> : vector<16x128xf32>
    %952 = tpu.matmul %947, %51, %cst_173 {dimension_numbers = #tpu.dot_dimension_numbers<[1], [0], [0], [1], [0, 0, 1, 1], [], []>} : vector<16x128xf32>, vector<128x128xf32>, vector<16x128xf32> -> vector<16x128xf32>
    %cst_174 = arith.constant dense<0.000000e+00> : vector<16x128xf32>
    %953 = tpu.matmul %948, %51, %cst_174 {dimension_numbers = #tpu.dot_dimension_numbers<[1], [0], [0], [1], [0, 0, 1, 1], [], []>} : vector<16x128xf32>, vector<128x128xf32>, vector<16x128xf32> -> vector<16x128xf32>
    %954 = arith.addf %952, %953 : vector<16x128xf32>
    %cst_175 = arith.constant dense<0.000000e+00> : vector<16x128xf32>
    %955 = tpu.matmul %947, %59, %cst_175 {dimension_numbers = #tpu.dot_dimension_numbers<[1], [0], [0], [1], [0, 0, 1, 1], [], []>} : vector<16x128xf32>, vector<128x128xf32>, vector<16x128xf32> -> vector<16x128xf32>
    %cst_176 = arith.constant dense<0.000000e+00> : vector<16x128xf32>
    %956 = tpu.matmul %948, %59, %cst_176 {dimension_numbers = #tpu.dot_dimension_numbers<[1], [0], [0], [1], [0, 0, 1, 1], [], []>} : vector<16x128xf32>, vector<128x128xf32>, vector<16x128xf32> -> vector<16x128xf32>
    %957 = arith.addf %955, %956 : vector<16x128xf32>
    %958 = arith.addf %945, %946 : vector<16x128xf32>
    %cst_177 = arith.constant dense<0.000000e+00> : vector<16x128xf32>
    %959 = tpu.matmul %945, %51, %cst_177 {dimension_numbers = #tpu.dot_dimension_numbers<[1], [0], [0], [1], [0, 0, 1, 1], [], []>} : vector<16x128xf32>, vector<128x128xf32>, vector<16x128xf32> -> vector<16x128xf32>
    %cst_178 = arith.constant dense<0.000000e+00> : vector<16x128xf32>
    %960 = tpu.matmul %946, %51, %cst_178 {dimension_numbers = #tpu.dot_dimension_numbers<[1], [0], [0], [1], [0, 0, 1, 1], [], []>} : vector<16x128xf32>, vector<128x128xf32>, vector<16x128xf32> -> vector<16x128xf32>
    %961 = arith.addf %959, %960 : vector<16x128xf32>
    %cst_179 = arith.constant dense<0.000000e+00> : vector<16x128xf32>
    %962 = tpu.matmul %945, %59, %cst_179 {dimension_numbers = #tpu.dot_dimension_numbers<[1], [0], [0], [1], [0, 0, 1, 1], [], []>} : vector<16x128xf32>, vector<128x128xf32>, vector<16x128xf32> -> vector<16x128xf32>
    %cst_180 = arith.constant dense<0.000000e+00> : vector<16x128xf32>
    %963 = tpu.matmul %946, %59, %cst_180 {dimension_numbers = #tpu.dot_dimension_numbers<[1], [0], [0], [1], [0, 0, 1, 1], [], []>} : vector<16x128xf32>, vector<128x128xf32>, vector<16x128xf32> -> vector<16x128xf32>
    %964 = arith.addf %962, %963 : vector<16x128xf32>
    %965 = arith.addf %949, %950 : vector<16x128xf32>
    %cst_181 = arith.constant dense<0.000000e+00> : vector<16x128xf32>
    %966 = tpu.matmul %949, %51, %cst_181 {dimension_numbers = #tpu.dot_dimension_numbers<[1], [0], [0], [1], [0, 0, 1, 1], [], []>} : vector<16x128xf32>, vector<128x128xf32>, vector<16x128xf32> -> vector<16x128xf32>
    %cst_182 = arith.constant dense<0.000000e+00> : vector<16x128xf32>
    %967 = tpu.matmul %950, %51, %cst_182 {dimension_numbers = #tpu.dot_dimension_numbers<[1], [0], [0], [1], [0, 0, 1, 1], [], []>} : vector<16x128xf32>, vector<128x128xf32>, vector<16x128xf32> -> vector<16x128xf32>
    %968 = arith.addf %966, %967 : vector<16x128xf32>
    %cst_183 = arith.constant dense<0.000000e+00> : vector<16x128xf32>
    %969 = tpu.matmul %949, %59, %cst_183 {dimension_numbers = #tpu.dot_dimension_numbers<[1], [0], [0], [1], [0, 0, 1, 1], [], []>} : vector<16x128xf32>, vector<128x128xf32>, vector<16x128xf32> -> vector<16x128xf32>
    %cst_184 = arith.constant dense<0.000000e+00> : vector<16x128xf32>
    %970 = tpu.matmul %950, %59, %cst_184 {dimension_numbers = #tpu.dot_dimension_numbers<[1], [0], [0], [1], [0, 0, 1, 1], [], []>} : vector<16x128xf32>, vector<128x128xf32>, vector<16x128xf32> -> vector<16x128xf32>
    %971 = arith.addf %969, %970 : vector<16x128xf32>
    %c114 = arith.constant 114 : index
    %972 = memref.load %arg4[%c114] : memref<254xf32, #tpu.memory_space<smem>>
    %973 = vector.broadcast %972 : f32 to vector<16x128xf32>
    %974 = arith.mulf %954, %973 : vector<16x128xf32>
    %c115 = arith.constant 115 : index
    %975 = memref.load %arg4[%c115] : memref<254xf32, #tpu.memory_space<smem>>
    %976 = vector.broadcast %975 : f32 to vector<16x128xf32>
    %977 = arith.mulf %954, %976 : vector<16x128xf32>
    %c116 = arith.constant 116 : index
    %978 = memref.load %arg4[%c116] : memref<254xf32, #tpu.memory_space<smem>>
    %979 = vector.broadcast %978 : f32 to vector<16x128xf32>
    %980 = arith.mulf %954, %979 : vector<16x128xf32>
    %c117 = arith.constant 117 : index
    %981 = memref.load %arg4[%c117] : memref<254xf32, #tpu.memory_space<smem>>
    %982 = vector.broadcast %981 : f32 to vector<16x128xf32>
    %983 = arith.mulf %954, %982 : vector<16x128xf32>
    %c130 = arith.constant 130 : index
    %984 = memref.load %arg4[%c130] : memref<254xf32, #tpu.memory_space<smem>>
    %985 = vector.broadcast %984 : f32 to vector<16x128xf32>
    %986 = arith.mulf %951, %985 : vector<16x128xf32>
    %c131 = arith.constant 131 : index
    %987 = memref.load %arg4[%c131] : memref<254xf32, #tpu.memory_space<smem>>
    %988 = vector.broadcast %987 : f32 to vector<16x128xf32>
    %989 = arith.mulf %951, %988 : vector<16x128xf32>
    %c132 = arith.constant 132 : index
    %990 = memref.load %arg4[%c132] : memref<254xf32, #tpu.memory_space<smem>>
    %991 = vector.broadcast %990 : f32 to vector<16x128xf32>
    %992 = arith.mulf %951, %991 : vector<16x128xf32>
    %c133 = arith.constant 133 : index
    %993 = memref.load %arg4[%c133] : memref<254xf32, #tpu.memory_space<smem>>
    %994 = vector.broadcast %993 : f32 to vector<16x128xf32>
    %995 = arith.mulf %951, %994 : vector<16x128xf32>
    %c146 = arith.constant 146 : index
    %996 = memref.load %arg4[%c146] : memref<254xf32, #tpu.memory_space<smem>>
    %997 = vector.broadcast %996 : f32 to vector<16x128xf32>
    %998 = arith.mulf %957, %997 : vector<16x128xf32>
    %c147 = arith.constant 147 : index
    %999 = memref.load %arg4[%c147] : memref<254xf32, #tpu.memory_space<smem>>
    %1000 = vector.broadcast %999 : f32 to vector<16x128xf32>
    %1001 = arith.mulf %957, %1000 : vector<16x128xf32>
    %c148 = arith.constant 148 : index
    %1002 = memref.load %arg4[%c148] : memref<254xf32, #tpu.memory_space<smem>>
    %1003 = vector.broadcast %1002 : f32 to vector<16x128xf32>
    %1004 = arith.mulf %957, %1003 : vector<16x128xf32>
    %c149 = arith.constant 149 : index
    %1005 = memref.load %arg4[%c149] : memref<254xf32, #tpu.memory_space<smem>>
    %1006 = vector.broadcast %1005 : f32 to vector<16x128xf32>
    %1007 = arith.mulf %957, %1006 : vector<16x128xf32>
    %c162 = arith.constant 162 : index
    %1008 = memref.load %arg4[%c162] : memref<254xf32, #tpu.memory_space<smem>>
    %1009 = vector.broadcast %1008 : f32 to vector<16x128xf32>
    %1010 = arith.mulf %961, %1009 : vector<16x128xf32>
    %c163 = arith.constant 163 : index
    %1011 = memref.load %arg4[%c163] : memref<254xf32, #tpu.memory_space<smem>>
    %1012 = vector.broadcast %1011 : f32 to vector<16x128xf32>
    %1013 = arith.mulf %961, %1012 : vector<16x128xf32>
    %c164 = arith.constant 164 : index
    %1014 = memref.load %arg4[%c164] : memref<254xf32, #tpu.memory_space<smem>>
    %1015 = vector.broadcast %1014 : f32 to vector<16x128xf32>
    %1016 = arith.mulf %961, %1015 : vector<16x128xf32>
    %c165 = arith.constant 165 : index
    %1017 = memref.load %arg4[%c165] : memref<254xf32, #tpu.memory_space<smem>>
    %1018 = vector.broadcast %1017 : f32 to vector<16x128xf32>
    %1019 = arith.mulf %961, %1018 : vector<16x128xf32>
    %c178 = arith.constant 178 : index
    %1020 = memref.load %arg4[%c178] : memref<254xf32, #tpu.memory_space<smem>>
    %1021 = vector.broadcast %1020 : f32 to vector<16x128xf32>
    %1022 = arith.mulf %958, %1021 : vector<16x128xf32>
    %c179 = arith.constant 179 : index
    %1023 = memref.load %arg4[%c179] : memref<254xf32, #tpu.memory_space<smem>>
    %1024 = vector.broadcast %1023 : f32 to vector<16x128xf32>
    %1025 = arith.mulf %958, %1024 : vector<16x128xf32>
    %c180 = arith.constant 180 : index
    %1026 = memref.load %arg4[%c180] : memref<254xf32, #tpu.memory_space<smem>>
    %1027 = vector.broadcast %1026 : f32 to vector<16x128xf32>
    %1028 = arith.mulf %958, %1027 : vector<16x128xf32>
    %c181 = arith.constant 181 : index
    %1029 = memref.load %arg4[%c181] : memref<254xf32, #tpu.memory_space<smem>>
    %1030 = vector.broadcast %1029 : f32 to vector<16x128xf32>
    %1031 = arith.mulf %958, %1030 : vector<16x128xf32>
    %c194 = arith.constant 194 : index
    %1032 = memref.load %arg4[%c194] : memref<254xf32, #tpu.memory_space<smem>>
    %1033 = vector.broadcast %1032 : f32 to vector<16x128xf32>
    %1034 = arith.mulf %964, %1033 : vector<16x128xf32>
    %c195 = arith.constant 195 : index
    %1035 = memref.load %arg4[%c195] : memref<254xf32, #tpu.memory_space<smem>>
    %1036 = vector.broadcast %1035 : f32 to vector<16x128xf32>
    %1037 = arith.mulf %964, %1036 : vector<16x128xf32>
    %c196 = arith.constant 196 : index
    %1038 = memref.load %arg4[%c196] : memref<254xf32, #tpu.memory_space<smem>>
    %1039 = vector.broadcast %1038 : f32 to vector<16x128xf32>
    %1040 = arith.mulf %964, %1039 : vector<16x128xf32>
    %c197 = arith.constant 197 : index
    %1041 = memref.load %arg4[%c197] : memref<254xf32, #tpu.memory_space<smem>>
    %1042 = vector.broadcast %1041 : f32 to vector<16x128xf32>
    %1043 = arith.mulf %964, %1042 : vector<16x128xf32>
    %c210 = arith.constant 210 : index
    %1044 = memref.load %arg4[%c210] : memref<254xf32, #tpu.memory_space<smem>>
    %1045 = vector.broadcast %1044 : f32 to vector<16x128xf32>
    %1046 = arith.mulf %968, %1045 : vector<16x128xf32>
    %c211 = arith.constant 211 : index
    %1047 = memref.load %arg4[%c211] : memref<254xf32, #tpu.memory_space<smem>>
    %1048 = vector.broadcast %1047 : f32 to vector<16x128xf32>
    %1049 = arith.mulf %968, %1048 : vector<16x128xf32>
    %c212 = arith.constant 212 : index
    %1050 = memref.load %arg4[%c212] : memref<254xf32, #tpu.memory_space<smem>>
    %1051 = vector.broadcast %1050 : f32 to vector<16x128xf32>
    %1052 = arith.mulf %968, %1051 : vector<16x128xf32>
    %c213 = arith.constant 213 : index
    %1053 = memref.load %arg4[%c213] : memref<254xf32, #tpu.memory_space<smem>>
    %1054 = vector.broadcast %1053 : f32 to vector<16x128xf32>
    %1055 = arith.mulf %968, %1054 : vector<16x128xf32>
    %c226 = arith.constant 226 : index
    %1056 = memref.load %arg4[%c226] : memref<254xf32, #tpu.memory_space<smem>>
    %1057 = vector.broadcast %1056 : f32 to vector<16x128xf32>
    %1058 = arith.mulf %965, %1057 : vector<16x128xf32>
    %c227 = arith.constant 227 : index
    %1059 = memref.load %arg4[%c227] : memref<254xf32, #tpu.memory_space<smem>>
    %1060 = vector.broadcast %1059 : f32 to vector<16x128xf32>
    %1061 = arith.mulf %965, %1060 : vector<16x128xf32>
    %c228 = arith.constant 228 : index
    %1062 = memref.load %arg4[%c228] : memref<254xf32, #tpu.memory_space<smem>>
    %1063 = vector.broadcast %1062 : f32 to vector<16x128xf32>
    %1064 = arith.mulf %965, %1063 : vector<16x128xf32>
    %c229 = arith.constant 229 : index
    %1065 = memref.load %arg4[%c229] : memref<254xf32, #tpu.memory_space<smem>>
    %1066 = vector.broadcast %1065 : f32 to vector<16x128xf32>
    %1067 = arith.mulf %965, %1066 : vector<16x128xf32>
    %c242 = arith.constant 242 : index
    %1068 = memref.load %arg4[%c242] : memref<254xf32, #tpu.memory_space<smem>>
    %1069 = vector.broadcast %1068 : f32 to vector<16x128xf32>
    %1070 = arith.mulf %971, %1069 : vector<16x128xf32>
    %c243 = arith.constant 243 : index
    %1071 = memref.load %arg4[%c243] : memref<254xf32, #tpu.memory_space<smem>>
    %1072 = vector.broadcast %1071 : f32 to vector<16x128xf32>
    %1073 = arith.mulf %971, %1072 : vector<16x128xf32>
    %c244 = arith.constant 244 : index
    %1074 = memref.load %arg4[%c244] : memref<254xf32, #tpu.memory_space<smem>>
    %1075 = vector.broadcast %1074 : f32 to vector<16x128xf32>
    %1076 = arith.mulf %971, %1075 : vector<16x128xf32>
    %c245 = arith.constant 245 : index
    %1077 = memref.load %arg4[%c245] : memref<254xf32, #tpu.memory_space<smem>>
    %1078 = vector.broadcast %1077 : f32 to vector<16x128xf32>
    %1079 = arith.mulf %971, %1078 : vector<16x128xf32>
    %1080 = arith.truncf %395 : vector<16x128xf32> to vector<16x128xbf16>
    %1081 = arith.extf %1080 : vector<16x128xbf16> to vector<16x128xf32>
    %1082 = arith.subf %395, %1081 : vector<16x128xf32>
    %cst_185 = arith.constant dense<0.000000e+00> : vector<16x128xf32>
    %1083 = tpu.matmul %35, %1081, %cst_185 {dimension_numbers = #tpu.dot_dimension_numbers<[1], [0], [0], [1], [0, 0, 1, 1], [], []>} : vector<16x16xf32>, vector<16x128xf32>, vector<16x128xf32> -> vector<16x128xf32>
    %cst_186 = arith.constant dense<0.000000e+00> : vector<16x128xf32>
    %1084 = tpu.matmul %35, %1082, %cst_186 {dimension_numbers = #tpu.dot_dimension_numbers<[1], [0], [0], [1], [0, 0, 1, 1], [], []>} : vector<16x16xf32>, vector<16x128xf32>, vector<16x128xf32> -> vector<16x128xf32>
    %cst_187 = arith.constant dense<0.000000e+00> : vector<16x128xf32>
    %1085 = tpu.matmul %43, %1081, %cst_187 {dimension_numbers = #tpu.dot_dimension_numbers<[1], [0], [0], [1], [0, 0, 1, 1], [], []>} : vector<16x16xf32>, vector<16x128xf32>, vector<16x128xf32> -> vector<16x128xf32>
    %cst_188 = arith.constant dense<0.000000e+00> : vector<16x128xf32>
    %1086 = tpu.matmul %43, %1082, %cst_188 {dimension_numbers = #tpu.dot_dimension_numbers<[1], [0], [0], [1], [0, 0, 1, 1], [], []>} : vector<16x16xf32>, vector<16x128xf32>, vector<16x128xf32> -> vector<16x128xf32>
    %1087 = arith.addf %1083, %1084 : vector<16x128xf32>
    %cst_189 = arith.constant dense<0.000000e+00> : vector<16x128xf32>
    %1088 = tpu.matmul %1083, %51, %cst_189 {dimension_numbers = #tpu.dot_dimension_numbers<[1], [0], [0], [1], [0, 0, 1, 1], [], []>} : vector<16x128xf32>, vector<128x128xf32>, vector<16x128xf32> -> vector<16x128xf32>
    %cst_190 = arith.constant dense<0.000000e+00> : vector<16x128xf32>
    %1089 = tpu.matmul %1084, %51, %cst_190 {dimension_numbers = #tpu.dot_dimension_numbers<[1], [0], [0], [1], [0, 0, 1, 1], [], []>} : vector<16x128xf32>, vector<128x128xf32>, vector<16x128xf32> -> vector<16x128xf32>
    %1090 = arith.addf %1088, %1089 : vector<16x128xf32>
    %cst_191 = arith.constant dense<0.000000e+00> : vector<16x128xf32>
    %1091 = tpu.matmul %1083, %59, %cst_191 {dimension_numbers = #tpu.dot_dimension_numbers<[1], [0], [0], [1], [0, 0, 1, 1], [], []>} : vector<16x128xf32>, vector<128x128xf32>, vector<16x128xf32> -> vector<16x128xf32>
    %cst_192 = arith.constant dense<0.000000e+00> : vector<16x128xf32>
    %1092 = tpu.matmul %1084, %59, %cst_192 {dimension_numbers = #tpu.dot_dimension_numbers<[1], [0], [0], [1], [0, 0, 1, 1], [], []>} : vector<16x128xf32>, vector<128x128xf32>, vector<16x128xf32> -> vector<16x128xf32>
    %1093 = arith.addf %1091, %1092 : vector<16x128xf32>
    %1094 = arith.addf %1081, %1082 : vector<16x128xf32>
    %cst_193 = arith.constant dense<0.000000e+00> : vector<16x128xf32>
    %1095 = tpu.matmul %1081, %51, %cst_193 {dimension_numbers = #tpu.dot_dimension_numbers<[1], [0], [0], [1], [0, 0, 1, 1], [], []>} : vector<16x128xf32>, vector<128x128xf32>, vector<16x128xf32> -> vector<16x128xf32>
    %cst_194 = arith.constant dense<0.000000e+00> : vector<16x128xf32>
    %1096 = tpu.matmul %1082, %51, %cst_194 {dimension_numbers = #tpu.dot_dimension_numbers<[1], [0], [0], [1], [0, 0, 1, 1], [], []>} : vector<16x128xf32>, vector<128x128xf32>, vector<16x128xf32> -> vector<16x128xf32>
    %1097 = arith.addf %1095, %1096 : vector<16x128xf32>
    %cst_195 = arith.constant dense<0.000000e+00> : vector<16x128xf32>
    %1098 = tpu.matmul %1081, %59, %cst_195 {dimension_numbers = #tpu.dot_dimension_numbers<[1], [0], [0], [1], [0, 0, 1, 1], [], []>} : vector<16x128xf32>, vector<128x128xf32>, vector<16x128xf32> -> vector<16x128xf32>
    %cst_196 = arith.constant dense<0.000000e+00> : vector<16x128xf32>
    %1099 = tpu.matmul %1082, %59, %cst_196 {dimension_numbers = #tpu.dot_dimension_numbers<[1], [0], [0], [1], [0, 0, 1, 1], [], []>} : vector<16x128xf32>, vector<128x128xf32>, vector<16x128xf32> -> vector<16x128xf32>
    %1100 = arith.addf %1098, %1099 : vector<16x128xf32>
    %1101 = arith.addf %1085, %1086 : vector<16x128xf32>
    %cst_197 = arith.constant dense<0.000000e+00> : vector<16x128xf32>
    %1102 = tpu.matmul %1085, %51, %cst_197 {dimension_numbers = #tpu.dot_dimension_numbers<[1], [0], [0], [1], [0, 0, 1, 1], [], []>} : vector<16x128xf32>, vector<128x128xf32>, vector<16x128xf32> -> vector<16x128xf32>
    %cst_198 = arith.constant dense<0.000000e+00> : vector<16x128xf32>
    %1103 = tpu.matmul %1086, %51, %cst_198 {dimension_numbers = #tpu.dot_dimension_numbers<[1], [0], [0], [1], [0, 0, 1, 1], [], []>} : vector<16x128xf32>, vector<128x128xf32>, vector<16x128xf32> -> vector<16x128xf32>
    %1104 = arith.addf %1102, %1103 : vector<16x128xf32>
    %cst_199 = arith.constant dense<0.000000e+00> : vector<16x128xf32>
    %1105 = tpu.matmul %1085, %59, %cst_199 {dimension_numbers = #tpu.dot_dimension_numbers<[1], [0], [0], [1], [0, 0, 1, 1], [], []>} : vector<16x128xf32>, vector<128x128xf32>, vector<16x128xf32> -> vector<16x128xf32>
    %cst_200 = arith.constant dense<0.000000e+00> : vector<16x128xf32>
    %1106 = tpu.matmul %1086, %59, %cst_200 {dimension_numbers = #tpu.dot_dimension_numbers<[1], [0], [0], [1], [0, 0, 1, 1], [], []>} : vector<16x128xf32>, vector<128x128xf32>, vector<16x128xf32> -> vector<16x128xf32>
    %1107 = arith.addf %1105, %1106 : vector<16x128xf32>
    %c118 = arith.constant 118 : index
    %1108 = memref.load %arg4[%c118] : memref<254xf32, #tpu.memory_space<smem>>
    %1109 = vector.broadcast %1108 : f32 to vector<16x128xf32>
    %1110 = arith.mulf %1090, %1109 : vector<16x128xf32>
    %c119 = arith.constant 119 : index
    %1111 = memref.load %arg4[%c119] : memref<254xf32, #tpu.memory_space<smem>>
    %1112 = vector.broadcast %1111 : f32 to vector<16x128xf32>
    %1113 = arith.mulf %1090, %1112 : vector<16x128xf32>
    %c120 = arith.constant 120 : index
    %1114 = memref.load %arg4[%c120] : memref<254xf32, #tpu.memory_space<smem>>
    %1115 = vector.broadcast %1114 : f32 to vector<16x128xf32>
    %1116 = arith.mulf %1090, %1115 : vector<16x128xf32>
    %c121 = arith.constant 121 : index
    %1117 = memref.load %arg4[%c121] : memref<254xf32, #tpu.memory_space<smem>>
    %1118 = vector.broadcast %1117 : f32 to vector<16x128xf32>
    %1119 = arith.mulf %1090, %1118 : vector<16x128xf32>
    %c134 = arith.constant 134 : index
    %1120 = memref.load %arg4[%c134] : memref<254xf32, #tpu.memory_space<smem>>
    %1121 = vector.broadcast %1120 : f32 to vector<16x128xf32>
    %1122 = arith.mulf %1087, %1121 : vector<16x128xf32>
    %c135 = arith.constant 135 : index
    %1123 = memref.load %arg4[%c135] : memref<254xf32, #tpu.memory_space<smem>>
    %1124 = vector.broadcast %1123 : f32 to vector<16x128xf32>
    %1125 = arith.mulf %1087, %1124 : vector<16x128xf32>
    %c136 = arith.constant 136 : index
    %1126 = memref.load %arg4[%c136] : memref<254xf32, #tpu.memory_space<smem>>
    %1127 = vector.broadcast %1126 : f32 to vector<16x128xf32>
    %1128 = arith.mulf %1087, %1127 : vector<16x128xf32>
    %c137 = arith.constant 137 : index
    %1129 = memref.load %arg4[%c137] : memref<254xf32, #tpu.memory_space<smem>>
    %1130 = vector.broadcast %1129 : f32 to vector<16x128xf32>
    %1131 = arith.mulf %1087, %1130 : vector<16x128xf32>
    %c150 = arith.constant 150 : index
    %1132 = memref.load %arg4[%c150] : memref<254xf32, #tpu.memory_space<smem>>
    %1133 = vector.broadcast %1132 : f32 to vector<16x128xf32>
    %1134 = arith.mulf %1093, %1133 : vector<16x128xf32>
    %c151 = arith.constant 151 : index
    %1135 = memref.load %arg4[%c151] : memref<254xf32, #tpu.memory_space<smem>>
    %1136 = vector.broadcast %1135 : f32 to vector<16x128xf32>
    %1137 = arith.mulf %1093, %1136 : vector<16x128xf32>
    %c152 = arith.constant 152 : index
    %1138 = memref.load %arg4[%c152] : memref<254xf32, #tpu.memory_space<smem>>
    %1139 = vector.broadcast %1138 : f32 to vector<16x128xf32>
    %1140 = arith.mulf %1093, %1139 : vector<16x128xf32>
    %c153 = arith.constant 153 : index
    %1141 = memref.load %arg4[%c153] : memref<254xf32, #tpu.memory_space<smem>>
    %1142 = vector.broadcast %1141 : f32 to vector<16x128xf32>
    %1143 = arith.mulf %1093, %1142 : vector<16x128xf32>
    %c166 = arith.constant 166 : index
    %1144 = memref.load %arg4[%c166] : memref<254xf32, #tpu.memory_space<smem>>
    %1145 = vector.broadcast %1144 : f32 to vector<16x128xf32>
    %1146 = arith.mulf %1097, %1145 : vector<16x128xf32>
    %c167 = arith.constant 167 : index
    %1147 = memref.load %arg4[%c167] : memref<254xf32, #tpu.memory_space<smem>>
    %1148 = vector.broadcast %1147 : f32 to vector<16x128xf32>
    %1149 = arith.mulf %1097, %1148 : vector<16x128xf32>
    %c168 = arith.constant 168 : index
    %1150 = memref.load %arg4[%c168] : memref<254xf32, #tpu.memory_space<smem>>
    %1151 = vector.broadcast %1150 : f32 to vector<16x128xf32>
    %1152 = arith.mulf %1097, %1151 : vector<16x128xf32>
    %c169 = arith.constant 169 : index
    %1153 = memref.load %arg4[%c169] : memref<254xf32, #tpu.memory_space<smem>>
    %1154 = vector.broadcast %1153 : f32 to vector<16x128xf32>
    %1155 = arith.mulf %1097, %1154 : vector<16x128xf32>
    %c182 = arith.constant 182 : index
    %1156 = memref.load %arg4[%c182] : memref<254xf32, #tpu.memory_space<smem>>
    %1157 = vector.broadcast %1156 : f32 to vector<16x128xf32>
    %1158 = arith.mulf %1094, %1157 : vector<16x128xf32>
    %c183 = arith.constant 183 : index
    %1159 = memref.load %arg4[%c183] : memref<254xf32, #tpu.memory_space<smem>>
    %1160 = vector.broadcast %1159 : f32 to vector<16x128xf32>
    %1161 = arith.mulf %1094, %1160 : vector<16x128xf32>
    %c184 = arith.constant 184 : index
    %1162 = memref.load %arg4[%c184] : memref<254xf32, #tpu.memory_space<smem>>
    %1163 = vector.broadcast %1162 : f32 to vector<16x128xf32>
    %1164 = arith.mulf %1094, %1163 : vector<16x128xf32>
    %c185 = arith.constant 185 : index
    %1165 = memref.load %arg4[%c185] : memref<254xf32, #tpu.memory_space<smem>>
    %1166 = vector.broadcast %1165 : f32 to vector<16x128xf32>
    %1167 = arith.mulf %1094, %1166 : vector<16x128xf32>
    %c198 = arith.constant 198 : index
    %1168 = memref.load %arg4[%c198] : memref<254xf32, #tpu.memory_space<smem>>
    %1169 = vector.broadcast %1168 : f32 to vector<16x128xf32>
    %1170 = arith.mulf %1100, %1169 : vector<16x128xf32>
    %c199 = arith.constant 199 : index
    %1171 = memref.load %arg4[%c199] : memref<254xf32, #tpu.memory_space<smem>>
    %1172 = vector.broadcast %1171 : f32 to vector<16x128xf32>
    %1173 = arith.mulf %1100, %1172 : vector<16x128xf32>
    %c200 = arith.constant 200 : index
    %1174 = memref.load %arg4[%c200] : memref<254xf32, #tpu.memory_space<smem>>
    %1175 = vector.broadcast %1174 : f32 to vector<16x128xf32>
    %1176 = arith.mulf %1100, %1175 : vector<16x128xf32>
    %c201 = arith.constant 201 : index
    %1177 = memref.load %arg4[%c201] : memref<254xf32, #tpu.memory_space<smem>>
    %1178 = vector.broadcast %1177 : f32 to vector<16x128xf32>
    %1179 = arith.mulf %1100, %1178 : vector<16x128xf32>
    %c214 = arith.constant 214 : index
    %1180 = memref.load %arg4[%c214] : memref<254xf32, #tpu.memory_space<smem>>
    %1181 = vector.broadcast %1180 : f32 to vector<16x128xf32>
    %1182 = arith.mulf %1104, %1181 : vector<16x128xf32>
    %c215 = arith.constant 215 : index
    %1183 = memref.load %arg4[%c215] : memref<254xf32, #tpu.memory_space<smem>>
    %1184 = vector.broadcast %1183 : f32 to vector<16x128xf32>
    %1185 = arith.mulf %1104, %1184 : vector<16x128xf32>
    %c216 = arith.constant 216 : index
    %1186 = memref.load %arg4[%c216] : memref<254xf32, #tpu.memory_space<smem>>
    %1187 = vector.broadcast %1186 : f32 to vector<16x128xf32>
    %1188 = arith.mulf %1104, %1187 : vector<16x128xf32>
    %c217 = arith.constant 217 : index
    %1189 = memref.load %arg4[%c217] : memref<254xf32, #tpu.memory_space<smem>>
    %1190 = vector.broadcast %1189 : f32 to vector<16x128xf32>
    %1191 = arith.mulf %1104, %1190 : vector<16x128xf32>
    %c230 = arith.constant 230 : index
    %1192 = memref.load %arg4[%c230] : memref<254xf32, #tpu.memory_space<smem>>
    %1193 = vector.broadcast %1192 : f32 to vector<16x128xf32>
    %1194 = arith.mulf %1101, %1193 : vector<16x128xf32>
    %c231 = arith.constant 231 : index
    %1195 = memref.load %arg4[%c231] : memref<254xf32, #tpu.memory_space<smem>>
    %1196 = vector.broadcast %1195 : f32 to vector<16x128xf32>
    %1197 = arith.mulf %1101, %1196 : vector<16x128xf32>
    %c232 = arith.constant 232 : index
    %1198 = memref.load %arg4[%c232] : memref<254xf32, #tpu.memory_space<smem>>
    %1199 = vector.broadcast %1198 : f32 to vector<16x128xf32>
    %1200 = arith.mulf %1101, %1199 : vector<16x128xf32>
    %c233 = arith.constant 233 : index
    %1201 = memref.load %arg4[%c233] : memref<254xf32, #tpu.memory_space<smem>>
    %1202 = vector.broadcast %1201 : f32 to vector<16x128xf32>
    %1203 = arith.mulf %1101, %1202 : vector<16x128xf32>
    %c246 = arith.constant 246 : index
    %1204 = memref.load %arg4[%c246] : memref<254xf32, #tpu.memory_space<smem>>
    %1205 = vector.broadcast %1204 : f32 to vector<16x128xf32>
    %1206 = arith.mulf %1107, %1205 : vector<16x128xf32>
    %c247 = arith.constant 247 : index
    %1207 = memref.load %arg4[%c247] : memref<254xf32, #tpu.memory_space<smem>>
    %1208 = vector.broadcast %1207 : f32 to vector<16x128xf32>
    %1209 = arith.mulf %1107, %1208 : vector<16x128xf32>
    %c248 = arith.constant 248 : index
    %1210 = memref.load %arg4[%c248] : memref<254xf32, #tpu.memory_space<smem>>
    %1211 = vector.broadcast %1210 : f32 to vector<16x128xf32>
    %1212 = arith.mulf %1107, %1211 : vector<16x128xf32>
    %c249 = arith.constant 249 : index
    %1213 = memref.load %arg4[%c249] : memref<254xf32, #tpu.memory_space<smem>>
    %1214 = vector.broadcast %1213 : f32 to vector<16x128xf32>
    %1215 = arith.mulf %1107, %1214 : vector<16x128xf32>
    %1216 = arith.addf %974, %986 : vector<16x128xf32>
    %1217 = arith.addf %998, %1010 : vector<16x128xf32>
    %1218 = arith.addf %1022, %1034 : vector<16x128xf32>
    %1219 = arith.addf %1046, %1058 : vector<16x128xf32>
    %1220 = arith.addf %1070, %1110 : vector<16x128xf32>
    %1221 = arith.addf %1122, %1134 : vector<16x128xf32>
    %1222 = arith.addf %1146, %1158 : vector<16x128xf32>
    %1223 = arith.addf %1170, %1182 : vector<16x128xf32>
    %1224 = arith.addf %1194, %1206 : vector<16x128xf32>
    %1225 = arith.addf %1216, %1217 : vector<16x128xf32>
    %1226 = arith.addf %1218, %1219 : vector<16x128xf32>
    %1227 = arith.addf %1220, %1221 : vector<16x128xf32>
    %1228 = arith.addf %1222, %1223 : vector<16x128xf32>
    %1229 = arith.addf %1225, %1226 : vector<16x128xf32>
    %1230 = arith.addf %1227, %1228 : vector<16x128xf32>
    %1231 = arith.addf %1229, %1230 : vector<16x128xf32>
    %1232 = arith.addf %1231, %1224 : vector<16x128xf32>
    %1233 = arith.addf %977, %989 : vector<16x128xf32>
    %1234 = arith.addf %1001, %1013 : vector<16x128xf32>
    %1235 = arith.addf %1025, %1037 : vector<16x128xf32>
    %1236 = arith.addf %1049, %1061 : vector<16x128xf32>
    %1237 = arith.addf %1073, %1113 : vector<16x128xf32>
    %1238 = arith.addf %1125, %1137 : vector<16x128xf32>
    %1239 = arith.addf %1149, %1161 : vector<16x128xf32>
    %1240 = arith.addf %1173, %1185 : vector<16x128xf32>
    %1241 = arith.addf %1197, %1209 : vector<16x128xf32>
    %1242 = arith.addf %1233, %1234 : vector<16x128xf32>
    %1243 = arith.addf %1235, %1236 : vector<16x128xf32>
    %1244 = arith.addf %1237, %1238 : vector<16x128xf32>
    %1245 = arith.addf %1239, %1240 : vector<16x128xf32>
    %1246 = arith.addf %1242, %1243 : vector<16x128xf32>
    %1247 = arith.addf %1244, %1245 : vector<16x128xf32>
    %1248 = arith.addf %1246, %1247 : vector<16x128xf32>
    %1249 = arith.addf %1248, %1241 : vector<16x128xf32>
    %1250 = arith.addf %980, %992 : vector<16x128xf32>
    %1251 = arith.addf %1004, %1016 : vector<16x128xf32>
    %1252 = arith.addf %1028, %1040 : vector<16x128xf32>
    %1253 = arith.addf %1052, %1064 : vector<16x128xf32>
    %1254 = arith.addf %1076, %1116 : vector<16x128xf32>
    %1255 = arith.addf %1128, %1140 : vector<16x128xf32>
    %1256 = arith.addf %1152, %1164 : vector<16x128xf32>
    %1257 = arith.addf %1176, %1188 : vector<16x128xf32>
    %1258 = arith.addf %1200, %1212 : vector<16x128xf32>
    %1259 = arith.addf %1250, %1251 : vector<16x128xf32>
    %1260 = arith.addf %1252, %1253 : vector<16x128xf32>
    %1261 = arith.addf %1254, %1255 : vector<16x128xf32>
    %1262 = arith.addf %1256, %1257 : vector<16x128xf32>
    %1263 = arith.addf %1259, %1260 : vector<16x128xf32>
    %1264 = arith.addf %1261, %1262 : vector<16x128xf32>
    %1265 = arith.addf %1263, %1264 : vector<16x128xf32>
    %1266 = arith.addf %1265, %1258 : vector<16x128xf32>
    %1267 = arith.addf %983, %995 : vector<16x128xf32>
    %1268 = arith.addf %1007, %1019 : vector<16x128xf32>
    %1269 = arith.addf %1031, %1043 : vector<16x128xf32>
    %1270 = arith.addf %1055, %1067 : vector<16x128xf32>
    %1271 = arith.addf %1079, %1119 : vector<16x128xf32>
    %1272 = arith.addf %1131, %1143 : vector<16x128xf32>
    %1273 = arith.addf %1155, %1167 : vector<16x128xf32>
    %1274 = arith.addf %1179, %1191 : vector<16x128xf32>
    %1275 = arith.addf %1203, %1215 : vector<16x128xf32>
    %1276 = arith.addf %1267, %1268 : vector<16x128xf32>
    %1277 = arith.addf %1269, %1270 : vector<16x128xf32>
    %1278 = arith.addf %1271, %1272 : vector<16x128xf32>
    %1279 = arith.addf %1273, %1274 : vector<16x128xf32>
    %1280 = arith.addf %1276, %1277 : vector<16x128xf32>
    %1281 = arith.addf %1278, %1279 : vector<16x128xf32>
    %1282 = arith.addf %1280, %1281 : vector<16x128xf32>
    %1283 = arith.addf %1282, %1275 : vector<16x128xf32>
    %1284 = arith.addf %892, %1232 : vector<16x128xf32>
    %c250 = arith.constant 250 : index
    %1285 = memref.load %arg4[%c250] : memref<254xf32, #tpu.memory_space<smem>>
    %1286 = vector.broadcast %1285 : f32 to vector<16x128xf32>
    %1287 = arith.addf %1284, %1286 : vector<16x128xf32>
    %cst_201 = arith.constant 0.000000e+00 : f32
    %1288 = vector.broadcast %cst_201 : f32 to vector<16x128xf32>
    %1289 = arith.maximumf %1287, %1288 : vector<16x128xf32>
    %c0_202 = arith.constant 0 : index
    %c0_203 = arith.constant 0 : index
    %c0_204 = arith.constant 0 : index
    %c0_205 = arith.constant 0 : index
    %1290 = vector.load %arg5[%c0_202, %c0_203, %c0_204, %c0_205] : memref<1x4x16x128xf32, #tpu.memory_space<vmem>>, vector<1x1x16x128xf32>
    %1291 = vector.shape_cast %1290 : vector<1x1x16x128xf32> to vector<16x128xf32>
    %1292 = vector.shape_cast %1289 : vector<16x128xf32> to vector<1x1x16x128xf32>
    tpu.vector_store %arg5[%c0_202, %c0_203, %c0_204, %c0_205], %1292 {strides = array<i32>} : memref<1x4x16x128xf32, #tpu.memory_space<vmem>>, vector<1x1x16x128xf32>,
    %1293 = arith.addf %909, %1249 : vector<16x128xf32>
    %c251 = arith.constant 251 : index
    %1294 = memref.load %arg4[%c251] : memref<254xf32, #tpu.memory_space<smem>>
    %1295 = vector.broadcast %1294 : f32 to vector<16x128xf32>
    %1296 = arith.addf %1293, %1295 : vector<16x128xf32>
    %cst_206 = arith.constant 0.000000e+00 : f32
    %1297 = vector.broadcast %cst_206 : f32 to vector<16x128xf32>
    %1298 = arith.maximumf %1296, %1297 : vector<16x128xf32>
    %c0_207 = arith.constant 0 : index
    %c1_208 = arith.constant 1 : index
    %c0_209 = arith.constant 0 : index
    %c0_210 = arith.constant 0 : index
    %1299 = vector.load %arg5[%c0_207, %c1_208, %c0_209, %c0_210] : memref<1x4x16x128xf32, #tpu.memory_space<vmem>>, vector<1x1x16x128xf32>
    %1300 = vector.shape_cast %1299 : vector<1x1x16x128xf32> to vector<16x128xf32>
    %1301 = vector.shape_cast %1298 : vector<16x128xf32> to vector<1x1x16x128xf32>
    tpu.vector_store %arg5[%c0_207, %c1_208, %c0_209, %c0_210], %1301 {strides = array<i32>} : memref<1x4x16x128xf32, #tpu.memory_space<vmem>>, vector<1x1x16x128xf32>,
    %1302 = arith.addf %926, %1266 : vector<16x128xf32>
    %c252 = arith.constant 252 : index
    %1303 = memref.load %arg4[%c252] : memref<254xf32, #tpu.memory_space<smem>>
    %1304 = vector.broadcast %1303 : f32 to vector<16x128xf32>
    %1305 = arith.addf %1302, %1304 : vector<16x128xf32>
    %cst_211 = arith.constant 0.000000e+00 : f32
    %1306 = vector.broadcast %cst_211 : f32 to vector<16x128xf32>
    %1307 = arith.maximumf %1305, %1306 : vector<16x128xf32>
    %c0_212 = arith.constant 0 : index
    %c2_213 = arith.constant 2 : index
    %c0_214 = arith.constant 0 : index
    %c0_215 = arith.constant 0 : index
    %1308 = vector.load %arg5[%c0_212, %c2_213, %c0_214, %c0_215] : memref<1x4x16x128xf32, #tpu.memory_space<vmem>>, vector<1x1x16x128xf32>
    %1309 = vector.shape_cast %1308 : vector<1x1x16x128xf32> to vector<16x128xf32>
    %1310 = vector.shape_cast %1307 : vector<16x128xf32> to vector<1x1x16x128xf32>
    tpu.vector_store %arg5[%c0_212, %c2_213, %c0_214, %c0_215], %1310 {strides = array<i32>} : memref<1x4x16x128xf32, #tpu.memory_space<vmem>>, vector<1x1x16x128xf32>,
    %1311 = arith.addf %943, %1283 : vector<16x128xf32>
    %c253 = arith.constant 253 : index
    %1312 = memref.load %arg4[%c253] : memref<254xf32, #tpu.memory_space<smem>>
    %1313 = vector.broadcast %1312 : f32 to vector<16x128xf32>
    %1314 = arith.addf %1311, %1313 : vector<16x128xf32>
    %cst_216 = arith.constant 0.000000e+00 : f32
    %1315 = vector.broadcast %cst_216 : f32 to vector<16x128xf32>
    %1316 = arith.maximumf %1314, %1315 : vector<16x128xf32>
    %c0_217 = arith.constant 0 : index
    %c3_218 = arith.constant 3 : index
    %c0_219 = arith.constant 0 : index
    %c0_220 = arith.constant 0 : index
    %1317 = vector.load %arg5[%c0_217, %c3_218, %c0_219, %c0_220] : memref<1x4x16x128xf32, #tpu.memory_space<vmem>>, vector<1x1x16x128xf32>
    %1318 = vector.shape_cast %1317 : vector<1x1x16x128xf32> to vector<16x128xf32>
    %1319 = vector.shape_cast %1316 : vector<16x128xf32> to vector<1x1x16x128xf32>
    tpu.vector_store %arg5[%c0_217, %c3_218, %c0_219, %c0_220], %1319 {strides = array<i32>} : memref<1x4x16x128xf32, #tpu.memory_space<vmem>>, vector<1x1x16x128xf32>,
    return
  }
  func.func @transform_0(%arg0: i32) -> (i32, i32, i32, i32) {
    %c0_i32 = arith.constant 0 : i32
    %c0_i32_0 = arith.constant 0 : i32
    %c0_i32_1 = arith.constant 0 : i32
    %c0_i32_2 = arith.constant 0 : i32
    return %arg0, %c0_i32, %c0_i32_0, %c0_i32_1 : i32, i32, i32, i32
  }
  func.func @transform_1(%arg0: i32) -> (i32, i32, i32, i32) {
    %c0_i32 = arith.constant 0 : i32
    %c0_i32_0 = arith.constant 0 : i32
    %c0_i32_1 = arith.constant 0 : i32
    %c0_i32_2 = arith.constant 0 : i32
    return %arg0, %c0_i32, %c0_i32_0, %c0_i32_1 : i32, i32, i32, i32
  }
  func.func @transform_2(%arg0: i32) -> (i32, i32, i32, i32) {
    %c0_i32 = arith.constant 0 : i32
    %c0_i32_0 = arith.constant 0 : i32
    %c0_i32_1 = arith.constant 0 : i32
    %c0_i32_2 = arith.constant 0 : i32
    return %arg0, %c0_i32, %c0_i32_0, %c0_i32_1 : i32, i32, i32, i32
  }
  func.func @transform_3(%arg0: i32) -> i32 {
    %c0_i32 = arith.constant 0 : i32
    %c0_i32_0 = arith.constant 0 : i32
    return %c0_i32 : i32
  }
  func.func @transform_4(%arg0: i32) -> (i32, i32, i32, i32) {
    %c0_i32 = arith.constant 0 : i32
    %c0_i32_0 = arith.constant 0 : i32
    %c0_i32_1 = arith.constant 0 : i32
    %c0_i32_2 = arith.constant 0 : i32
    return %arg0, %c0_i32, %c0_i32_0, %c0_i32_1 : i32, i32, i32, i32
  }
}

</mosaic_0001>

<bundles_post_ra>
// kernel: decoder_edge_block_forward.1
= control target key start
LH: loop header
LB: loop body
LE: loop exit
PB: predicated region body
PF: predicated region fallthrough
CT: control target
= control target key end

     0   :  { %s25366_s0 = inlined_call_operand.vmem [shape: f32[2,8,8,64], index: 0, kind: input, shape index: {}]   ;;  %s25367_s1 = inlined_call_operand.vmem [shape: f32[2,4,16,128], index: 1, kind: input, shape index: {}]   ;;  %s25368_s2 = inlined_call_operand.hbm [shape: f32[2,4,16,128], index: 2, kind: input, shape index: {}]   ;;  %s25369_s3 = inlined_call_operand.vmem [shape: f32[254], index: 3, kind: input, shape index: {}]   ;;  %s25370_s4 = inlined_call_operand.hbm [shape: f32[2,4,16,128], index: 4, kind: output, shape index: {}]  }
   0x1   :  { %25522 = sst [smem:[#allocation50_spill]] %s25366_s0 }
   0x2   :  { %25523 = sst [smem:[#allocation51_spill]] %s25367_s1 }
   0x3   :  { %25524 = sst [smem:[#allocation52_spill]] %s25368_s2 }
   0x4   :  { %25525 = sst [smem:[#allocation53_spill]] %s25369_s3 }
   0x5   :  { %9 = vsyncpa [#allocation3], 0 }
   0x6   :  { %11 = vsyncpa [#allocation3 + $0x1], 0 }
   0x7   :  { %12 = vsyncpa [#allocation5], 0 }
   0x8   :  { %13 = vsyncpa [#allocation4], 0 }
   0x9   :  { %15 = vsyncpa [#allocation4 + $0x1], 0  ;;  %s19386_s15 = smov 0   ;;  %s19388_s16 = smov 0  }
   0xa   :  { %s19390_s17 = smov 0   ;;  %s19392_s18 = smov 0  }
   0xb LB: > { %25526 = sst [smem:[#allocation11_spill]] %s19346_s17  ;;  %s19407_s19 = sadd.s32 4294967295, %s19350_s18   ;;  %s19350_s18 = sphi %s19392_s18, %s25878_s18   ;;  %s19346_s17 = sphi %s19390_s17, %s25875_s17   ;;  %s19342_s16 = sphi %s19388_s16, %s25877_s16   ;;  %s19338_s15 = sphi %s19386_s15, %s25876_s15  }
   0xc   : > { %s10587_s20 = sadd.s32 4294967294, %s19350_s18   ;;  %s19411_s21 = sadd.s32 1, %s19350_s18  }
   0xd   : > { %s80_s22 = sadd.s32 1, %s19346_s17  ;;  %s77_s23 = ssub.s32 %s19350_s18, %s19411_s21 }
   0xe   : > { %p87_p0 = scmp.ne.s32.totalorder %s19346_s17, %s19342_s16  ;;  %p78_p1 = scmp.eq.s32.totalorder %s77_s23, 0 }
   0xf   : > { %p88_p2 = scmp.eq.s32.totalorder %s19350_s18, 0  ;;  %p93_p3 = scmp.ne.s32.totalorder %s19342_s16, %s19338_s15 }
  0x10   : > { %p25372_p4 = scmp.eq.s32.totalorder %s19407_s19, 0  ;;  %p138_p7 = scmp.eq.s32.totalorder %s19407_s19, 1 }
  0x11   : > { %s19423_s24 = scalar_select %p78_p1, %s19346_s17, %s80_s22  }
  0x12   : > { %p19425_p5 = por %p88_p2, %p87_p0  ;;  %p19431_p6 = por %p25372_p4, %p93_p3 }
  0x13   : > { %25527 = sst [smem:[#allocation12_spill]] %s19423_s24  ;;  %p144_p8 = scmp.eq.s32.totalorder %s10587_s20, 1 }
  0x14   : > { %s25529_s26 = scalar_select %p19431_p6, 1, 0 }
  0x15   : > { %p10588_p9 = scmp.ge.s32.totalorder %s19350_s18, 1  ;;  %p151_p10 = scmp.lt.s32.totalorder %s19350_s18, 3 }
  0x16   : > { %p19438_p11 = por %p138_p7, %p87_p0  ;;  %p19442_p12 = por %p144_p8, %p93_p3 }
  0x17   : > { %p19446_p13 = pnand %p10588_p9, %p151_p10  ;;  %s25533_s3 = sld [smem:[#allocation53_spill]] }
  0x18   : > { %s25530_s27 = scalar_select %p19438_p11, 1, 0 }
  0x19   : > { %s25531_s28 = scalar_select %p19442_p12, 1, 0 }
  0x1a   : > { %p19180_p1 = pneg %p19446_p13  ;;  %p19193_p2 = scmp.lt.s32.totalorder %s19350_s18, 2 }
  0x1b   : > { %s191_s8 = sand.u32 1, %s19346_s17  }
  0x1c   : > { %p19459_p7 = pnand %p19180_p1, %p25372_p4  ;;  %p19466_p3 = pnand %p19193_p2, %p19425_p5 }
  0x1d   : > { %s164_s6 = sshll.u32 %s25533_s3, 4  ;;  %s10591_s10 = sshll.u32 %s191_s8, 6  ;;  %s165_s6 = int_to_ptr.vmem [resolvable:$true] %s164_s6 }
  0x1e   : > { %s19235_s11 = scalar_lea.vmem %s165_s6, 32  ;;  %p19237_p9 = pneg %p19459_p7 }
  0x1f   : > { %p19236_p8 = scmp.ne.s32.totalorder %s165_s6, %s19235_s11  ;;  %p19243_p12 = scmp.lt.s32.totalorder %s165_s6, %s165_s6 }
  0x20   : > { %p19244_p11 = scmp.lt.s32.totalorder %s19235_s11, %s19235_s11 }
  0x21   : > { %p19238_p10 = pnand %p19237_p9, %p19236_p8 }
  0x22   : > { %p19245_p1 = por %p19244_p11, %p19243_p12 }
  0x23   : > { %p19239_p0 = pneg %p19238_p10 }
  0x25   : > { %p19246_p4 = pnand %p19245_p1, %p19239_p0 }
  0x27   : > { %19249 = shalt.err (!%p19246_p4)
}
  0x28   : > { %s19352_s12 = smov [#allocation6]   ;;  %s12184_s13 = sshll.u32 %s19350_s18, 10 }
  0x29   : > { %19183 = dma.vmem_to_smem (!%p19459_p7), %s165_s6, 32, %s19352_s12, [#allocation5]  }
  0x2a   : > { %s195_s14 = scalar_lea.vmem [#allocation2], %s10591_s10  ;;  %s25536_s2 = sld [smem:[#allocation52_spill]] }
  0x2b   : > { %s202_s20 = sshll.u32 %s195_s14, 4  ;;  %s19482_s30 = scalar_lea.sflag [#allocation3], %s191_s8  ;;  %s19480_s20 = int_to_ptr.vmem [resolvable:$true] %s202_s20 }
  0x2c   : > { %p19252_p5 = pneg %p19466_p3 }
  0x30   : > { %s19478_s25 = scalar_lea.hbm %s25536_s2, %s12184_s13  ;;  %s19255_s10 = scalar_lea.hbm %s25536_s2, 2048 }
  0x31   : > { %s19250_s5 = scalar_lea.hbm %s19478_s25, 1024  ;;  %p19256_p0 = scmp.lt.u32.totalorder %s19478_s25, %s25536_s2 }
  0x32   : > { %p19251_p4 = scmp.ne.s32.totalorder %s19478_s25, %s19250_s5  ;;  %p19257_p2 = scmp.lt.u32.totalorder %s19255_s10, %s19250_s5 }
  0x33   : > { %p19259_p8 = scmp.lt.u32.totalorder %s19250_s5, %s19478_s25 }
  0x34   : > { %p19253_p11 = pnand %p19252_p5, %p19251_p4  ;;  %p19258_p7 = por %p19257_p2, %p19256_p0 }
  0x36   : > { %p19254_p12 = pneg %p19253_p11  ;;  %p19260_p9 = por %p19259_p8, %p19258_p7 }
  0x38   : > { %p19261_p10 = pnand %p19260_p9, %p19254_p12 }
  0x3a   : > { %19264 = shalt.err (!%p19261_p10)
}
  0x3b   : > { %s19265_s8 = scalar_lea.vmem %s19480_s20, 1024  ;;  %s19353_s13 = smov [#allocation2]  }
  0x3c   : > { %p19266_p1 = scmp.ne.s32.totalorder %s19480_s20, %s19265_s8  ;;  %s19270_s14 = sshll.u32 %s19353_s13, 4  ;;  %s19271_s14 = int_to_ptr.vmem [resolvable:$false] %s19270_s14 }
  0x3d   : > { %s19272_s22 = scalar_lea.vmem %s19271_s14, 2048  ;;  %p19273_p6 = scmp.lt.s32.totalorder %s19480_s20, %s19271_s14 }
  0x3e   : > { %p19268_p4 = pnand %p19266_p1, %p19252_p5  ;;  %p19274_p0 = scmp.lt.s32.totalorder %s19272_s22, %s19265_s8 }
  0x40   : > { %p19269_p11 = pneg %p19268_p4  ;;  %p19275_p2 = por %p19274_p0, %p19273_p6 }
  0x42   : > { %p19276_p7 = pnand %p19275_p2, %p19269_p11 }
  0x44   : > { %19279 = shalt.err (!%p19276_p7)
}
  0x45   : > { %s19354_s23 = smov 128   ;;  %s19355_s5 = smov 8  }
  0x46   : > { %19187 = dma.hbm_to_vmem [thread:$0]  (!%p19466_p3), %s19478_s25, 1024, %s19480_s20, %s19482_s30, %s19354_s23, %s19354_s23, %s19355_s5  }
  0x47   : > { %214 = sbr.rel (%p19446_p13) target bundleno = 3362 (0xd22), region = 36 }
  0x4e   : > { %s19513_s6 = sand.u32 1, %s19342_s16   ;;  %p25537_p6 = scmp.ne.s32.totalorder %s25529_s26, 0 }
  0x4f   : > { %s25449_s7 = sshll.u32 %s19513_s6, 6  ;;  %s217_s10 = scalar_lea.sflag [#allocation3], %s19513_s6 }
  0x50   : > { %s19519_s11 = scalar_lea.vmem [#allocation2], %s25449_s7 }
  0x51   : > { %19325 = dma.done.wait (%p25537_p6), %s217_s10, 1024  }
  0x52   : > { %19327 = vsyncadd (%p25537_p6), %s217_s10, 4294966272  ;;  %p25538_p3 = scmp.eq.s32.totalorder %s19407_s19, 0 }
  0x54   : > { %19329 = dma.done.wait (%p25538_p3), [#allocation5], 32   ;;  %p25539_p13 = pmov %p25538_p3 }
  0x56   : > { %19331 = vsyncadd (%p25539_p13), [#allocation5], 4294967264 }
  0x57   : > { %229 = sfence }
  0x58   : > { %p260_p5 = scmp.lt.s32.totalorder %s19407_s19, 1  ;;  %s19530_s29 = sld [smem:[#allocation6]]  ;;  %v270_v0 = vlaneseq  ;;  %vm25374_vm0 = vcmask 64512   ;;  %v19356_v20 = vmov 0.0   ;;  %v25549_v62 = vmov 0 }
  0x59   : > { %s19532_s9 = sld [smem:[#allocation6 + $0x4]]  ;;  %s19534_s20 = sld [smem:[#allocation6 + $0x8]] }
  0x5a   : > { %s19537_s25 = scalar_select %p260_p5, %s19407_s19, 1  ;;  %v19539_v1 = vshrl.u32 %v270_v0, 7  ;;  %v19541_v2 = vand.u32 127, %v270_v0  ;;  %v25552_v0 = vmov 0 }
  0x5b   : > { %s19543_s26 = sld [smem:[#allocation6 + $0xc]]  ;;  %s19545_s30 = sld [smem:[#allocation6 + $0x10]] }
  0x5c   : > { %s12185_s12 = sshll.u32 %s19537_s25, 6  ;;  %s19548_s8 = sld [smem:[#allocation6 + $0x14]]  ;;  %v19551_v3 = vadd.s32 8, %v19539_v1  ;;  %v19554_v4 = vmul.u32 2, %v19541_v2  ;;  %v10602_v5 = vadd.s32 4294967295, %v19539_v1  ;;  %v345_v6 = vadd.s32 1, %v19539_v1 }
  0x5d   : > { %s25540_s0 = sld [smem:[#allocation50_spill]]  ;;  %s19564_s23 = sld [smem:[#allocation6 + $0x18]]  ;;  %v19568_v7 = vadd.s32 64, %v19539_v1  ;;  %v19571_v8 = vadd.s32 72, %v19539_v1  ;;  %v19574_v9 = vadd.s32 80, %v19539_v1  ;;  %v354_v47 = vadd.s32 88, %v19539_v1 }
  0x5e   : > { %v463_v13 = vstv %s19530_s29  ;;  %s19586_s5 = sld [smem:[#allocation6 + $0x1c]]  ;;  %vm276_vm1 = vcmp.eq.s32.totalorder %v19539_v1, %v19554_v4  ;;  %v19591_v14 = vadd.s32 1, %v19554_v4  ;;  %vm341_vm2 = vcmp.eq.s32.totalorder %v19541_v2, %v10602_v5  ;;  %s19614_s10 = sld [smem:[#allocation6 + $0x1]] }
  0x5f   : > { %v466_v18 = vstv %s19532_s9  ;;  %v10603_v19 = vadd.s32 4294967295, %v19551_v3  ;;  %v19604_v21 = vsel %vm341_vm2, 1.0, %v19356_v20  ;;  %v469_v24 = vstv %s19534_s20  ;;  %s19626_s29 = sld [smem:[#allocation6 + $0x5]]  ;;  %s19628_s9 = sld [smem:[#allocation6 + $0x9]] }
  0x60   : > { %25541 = vst [vmem:[#allocation13_spill] sm:$0xff] %v19604_v21  ;;  %vm279_vm3 = vcmp.eq.s32.totalorder %v19539_v1, %v19591_v14  ;;  %v346_v25 = vadd.s32 1, %v19551_v3  ;;  %vm347_vm6 = vcmp.eq.s32.totalorder %v19541_v2, %v345_v6  ;;  %v19661_v48 = vadd.s32 96, %v19539_v1  ;;  %s19682_s20 = sld [smem:[#allocation6 + $0xd]]  ;;  %s10705_s14 = sld [smem:[#allocation6 + $0x2]] }
  0x61   : > { %v472_v28 = vstv %s19543_s26  ;;  %v475_v29 = vstv %s19545_s30  ;;  %vm281_vm4 = vmor %vm276_vm1, %vm279_vm3  ;;  %vm342_vm5 = vcmp.eq.s32.totalorder %v19541_v2, %v10603_v19  ;;  %v19654_v44 = vsel %vm347_vm6, 1.0, %v19356_v20  ;;  %s19687_s26 = sld [smem:[#allocation6 + $0x11]]  ;;  %s19689_s30 = sld [smem:[#allocation6 + $0x15]] }
  0x62   : > { %v478_v33 = vstv %s19548_s8  ;;  %v19639_v37 = vsel %vm281_vm4, 1.0, %v19356_v20  ;;  %v19642_v38 = vsel %vm342_vm5, 1.0, %v19356_v20  ;;  %vm348_vm7 = vcmp.eq.s32.totalorder %v19541_v2, %v346_v25  ;;  %25543 = vst [vmem:[#allocation15_spill] sm:$0xff] %v19654_v44  ;;  %s19703_s8 = sld [smem:[#allocation6 + $0x19]]  ;;  %s19705_s13 = sld [smem:[#allocation6 + $0x1d]] }
  0x63   : > { %s19562_s22 = scalar_lea.vmem %s25540_s0, %s12185_s12  ;;  %v481_v36 = vstv %s19564_s23  ;;  %25542 = vst [vmem:[#allocation14_spill] sm:$0xff] %v19642_v38  ;;  %13691 = vmatprep.mubr.msk.f32.mxu1 %vm25374_vm0, %v19639_v37  ;;  %13686 = vmatprep.mubr.msk.f32.mxu0 %vm25374_vm0, %v19639_v37  ;;  %v19657_v46 = vsel %vm348_vm7, 1.0, %v19356_v20  ;;  %v19664_v50 = vadd.s32 104, %v19539_v1  ;;  %v19667_v51 = vadd.s32 112, %v19539_v1  ;;  %s10707_s23 = sld [smem:[#allocation6 + $0xa]] }
  0x64   : > { %v19577_v10 = vld [vmem:[%s19562_s22] sm:$0xff]  ;;  %v19580_v11 = vld [vmem:[%s19562_s22 + $0x8] sm:$0xff]  ;;  %v19583_v12 = vld [vmem:[%s19562_s22 + $0x10] sm:$0xff]  ;;  %v484_v40 = vstv %s19586_s5  ;;  %25544 = vst [vmem:[#allocation16_spill] sm:$0xff] %v19657_v46  ;;  %v19670_v52 = vadd.s32 120, %v19539_v1  ;;  %v19673_v53 = vadd.s32 4294967295, %v19541_v2  ;;  %vm277_vm8 = vcmp.eq.s32.totalorder %v19551_v3, %v19554_v4 }
  0x65   : > { %v19595_v15 = vld [vmem:[%s19562_s22 + $0x18] sm:$0xff]  ;;  %v19598_v16 = vld [vmem:[%s19562_s22 + $0x20] sm:$0xff]  ;;  %v464_v17 = vmul.f32 %v463_v13, %v19577_v10  ;;  %v19607_v22 = vld [vmem:[%s19562_s22 + $0x28] sm:$0xff]  ;;  %v467_v23 = vmul.f32 %v19580_v11, %v466_v18  ;;  %v470_v27 = vmul.f32 %v19583_v12, %v469_v24  ;;  %v19676_v54 = vadd.s32 1, %v19541_v2  ;;  %s10708_s5 = sld [smem:[#allocation6 + $0xe]]  ;;  %s25641_s1 = sld [smem:[#allocation51_spill]] }
  0x66   : > { %v19617_v26 = vld [vmem:[%s19562_s22 + $0x30] sm:$0xff]  ;;  %v19631_v30 = vld [vmem:[%s19562_s22 + $0x38] sm:$0xff]  ;;  %v473_v31 = vmul.f32 %v19595_v15, %v472_v28  ;;  %v476_v32 = vmul.f32 %v19598_v16, %v475_v29  ;;  %v479_v35 = vmul.f32 %v19607_v22, %v478_v33  ;;  %vm280_vm9 = vcmp.eq.s32.totalorder %v19551_v3, %v19591_v14  ;;  %s10706_s22 = sld [smem:[#allocation6 + $0x6]]  ;;  %s20250_s25 = sld [smem:[#allocation6 + $0x3c]] }
  0x67   : > { %v486_v34 = vadd.f32 %v467_v23, %v464_v17  ;;  %v482_v39 = vmul.f32 %v19617_v26, %v481_v36  ;;  %v485_v42 = vmul.f32 %v19631_v30, %v484_v40  ;;  %v871_v56 = vstv %s19614_s10  ;;  %vm19699_vm14 = vmor %vm277_vm8, %vm280_vm9  ;;  %s10709_s10 = sld [smem:[#allocation6 + $0x12]]  ;;  %s22751_s7 = sld [smem:[#allocation6 + $0xcd]] }
  0x68   : > { %v487_v41 = vadd.f32 %v473_v31, %v470_v27  ;;  %v488_v43 = vadd.f32 %v479_v35, %v476_v32  ;;  %v874_v57 = vstv %s19626_s29  ;;  %v877_v58 = vstv %s19628_s9  ;;  %s10710_s29 = sld [smem:[#allocation6 + $0x16]]  ;;  %s10711_s9 = sld [smem:[#allocation6 + $0x1a]] }
  0x69   : > { %v489_v49 = vadd.f32 %v485_v42, %v482_v39  ;;  %vm360_vm10 = vcmp.eq.s32.totalorder %v19539_v1, %v19673_v53  ;;  %vm361_vm11 = vcmp.eq.s32.totalorder %v19551_v3, %v19673_v53  ;;  %vm368_vm12 = vcmp.eq.s32.totalorder %v19568_v7, %v19673_v53  ;;  %s23582_s0 = sld [smem:[#allocation6 + $0xce]]  ;;  %s23588_s2 = sld [smem:[#allocation6 + $0xd1]] }
  0x6a   : > { %v490_v45 = vadd.f32 %v487_v41, %v486_v34  ;;  %vm369_vm13 = vcmp.eq.s32.totalorder %v19571_v8, %v19673_v53  ;;  %vm370_vm15 = vcmp.eq.s32.totalorder %v19574_v9, %v19673_v53  ;;  %vm371_vm1 = vcmp.eq.s32.totalorder %v354_v47, %v19673_v53  ;;  %vm19712_vm3 = vmpackc.low %vm361_vm11, %vm360_vm10  ;;  %s25168_s3 = sld [smem:[#allocation6 + $0xd9]]  ;;  %s25170_s24 = sld [smem:[#allocation6 + $0xf6]] }
  0x6b   : > { %v491_v55 = vadd.f32 %v489_v49, %v488_v43  ;;  %vm372_vm2 = vcmp.eq.s32.totalorder %v19661_v48, %v19673_v53  ;;  %vm373_vm4 = vcmp.eq.s32.totalorder %v19664_v50, %v19673_v53  ;;  %vm374_vm5 = vcmp.eq.s32.totalorder %v19667_v51, %v19673_v53  ;;  %vm19724_vm8 = vmpackc.low %vm369_vm13, %vm368_vm12  ;;  %s25172_s17 = sld [smem:[#allocation6 + $0xf7]]  ;;  %p25871_p8 = scmp.ne.s32.totalorder %s25530_s27, 0 }
  0x6c   : > { %vm375_vm6 = vcmp.eq.s32.totalorder %v19670_v52, %v19673_v53  ;;  %v25550_v62 = vsel %vm19724_vm8, 4294967295, %v25549_v62  ;;  %vm394_vm9 = vcmp.eq.s32.totalorder %v19551_v3, %v19676_v54  ;;  %vm402_vm11 = vcmp.eq.s32.totalorder %v19571_v8, %v19676_v54  ;;  %vm19734_vm0 = vmpackc.low %vm371_vm1, %vm370_vm15 }
  0x6d   : > { %v492_v60 = vadd.f32 %v491_v55, %v490_v45  ;;  %25551 = vst [vmem:[#allocation17_spill] sm:$0xff] %v25550_v62  ;;  %v25553_v0 = vsel %vm19734_vm0, 4294967295, %v25552_v0  ;;  %vm403_vm12 = vcmp.eq.s32.totalorder %v19574_v9, %v19676_v54  ;;  %vm405_vm7 = vcmp.eq.s32.totalorder %v19661_v48, %v19676_v54  ;;  %vm19748_vm15 = vmpackc.low %vm373_vm4, %vm372_vm2 }
  0x6e   : > { %25554 = vst [vmem:[#allocation18_spill] sm:$0xff] %v25553_v0  ;;  %v25555_v4 = vmov 0  ;;  %vm407_vm1 = vcmp.eq.s32.totalorder %v19667_v51, %v19676_v54  ;;  %vm408_vm13 = vcmp.eq.s32.totalorder %v19670_v52, %v19676_v54  ;;  %vm19762_vm10 = vmpackc.low %vm375_vm6, %vm374_vm5  ;;  %v25558_v6 = vmov 0 }
  0x6f   : > { %v493_v63 = vpack.c.bf16 %v492_v60, %v492_v60  ;;  %v25556_v4 = vsel %vm19748_vm15, 4294967295, %v25555_v4  ;;  %v25559_v6 = vsel %vm19762_vm10, 4294967295, %v25558_v6  ;;  %v19769_v13 = vsel %vm19699_vm14, 1.0, %v19356_v20 }
  0x70   : > { %25557 = vst [vmem:[#allocation19_spill] sm:$0xff] %v25556_v4  ;;  %25560 = vst [vmem:[#allocation20_spill] sm:$0xff] %v25559_v6  ;;  %vm25561_vm2 = vcmp.eq.s32.totalorder %v19539_v1, %v19676_v54  ;;  %v25562_v14 = vmov 0  ;;  %v872_v17 = vmul.f32 %v871_v56, %v19577_v10  ;;  %v875_v18 = vmul.f32 %v19580_v11, %v874_v57 }
  0x71   : > { %v494_v5 = vunpack.c.l.bf16 %v493_v63  ;;  %vm19774_vm4 = vmpackc.low %vm394_vm9, %vm25561_vm2  ;;  %v878_v19 = vmul.f32 %v19583_v12, %v877_v58  ;;  %v880_v23 = vstv %s19682_s20  ;;  %vm25564_vm14 = vcmp.eq.s32.totalorder %v19568_v7, %v19676_v54  ;;  %s10712_s20 = sld [smem:[#allocation6 + $0x1e]] }
  0x72   : > { %v25563_v14 = vsel %vm19774_vm4, 4294967295, %v25562_v14  ;;  %vm19788_vm5 = vmpackc.low %vm402_vm11, %vm25564_vm14  ;;  %v25565_v20 = vmov 0  ;;  %v881_v25 = vmul.f32 %v19595_v15, %v880_v23  ;;  %v883_v27 = vstv %s19687_s26  ;;  %s20043_s26 = sld [smem:[#allocation6 + $0x3]] }
  0x73   : > { %v495_v24 = vsub.f32 %v492_v60, %v494_v5  ;;  %v25566_v20 = vsel %vm19788_vm5, 4294967295, %v25565_v20  ;;  %v886_v28 = vstv %s19689_s30  ;;  %13684 = vmatprep.subr.mxu0 %v494_v5  ;;  %vm25568_vm6 = vcmp.eq.s32.totalorder %v354_v47, %v19676_v54  ;;  %s20045_s30 = sld [smem:[#allocation6 + $0x7]] }
  0x74   : > { %25567 = vst [vmem:[#allocation21_spill] sm:$0xff] %v25566_v20  ;;  %vm19800_vm9 = vmpackc.low %vm25568_vm6, %vm403_vm12  ;;  %v25569_v29 = vmov 0  ;;  %v884_v7 = vmul.f32 %v19598_v16, %v883_v27  ;;  %v887_v8 = vmul.f32 %v19607_v22, %v886_v28  ;;  %v889_v31 = vstv %s19703_s8  ;;  %13685 = vmatpush3.msra.mxu0 %v494_v5  ;;  %s20047_s8 = sld [smem:[#allocation6 + $0xb]] }
  0x75   : > { %v25570_v29 = vsel %vm19800_vm9, 4294967295, %v25569_v29  ;;  %v892_v32 = vstv %s19705_s13  ;;  %13689 = vmatprep.subr.mxu1 %v495_v24  ;;  %vm25572_vm11 = vcmp.eq.s32.totalorder %v19664_v50, %v19676_v54  ;;  %v25573_v9 = vmov 0  ;;  %vm19826_vm12 = vmpackc.low %vm408_vm13, %vm407_vm1  ;;  %s20049_s13 = sld [smem:[#allocation6 + $0xf]] }
  0x76   : > { %25571 = vst [vmem:[#allocation22_spill] sm:$0xff] %v25570_v29  ;;  %vm19814_vm2 = vmpackc.low %vm25572_vm11, %vm405_vm7  ;;  %v890_v33 = vmul.f32 %v19617_v26, %v889_v31  ;;  %v893_v34 = vmul.f32 %v19631_v30, %v892_v32  ;;  %v894_v35 = vadd.f32 %v875_v18, %v872_v17  ;;  %v895_v36 = vadd.f32 %v881_v25, %v878_v19 }
  0x77   : > { %v25574_v9 = vsel %vm19814_vm2, 4294967295, %v25573_v9  ;;  %13690 = vmatpush3.msra.mxu1 %v495_v24  ;;  %v25576_v39 = vmov 0  ;;  %v896_v40 = vadd.f32 %v887_v8, %v884_v7  ;;  %vm25579_vm7 = vcmask 64512  }
  0x78   : > { %25575 = vst [vmem:[#allocation23_spill] sm:$0xff] %v25574_v9  ;;  %v25577_v39 = vsel %vm19826_vm12, 4294967295, %v25576_v39  ;;  %13687 = vmatmul.mubr.msk.f32.vlgmr.msra.gmra.mrb[0].mxu0 %vm25579_vm7, %v19769_v13  ;;  %v291_v41 = vmul.u32 2, %v19539_v1  ;;  %v292_v42 = vmul.u32 2, %v19551_v3  ;;  %v285_v43 = vadd.s32 16, %v19539_v1  ;;  %vm25580_vm14 = vmmov %vm25579_vm7 }
  0x79   : > { %25578 = vst [vmem:[#allocation24_spill] sm:$0xff] %v25577_v39  ;;  %13692 = vmatmul.mubr.msk.f32.vlgmr.msra.gmra.mrb[0].mxu1 %vm25580_vm14, %v19769_v13  ;;  %v897_v45 = vadd.f32 %v893_v34, %v890_v33  ;;  %v898_v47 = vadd.f32 %v895_v36, %v894_v35  ;;  %v286_v48 = vadd.s32 24, %v19539_v1  ;;  %v19839_v49 = vadd.s32 32, %v19539_v1  ;;  %vm25581_vm13 = vmmov %vm25579_vm7 }
  0x7a   : > { %13734 = vmatprep.mubr.msk.f32.mxu1 %vm25581_vm13, %v19639_v37  ;;  %vm299_vm1 = vcmp.eq.s32.totalorder %v19541_v2, %v291_v41  ;;  %vm19845_vm6 = vcmp.eq.s32.totalorder %v19541_v2, %v292_v42  ;;  %v307_v50 = vadd.s32 1, %v291_v41  ;;  %v308_v51 = vadd.s32 1, %v292_v42 }
  0x7b   : > { %v899_v52 = vadd.f32 %v897_v45, %v896_v40  ;;  %v293_v55 = vmul.u32 2, %v285_v43  ;;  %v294_v56 = vmul.u32 2, %v286_v48  ;;  %v288_v5 = vadd.s32 40, %v19539_v1 }
  0x7c   : > { %vm315_vm7 = vcmp.eq.s32.totalorder %v19541_v2, %v307_v50  ;;  %vm316_vm14 = vcmp.eq.s32.totalorder %v19541_v2, %v308_v51  ;;  %v295_v17 = vmul.u32 2, %v19839_v49  ;;  %v25385_v23 = vmov 1.0|1.0  }
  0x7d   : > { %v900_v57 = vadd.f32 %v899_v52, %v898_v47  ;;  %vm323_vm2 = vmor %vm299_vm1, %vm315_vm7  ;;  %vm19855_vm10 = vcmp.eq.s32.totalorder %v19541_v2, %v293_v55  ;;  %vm19860_vm9 = vcmp.eq.s32.totalorder %v19541_v2, %v294_v56  ;;  %v309_v60 = vadd.s32 1, %v293_v55 }
  0x7e   : > { %vm324_vm11 = vmor %vm19845_vm6, %vm316_vm14  ;;  %v310_v63 = vadd.s32 1, %v294_v56  ;;  %v296_v24 = vmul.u32 2, %v288_v5  ;;  %v311_v27 = vadd.s32 1, %v295_v17  ;;  %v289_v7 = vadd.s32 48, %v19539_v1 }
  0x7f   : > { %v901_v18 = vpack.c.bf16 %v900_v57, %v900_v57  ;;  %vm19869_vm1 = vmpackc.low %vm324_vm11, %vm323_vm2  ;;  %vm317_vm7 = vcmp.eq.s32.totalorder %v19541_v2, %v309_v60  ;;  %vm19885_vm11 = vcmp.eq.s32.totalorder %v19541_v2, %v295_v17  ;;  %v290_v33 = vadd.s32 56, %v19539_v1 }
  0x80   : > { %16565 = vmatprep.subr.msk.bf16.mxu0 %vm19869_vm1, %v25385_v23  ;;  %vm318_vm14 = vcmp.eq.s32.totalorder %v19541_v2, %v310_v63  ;;  %vm325_vm2 = vmor %vm19855_vm10, %vm317_vm7  ;;  %vm19902_vm7 = vcmp.eq.s32.totalorder %v19541_v2, %v296_v24  ;;  %v312_v32 = vadd.s32 1, %v296_v24  ;;  %v25598_v35 = vmov 0  ;;  %v25659_v19 = vld [vmem:[#allocation24_spill] sm:$0xff] }
  0x81   : > { %v902_v28 = vunpack.c.l.bf16 %v901_v18  ;;  %16567 = vmatpush3.bf16.msk.msra.mxu0 %vm19869_vm1, %v25385_v23  ;;  %vm326_vm6 = vmor %vm19860_vm9, %vm318_vm14  ;;  %vm25596_vm9 = vcmp.eq.s32.totalorder %v285_v43, %v19673_v53  ;;  %v297_v36 = vmul.u32 2, %v289_v7  ;;  %vm25601_vm12 = vcmp.eq.s32.totalorder %v285_v43, %v19676_v54 }
  0x82   : > { %vm19897_vm10 = vmpackc.low %vm326_vm6, %vm325_vm2  ;;  %vm25597_vm6 = vcmp.eq.s32.totalorder %v286_v48, %v19673_v53  ;;  %vm25602_vm15 = vcmp.eq.s32.totalorder %v286_v48, %v19676_v54  ;;  %v25603_v1 = vmov 0  ;;  %vm320_vm0 = vcmp.eq.s32.totalorder %v19541_v2, %v312_v32 }
  0x83   : > { %13732 = vmatprep.subr.mxu1 %v902_v28  ;;  %v903_v34 = vsub.f32 %v900_v57, %v902_v28  ;;  %16569 = vmatprep.subr.msk.bf16.mxu0 %vm19897_vm10, %v25385_v23  ;;  %vm19915_vm14 = vmpackc.low %vm25597_vm6, %vm25596_vm9  ;;  %v298_v40 = vmul.u32 2, %v290_v33  ;;  %v313_v41 = vadd.s32 1, %v297_v36  ;;  %v25613_v45 = vmov 0 }
  0x84   : > { %v25599_v35 = vsel %vm19915_vm14, 4294967295, %v25598_v35  ;;  %13733 = vmatpush3.msra.mxu1 %v902_v28  ;;  %vm19925_vm5 = vmpackc.low %vm25602_vm15, %vm25601_vm12  ;;  %vm25616_vm6 = vcmask 64512   ;;  %vm25617_vm9 = vcmp.eq.s32.totalorder %v19839_v49, %v19676_v54  ;;  %v25619_v47 = vmov 0 }
  0x85   : > { %25600 = vst [vmem:[#allocation25_spill] sm:$0xff] %v25599_v35  ;;  %v25604_v1 = vsel %vm19925_vm5, 4294967295, %v25603_v1  ;;  %vm25606_vm2 = vmmov %vm25581_vm13  ;;  %13737 = vmatprep.subr.mxu1 %v903_v34  ;;  %vm25607_vm13 = vcmp.eq.s32.totalorder %v19541_v2, %v311_v27  ;;  %v314_v42 = vadd.s32 1, %v298_v40  ;;  %16571 = vmatpush3.bf16.msk.msra.mxu0 %vm19897_vm10, %v25385_v23  ;;  %vm25618_vm5 = vcmp.eq.s32.totalorder %v288_v5, %v19676_v54 }
  0x86   : > { %25605 = vst [vmem:[#allocation26_spill] sm:$0xff] %v25604_v1  ;;  %13735 = vmatmul.mubr.msk.f32.vlgmr.msra.gmra.mrb[2].mxu1 %vm25606_vm2, %v19769_v13  ;;  %vm327_vm8 = vmor %vm19885_vm11, %vm25607_vm13  ;;  %vm305_vm13 = vcmp.eq.s32.totalorder %v19541_v2, %v297_v36  ;;  %vm321_vm11 = vcmp.eq.s32.totalorder %v19541_v2, %v313_v41  ;;  %v25626_v48 = vmov 0  ;;  %v1277_v3 = vstv %s10707_s23  ;;  %s20053_s23 = sld [smem:[#allocation6 + $0x1b]] }
  0x87   : > { %13738 = vmatpush3.msra.mxu1 %v903_v34  ;;  %vm25608_vm15 = vmmov %vm25606_vm2  ;;  %v1280_v50 = vstv %s10708_s5  ;;  %v1283_v51 = vstv %s10709_s10  ;;  %v1286_v52 = vstv %s10710_s29  ;;  %v1289_v55 = vstv %s10711_s9  ;;  %s20055_s5 = sld [smem:[#allocation6 + $0x1f]]  ;;  %s20192_s10 = sld [smem:[#allocation6 + $0x2c]] }
  0x88   : > { %13739 = vmatprep.mubr.msk.f32.mxu1 %vm25608_vm15, %v19639_v37  ;;  %vm328_vm12 = vmor %vm19902_vm7, %vm320_vm0  ;;  %16597 = vmatprep.subr.msk.bf16.mxu1 %vm19869_vm1, %v25385_v23  ;;  %vm25611_vm0 = vcmp.eq.s32.totalorder %v19839_v49, %v19673_v53  ;;  %vm306_vm15 = vcmp.eq.s32.totalorder %v19541_v2, %v298_v40  ;;  %v25631_v49 = vmov 0  ;;  %v1292_v56 = vstv %s10712_s20  ;;  %s20194_s29 = sld [smem:[#allocation6 + $0x30]]  ;;  %s20196_s9 = sld [smem:[#allocation6 + $0x34]] }
  0x89   : > { %vm19945_vm2 = vmpackc.low %vm328_vm12, %vm327_vm8  ;;  %vm25612_vm8 = vcmp.eq.s32.totalorder %v288_v5, %v19673_v53  ;;  %vm322_vm12 = vcmp.eq.s32.totalorder %v19541_v2, %v314_v42  ;;  %v1278_v59 = vmul.f32 %v19583_v12, %v1277_v3  ;;  %v1281_v60 = vmul.f32 %v19595_v15, %v1280_v50  ;;  %s20198_s20 = sld [smem:[#allocation6 + $0x38]] }
  0x8a   : > { %16573 = vmatprep.subr.msk.bf16.mxu0 %vm19945_vm2, %v25385_v23  ;;  %vm19962_vm7 = vmpackc.low %vm25612_vm8, %vm25611_vm0  ;;  %13740 = vmatmul.mubr.msk.f32.vlgmr.msra.gmra.mrb[4].mxu1 %vm25616_vm6, %v19769_v13  ;;  %v1284_v63 = vmul.f32 %v19598_v16, %v1283_v51  ;;  %v1287_v5 = vmul.f32 %v19607_v22, %v1286_v52  ;;  %v1290_v17 = vmul.f32 %v19617_v26, %v1289_v55  ;;  %v1671_v40 = vstv %s20043_s26  ;;  %s20200_s26 = sld [smem:[#allocation6 + $0x20]] }
  0x8b   : > { %v25614_v45 = vsel %vm19962_vm7, 4294967295, %v25613_v45  ;;  %vm19975_vm4 = vmpackc.low %vm25618_vm5, %vm25617_vm9  ;;  %16599 = vmatpush3.bf16.msk.msra.mxu1 %vm19869_vm1, %v25385_v23  ;;  %16575 = vmatpush3.bf16.msk.msra.mxu0 %vm19945_vm2, %v25385_v23  ;;  %vm25624_vm5 = vcmp.eq.s32.totalorder %v289_v7, %v19673_v53  ;;  %vm25625_vm9 = vcmp.eq.s32.totalorder %v290_v33, %v19673_v53  ;;  %v1271_v53 = vstv %s10705_s14  ;;  %s10750_s14 = sld [smem:[#allocation6 + $0x13]] }
  0x8c   : > { %25615 = vst [vmem:[#allocation27_spill] sm:$0xff] %v25614_v45  ;;  %v25620_v47 = vsel %vm19975_vm4, 4294967295, %v25619_v47  ;;  %vm329_vm0 = vmor %vm305_vm13, %vm321_vm11  ;;  %16601 = vmatprep.subr.msk.bf16.mxu1 %vm19897_vm10, %v25385_v23  ;;  %vm25629_vm11 = vcmp.eq.s32.totalorder %v289_v7, %v19676_v54  ;;  %v1272_v57 = vmul.f32 %v1271_v53, %v19577_v10  ;;  %v1293_v18 = vmul.f32 %v19631_v30, %v1292_v56 }
  0x8d   : > { %25621 = vst [vmem:[#allocation28_spill] sm:$0xff] %v25620_v47  ;;  %vm330_vm8 = vmor %vm306_vm15, %vm322_vm12  ;;  %vm25630_vm15 = vcmp.eq.s32.totalorder %v290_v33, %v19676_v54  ;;  %v1274_v54 = vstv %s10706_s22  ;;  %v1295_v25 = vadd.f32 %v1281_v60, %v1278_v59  ;;  %v1296_v27 = vadd.f32 %v1287_v5, %v1284_v63  ;;  %s20051_s22 = sld [smem:[#allocation6 + $0x17]] }
  0x8e   : > { %vm19988_vm6 = vmpackc.low %vm330_vm8, %vm329_vm0  ;;  %v1275_v58 = vmul.f32 %v19580_v11, %v1274_v54  ;;  %v1297_v28 = vadd.f32 %v1293_v18, %v1290_v17  ;;  %vm653_vm0 = vcmask 523264   ;;  %v1674_v41 = vstv %s20045_s30  ;;  %s20202_s30 = sld [smem:[#allocation6 + $0x24]] }
  0x8f   : > { %16577 = vmatprep.subr.msk.bf16.mxu0 %vm19988_vm6, %v25385_v23  ;;  %vm19999_vm13 = vmpackc.low %vm25625_vm9, %vm25624_vm5  ;;  %16603 = vmatpush3.bf16.msk.msra.mxu1 %vm19897_vm10, %v25385_v23  ;;  %v1677_v53 = vstv %s20047_s8  ;;  %v1680_v54 = vstv %s20049_s13  ;;  %v1689_v51 = vstv %s20053_s23  ;;  %v1692_v52 = vstv %s20055_s5  ;;  %s20204_s8 = sld [smem:[#allocation6 + $0x28]]  ;;  %s20279_s23 = sld [smem:[#allocation6 + $0x2d]] }
  0x90   : > { %v25627_v48 = vsel %vm19999_vm13, 4294967295, %v25626_v48  ;;  %vm20007_vm12 = vmpackc.low %vm25630_vm15, %vm25629_vm11  ;;  %16579 = vmatpush3.bf16.msk.msra.mxu0 %vm19988_vm6, %v25385_v23  ;;  %16605 = vmatprep.subr.msk.bf16.mxu1 %vm19945_vm2, %v25385_v23  ;;  %v1294_v24 = vadd.f32 %v1275_v58, %v1272_v57  ;;  %v1299_v36 = vadd.f32 %v1297_v28, %v1296_v27  ;;  %v1672_v55 = vmul.f32 %v1671_v40, %v19577_v10  ;;  %s20281_s5 = sld [smem:[#allocation6 + $0x31]]  ;;  %s10741_s13 = sld [smem:[#allocation6 + $0x32]] }
  0x91   : > { %25628 = vst [vmem:[#allocation29_spill] sm:$0xff] %v25627_v48  ;;  %v25632_v49 = vsel %vm20007_vm12, 4294967295, %v25631_v49  ;;  %16581 = vmatprep.subr.msk.bf16.mxu0 %vm19869_vm1, %v25385_v23  ;;  %v1683_v3 = vstv %s10750_s14  ;;  %v1675_v56 = vmul.f32 %v19580_v11, %v1674_v41  ;;  %v1678_v57 = vmul.f32 %v19583_v12, %v1677_v53  ;;  %s10742_s14 = sld [smem:[#allocation6 + $0x36]] }
  0x92   : > { %25633 = vst [vmem:[#allocation30_spill] sm:$0xff] %v25632_v49  ;;  %v1298_v34 = vadd.f32 %v1295_v25, %v1294_v24  ;;  %v1681_v58 = vmul.f32 %v19595_v15, %v1680_v54  ;;  %v1684_v59 = vmul.f32 %v19598_v16, %v1683_v3  ;;  %v1690_v10 = vmul.f32 %v19617_v26, %v1689_v51  ;;  %v20236_v3 = vld [vmem:[%s19519_s11] sm:$0xff] }
  0x93   : > { %16607 = vmatpush3.bf16.msk.msra.mxu1 %vm19945_vm2, %v25385_v23  ;;  %v1686_v50 = vstv %s20051_s22  ;;  %v1693_v5 = vmul.f32 %v19631_v30, %v1692_v52  ;;  %v1694_v11 = vadd.f32 %v1675_v56, %v1672_v55  ;;  %vm25634_vm8 = vcmask 64512   ;;  %s20211_s22 = scalar_lea.vmem %s25641_s1, %s12185_s12  ;;  %v20242_v51 = vld [vmem:[%s19519_s11 + $0x20] sm:$0xff]  ;;  %s20274_s12 = sld [smem:[#allocation6 + $0x40]] }
  0x94   : > { %16609 = vmatprep.subr.msk.bf16.mxu1 %vm19988_vm6, %v25385_v23  ;;  %v1300_v42 = vadd.f32 %v1299_v36, %v1298_v34  ;;  %v1687_v63 = vmul.f32 %v19607_v22, %v1686_v50  ;;  %v1695_v16 = vadd.f32 %v1681_v58, %v1678_v57  ;;  %vm25635_vm5 = vmmov %vm25634_vm8  ;;  %v20223_v34 = vld [vmem:[%s19519_s11 + $0x28] sm:$0xff]  ;;  %v829_v36 = vstv %s20192_s10  ;;  %v20227_v40 = vld [vmem:[%s20211_s22 + $0x18] sm:$0xff]  ;;  %s20284_s10 = sld [smem:[#allocation6 + $0x35]]  ;;  %s23584_s1 = sld [smem:[#allocation6 + $0xcf]] }
  0x95   : > { %v1697_v24 = vadd.f32 %v1693_v5, %v1690_v10  ;;  %vm25636_vm9 = vmmov %vm25635_vm5  ;;  %25644 = vst [vmem:[#allocation33_spill] sm:$0xff] %v20223_v34  ;;  %v833_v41 = vstv %s20194_s29  ;;  %v841_v53 = vstv %s20198_s20  ;;  %v20233_v54 = vld [vmem:[%s20211_s22 + $0x30] sm:$0xff]  ;;  %v20245_v52 = vld [vmem:[%s20211_s22 + $0x28] sm:$0xff]  ;;  %s20286_s29 = sld [smem:[#allocation6 + $0x39]]  ;;  %s20290_s20 = sld [smem:[#allocation6 + $0x25]] }
  0x96   : > { %v1301_v60 = vpack.c.bf16 %v1300_v42, %v1300_v42  ;;  %v1696_v18 = vadd.f32 %v1687_v63, %v1684_v59  ;;  %v1698_v30 = vadd.f32 %v1695_v16, %v1694_v11  ;;  %vm25637_vm11 = vmmov %vm25635_vm5  ;;  %v20239_v50 = vld [vmem:[%s19519_s11 + $0x10] sm:$0xff]  ;;  %v817_v55 = vstv %s20200_s26  ;;  %v20260_v5 = vld [vmem:[%s20211_s22 + $0x20] sm:$0xff]  ;;  %s20296_s26 = sld [smem:[#allocation6 + $0x29]] }
  0x97   : > { %16611 = vmatpush3.bf16.msk.msra.mxu1 %vm19988_vm6, %v25385_v23  ;;  %vm25638_vm15 = vmmov %vm25635_vm5  ;;  %v821_v56 = vstv %s20202_s30  ;;  %v825_v57 = vstv %s20204_s8  ;;  %v843_v63 = vmul.f32 %v20223_v34, %v841_v53  ;;  %v20257_v10 = vld [vmem:[%s20211_s22 + $0x10] sm:$0xff]  ;;  %v830_v11 = vmul.f32 %v20233_v54, %v829_v36  ;;  %s20337_s30 = sld [smem:[#allocation6 + $0x41]]  ;;  %s10740_s8 = sld [smem:[#allocation6 + $0x2e]] }
  0x98   : > { %16613 = vmatprep.subr.msk.bf16.mxu1 %vm19869_vm1, %v25385_v23  ;;  %v1302_v15 = vunpack.c.l.bf16 %v1301_v60  ;;  %v1699_v25 = vadd.f32 %v1697_v24, %v1696_v18  ;;  %25645 = vst [vmem:[#allocation34_spill] sm:$0xff] %v20257_v10  ;;  %v842_v16 = vmul.f32 %v20242_v51, %v841_v53  ;;  %v823_v18 = vmul.f32 %v20227_v40, %v821_v56 }
  0x99   : > { %v827_v24 = vmul.f32 %v20245_v52, %v825_v57  ;;  %v845_v53 = vstv %s20250_s25  ;;  %s20528_s25 = sld [smem:[#allocation6 + $0x22]]  ;;  %v1633_v43 = vstv %s10741_s13  ;;  %v1637_v2 = vstv %s10742_s14  ;;  %s20580_s13 = sld [smem:[#allocation6 + $0x3f]] }
  0x9a   : > { %v1303_v27 = vsub.f32 %v1300_v42, %v1302_v15  ;;  %v1700_v28 = vadd.f32 %v1699_v25, %v1698_v30  ;;  %v837_v42 = vstv %s20196_s9  ;;  %v826_v30 = vmul.f32 %v20260_v5, %v825_v57  ;;  %s20288_s9 = sld [smem:[#allocation6 + $0x21]]  ;;  %s20625_s14 = sld [smem:[#allocation6 + $0x43]] }
  0x9d   : > { %v1629_v8 = vstv %s10740_s8  ;;  %s20561_s8 = sld [smem:[#allocation6 + $0x2b]] }
 0x14b   : > { %v13688_v7 = vpop.f32.mrb[0].mxu0 }
 0x14c   : > { %v13693_v31 = vpop.f32.mrb[0].mxu1  ;;  %v569_v32 = vpop.f32.mrb[1].mxu0 }
 0x14d   : > { %v644_v33 = vpop.f32.mrb[1].mxu1 }
 0x14e   : > { %13710 = vmatprep.mubr.msk.f32.mxu0 %vm653_vm0, %v644_v33  ;;  %v20220_v33 = vld [vmem:[%s19519_s11 + $0x18] sm:$0xff] }
 0x14f   : > { %13711 = vmatmul.mubr.msk.f32.vlgmr.msra.gmra.mrb[2].mxu0 %vm653_vm0, %v13693_v31  ;;  %25643 = vst [vmem:[#allocation32_spill] sm:$0xff] %v20220_v33  ;;  %v839_v60 = vmul.f32 %v20220_v33, %v837_v42 }
 0x150   : > { %16583 = vmatpush3.bf16.msk.msra.mxu0 %vm19869_vm1, %v25385_v23  ;;  %13729 = vmatprep.mubr.msk.f32.mxu0 %vm653_vm0, %v569_v32 }
 0x151   : > { %16585 = vmatprep.subr.msk.bf16.mxu0 %vm19897_vm10, %v25385_v23 }
 0x154   : > { %16587 = vmatpush3.bf16.msk.msra.mxu0 %vm19897_vm10, %v25385_v23 }
 0x155   : > { %16589 = vmatprep.subr.msk.bf16.mxu0 %vm19945_vm2, %v25385_v23 }
 0x158   : > { %16591 = vmatpush3.bf16.msk.msra.mxu0 %vm19945_vm2, %v25385_v23 }
 0x159   : > { %v13736_v17 = vpop.f32.mrb[2].mxu1  ;;  %16593 = vmatprep.subr.msk.bf16.mxu0 %vm19988_vm6, %v25385_v23 }
 0x15a   : > { %v970_v12 = vpop.f32.mrb[3].mxu1 }
 0x15c   : > { %16595 = vmatpush3.bf16.msk.msra.mxu0 %vm19988_vm6, %v25385_v23 }
 0x15d   : > { %v13741_v22 = vpop.f32.mrb[4].mxu1  ;;  %13780 = vmatprep.subr.mxu0 %v1302_v15 }
 0x15e   : > { %v1045_v26 = vpop.f32.mrb[5].mxu1 }
 0x15f   : > { %13758 = vmatprep.mubr.msk.f32.mxu1 %vm653_vm0, %v1045_v26  ;;  %13730 = vmatmul.mubr.msk.f32.vlgmr.msra.gmra.mrb[2].mxu0 %vm653_vm0, %v13688_v7  ;;  %v1701_v7 = vpack.c.bf16 %v1700_v28, %v1700_v28  ;;  %v822_v26 = vmul.f32 %v20257_v10, %v821_v56 }
 0x160   : > { %13759 = vmatmul.mubr.msk.f32.vlgmr.msra.gmra.mrb[6].mxu1 %vm653_vm0, %v13741_v22  ;;  %13781 = vmatpush3.msra.mxu0 %v1302_v15  ;;  %v838_v15 = vmul.f32 %v20239_v50, %v837_v42  ;;  %v20272_v22 = vld [vmem:[%s20211_s22] sm:$0xff] }
 0x161   : > { %16615 = vmatpush3.bf16.msk.msra.mxu1 %vm19869_vm1, %v25385_v23  ;;  %13782 = vmatprep.mubr.msk.f32.mxu0 %vm25634_vm8, %v19639_v37  ;;  %v1702_v31 = vunpack.c.l.bf16 %v1701_v7  ;;  %vm25639_vm8 = vmmov %vm25635_vm5  ;;  %v818_v7 = vmul.f32 %v817_v55, %v20272_v22  ;;  %v850_v56 = vadd.f32 %v826_v30, %v822_v26  ;;  %v1229_v30 = vstv %s20279_s23  ;;  %s10739_s23 = sld [smem:[#allocation6 + $0x2a]] }
 0x162   : > { %16617 = vmatprep.subr.msk.bf16.mxu1 %vm19897_vm10, %v25385_v23  ;;  %13785 = vmatprep.subr.mxu0 %v1303_v27 }
 0x163   : > { %13777 = vmatprep.mubr.msk.f32.mxu1 %vm653_vm0, %v970_v12  ;;  %13783 = vmatmul.mubr.msk.f32.vlgmr.msra.gmra.mrb[4].mxu0 %vm25635_vm5, %v19769_v13  ;;  %v1703_v32 = vsub.f32 %v1700_v28, %v1702_v31  ;;  %v834_v12 = vmul.f32 %v833_v41, %v20236_v3  ;;  %v855_v28 = vadd.f32 %v843_v63, %v839_v60 }
 0x164   : > { %13786 = vmatpush3.msra.mxu0 %v1303_v27  ;;  %13787 = vmatprep.mubr.msk.f32.mxu0 %vm25636_vm9, %v19639_v37  ;;  %vm25640_vm9 = vmmov %vm25635_vm5 }
 0x165   : > { %16619 = vmatpush3.bf16.msk.msra.mxu1 %vm19897_vm10, %v25385_v23  ;;  %16629 = vmatprep.subr.msk.bf16.mxu0 %vm19869_vm1, %v25385_v23 }
 0x166   : > { %16621 = vmatprep.subr.msk.bf16.mxu1 %vm19945_vm2, %v25385_v23 }
 0x167   : > { %13788 = vmatmul.mubr.msk.f32.vlgmr.msra.gmra.mrb[6].mxu0 %vm25637_vm11, %v19769_v13  ;;  %vm25397_vm11 = vcmask 130048  }
 0x168   : > { %16631 = vmatpush3.bf16.msk.msra.mxu0 %vm19869_vm1, %v25385_v23 }
 0x169   : > { %16623 = vmatpush3.bf16.msk.msra.mxu1 %vm19945_vm2, %v25385_v23  ;;  %16633 = vmatprep.subr.msk.bf16.mxu0 %vm19897_vm10, %v25385_v23 }
 0x16a   : > { %16625 = vmatprep.subr.msk.bf16.mxu1 %vm19988_vm6, %v25385_v23 }
 0x16c   : > { %16635 = vmatpush3.bf16.msk.msra.mxu0 %vm19897_vm10, %v25385_v23 }
 0x16d   : > { %16627 = vmatpush3.bf16.msk.msra.mxu1 %vm19988_vm6, %v25385_v23  ;;  %16637 = vmatprep.subr.msk.bf16.mxu0 %vm19945_vm2, %v25385_v23 }
 0x16e   : > { %13828 = vmatprep.subr.mxu1 %v1702_v31 }
 0x170   : > { %13778 = vmatmul.mubr.msk.f32.vlgmr.msra.gmra.mrb[6].mxu1 %vm653_vm0, %v13736_v17  ;;  %16639 = vmatpush3.bf16.msk.msra.mxu0 %vm19945_vm2, %v25385_v23  ;;  %v20263_v17 = vld [vmem:[%s20211_s22 + $0x8] sm:$0xff] }
 0x171   : > { %13829 = vmatpush3.msra.mxu1 %v1702_v31  ;;  %13830 = vmatprep.mubr.msk.f32.mxu1 %vm25638_vm15, %v19639_v37  ;;  %v819_v25 = vmul.f32 %v817_v55, %v20263_v17  ;;  %v852_v31 = vadd.f32 %v834_v12, %v830_v11  ;;  %vm25655_vm15 = vnez %v25556_v4 }
 0x172   : > { %13833 = vmatprep.subr.mxu1 %v1703_v32  ;;  %16641 = vmatprep.subr.msk.bf16.mxu0 %vm19988_vm6, %v25385_v23 }
 0x174   : > { %13831 = vmatmul.mubr.msk.f32.vlgmr.msra.gmra.mrb[8].mxu1 %vm25639_vm8, %v19769_v13  ;;  %16643 = vmatpush3.bf16.msk.msra.mxu0 %vm19988_vm6, %v25385_v23  ;;  %vm25656_vm8 = vnez %v25570_v29 }
 0x175   : > { %13834 = vmatpush3.msra.mxu1 %v1703_v32  ;;  %13835 = vmatprep.mubr.msk.f32.mxu1 %vm25635_vm5, %v19639_v37  ;;  %v20214_v37 = vld [vmem:[%s19519_s11 + $0x8] sm:$0xff]  ;;  %v854_v32 = vadd.f32 %v842_v16, %v838_v15  ;;  %vm25657_vm5 = vnez %v25559_v6 }
 0x176   : > { %16661 = vmatprep.subr.msk.bf16.mxu1 %vm19869_vm1, %v25385_v23  ;;  %16645 = vmatprep.subr.msk.bf16.mxu0 %vm19869_vm1, %v25385_v23  ;;  %25642 = vst [vmem:[#allocation31_spill] sm:$0xff] %v20214_v37  ;;  %v835_v59 = vmul.f32 %v833_v41, %v20214_v37  ;;  %v20293_v41 = vld [vmem:[%s19519_s11 + $0x38] sm:$0xff] }
 0x177   : > { %v858_v63 = vadd.f32 %v854_v32, %v852_v31  ;;  %v847_v11 = vmul.f32 %v20293_v41, %v845_v53  ;;  %v1217_v31 = vstv %s20288_s9  ;;  %v1221_v32 = vstv %s20290_s20  ;;  %s20549_s9 = sld [smem:[#allocation6 + $0x33]]  ;;  %s20552_s20 = sld [smem:[#allocation6 + $0x37]] }
 0x178   : > { %13836 = vmatmul.mubr.msk.f32.vlgmr.msra.gmra.mrb[10].mxu1 %vm25640_vm9, %v19769_v13  ;;  %v20217_v13 = vld [vmem:[%s20211_s22 + $0x38] sm:$0xff]  ;;  %vm25658_vm9 = vnez %v25574_v9  ;;  %s10743_s22 = sld [smem:[#allocation6 + $0x3a]] }
 0x179   : > { %16663 = vmatpush3.bf16.msk.msra.mxu1 %vm19869_vm1, %v25385_v23  ;;  %v831_v58 = vmul.f32 %v20217_v13, %v829_v36  ;;  %v851_v36 = vadd.f32 %v827_v24, %v823_v18 }
 0x17a   : > { %16665 = vmatprep.subr.msk.bf16.mxu1 %vm19897_vm10, %v25385_v23 }
 0x17b   : > { %v853_v27 = vadd.f32 %v835_v59, %v831_v58  ;;  %v20299_v58 = vld [vmem:[%s19519_s11 + $0x30] sm:$0xff]  ;;  %s20315_s11 = sld [smem:[#allocation6 + $0x3d]] }
 0x17c   : > { %v846_v15 = vmul.f32 %v20299_v58, %v845_v53  ;;  %v1231_v53 = vmul.f32 %v20217_v13, %v1229_v30 }
 0x17d   : > { %16667 = vmatpush3.bf16.msk.msra.mxu1 %vm19897_vm10, %v25385_v23  ;;  %v859_v57 = vadd.f32 %v855_v28, %v853_v27  ;;  %v865_v27 = vstv %s20274_s12  ;;  %s10738_s12 = sld [smem:[#allocation6 + $0x26]] }
 0x17e   : > { %16669 = vmatprep.subr.msk.bf16.mxu1 %vm19945_vm2, %v25385_v23 }
 0x181   : > { %16671 = vmatpush3.bf16.msk.msra.mxu1 %vm19945_vm2, %v25385_v23 }
 0x182   : > { %16673 = vmatprep.subr.msk.bf16.mxu1 %vm19988_vm6, %v25385_v23 }
 0x185   : > { %16675 = vmatpush3.bf16.msk.msra.mxu1 %vm19988_vm6, %v25385_v23 }
 0x186   : > { %16677 = vmatprep.subr.msk.bf16.mxu1 %vm19869_vm1, %v25385_v23 }
 0x232   : > { %v13731_v42 = vpop.f32.mrb[2].mxu0 }
 0x233   : > { %v849_v55 = vadd.f32 %v13731_v42, %v819_v25  ;;  %v807_v59 = vpop.f32.mrb[3].mxu0  ;;  %v1233_v25 = vstv %s20281_s5  ;;  %v1237_v42 = vstv %s20284_s10  ;;  %s20531_s5 = sld [smem:[#allocation6 + $0x3e]]  ;;  %s20543_s10 = sld [smem:[#allocation6 + $0x42]] }
 0x234   : > { %v848_v60 = vadd.f32 %v818_v7, %v807_v59  ;;  %v1241_v7 = vstv %s20286_s29  ;;  %s20547_s29 = sld [smem:[#allocation6 + $0x2f]] }
 0x235   : > { %v857_v12 = vadd.f32 %v851_v36, %v849_v55  ;;  %v1225_v36 = vstv %s20296_s26  ;;  %s20554_s26 = sld [smem:[#allocation6 + $0x3b]] }
 0x236   : > { %v856_v16 = vadd.f32 %v850_v56, %v848_v60  ;;  %v20303_v18 = vpop.f32.mrb[4].mxu0  ;;  %v1235_v56 = vmul.f32 %v1233_v25, %v20214_v37  ;;  %v1239_v60 = vmul.f32 %v20220_v33, %v1237_v42  ;;  %v1227_v33 = vmul.f32 %v20245_v52, %v1225_v36 }
 0x237   : > { %v861_v24 = vadd.f32 %v859_v57, %v857_v12  ;;  %v1370_v26 = vpop.f32.mrb[5].mxu0  ;;  %v1230_v12 = vmul.f32 %v20233_v54, %v1229_v30  ;;  %v1226_v30 = vmul.f32 %v20260_v5, %v1225_v36 }
 0x238   : > { %v860_v28 = vadd.f32 %v858_v63, %v856_v16  ;;  %v1243_v63 = vmul.f32 %v20223_v34, %v1241_v7  ;;  %v1238_v16 = vmul.f32 %v20239_v50, %v1237_v42  ;;  %v25646_v34 = vmov 1.0|1.0  }
 0x239   : > { %v863_v59 = vadd.f32 %v861_v24, %v847_v11  ;;  %v1242_v24 = vmul.f32 %v20242_v51, %v1241_v7  ;;  %v1218_v7 = vmul.f32 %v1217_v31, %v20272_v22 }
 0x23a   : > { %v862_v23 = vadd.f32 %v860_v28, %v846_v15  ;;  %v13789_v39 = vpop.f32.mrb[6].mxu0  ;;  %v1234_v15 = vmul.f32 %v1233_v25, %v20236_v3  ;;  %v1219_v25 = vmul.f32 %v1217_v31, %v20263_v17 }
 0x23b   : > { %v867_v55 = vadd.f32 %v865_v27, %v863_v59  ;;  %v1445_v57 = vpop.f32.mrb[7].mxu0  ;;  %v1223_v59 = vmul.f32 %v20227_v40, %v1221_v32 }
 0x23c   : > { %v866_v11 = vadd.f32 %v865_v27, %v862_v23  ;;  %13806 = vmatprep.mubr.msk.f32.mxu0 %vm653_vm0, %v1445_v57  ;;  %v1222_v23 = vmul.f32 %v20257_v10, %v1221_v32  ;;  %v1253_v27 = vadd.f32 %v1235_v56, %v1231_v53  ;;  %v1254_v57 = vadd.f32 %v1242_v24, %v1238_v16 }
 0x23d   : > { %v869_v28 = vmax.f32 %v867_v55, 0.0  ;;  %13807 = vmatmul.mubr.msk.f32.vlgmr.msra.gmra.mrb[8].mxu0 %vm653_vm0, %v13789_v39  ;;  %v1255_v39 = vadd.f32 %v1243_v63, %v1239_v60  ;;  %v1252_v55 = vadd.f32 %v1234_v15, %v1230_v12  ;;  %v1245_v32 = vstv %s20315_s11  ;;  %s20557_s11 = sld [smem:[#allocation6 + $0x23]] }
 0x23e   : > { %v868_v37 = vmax.f32 %v866_v11, 0.0  ;;  %16647 = vmatpush3.bf16.msk.msra.mxu0 %vm19869_vm1, %v25646_v34  ;;  %13825 = vmatprep.mubr.msk.f32.mxu0 %vm653_vm0, %v1370_v26  ;;  %v1251_v26 = vadd.f32 %v1227_v33, %v1223_v59  ;;  %v1250_v10 = vadd.f32 %v1226_v30, %v1222_v23  ;;  %v1247_v33 = vmul.f32 %v20293_v41, %v1245_v32 }
 0x23f   : > { %16649 = vmatprep.subr.msk.bf16.mxu0 %vm19897_vm10, %v25646_v34  ;;  %v1259_v53 = vadd.f32 %v1255_v39, %v1253_v27  ;;  %v1258_v31 = vadd.f32 %v1254_v57, %v1252_v55  ;;  %v1246_v16 = vmul.f32 %v20299_v58, %v1245_v32 }
 0x240   : > { %v2070_v42 = vpack.c.bf16 %v869_v28, %v868_v37 }
 0x242   : > { %16651 = vmatpush3.bf16.msk.msra.mxu0 %vm19897_vm10, %v25646_v34  ;;  %v20347_v63 = vunpack.c.l.bf16 %v2070_v42  ;;  %v20350_v15 = vunpack.c.h.bf16 %v2070_v42 }
 0x243   : > { %v13779_v11 = vpop.f32.mrb[6].mxu1  ;;  %16653 = vmatprep.subr.msk.bf16.mxu0 %vm19945_vm2, %v25646_v34 }
 0x244   : > { %v1249_v36 = vadd.f32 %v13779_v11, %v1219_v25  ;;  %v1207_v56 = vpop.f32.mrb[7].mxu1  ;;  %v1265_v25 = vstv %s20337_s30  ;;  %v20361_v39 = vsub.f32 %v868_v37, %v20347_v63  ;;  %v20364_v55 = vsub.f32 %v869_v28, %v20350_v15  ;;  %s20559_s30 = sld [smem:[#allocation6 + $0x27]] }
 0x245   : > { %v1248_v60 = vadd.f32 %v1218_v7, %v1207_v56  ;;  %v1621_v56 = vstv %s10738_s12  ;;  %s10987_s12 = sld [smem:[#allocation6 + $0x44]] }
 0x246   : > { %v1257_v12 = vadd.f32 %v1251_v26, %v1249_v36  ;;  %16655 = vmatpush3.bf16.msk.msra.mxu0 %vm19945_vm2, %v25646_v34  ;;  %v16696_v28 = vpack.c.bf16 %v20364_v55, %v20361_v39 }
 0x247   : > { %v1256_v24 = vadd.f32 %v1250_v10, %v1248_v60  ;;  %v13832_v59 = vpop.f32.mrb[8].mxu1  ;;  %16657 = vmatprep.subr.msk.bf16.mxu0 %vm19988_vm6, %v25646_v34  ;;  %v1625_v60 = vstv %s10739_s23  ;;  %s10988_s23 = sld [smem:[#allocation6 + $0x45]] }
 0x248   : > { %v1261_v23 = vadd.f32 %v1259_v53, %v1257_v12  ;;  %v1770_v30 = vpop.f32.mrb[9].mxu1  ;;  %v1617_v53 = vstv %s20528_s25  ;;  %s10990_s25 = sld [smem:[#allocation6 + $0x49]] }
 0x249   : > { %v1260_v27 = vadd.f32 %v1258_v31, %v1256_v24  ;;  %v1631_v31 = vmul.f32 %v20217_v13, %v1629_v8 }
 0x24a   : > { %v1263_v7 = vadd.f32 %v1261_v23, %v1247_v33  ;;  %16659 = vmatpush3.bf16.msk.msra.mxu0 %vm19988_vm6, %v25646_v34  ;;  %v25661_v33 = vld [vmem:[#allocation31_spill] sm:$0xff] }
 0x24b   : > { %v1262_v10 = vadd.f32 %v1260_v27, %v1246_v16  ;;  %v13837_v57 = vpop.f32.mrb[10].mxu1  ;;  %16693 = vmatprep.subr.bf16.mxu0 %v2070_v42  ;;  %v1635_v12 = vmul.f32 %v1633_v43, %v25661_v33  ;;  %v25662_v16 = vld [vmem:[#allocation32_spill] sm:$0xff]  ;;  %v1638_v27 = vmul.f32 %v20239_v50, %v1637_v2 }
 0x24c   : > { %v20369_v26 = vadd.f32 %v1265_v25, %v1263_v7  ;;  %v1845_v11 = vpop.f32.mrb[11].mxu1  ;;  %v1639_v24 = vmul.f32 %v25662_v16, %v1637_v2 }
 0x24d   : > { %v20371_v32 = vadd.f32 %v1265_v25, %v1262_v10  ;;  %13854 = vmatprep.mubr.msk.f32.mxu1 %vm653_vm0, %v1845_v11  ;;  %13826 = vmatmul.mubr.msk.f32.vlgmr.msra.gmra.mrb[8].mxu0 %vm653_vm0, %v20303_v18  ;;  %v1634_v25 = vmul.f32 %v1633_v43, %v20236_v3  ;;  %v1623_v10 = vmul.f32 %v20227_v40, %v1621_v56  ;;  %v25664_v11 = vld [vmem:[#allocation34_spill] sm:$0xff] }
 0x24e   : > { %25647 = vst [vmem:[#allocation35_spill] sm:$0xff] %v20369_v26  ;;  %v25398_v37 = vmax.f32 %v20369_v26, 0.0  ;;  %13855 = vmatmul.mubr.msk.f32.vlgmr.msra.gmra.mrb[12].mxu1 %vm653_vm0, %v13837_v57  ;;  %16695 = vmatpush3.bf16.msra.mxu0 %v2070_v42  ;;  %v1627_v57 = vmul.f32 %v20245_v52, %v1625_v60  ;;  %v1653_v43 = vadd.f32 %v1635_v12, %v1631_v31  ;;  %v1645_v31 = vstv %s20531_s5  ;;  %s10996_s5 = sld [smem:[#allocation6 + $0x55]] }
 0x24f   : > { %25648 = vst [vmem:[#allocation36_spill] sm:$0xff] %v20371_v32  ;;  %v25399_v36 = vmax.f32 %v20371_v32, 0.0  ;;  %16679 = vmatpush3.bf16.msk.msra.mxu1 %vm19869_vm1, %v25646_v34  ;;  %16697 = vmatprep.subr.bf16.mxu0 %v16696_v28  ;;  %vm25650_vm1 = vnez %v25563_v14 }
 0x250   : > { %16681 = vmatprep.subr.msk.bf16.mxu1 %vm19897_vm10, %v25646_v34  ;;  %13880 = vmatprep.mubr.msk.f32.mxu0 %vm25397_vm11, %v19604_v21 }
 0x251   : > { %v20391_v18 = vpack.c.bf16 %v25398_v37, %v25399_v36  ;;  %13873 = vmatprep.mubr.msk.f32.mxu1 %vm653_vm0, %v1770_v30  ;;  %13881 = vmatmul.mubr.msk.f32.vlgmr.msra.gmra.mrb[10].mxu0 %vm25397_vm11, %v19642_v38  ;;  %v1630_v30 = vmul.f32 %v20233_v54, %v1629_v8  ;;  %v1626_v37 = vmul.f32 %v20260_v5, %v1625_v60 }
 0x252   : > { %16699 = vmatpush3.bf16.msra.mxu0 %v16696_v28  ;;  %13887 = vmatprep.mubr.msk.f32.mxu0 %vm25397_vm11, %v19604_v21  ;;  %v1619_v8 = vmul.f32 %v1617_v53, %v20263_v17 }
 0x253   : > { %25649 = vst [vmem:[#allocation37_spill] sm:$0xff] %v20391_v18  ;;  %16683 = vmatpush3.bf16.msk.msra.mxu1 %vm19897_vm10, %v25646_v34  ;;  %16701 = vmatprep.subr.bf16.mxu0 %v2070_v42  ;;  %vm25651_vm10 = vnez %v25604_v1  ;;  %v1652_v36 = vadd.f32 %v1634_v25, %v1630_v30  ;;  %v2029_v18 = vstv %s20547_s29  ;;  %s10992_s29 = sld [smem:[#allocation6 + $0x4d]] }
 0x254   : > { %16685 = vmatprep.subr.msk.bf16.mxu1 %vm19945_vm2, %v25646_v34 }
 0x255   : > { %13888 = vmatmul.mubr.msk.f32.vlgmr.msra.gmra.mrb[12].mxu0 %vm25397_vm11, %v19642_v38 }
 0x256   : > { %16703 = vmatpush3.bf16.msra.mxu0 %v2070_v42  ;;  %13894 = vmatprep.mubr.msk.f32.mxu0 %vm25397_vm11, %v19654_v44  ;;  %v1641_v42 = vstv %s10743_s22  ;;  %s10989_s22 = sld [smem:[#allocation6 + $0x48]] }
 0x257   : > { %16687 = vmatpush3.bf16.msk.msra.mxu1 %vm19945_vm2, %v25646_v34  ;;  %16709 = vmatprep.subr.msk.bf16.mxu0 %vm19712_vm3, %v25646_v34  ;;  %vm25652_vm2 = vnez %v25550_v62  ;;  %v1642_v7 = vmul.f32 %v20242_v51, %v1641_v42 }
 0x258   : > { %16689 = vmatprep.subr.msk.bf16.mxu1 %vm19988_vm6, %v25646_v34 }
 0x259   : > { %13895 = vmatmul.mubr.msk.f32.vlgmr.msra.gmra.mrb[14].mxu0 %vm25397_vm11, %v19657_v46  ;;  %v1654_v26 = vadd.f32 %v1642_v7, %v1638_v27  ;;  %v1647_v27 = vmul.f32 %v20293_v41, %v1645_v31 }
 0x25a   : > { %16711 = vmatpush3.bf16.msk.msra.mxu0 %vm19712_vm3, %v25646_v34 }
 0x25b   : > { %16691 = vmatpush3.bf16.msk.msra.mxu1 %vm19988_vm6, %v25646_v34  ;;  %16713 = vmatprep.subr.msk.bf16.mxu0 %vm19915_vm14, %v25646_v34  ;;  %vm25653_vm6 = vnez %v25553_v0  ;;  %v1658_v25 = vadd.f32 %v1654_v26, %v1652_v36  ;;  %v2025_v36 = vstv %s20561_s8  ;;  %s11001_s8 = sld [smem:[#allocation6 + $0x60]] }
 0x25c   : > { %16705 = vmatprep.subr.bf16.mxu1 %v16696_v28 }
 0x25e   : > { %13874 = vmatmul.mubr.msk.f32.vlgmr.msra.gmra.mrb[12].mxu1 %vm653_vm0, %v13832_v59  ;;  %16715 = vmatpush3.bf16.msk.msra.mxu0 %vm19915_vm14, %v25646_v34  ;;  %vm25654_vm0 = vnez %v25566_v20  ;;  %v25663_v59 = vld [vmem:[#allocation33_spill] sm:$0xff] }
 0x25f   : > { %16707 = vmatpush3.bf16.msra.mxu1 %v16696_v28  ;;  %13901 = vmatprep.mubr.msk.f32.mxu1 %vm25397_vm11, %v19654_v44  ;;  %v1643_v23 = vmul.f32 %v25663_v59, %v1641_v42  ;;  %v1622_v28 = vmul.f32 %v25664_v11, %v1621_v56  ;;  %v1618_v42 = vmul.f32 %v1617_v53, %v20272_v22 }
 0x260   : > { %16773 = vmatprep.subr.msk.bf16.mxu1 %vm25650_vm1, %v25646_v34  ;;  %16717 = vmatprep.subr.msk.bf16.mxu0 %vm19962_vm7, %v25646_v34  ;;  %v1651_v56 = vadd.f32 %v1627_v57, %v1623_v10  ;;  %v1646_v10 = vmul.f32 %v20299_v58, %v1645_v31  ;;  %v2031_v44 = vmul.f32 %v20217_v13, %v2029_v18 }
 0x261   : > { %v1655_v2 = vadd.f32 %v1643_v23, %v1639_v24  ;;  %v1650_v12 = vadd.f32 %v1626_v37, %v1622_v28  ;;  %v2033_v37 = vstv %s20549_s9  ;;  %s10993_s9 = sld [smem:[#allocation6 + $0x50]] }
 0x262   : > { %13902 = vmatmul.mubr.msk.f32.vlgmr.msra.gmra.mrb[14].mxu1 %vm25397_vm11, %v19657_v46  ;;  %16719 = vmatpush3.bf16.msk.msra.mxu0 %vm19962_vm7, %v25646_v34  ;;  %vm25660_vm11 = vnez %v25659_v19  ;;  %v2034_v13 = vmul.f32 %v2033_v37, %v20236_v3 }
 0x263   : > { %16775 = vmatpush3.bf16.msk.msra.mxu1 %vm25650_vm1, %v25646_v34  ;;  %16721 = vmatprep.subr.msk.bf16.mxu0 %vm19999_vm13, %v25646_v34  ;;  %v1659_v23 = vadd.f32 %v1655_v2, %v1653_v43  ;;  %v2041_v43 = vstv %s20554_s26  ;;  %v1665_v2 = vstv %s20543_s10  ;;  %s10991_s10 = sld [smem:[#allocation6 + $0x4c]]  ;;  %s10998_s26 = sld [smem:[#allocation6 + $0x59]] }
 0x264   : > { %16777 = vmatprep.subr.msk.bf16.mxu1 %vm25651_vm10, %v25646_v34 }
 0x266   : > { %16723 = vmatpush3.bf16.msk.msra.mxu0 %vm19999_vm13, %v25646_v34 }
 0x267   : > { %16779 = vmatpush3.bf16.msk.msra.mxu1 %vm25651_vm10, %v25646_v34  ;;  %16725 = vmatprep.subr.msk.bf16.mxu0 %vm25652_vm2, %v25646_v34 }
 0x268   : > { %16781 = vmatprep.subr.msk.bf16.mxu1 %vm19975_vm4, %v25646_v34 }
 0x26a   : > { %16727 = vmatpush3.bf16.msk.msra.mxu0 %vm25652_vm2, %v25646_v34 }
 0x26b   : > { %16783 = vmatpush3.bf16.msk.msra.mxu1 %vm19975_vm4, %v25646_v34  ;;  %16729 = vmatprep.subr.msk.bf16.mxu0 %vm25653_vm6, %v25646_v34 }
 0x26c   : > { %16785 = vmatprep.subr.msk.bf16.mxu1 %vm20007_vm12, %v25646_v34 }
 0x26e   : > { %16731 = vmatpush3.bf16.msk.msra.mxu0 %vm25653_vm6, %v25646_v34 }
 0x26f   : > { %16787 = vmatpush3.bf16.msk.msra.mxu1 %vm20007_vm12, %v25646_v34  ;;  %16733 = vmatprep.subr.msk.bf16.mxu0 %vm25655_vm15, %v25646_v34 }
 0x270   : > { %16789 = vmatprep.subr.msk.bf16.mxu1 %vm25654_vm0, %v25646_v34 }
 0x272   : > { %16735 = vmatpush3.bf16.msk.msra.mxu0 %vm25655_vm15, %v25646_v34 }
 0x273   : > { %16791 = vmatpush3.bf16.msk.msra.mxu1 %vm25654_vm0, %v25646_v34  ;;  %16737 = vmatprep.subr.msk.bf16.mxu0 %vm25657_vm5, %v25646_v34 }
 0x274   : > { %16793 = vmatprep.subr.msk.bf16.mxu1 %vm25656_vm8, %v25646_v34 }
 0x276   : > { %16739 = vmatpush3.bf16.msk.msra.mxu0 %vm25657_vm5, %v25646_v34 }
 0x277   : > { %16795 = vmatpush3.bf16.msk.msra.mxu1 %vm25656_vm8, %v25646_v34  ;;  %16741 = vmatprep.subr.msk.bf16.mxu0 %vm19712_vm3, %v25646_v34 }
 0x278   : > { %16797 = vmatprep.subr.msk.bf16.mxu1 %vm25658_vm9, %v25646_v34 }
 0x27b   : > { %16799 = vmatpush3.bf16.msk.msra.mxu1 %vm25658_vm9, %v25646_v34 }
 0x27c   : > { %16801 = vmatprep.subr.msk.bf16.mxu1 %vm25660_vm11, %v25646_v34 }
 0x27f   : > { %16803 = vmatpush3.bf16.msk.msra.mxu1 %vm25660_vm11, %v25646_v34 }
 0x280   : > { %16805 = vmatprep.subr.msk.bf16.mxu1 %vm25650_vm1, %v25646_v34 }
 0x320   : > { %v13827_v60 = vpop.f32.mrb[8].mxu0 }
 0x321   : > { %v1649_v24 = vadd.f32 %v13827_v60, %v1619_v8  ;;  %v1607_v53 = vpop.f32.mrb[9].mxu0  ;;  %v2037_v60 = vstv %s20552_s20  ;;  %s10994_s20 = sld [smem:[#allocation6 + $0x51]] }
 0x322   : > { %v1648_v30 = vadd.f32 %v1618_v42, %v1607_v53  ;;  %v2017_v42 = vstv %s20557_s11  ;;  %v2021_v53 = vstv %s20559_s30  ;;  %s10995_s11 = sld [smem:[#allocation6 + $0x54]]  ;;  %s10997_s30 = sld [smem:[#allocation6 + $0x58]] }
 0x323   : > { %v1657_v7 = vadd.f32 %v1651_v56, %v1649_v24  ;;  %v2035_v56 = vmul.f32 %v2033_v37, %v25661_v33  ;;  %v2039_v24 = vmul.f32 %v25662_v16, %v2037_v60  ;;  %v2038_v33 = vmul.f32 %v20239_v50, %v2037_v60 }
 0x324   : > { %v1656_v57 = vadd.f32 %v1650_v12, %v1648_v30  ;;  %v20566_v32 = vpop.f32.mrb[10].mxu0  ;;  %v2043_v30 = vmul.f32 %v25663_v59, %v2041_v43  ;;  %v2042_v16 = vmul.f32 %v20242_v51, %v2041_v43  ;;  %v2027_v59 = vmul.f32 %v20245_v52, %v2025_v36 }
 0x325   : > { %v1661_v28 = vadd.f32 %v1659_v23, %v1657_v7  ;;  %v2148_v8 = vpop.f32.mrb[11].mxu0  ;;  %v2030_v23 = vmul.f32 %v20233_v54, %v2029_v18  ;;  %v2023_v18 = vmul.f32 %v20227_v40, %v2021_v53  ;;  %v2019_v50 = vmul.f32 %v2017_v42, %v20263_v17 }
 0x326   : > { %v1660_v46 = vadd.f32 %v1658_v25, %v1656_v57  ;;  %v2022_v51 = vmul.f32 %v25664_v11, %v2021_v53  ;;  %v2026_v57 = vmul.f32 %v20260_v5, %v2025_v36  ;;  %v2053_v40 = vadd.f32 %v2035_v56, %v2031_v44 }
 0x327   : > { %v1663_v26 = vadd.f32 %v1661_v28, %v1647_v27  ;;  %v2055_v52 = vadd.f32 %v2043_v30, %v2039_v24  ;;  %v2018_v28 = vmul.f32 %v2017_v42, %v20272_v22  ;;  %v2052_v44 = vadd.f32 %v2034_v13, %v2030_v23 }
 0x328   : > { %v1662_v31 = vadd.f32 %v1660_v46, %v1646_v10  ;;  %v13889_v12 = vpop.f32.mrb[12].mxu0  ;;  %v2054_v5 = vadd.f32 %v2042_v16, %v2038_v33  ;;  %v2051_v22 = vadd.f32 %v2027_v59, %v2023_v18  ;;  %v2050_v43 = vadd.f32 %v2026_v57, %v2022_v51 }
 0x329   : > { %v20583_v7 = vadd.f32 %v1665_v2, %v1663_v26  ;;  %v20586_v25 = vadd.f32 %v13889_v12, %v20566_v32  ;;  %v2223_v27 = vpop.f32.mrb[13].mxu0  ;;  %v2059_v42 = vadd.f32 %v2055_v52, %v2053_v40  ;;  %v2065_v13 = vstv %s20625_s14  ;;  %s10999_s14 = sld [smem:[#allocation6 + $0x5c]] }
 0x32a   : > { %v20590_v46 = vadd.f32 %v1665_v2, %v1662_v31  ;;  %v20592_v10 = vadd.f32 %v2223_v27, %v2148_v8  ;;  %13936 = vmatprep.mubr.f32.mxu0 %v2223_v27  ;;  %14006 = vmatprep.mubr.f32.mxu1 %v2223_v27  ;;  %v2058_v36 = vadd.f32 %v2054_v5, %v2052_v44  ;;  %v3299_v44 = vstv %s10988_s23  ;;  %s11207_s23 = sld [smem:[#allocation6 + $0x4a]] }
 0x32b   : > { %v1669_v54 = vmax.f32 %v20583_v7, 0.0  ;;  %13937 = vmatmul.mubr.f32.vlgmr.msra.gmra.mrb[16].mxu0 %v13889_v12  ;;  %14007 = vmatmul.mubr.f32.vlgmr.msra.gmra.mrb[16].mxu1 %v13889_v12 }
 0x32c   : > { %v1668_v3 = vmax.f32 %v20590_v46, 0.0  ;;  %16743 = vmatpush3.bf16.msk.msra.mxu0 %vm19712_vm3, %v25646_v34  ;;  %16807 = vmatpush3.bf16.msk.msra.mxu1 %vm25650_vm1, %v25646_v34  ;;  %v20608_v37 = vpop.f32.mrb[14].mxu0  ;;  %v25672_v46 = vld [vmem:[#allocation15_spill] sm:$0xff] }
 0x32d   : > { %13971 = vmatprep.mubr.f32.mxu0 %v2148_v8  ;;  %14041 = vmatprep.mubr.f32.mxu1 %v2148_v8  ;;  %v20611_v60 = vpop.f32.mrb[15].mxu0  ;;  %v2045_v8 = vstv %s20580_s13  ;;  %s11002_s13 = sld [smem:[#allocation6 + $0x61]] }
 0x32e   : > { %v20617_v17 = vpack.c.bf16 %v1669_v54, %v1668_v3  ;;  %16745 = vmatprep.subr.msk.bf16.mxu0 %vm19915_vm14, %v25646_v34  ;;  %16809 = vmatprep.subr.msk.bf16.mxu1 %vm25651_vm10, %v25646_v34  ;;  %v2047_v56 = vmul.f32 %v20293_v41, %v2045_v8  ;;  %v2046_v12 = vmul.f32 %v20299_v58, %v2045_v8 }
 0x330   : > { %16747 = vmatpush3.bf16.msk.msra.mxu0 %vm19915_vm14, %v25646_v34  ;;  %16811 = vmatpush3.bf16.msk.msra.mxu1 %vm25651_vm10, %v25646_v34  ;;  %v21110_v52 = vunpack.c.h.bf16 %v20617_v17 }
 0x331   : > { %v13875_v11 = vpop.f32.mrb[12].mxu1  ;;  %16749 = vmatprep.subr.msk.bf16.mxu0 %vm19962_vm7, %v25646_v34  ;;  %16813 = vmatprep.subr.msk.bf16.mxu1 %vm19975_vm4, %v25646_v34 }
 0x332   : > { %v2049_v2 = vadd.f32 %v13875_v11, %v2019_v50  ;;  %v2007_v53 = vpop.f32.mrb[13].mxu1 }
 0x333   : > { %v2048_v26 = vadd.f32 %v2018_v28, %v2007_v53 }
 0x334   : > { %v2057_v31 = vadd.f32 %v2051_v22, %v2049_v2  ;;  %16751 = vmatpush3.bf16.msk.msra.mxu0 %vm19962_vm7, %v25646_v34  ;;  %16815 = vmatpush3.bf16.msk.msra.mxu1 %vm19975_vm4, %v25646_v34 }
 0x335   : > { %v2056_v24 = vadd.f32 %v2050_v43, %v2048_v26  ;;  %v20648_v30 = vpop.f32.mrb[14].mxu1  ;;  %16753 = vmatprep.subr.msk.bf16.mxu0 %vm19999_vm13, %v25646_v34  ;;  %16817 = vmatprep.subr.msk.bf16.mxu1 %vm20007_vm12, %v25646_v34 }
 0x336   : > { %v2061_v41 = vadd.f32 %v2059_v42, %v2057_v31  ;;  %v20658_v23 = vadd.f32 %v20648_v30, %v20608_v37  ;;  %v20660_v27 = vpop.f32.mrb[15].mxu1 }
 0x337   : > { %v2060_v58 = vadd.f32 %v2058_v36, %v2056_v24  ;;  %v20665_v33 = vadd.f32 %v20660_v27, %v20611_v60 }
 0x338   : > { %v2063_v16 = vadd.f32 %v2061_v41, %v2047_v56  ;;  %16755 = vmatpush3.bf16.msk.msra.mxu0 %vm19999_vm13, %v25646_v34  ;;  %16819 = vmatpush3.bf16.msk.msra.mxu1 %vm20007_vm12, %v25646_v34 }
 0x339   : > { %v2062_v18 = vadd.f32 %v2060_v58, %v2046_v12  ;;  %16757 = vmatprep.subr.msk.bf16.mxu0 %vm25652_vm2, %v25646_v34  ;;  %16821 = vmatprep.subr.msk.bf16.mxu1 %vm25654_vm0, %v25646_v34  ;;  %v3315_v58 = vstv %s10992_s29  ;;  %s11206_s29 = sld [smem:[#allocation6 + $0x47]] }
 0x33a   : > { %v20679_v59 = vadd.f32 %v2065_v13, %v2063_v16  ;;  %v3319_v16 = vstv %s10993_s9  ;;  %s11209_s9 = sld [smem:[#allocation6 + $0x4e]] }
 0x33b   : > { %v20681_v50 = vadd.f32 %v2065_v13, %v2062_v18  ;;  %v3331_v13 = vstv %s10996_s5  ;;  %v3339_v18 = vstv %s10998_s26  ;;  %s11208_s5 = sld [smem:[#allocation6 + $0x4b]] }
 0x33c   : > { %25665 = vst [vmem:[#allocation31_spill] sm:$0xff] %v20679_v59  ;;  %v25413_v51 = vmax.f32 %v20679_v59, 0.0  ;;  %16759 = vmatpush3.bf16.msk.msra.mxu0 %vm25652_vm2, %v25646_v34  ;;  %16823 = vmatpush3.bf16.msk.msra.mxu1 %vm25654_vm0, %v25646_v34  ;;  %s11212_s26 = sld [smem:[#allocation6 + $0x53]] }
 0x33d   : > { %25666 = vst [vmem:[#allocation32_spill] sm:$0xff] %v20681_v50  ;;  %v25414_v57 = vmax.f32 %v20681_v50, 0.0  ;;  %16761 = vmatprep.subr.msk.bf16.mxu0 %vm25653_vm6, %v25646_v34  ;;  %16825 = vmatprep.subr.msk.bf16.mxu1 %vm25656_vm8, %v25646_v34 }
 0x33f   : > { %v20701_v40 = vpack.c.bf16 %v25413_v51, %v25414_v57 }
 0x340   : > { %16763 = vmatpush3.bf16.msk.msra.mxu0 %vm25653_vm6, %v25646_v34  ;;  %16827 = vmatpush3.bf16.msk.msra.mxu1 %vm25656_vm8, %v25646_v34 }
 0x341   : > { %25667 = vst [vmem:[#allocation33_spill] sm:$0xff] %v20701_v40  ;;  %16765 = vmatprep.subr.msk.bf16.mxu0 %vm25655_vm15, %v25646_v34  ;;  %16829 = vmatprep.subr.msk.bf16.mxu1 %vm25658_vm9, %v25646_v34 }
 0x344   : > { %16767 = vmatpush3.bf16.msk.msra.mxu0 %vm25655_vm15, %v25646_v34  ;;  %16831 = vmatpush3.bf16.msk.msra.mxu1 %vm25658_vm9, %v25646_v34 }
 0x345   : > { %16769 = vmatprep.subr.msk.bf16.mxu0 %vm25657_vm5, %v25646_v34  ;;  %16833 = vmatprep.subr.msk.bf16.mxu1 %vm25660_vm11, %v25646_v34 }
 0x348   : > { %16771 = vmatpush3.bf16.msk.msra.mxu0 %vm25657_vm5, %v25646_v34  ;;  %16835 = vmatpush3.bf16.msk.msra.mxu1 %vm25660_vm11, %v25646_v34 }
 0x349   : > { %16837 = vmatprep.subr.msk.bf16.mxu0 %vm19712_vm3, %v25646_v34  ;;  %16901 = vmatprep.subr.msk.bf16.mxu1 %vm25650_vm1, %v25646_v34 }
 0x34b   : > { %13972 = vmatmul.mubr.f32.vlgmr.msra.gmra.mrb[16].mxu0 %v20566_v32  ;;  %14042 = vmatmul.mubr.f32.vlgmr.msra.gmra.mrb[16].mxu1 %v20566_v32  ;;  %v21104_v32 = vunpack.c.l.bf16 %v20617_v17 }
 0x34c   : > { %16839 = vmatpush3.bf16.msk.msra.mxu0 %vm19712_vm3, %v25646_v34  ;;  %14076 = vmatprep.mubr.f32.mxu0 %v20361_v39 }
 0x34d   : > { %16903 = vmatpush3.bf16.msk.msra.mxu1 %vm25650_vm1, %v25646_v34  ;;  %14146 = vmatprep.mubr.f32.mxu1 %v20361_v39  ;;  %v21124_v28 = vsub.f32 %v1668_v3, %v21104_v32  ;;  %v3303_v3 = vstv %s10989_s22  ;;  %s11000_s22 = sld [smem:[#allocation6 + $0x5d]] }
 0x34e   : > { %16841 = vmatprep.subr.msk.bf16.mxu0 %vm19915_vm14, %v25646_v34  ;;  %16905 = vmatprep.subr.msk.bf16.mxu1 %vm25651_vm10, %v25646_v34  ;;  %v3305_v11 = vmul.f32 %v3303_v3, %v20586_v25  ;;  %v3304_v26 = vmul.f32 %v3303_v3, %v20592_v10 }
 0x350   : > { %16843 = vmatpush3.bf16.msk.msra.mxu0 %vm19915_vm14, %v25646_v34 }
 0x351   : > { %16907 = vmatpush3.bf16.msk.msra.mxu1 %vm25651_vm10, %v25646_v34  ;;  %16845 = vmatprep.subr.msk.bf16.mxu0 %vm19962_vm7, %v25646_v34 }
 0x352   : > { %16909 = vmatprep.subr.msk.bf16.mxu1 %vm19975_vm4, %v25646_v34 }
 0x354   : > { %16847 = vmatpush3.bf16.msk.msra.mxu0 %vm19962_vm7, %v25646_v34 }
 0x355   : > { %16911 = vmatpush3.bf16.msk.msra.mxu1 %vm19975_vm4, %v25646_v34  ;;  %16849 = vmatprep.subr.msk.bf16.mxu0 %vm19999_vm13, %v25646_v34 }
 0x356   : > { %16913 = vmatprep.subr.msk.bf16.mxu1 %vm20007_vm12, %v25646_v34 }
 0x358   : > { %16851 = vmatpush3.bf16.msk.msra.mxu0 %vm19999_vm13, %v25646_v34 }
 0x359   : > { %16915 = vmatpush3.bf16.msk.msra.mxu1 %vm20007_vm12, %v25646_v34  ;;  %16853 = vmatprep.subr.msk.bf16.mxu0 %vm25652_vm2, %v25646_v34 }
 0x35a   : > { %16917 = vmatprep.subr.msk.bf16.mxu1 %vm25654_vm0, %v25646_v34 }
 0x35c   : > { %16855 = vmatpush3.bf16.msk.msra.mxu0 %vm25652_vm2, %v25646_v34 }
 0x35d   : > { %16919 = vmatpush3.bf16.msk.msra.mxu1 %vm25654_vm0, %v25646_v34  ;;  %16857 = vmatprep.subr.msk.bf16.mxu0 %vm25653_vm6, %v25646_v34 }
 0x35e   : > { %16921 = vmatprep.subr.msk.bf16.mxu1 %vm25656_vm8, %v25646_v34 }
 0x360   : > { %16859 = vmatpush3.bf16.msk.msra.mxu0 %vm25653_vm6, %v25646_v34 }
 0x361   : > { %16923 = vmatpush3.bf16.msk.msra.mxu1 %vm25656_vm8, %v25646_v34  ;;  %16861 = vmatprep.subr.msk.bf16.mxu0 %vm25655_vm15, %v25646_v34 }
 0x362   : > { %16925 = vmatprep.subr.msk.bf16.mxu1 %vm25658_vm9, %v25646_v34 }
 0x364   : > { %16863 = vmatpush3.bf16.msk.msra.mxu0 %vm25655_vm15, %v25646_v34 }
 0x365   : > { %16927 = vmatpush3.bf16.msk.msra.mxu1 %vm25658_vm9, %v25646_v34  ;;  %16865 = vmatprep.subr.msk.bf16.mxu0 %vm25657_vm5, %v25646_v34 }
 0x366   : > { %16929 = vmatprep.subr.msk.bf16.mxu1 %vm25660_vm11, %v25646_v34 }
 0x368   : > { %16867 = vmatpush3.bf16.msk.msra.mxu0 %vm25657_vm5, %v25646_v34 }
 0x369   : > { %16931 = vmatpush3.bf16.msk.msra.mxu1 %vm25660_vm11, %v25646_v34  ;;  %16869 = vmatprep.subr.msk.bf16.mxu0 %vm19712_vm3, %v25646_v34 }
 0x36a   : > { %16933 = vmatprep.subr.msk.bf16.mxu1 %vm25650_vm1, %v25646_v34 }
 0x36b   : > { %14077 = vmatmul.mubr.f32.vlgmr.msra.gmra.mrb[18].mxu0 %v20364_v55 }
 0x36c   : > { %14147 = vmatmul.mubr.f32.vlgmr.msra.gmra.mrb[18].mxu1 %v20364_v55  ;;  %16871 = vmatpush3.bf16.msk.msra.mxu0 %vm19712_vm3, %v25646_v34 }
 0x36d   : > { %14111 = vmatprep.mubr.f32.mxu0 %v20347_v63  ;;  %16935 = vmatpush3.bf16.msk.msra.mxu1 %vm25650_vm1, %v25646_v34 }
 0x36e   : > { %14181 = vmatprep.mubr.f32.mxu1 %v20347_v63  ;;  %16873 = vmatprep.subr.msk.bf16.mxu0 %vm19915_vm14, %v25646_v34 }
 0x36f   : > { %16937 = vmatprep.subr.msk.bf16.mxu1 %vm25651_vm10, %v25646_v34 }
 0x370   : > { %16875 = vmatpush3.bf16.msk.msra.mxu0 %vm19915_vm14, %v25646_v34 }
 0x371   : > { %16939 = vmatpush3.bf16.msk.msra.mxu1 %vm25651_vm10, %v25646_v34  ;;  %16877 = vmatprep.subr.msk.bf16.mxu0 %vm19962_vm7, %v25646_v34 }
 0x372   : > { %16941 = vmatprep.subr.msk.bf16.mxu1 %vm19975_vm4, %v25646_v34 }
 0x374   : > { %16879 = vmatpush3.bf16.msk.msra.mxu0 %vm19962_vm7, %v25646_v34 }
 0x375   : > { %16943 = vmatpush3.bf16.msk.msra.mxu1 %vm19975_vm4, %v25646_v34  ;;  %16881 = vmatprep.subr.msk.bf16.mxu0 %vm19999_vm13, %v25646_v34 }
 0x376   : > { %16945 = vmatprep.subr.msk.bf16.mxu1 %vm20007_vm12, %v25646_v34 }
 0x378   : > { %16883 = vmatpush3.bf16.msk.msra.mxu0 %vm19999_vm13, %v25646_v34 }
 0x379   : > { %16947 = vmatpush3.bf16.msk.msra.mxu1 %vm20007_vm12, %v25646_v34  ;;  %16885 = vmatprep.subr.msk.bf16.mxu0 %vm25652_vm2, %v25646_v34 }
 0x37a   : > { %16949 = vmatprep.subr.msk.bf16.mxu1 %vm25654_vm0, %v25646_v34 }
 0x37c   : > { %16887 = vmatpush3.bf16.msk.msra.mxu0 %vm25652_vm2, %v25646_v34 }
 0x37d   : > { %16951 = vmatpush3.bf16.msk.msra.mxu1 %vm25654_vm0, %v25646_v34  ;;  %16889 = vmatprep.subr.msk.bf16.mxu0 %vm25653_vm6, %v25646_v34 }
 0x37e   : > { %16953 = vmatprep.subr.msk.bf16.mxu1 %vm25656_vm8, %v25646_v34 }
 0x380   : > { %16891 = vmatpush3.bf16.msk.msra.mxu0 %vm25653_vm6, %v25646_v34 }
 0x381   : > { %16955 = vmatpush3.bf16.msk.msra.mxu1 %vm25656_vm8, %v25646_v34  ;;  %16893 = vmatprep.subr.msk.bf16.mxu0 %vm25655_vm15, %v25646_v34 }
 0x382   : > { %16957 = vmatprep.subr.msk.bf16.mxu1 %vm25658_vm9, %v25646_v34 }
 0x384   : > { %16895 = vmatpush3.bf16.msk.msra.mxu0 %vm25655_vm15, %v25646_v34 }
 0x385   : > { %16959 = vmatpush3.bf16.msk.msra.mxu1 %vm25658_vm9, %v25646_v34  ;;  %16897 = vmatprep.subr.msk.bf16.mxu0 %vm25657_vm5, %v25646_v34 }
 0x386   : > { %16961 = vmatprep.subr.msk.bf16.mxu1 %vm25660_vm11, %v25646_v34 }
 0x388   : > { %16899 = vmatpush3.bf16.msk.msra.mxu0 %vm25657_vm5, %v25646_v34 }
 0x389   : > { %16963 = vmatpush3.bf16.msk.msra.mxu1 %vm25660_vm11, %v25646_v34  ;;  %16965 = vmatprep.subr.msk.bf16.mxu0 %vm19712_vm3, %v25646_v34 }
 0x38a   : > { %17029 = vmatprep.subr.msk.bf16.mxu1 %vm25650_vm1, %v25646_v34 }
 0x38b   : > { %14112 = vmatmul.mubr.f32.vlgmr.msra.gmra.mrb[18].mxu0 %v20350_v15 }
 0x38c   : > { %14182 = vmatmul.mubr.f32.vlgmr.msra.gmra.mrb[18].mxu1 %v20350_v15  ;;  %16967 = vmatpush3.bf16.msk.msra.mxu0 %vm19712_vm3, %v25646_v34 }
 0x38d   : > { %17031 = vmatpush3.bf16.msk.msra.mxu1 %vm25650_vm1, %v25646_v34  ;;  %16969 = vmatprep.subr.msk.bf16.mxu0 %vm19915_vm14, %v25646_v34 }
 0x38e   : > { %17033 = vmatprep.subr.msk.bf16.mxu1 %vm25651_vm10, %v25646_v34  ;;  %14216 = vmatprep.mubr.f32.mxu0 %v20660_v27 }
 0x38f   : > { %14286 = vmatprep.mubr.f32.mxu1 %v20660_v27  ;;  %v3311_v27 = vstv %s10991_s10  ;;  %s11205_s10 = sld [smem:[#allocation6 + $0x46]] }
 0x390   : > { %16971 = vmatpush3.bf16.msk.msra.mxu0 %vm19915_vm14, %v25646_v34 }
 0x391   : > { %17035 = vmatpush3.bf16.msk.msra.mxu1 %vm25651_vm10, %v25646_v34  ;;  %16973 = vmatprep.subr.msk.bf16.mxu0 %vm19962_vm7, %v25646_v34 }
 0x392   : > { %17037 = vmatprep.subr.msk.bf16.mxu1 %vm19975_vm4, %v25646_v34 }
 0x394   : > { %16975 = vmatpush3.bf16.msk.msra.mxu0 %vm19962_vm7, %v25646_v34 }
 0x395   : > { %17039 = vmatpush3.bf16.msk.msra.mxu1 %vm19975_vm4, %v25646_v34  ;;  %16977 = vmatprep.subr.msk.bf16.mxu0 %vm19999_vm13, %v25646_v34 }
 0x396   : > { %17041 = vmatprep.subr.msk.bf16.mxu1 %vm20007_vm12, %v25646_v34 }
 0x398   : > { %16979 = vmatpush3.bf16.msk.msra.mxu0 %vm19999_vm13, %v25646_v34 }
 0x399   : > { %17043 = vmatpush3.bf16.msk.msra.mxu1 %vm20007_vm12, %v25646_v34  ;;  %16981 = vmatprep.subr.msk.bf16.mxu0 %vm25652_vm2, %v25646_v34 }
 0x39a   : > { %17045 = vmatprep.subr.msk.bf16.mxu1 %vm25654_vm0, %v25646_v34 }
 0x39c   : > { %16983 = vmatpush3.bf16.msk.msra.mxu0 %vm25652_vm2, %v25646_v34 }
 0x39d   : > { %17047 = vmatpush3.bf16.msk.msra.mxu1 %vm25654_vm0, %v25646_v34  ;;  %16985 = vmatprep.subr.msk.bf16.mxu0 %vm25653_vm6, %v25646_v34 }
 0x39e   : > { %17049 = vmatprep.subr.msk.bf16.mxu1 %vm25656_vm8, %v25646_v34 }
 0x3a0   : > { %16987 = vmatpush3.bf16.msk.msra.mxu0 %vm25653_vm6, %v25646_v34 }
 0x3a1   : > { %17051 = vmatpush3.bf16.msk.msra.mxu1 %vm25656_vm8, %v25646_v34  ;;  %16989 = vmatprep.subr.msk.bf16.mxu0 %vm25655_vm15, %v25646_v34 }
 0x3a2   : > { %17053 = vmatprep.subr.msk.bf16.mxu1 %vm25658_vm9, %v25646_v34 }
 0x3a4   : > { %16991 = vmatpush3.bf16.msk.msra.mxu0 %vm25655_vm15, %v25646_v34 }
 0x3a5   : > { %17055 = vmatpush3.bf16.msk.msra.mxu1 %vm25658_vm9, %v25646_v34  ;;  %16993 = vmatprep.subr.msk.bf16.mxu0 %vm25657_vm5, %v25646_v34 }
 0x3a6   : > { %17057 = vmatprep.subr.msk.bf16.mxu1 %vm25660_vm11, %v25646_v34 }
 0x3a8   : > { %16995 = vmatpush3.bf16.msk.msra.mxu0 %vm25657_vm5, %v25646_v34 }
 0x3a9   : > { %17059 = vmatpush3.bf16.msk.msra.mxu1 %vm25660_vm11, %v25646_v34  ;;  %16997 = vmatprep.subr.msk.bf16.mxu0 %vm19712_vm3, %v25646_v34 }
 0x3aa   : > { %17061 = vmatprep.subr.msk.bf16.mxu1 %vm25650_vm1, %v25646_v34 }
 0x3ab   : > { %14217 = vmatmul.mubr.f32.vlgmr.msra.gmra.mrb[20].mxu0 %v20648_v30 }
 0x3ac   : > { %14287 = vmatmul.mubr.f32.vlgmr.msra.gmra.mrb[20].mxu1 %v20648_v30  ;;  %16999 = vmatpush3.bf16.msk.msra.mxu0 %vm19712_vm3, %v25646_v34 }
 0x3ad   : > { %17063 = vmatpush3.bf16.msk.msra.mxu1 %vm25650_vm1, %v25646_v34  ;;  %17001 = vmatprep.subr.msk.bf16.mxu0 %vm19915_vm14, %v25646_v34 }
 0x3ae   : > { %17065 = vmatprep.subr.msk.bf16.mxu1 %vm25651_vm10, %v25646_v34  ;;  %14251 = vmatprep.mubr.f32.mxu0 %v20611_v60 }
 0x3af   : > { %14321 = vmatprep.mubr.f32.mxu1 %v20611_v60  ;;  %v21132_v60 = vsub.f32 %v1669_v54, %v21110_v52  ;;  %v25675_v54 = vld [vmem:[#allocation16_spill] sm:$0xff] }
 0x3b0   : > { %17003 = vmatpush3.bf16.msk.msra.mxu0 %vm19915_vm14, %v25646_v34 }
 0x3b1   : > { %17067 = vmatpush3.bf16.msk.msra.mxu1 %vm25651_vm10, %v25646_v34  ;;  %17005 = vmatprep.subr.msk.bf16.mxu0 %vm19962_vm7, %v25646_v34  ;;  %v17096_v7 = vpack.c.bf16 %v21132_v60, %v21124_v28 }
 0x3b2   : > { %17069 = vmatprep.subr.msk.bf16.mxu1 %vm19975_vm4, %v25646_v34 }
 0x3b4   : > { %17007 = vmatpush3.bf16.msk.msra.mxu0 %vm19962_vm7, %v25646_v34 }
 0x3b5   : > { %17071 = vmatpush3.bf16.msk.msra.mxu1 %vm19975_vm4, %v25646_v34  ;;  %17009 = vmatprep.subr.msk.bf16.mxu0 %vm19999_vm13, %v25646_v34 }
 0x3b6   : > { %17073 = vmatprep.subr.msk.bf16.mxu1 %vm20007_vm12, %v25646_v34 }
 0x3b8   : > { %17011 = vmatpush3.bf16.msk.msra.mxu0 %vm19999_vm13, %v25646_v34 }
 0x3b9   : > { %17075 = vmatpush3.bf16.msk.msra.mxu1 %vm20007_vm12, %v25646_v34  ;;  %17013 = vmatprep.subr.msk.bf16.mxu0 %vm25652_vm2, %v25646_v34 }
 0x3ba   : > { %17077 = vmatprep.subr.msk.bf16.mxu1 %vm25654_vm0, %v25646_v34 }
 0x3bc   : > { %17015 = vmatpush3.bf16.msk.msra.mxu0 %vm25652_vm2, %v25646_v34 }
 0x3bd   : > { %17079 = vmatpush3.bf16.msk.msra.mxu1 %vm25654_vm0, %v25646_v34  ;;  %17017 = vmatprep.subr.msk.bf16.mxu0 %vm25653_vm6, %v25646_v34 }
 0x3be   : > { %17081 = vmatprep.subr.msk.bf16.mxu1 %vm25656_vm8, %v25646_v34 }
 0x3c0   : > { %17019 = vmatpush3.bf16.msk.msra.mxu0 %vm25653_vm6, %v25646_v34 }
 0x3c1   : > { %17083 = vmatpush3.bf16.msk.msra.mxu1 %vm25656_vm8, %v25646_v34  ;;  %17021 = vmatprep.subr.msk.bf16.mxu0 %vm25655_vm15, %v25646_v34 }
 0x3c2   : > { %17085 = vmatprep.subr.msk.bf16.mxu1 %vm25658_vm9, %v25646_v34 }
 0x3c4   : > { %17023 = vmatpush3.bf16.msk.msra.mxu0 %vm25655_vm15, %v25646_v34 }
 0x3c5   : > { %17087 = vmatpush3.bf16.msk.msra.mxu1 %vm25658_vm9, %v25646_v34  ;;  %17025 = vmatprep.subr.msk.bf16.mxu0 %vm25657_vm5, %v25646_v34 }
 0x3c6   : > { %17089 = vmatprep.subr.msk.bf16.mxu1 %vm25660_vm11, %v25646_v34 }
 0x3c8   : > { %17027 = vmatpush3.bf16.msk.msra.mxu0 %vm25657_vm5, %v25646_v34  ;;  %vm25668_vm5 = vcmask 130048  }
 0x3c9   : > { %17091 = vmatpush3.bf16.msk.msra.mxu1 %vm25660_vm11, %v25646_v34  ;;  %17093 = vmatprep.subr.bf16.mxu0 %v20617_v17  ;;  %vm25669_vm9 = vmmov %vm25668_vm5 }
 0x3ca   : > { %17097 = vmatprep.subr.bf16.mxu1 %v17096_v7  ;;  %vm25670_vm11 = vmmov %vm25668_vm5 }
 0x3cb   : > { %14252 = vmatmul.mubr.f32.vlgmr.msra.gmra.mrb[20].mxu0 %v20608_v37  ;;  %vm25671_vm15 = vmmov %vm25668_vm5 }
 0x3cc   : > { %14322 = vmatmul.mubr.f32.vlgmr.msra.gmra.mrb[20].mxu1 %v20608_v37  ;;  %17095 = vmatpush3.bf16.msra.mxu0 %v20617_v17  ;;  %vm25673_vm8 = vmmov %vm25668_vm5  ;;  %v3307_v37 = vstv %s10990_s25  ;;  %s11003_s25 = sld [smem:[#allocation6 + $0x64]] }
 0x3cd   : > { %17099 = vmatpush3.bf16.msra.mxu1 %v17096_v7  ;;  %17101 = vmatprep.subr.bf16.mxu0 %v20617_v17  ;;  %vm25674_vm6 = vmmov %vm25668_vm5  ;;  %v3309_v8 = vmul.f32 %v3307_v37, %v20586_v25  ;;  %v3308_v36 = vmul.f32 %v3307_v37, %v20592_v10  ;;  %v2691_v25 = vadd.f32 %v20364_v55, %v20350_v15  ;;  %v3323_v10 = vstv %s10994_s20  ;;  %s11210_s20 = sld [smem:[#allocation6 + $0x4f]] }
 0x3ce   : > { %17105 = vmatprep.subr.bf16.mxu1 %v17096_v7  ;;  %14328 = vmatprep.mubr.msk.f32.mxu0 %vm25668_vm5, %v19604_v21 }
 0x3cf   : > { %14335 = vmatprep.mubr.msk.f32.mxu1 %vm25669_vm9, %v19604_v21  ;;  %14329 = vmatmul.mubr.msk.f32.vlgmr.msra.gmra.mrb[22].mxu0 %vm25670_vm11, %v19642_v38  ;;  %vm25676_vm11 = vmmov %vm25668_vm5  ;;  %vm25680_vm9 = vnez %v25574_v9 }
 0x3d0   : > { %14336 = vmatmul.mubr.msk.f32.vlgmr.msra.gmra.mrb[22].mxu1 %vm25671_vm15, %v19642_v38  ;;  %17103 = vmatpush3.bf16.msra.mxu0 %v20617_v17  ;;  %vm25678_vm15 = vnez %v25570_v29  ;;  %v3295_v17 = vstv %s10987_s12  ;;  %s11004_s12 = sld [smem:[#allocation6 + $0x65]] }
 0x3d1   : > { %17107 = vmatpush3.bf16.msra.mxu1 %v17096_v7  ;;  %14342 = vmatprep.mubr.msk.f32.mxu0 %vm25673_vm8, %v25672_v46  ;;  %vm25679_vm8 = vnez %v25556_v4  ;;  %v2690_v7 = vadd.f32 %v20361_v39, %v20347_v63 }
 0x3d2   : > { %14349 = vmatprep.mubr.msk.f32.mxu1 %vm25674_vm6, %v25672_v46  ;;  %17109 = vmatprep.subr.msk.bf16.mxu0 %vm19712_vm3, %v25646_v34  ;;  %vm25677_vm6 = vnez %v25553_v0 }
 0x3d3   : > { %14343 = vmatmul.mubr.msk.f32.vlgmr.msra.gmra.mrb[24].mxu0 %vm25668_vm5, %v25675_v54  ;;  %17173 = vmatprep.subr.msk.bf16.mxu1 %vm25650_vm1, %v25646_v34  ;;  %vm25681_vm5 = vnez %v25559_v6  ;;  %v3332_v51 = vmul.f32 %v3331_v13, %v2690_v7 }
 0x3d4   : > { %14350 = vmatmul.mubr.msk.f32.vlgmr.msra.gmra.mrb[24].mxu1 %vm25676_vm11, %v25675_v54  ;;  %17111 = vmatpush3.bf16.msk.msra.mxu0 %vm19712_vm3, %v25646_v34  ;;  %vm25682_vm11 = vnez %v25659_v19 }
 0x3d5   : > { %17175 = vmatpush3.bf16.msk.msra.mxu1 %vm25650_vm1, %v25646_v34  ;;  %17113 = vmatprep.subr.msk.bf16.mxu0 %vm19915_vm14, %v25646_v34 }
 0x3d6   : > { %17177 = vmatprep.subr.msk.bf16.mxu1 %vm25651_vm10, %v25646_v34 }
 0x3d8   : > { %17115 = vmatpush3.bf16.msk.msra.mxu0 %vm19915_vm14, %v25646_v34 }
 0x3d9   : > { %17179 = vmatpush3.bf16.msk.msra.mxu1 %vm25651_vm10, %v25646_v34  ;;  %17117 = vmatprep.subr.msk.bf16.mxu0 %vm19962_vm7, %v25646_v34 }
 0x3da   : > { %17181 = vmatprep.subr.msk.bf16.mxu1 %vm19975_vm4, %v25646_v34 }
 0x3dc   : > { %17119 = vmatpush3.bf16.msk.msra.mxu0 %vm19962_vm7, %v25646_v34 }
 0x3dd   : > { %17183 = vmatpush3.bf16.msk.msra.mxu1 %vm19975_vm4, %v25646_v34  ;;  %17121 = vmatprep.subr.msk.bf16.mxu0 %vm19999_vm13, %v25646_v34 }
 0x3de   : > { %17185 = vmatprep.subr.msk.bf16.mxu1 %vm20007_vm12, %v25646_v34 }
 0x3e0   : > { %17123 = vmatpush3.bf16.msk.msra.mxu0 %vm19999_vm13, %v25646_v34 }
 0x3e1   : > { %17187 = vmatpush3.bf16.msk.msra.mxu1 %vm20007_vm12, %v25646_v34  ;;  %17125 = vmatprep.subr.msk.bf16.mxu0 %vm25652_vm2, %v25646_v34 }
 0x3e2   : > { %17189 = vmatprep.subr.msk.bf16.mxu1 %vm25654_vm0, %v25646_v34 }
 0x3e4   : > { %17127 = vmatpush3.bf16.msk.msra.mxu0 %vm25652_vm2, %v25646_v34 }
 0x3e5   : > { %17191 = vmatpush3.bf16.msk.msra.mxu1 %vm25654_vm0, %v25646_v34  ;;  %17129 = vmatprep.subr.msk.bf16.mxu0 %vm25677_vm6, %v25646_v34 }
 0x3e6   : > { %17193 = vmatprep.subr.msk.bf16.mxu1 %vm25678_vm15, %v25646_v34 }
 0x3e8   : > { %17131 = vmatpush3.bf16.msk.msra.mxu0 %vm25677_vm6, %v25646_v34 }
 0x3e9   : > { %17195 = vmatpush3.bf16.msk.msra.mxu1 %vm25678_vm15, %v25646_v34  ;;  %17133 = vmatprep.subr.msk.bf16.mxu0 %vm25679_vm8, %v25646_v34 }
 0x3ea   : > { %17197 = vmatprep.subr.msk.bf16.mxu1 %vm25680_vm9, %v25646_v34 }
 0x3ec   : > { %17135 = vmatpush3.bf16.msk.msra.mxu0 %vm25679_vm8, %v25646_v34 }
 0x3ed   : > { %17199 = vmatpush3.bf16.msk.msra.mxu1 %vm25680_vm9, %v25646_v34  ;;  %17137 = vmatprep.subr.msk.bf16.mxu0 %vm25681_vm5, %v25646_v34 }
 0x3ee   : > { %17201 = vmatprep.subr.msk.bf16.mxu1 %vm25682_vm11, %v25646_v34 }
 0x3f0   : > { %17139 = vmatpush3.bf16.msk.msra.mxu0 %vm25681_vm5, %v25646_v34 }
 0x3f1   : > { %17203 = vmatpush3.bf16.msk.msra.mxu1 %vm25682_vm11, %v25646_v34  ;;  %17141 = vmatprep.subr.msk.bf16.mxu0 %vm19712_vm3, %v25646_v34 }
 0x3f2   : > { %17205 = vmatprep.subr.msk.bf16.mxu1 %vm25650_vm1, %v25646_v34 }
 0x41e   : > { %v13973_v5 = vpop.f32.mrb[16].mxu0  ;;  %v14043_v22 = vpop.f32.mrb[16].mxu1 }
 0x41f   : > { %v3297_v43 = vmul.f32 %v13973_v5, %v3295_v17  ;;  %v3301_v2 = vmul.f32 %v13973_v5, %v3299_v44  ;;  %v2531_v42 = vpop.f32.mrb[17].mxu0  ;;  %v2681_v53 = vpop.f32.mrb[17].mxu1  ;;  %v3313_v3 = vmul.f32 %v14043_v22, %v3311_v27 }
 0x420   : > { %v3296_v56 = vmul.f32 %v3295_v17, %v2531_v42  ;;  %v3300_v31 = vmul.f32 %v3299_v44, %v2531_v42  ;;  %v3333_v17 = vmul.f32 %v3331_v13, %v2691_v25  ;;  %v3317_v44 = vmul.f32 %v14043_v22, %v3315_v58 }
 0x421   : > { %v4650_v12 = vadd.f32 %v3305_v11, %v3297_v43  ;;  %v4684_v24 = vadd.f32 %v3309_v8, %v3301_v2  ;;  %v3312_v5 = vmul.f32 %v3311_v27, %v2681_v53  ;;  %v3316_v42 = vmul.f32 %v3315_v58, %v2681_v53 }
 0x422   : > { %v4649_v30 = vadd.f32 %v3304_v26, %v3296_v56  ;;  %v4683_v41 = vadd.f32 %v3308_v36, %v3300_v31  ;;  %v3335_v53 = vstv %s10997_s30  ;;  %v3327_v58 = vstv %s10995_s11  ;;  %s11214_s11 = sld [smem:[#allocation6 + $0x57]]  ;;  %s11211_s30 = sld [smem:[#allocation6 + $0x52]] }
 0x423   : > { %v3343_v13 = vstv %s10999_s14  ;;  %s11220_s14 = sld [smem:[#allocation6 + $0x63]] }
 0x45e   : > { %v14113_v37 = vpop.f32.mrb[18].mxu0 }
 0x45f   : > { %v3321_v11 = vmul.f32 %v14113_v37, %v3319_v16  ;;  %v3325_v8 = vmul.f32 %v14113_v37, %v3323_v10  ;;  %v14183_v43 = vpop.f32.mrb[18].mxu1  ;;  %v2833_v2 = vpop.f32.mrb[19].mxu0  ;;  %v3329_v37 = vmul.f32 %v3327_v58, %v2691_v25 }
 0x460   : > { %v3341_v15 = vmul.f32 %v14183_v43, %v3339_v18  ;;  %v3320_v55 = vmul.f32 %v3319_v16, %v2833_v2  ;;  %v3324_v26 = vmul.f32 %v3323_v10, %v2833_v2  ;;  %v2983_v36 = vpop.f32.mrb[19].mxu1  ;;  %v3351_v16 = vstv %s11001_s8  ;;  %s11213_s8 = sld [smem:[#allocation6 + $0x56]] }
 0x461   : > { %v4652_v56 = vadd.f32 %v3321_v11, %v3313_v3  ;;  %v4686_v31 = vadd.f32 %v3325_v8, %v3317_v44  ;;  %v3340_v57 = vmul.f32 %v3339_v18, %v2983_v36  ;;  %v3355_v10 = vstv %s11002_s13  ;;  %s11219_s13 = sld [smem:[#allocation6 + $0x62]] }
 0x462   : > { %v4688_v59 = vadd.f32 %v3341_v15, %v3333_v17  ;;  %v4651_v63 = vadd.f32 %v3320_v55, %v3312_v5  ;;  %v4685_v39 = vadd.f32 %v3324_v26, %v3316_v42  ;;  %v3347_v18 = vstv %s11000_s22  ;;  %s11215_s22 = sld [smem:[#allocation6 + $0x5a]] }
 0x463   : > { %v4668_v50 = vadd.f32 %v4652_v56, %v4650_v12  ;;  %v4702_v40 = vadd.f32 %v4686_v31, %v4684_v24  ;;  %v4687_v22 = vadd.f32 %v3340_v57, %v3332_v51  ;;  %v3337_v3 = vmul.f32 %v14183_v43, %v3335_v53 }
 0x464   : > { %v4667_v27 = vadd.f32 %v4651_v63, %v4649_v30  ;;  %v4701_v54 = vadd.f32 %v4685_v39, %v4683_v41  ;;  %v3328_v17 = vmul.f32 %v3327_v58, %v2690_v7  ;;  %v3336_v12 = vmul.f32 %v3335_v53, %v2983_v36 }
 0x465   : > { %v3353_v51 = vmul.f32 %v3351_v16, %v20658_v23  ;;  %v3357_v57 = vmul.f32 %v3355_v10, %v20658_v23  ;;  %v3352_v11 = vmul.f32 %v3351_v16, %v20665_v33  ;;  %v3356_v8 = vmul.f32 %v3355_v10, %v20665_v33 }
 0x466   : > { %v4654_v25 = vadd.f32 %v3337_v3, %v3329_v37  ;;  %v4653_v55 = vadd.f32 %v3336_v12, %v3328_v17  ;;  %v3359_v17 = vstv %s11003_s25  ;;  %v3363_v12 = vstv %s11004_s12  ;;  %s11216_s25 = sld [smem:[#allocation6 + $0x5b]]  ;;  %s21833_s12 = sld [smem:[#allocation6 + $0x5e]] }
 0x49e   : > { %v14253_v24 = vpop.f32.mrb[20].mxu0 }
 0x49f   : > { %v3345_v30 = vmul.f32 %v14253_v24, %v3343_v13  ;;  %v3349_v41 = vmul.f32 %v14253_v24, %v3347_v18  ;;  %v21285_v44 = vpop.f32.mrb[20].mxu1  ;;  %v3135_v5 = vpop.f32.mrb[21].mxu0  ;;  %v4586_v24 = vstv %s11207_s23  ;;  %s21835_s23 = sld [smem:[#allocation6 + $0x5f]] }
 0x4a0   : > { %v3344_v2 = vmul.f32 %v3343_v13, %v3135_v5  ;;  %v3348_v42 = vmul.f32 %v3347_v18, %v3135_v5  ;;  %v21289_v43 = vpop.f32.mrb[21].mxu1  ;;  %v3365_v5 = vmul.f32 %v21285_v44, %v3363_v12 }
 0x4a1   : > { %v4656_v7 = vadd.f32 %v3353_v51, %v3345_v30  ;;  %v4690_v15 = vadd.f32 %v3357_v57, %v3349_v41  ;;  %v4590_v51 = vstv %s11208_s5  ;;  %v4578_v57 = vstv %s11205_s10  ;;  %s21837_s5 = sld [smem:[#allocation6 + $0x66]]  ;;  %s21839_s10 = sld [smem:[#allocation6 + $0x67]] }
 0x4a2   : > { %v4655_v26 = vadd.f32 %v3352_v11, %v3344_v2  ;;  %v4689_v36 = vadd.f32 %v3356_v8, %v3348_v42  ;;  %v14330_v23 = vpop.f32.mrb[22].mxu0  ;;  %v4582_v30 = vstv %s11206_s29  ;;  %v3361_v41 = vmul.f32 %v21285_v44, %v3359_v17  ;;  %s21849_s29 = sld [smem:[#allocation6 + $0x68]] }
 0x4a3   : > { %v4670_v56 = vadd.f32 %v4656_v7, %v4654_v25  ;;  %v4704_v31 = vadd.f32 %v4690_v15, %v4688_v59  ;;  %v14337_v63 = vpop.f32.mrb[22].mxu1  ;;  %v3437_v39 = vpop.f32.mrb[23].mxu0  ;;  %v4594_v11 = vstv %s11209_s9  ;;  %v4598_v8 = vstv %s11210_s20  ;;  %s21851_s9 = sld [smem:[#allocation6 + $0x69]]  ;;  %s11429_s20 = sld [smem:[#allocation6 + $0x7a]] }
 0x4a4   : > { %v4669_v53 = vadd.f32 %v4655_v26, %v4653_v55  ;;  %v4703_v58 = vadd.f32 %v4689_v36, %v4687_v22  ;;  %v21291_v16 = vadd.f32 %v14337_v63, %v14330_v23  ;;  %v3512_v33 = vpop.f32.mrb[23].mxu1  ;;  %v3360_v2 = vmul.f32 %v3359_v17, %v21289_v43 }
 0x4a5   : > { %v21293_v10 = vadd.f32 %v4670_v56, %v4668_v50  ;;  %v21295_v13 = vadd.f32 %v4704_v31, %v4702_v40  ;;  %v21297_v18 = vadd.f32 %v3512_v33, %v3437_v39  ;;  %14384 = vmatprep.mubr.f32.mxu0 %v3512_v33  ;;  %14454 = vmatprep.mubr.f32.mxu1 %v3512_v33 }
 0x4a6   : > { %v21299_v3 = vadd.f32 %v4669_v53, %v4667_v27  ;;  %v21301_v37 = vadd.f32 %v4703_v58, %v4701_v54  ;;  %14385 = vmatmul.mubr.f32.vlgmr.msra.gmra.mrb[26].mxu0 %v14337_v63  ;;  %v21303_v59 = vpop.f32.mrb[24].mxu0  ;;  %14455 = vmatmul.mubr.f32.vlgmr.msra.gmra.mrb[26].mxu1 %v14337_v63  ;;  %v3364_v42 = vmul.f32 %v3363_v12, %v21289_v43 }
 0x4a7   : > { %17143 = vmatpush3.bf16.msk.msra.mxu0 %vm19712_vm3, %v25646_v34  ;;  %v21308_v50 = vpop.f32.mrb[24].mxu1  ;;  %v21310_v40 = vpop.f32.mrb[25].mxu0  ;;  %17207 = vmatpush3.bf16.msk.msra.mxu1 %vm25650_vm1, %v25646_v34  ;;  %v4588_v25 = vmul.f32 %v4586_v24, %v21291_v16  ;;  %v4592_v7 = vmul.f32 %v4590_v51, %v21291_v16  ;;  %v4587_v55 = vmul.f32 %v4586_v24, %v21297_v18 }
 0x4a8   : > { %17145 = vmatprep.subr.msk.bf16.mxu0 %vm19915_vm14, %v25646_v34  ;;  %v21320_v54 = vadd.f32 %v21308_v50, %v21303_v59  ;;  %v21322_v22 = vpop.f32.mrb[25].mxu1  ;;  %17209 = vmatprep.subr.msk.bf16.mxu1 %vm25651_vm10, %v25646_v34  ;;  %v4591_v26 = vmul.f32 %v4590_v51, %v21297_v18 }
 0x4a9   : > { %14419 = vmatprep.mubr.f32.mxu0 %v3437_v39  ;;  %v21329_v27 = vadd.f32 %v21322_v22, %v21310_v40  ;;  %14489 = vmatprep.mubr.f32.mxu1 %v3437_v39 }
 0x4ab   : > { %17147 = vmatpush3.bf16.msk.msra.mxu0 %vm19915_vm14, %v25646_v34  ;;  %17211 = vmatpush3.bf16.msk.msra.mxu1 %vm25651_vm10, %v25646_v34 }
 0x4ac   : > { %17149 = vmatprep.subr.msk.bf16.mxu0 %vm19962_vm7, %v25646_v34  ;;  %17213 = vmatprep.subr.msk.bf16.mxu1 %vm19975_vm4, %v25646_v34 }
 0x4af   : > { %17151 = vmatpush3.bf16.msk.msra.mxu0 %vm19962_vm7, %v25646_v34  ;;  %17215 = vmatpush3.bf16.msk.msra.mxu1 %vm19975_vm4, %v25646_v34 }
 0x4b0   : > { %17153 = vmatprep.subr.msk.bf16.mxu0 %vm19999_vm13, %v25646_v34  ;;  %17217 = vmatprep.subr.msk.bf16.mxu1 %vm20007_vm12, %v25646_v34 }
 0x4b3   : > { %17155 = vmatpush3.bf16.msk.msra.mxu0 %vm19999_vm13, %v25646_v34  ;;  %17219 = vmatpush3.bf16.msk.msra.mxu1 %vm20007_vm12, %v25646_v34 }
 0x4b4   : > { %17157 = vmatprep.subr.msk.bf16.mxu0 %vm25652_vm2, %v25646_v34  ;;  %17221 = vmatprep.subr.msk.bf16.mxu1 %vm25654_vm0, %v25646_v34 }
 0x4b7   : > { %17159 = vmatpush3.bf16.msk.msra.mxu0 %vm25652_vm2, %v25646_v34  ;;  %17223 = vmatpush3.bf16.msk.msra.mxu1 %vm25654_vm0, %v25646_v34 }
 0x4b8   : > { %17161 = vmatprep.subr.msk.bf16.mxu0 %vm25677_vm6, %v25646_v34  ;;  %17225 = vmatprep.subr.msk.bf16.mxu1 %vm25678_vm15, %v25646_v34 }
 0x4bb   : > { %17163 = vmatpush3.bf16.msk.msra.mxu0 %vm25677_vm6, %v25646_v34  ;;  %17227 = vmatpush3.bf16.msk.msra.mxu1 %vm25678_vm15, %v25646_v34 }
 0x4bc   : > { %17165 = vmatprep.subr.msk.bf16.mxu0 %vm25679_vm8, %v25646_v34  ;;  %17229 = vmatprep.subr.msk.bf16.mxu1 %vm25680_vm9, %v25646_v34 }
 0x4bf   : > { %17167 = vmatpush3.bf16.msk.msra.mxu0 %vm25679_vm8, %v25646_v34  ;;  %17231 = vmatpush3.bf16.msk.msra.mxu1 %vm25680_vm9, %v25646_v34 }
 0x4c0   : > { %17169 = vmatprep.subr.msk.bf16.mxu0 %vm25681_vm5, %v25646_v34  ;;  %17233 = vmatprep.subr.msk.bf16.mxu1 %vm25682_vm11, %v25646_v34 }
 0x4c3   : > { %17171 = vmatpush3.bf16.msk.msra.mxu0 %vm25681_vm5, %v25646_v34  ;;  %17235 = vmatpush3.bf16.msk.msra.mxu1 %vm25682_vm11, %v25646_v34 }
 0x4c4   : > { %17237 = vmatprep.subr.msk.bf16.mxu0 %vm19712_vm3, %v25646_v34  ;;  %17301 = vmatprep.subr.msk.bf16.mxu1 %vm25650_vm1, %v25646_v34 }
 0x4c6   : > { %14420 = vmatmul.mubr.f32.vlgmr.msra.gmra.mrb[26].mxu0 %v14330_v23  ;;  %14490 = vmatmul.mubr.f32.vlgmr.msra.gmra.mrb[26].mxu1 %v14330_v23 }
 0x4c7   : > { %17239 = vmatpush3.bf16.msk.msra.mxu0 %vm19712_vm3, %v25646_v34  ;;  %14524 = vmatprep.mubr.f32.mxu0 %v21124_v28 }
 0x4c8   : > { %17303 = vmatpush3.bf16.msk.msra.mxu1 %vm25650_vm1, %v25646_v34  ;;  %14594 = vmatprep.mubr.f32.mxu1 %v21124_v28 }
 0x4c9   : > { %17241 = vmatprep.subr.msk.bf16.mxu0 %vm19915_vm14, %v25646_v34  ;;  %17305 = vmatprep.subr.msk.bf16.mxu1 %vm25651_vm10, %v25646_v34 }
 0x4cb   : > { %17243 = vmatpush3.bf16.msk.msra.mxu0 %vm19915_vm14, %v25646_v34 }
 0x4cc   : > { %17307 = vmatpush3.bf16.msk.msra.mxu1 %vm25651_vm10, %v25646_v34  ;;  %17245 = vmatprep.subr.msk.bf16.mxu0 %vm19962_vm7, %v25646_v34 }
 0x4cd   : > { %17309 = vmatprep.subr.msk.bf16.mxu1 %vm19975_vm4, %v25646_v34 }
 0x4cf   : > { %17247 = vmatpush3.bf16.msk.msra.mxu0 %vm19962_vm7, %v25646_v34 }
 0x4d0   : > { %17311 = vmatpush3.bf16.msk.msra.mxu1 %vm19975_vm4, %v25646_v34  ;;  %17249 = vmatprep.subr.msk.bf16.mxu0 %vm19999_vm13, %v25646_v34 }
 0x4d1   : > { %17313 = vmatprep.subr.msk.bf16.mxu1 %vm20007_vm12, %v25646_v34 }
 0x4d3   : > { %17251 = vmatpush3.bf16.msk.msra.mxu0 %vm19999_vm13, %v25646_v34 }
 0x4d4   : > { %17315 = vmatpush3.bf16.msk.msra.mxu1 %vm20007_vm12, %v25646_v34  ;;  %17253 = vmatprep.subr.msk.bf16.mxu0 %vm25652_vm2, %v25646_v34 }
 0x4d5   : > { %17317 = vmatprep.subr.msk.bf16.mxu1 %vm25654_vm0, %v25646_v34 }
 0x4d7   : > { %17255 = vmatpush3.bf16.msk.msra.mxu0 %vm25652_vm2, %v25646_v34 }
 0x4d8   : > { %17319 = vmatpush3.bf16.msk.msra.mxu1 %vm25654_vm0, %v25646_v34  ;;  %17257 = vmatprep.subr.msk.bf16.mxu0 %vm25677_vm6, %v25646_v34 }
 0x4d9   : > { %17321 = vmatprep.subr.msk.bf16.mxu1 %vm25678_vm15, %v25646_v34 }
 0x4db   : > { %17259 = vmatpush3.bf16.msk.msra.mxu0 %vm25677_vm6, %v25646_v34 }
 0x4dc   : > { %17323 = vmatpush3.bf16.msk.msra.mxu1 %vm25678_vm15, %v25646_v34  ;;  %17261 = vmatprep.subr.msk.bf16.mxu0 %vm25679_vm8, %v25646_v34 }
 0x4dd   : > { %17325 = vmatprep.subr.msk.bf16.mxu1 %vm25680_vm9, %v25646_v34 }
 0x4df   : > { %17263 = vmatpush3.bf16.msk.msra.mxu0 %vm25679_vm8, %v25646_v34 }
 0x4e0   : > { %17327 = vmatpush3.bf16.msk.msra.mxu1 %vm25680_vm9, %v25646_v34  ;;  %17265 = vmatprep.subr.msk.bf16.mxu0 %vm25681_vm5, %v25646_v34 }
 0x4e1   : > { %17329 = vmatprep.subr.msk.bf16.mxu1 %vm25682_vm11, %v25646_v34 }
 0x4e3   : > { %17267 = vmatpush3.bf16.msk.msra.mxu0 %vm25681_vm5, %v25646_v34 }
 0x4e4   : > { %17331 = vmatpush3.bf16.msk.msra.mxu1 %vm25682_vm11, %v25646_v34  ;;  %17269 = vmatprep.subr.msk.bf16.mxu0 %vm19712_vm3, %v25646_v34 }
 0x4e5   : > { %17333 = vmatprep.subr.msk.bf16.mxu1 %vm25650_vm1, %v25646_v34 }
 0x4e6   : > { %14525 = vmatmul.mubr.f32.vlgmr.msra.gmra.mrb[28].mxu0 %v21132_v60 }
 0x4e7   : > { %14595 = vmatmul.mubr.f32.vlgmr.msra.gmra.mrb[28].mxu1 %v21132_v60  ;;  %17271 = vmatpush3.bf16.msk.msra.mxu0 %vm19712_vm3, %v25646_v34 }
 0x4e8   : > { %14559 = vmatprep.mubr.f32.mxu0 %v21104_v32  ;;  %17335 = vmatpush3.bf16.msk.msra.mxu1 %vm25650_vm1, %v25646_v34 }
 0x4e9   : > { %14629 = vmatprep.mubr.f32.mxu1 %v21104_v32  ;;  %17273 = vmatprep.subr.msk.bf16.mxu0 %vm19915_vm14, %v25646_v34 }
 0x4ea   : > { %17337 = vmatprep.subr.msk.bf16.mxu1 %vm25651_vm10, %v25646_v34 }
 0x4eb   : > { %17275 = vmatpush3.bf16.msk.msra.mxu0 %vm19915_vm14, %v25646_v34 }
 0x4ec   : > { %17339 = vmatpush3.bf16.msk.msra.mxu1 %vm25651_vm10, %v25646_v34  ;;  %17277 = vmatprep.subr.msk.bf16.mxu0 %vm19962_vm7, %v25646_v34 }
 0x4ed   : > { %17341 = vmatprep.subr.msk.bf16.mxu1 %vm19975_vm4, %v25646_v34 }
 0x4ef   : > { %17279 = vmatpush3.bf16.msk.msra.mxu0 %vm19962_vm7, %v25646_v34 }
 0x4f0   : > { %17343 = vmatpush3.bf16.msk.msra.mxu1 %vm19975_vm4, %v25646_v34  ;;  %17281 = vmatprep.subr.msk.bf16.mxu0 %vm19999_vm13, %v25646_v34 }
 0x4f1   : > { %17345 = vmatprep.subr.msk.bf16.mxu1 %vm20007_vm12, %v25646_v34 }
 0x4f3   : > { %17283 = vmatpush3.bf16.msk.msra.mxu0 %vm19999_vm13, %v25646_v34 }
 0x4f4   : > { %17347 = vmatpush3.bf16.msk.msra.mxu1 %vm20007_vm12, %v25646_v34  ;;  %17285 = vmatprep.subr.msk.bf16.mxu0 %vm25652_vm2, %v25646_v34 }
 0x4f5   : > { %17349 = vmatprep.subr.msk.bf16.mxu1 %vm25654_vm0, %v25646_v34 }
 0x4f7   : > { %17287 = vmatpush3.bf16.msk.msra.mxu0 %vm25652_vm2, %v25646_v34 }
 0x4f8   : > { %17351 = vmatpush3.bf16.msk.msra.mxu1 %vm25654_vm0, %v25646_v34  ;;  %17289 = vmatprep.subr.msk.bf16.mxu0 %vm25677_vm6, %v25646_v34 }
 0x4f9   : > { %17353 = vmatprep.subr.msk.bf16.mxu1 %vm25678_vm15, %v25646_v34 }
 0x4fb   : > { %17291 = vmatpush3.bf16.msk.msra.mxu0 %vm25677_vm6, %v25646_v34 }
 0x4fc   : > { %17355 = vmatpush3.bf16.msk.msra.mxu1 %vm25678_vm15, %v25646_v34  ;;  %17293 = vmatprep.subr.msk.bf16.mxu0 %vm25679_vm8, %v25646_v34 }
 0x4fd   : > { %17357 = vmatprep.subr.msk.bf16.mxu1 %vm25680_vm9, %v25646_v34 }
 0x4ff   : > { %17295 = vmatpush3.bf16.msk.msra.mxu0 %vm25679_vm8, %v25646_v34 }
 0x500   : > { %17359 = vmatpush3.bf16.msk.msra.mxu1 %vm25680_vm9, %v25646_v34  ;;  %17297 = vmatprep.subr.msk.bf16.mxu0 %vm25681_vm5, %v25646_v34 }
 0x501   : > { %17361 = vmatprep.subr.msk.bf16.mxu1 %vm25682_vm11, %v25646_v34 }
 0x503   : > { %17299 = vmatpush3.bf16.msk.msra.mxu0 %vm25681_vm5, %v25646_v34 }
 0x504   : > { %17363 = vmatpush3.bf16.msk.msra.mxu1 %vm25682_vm11, %v25646_v34  ;;  %17365 = vmatprep.subr.msk.bf16.mxu0 %vm19712_vm3, %v25646_v34 }
 0x505   : > { %17429 = vmatprep.subr.msk.bf16.mxu1 %vm25650_vm1, %v25646_v34 }
 0x506   : > { %14560 = vmatmul.mubr.f32.vlgmr.msra.gmra.mrb[28].mxu0 %v21110_v52 }
 0x507   : > { %14630 = vmatmul.mubr.f32.vlgmr.msra.gmra.mrb[28].mxu1 %v21110_v52  ;;  %17367 = vmatpush3.bf16.msk.msra.mxu0 %vm19712_vm3, %v25646_v34 }
 0x508   : > { %17431 = vmatpush3.bf16.msk.msra.mxu1 %vm25650_vm1, %v25646_v34  ;;  %17369 = vmatprep.subr.msk.bf16.mxu0 %vm19915_vm14, %v25646_v34 }
 0x509   : > { %17433 = vmatprep.subr.msk.bf16.mxu1 %vm25651_vm10, %v25646_v34  ;;  %14664 = vmatprep.mubr.f32.mxu0 %v21322_v22 }
 0x50a   : > { %14734 = vmatprep.mubr.f32.mxu1 %v21322_v22 }
 0x50b   : > { %17371 = vmatpush3.bf16.msk.msra.mxu0 %vm19915_vm14, %v25646_v34 }
 0x50c   : > { %17435 = vmatpush3.bf16.msk.msra.mxu1 %vm25651_vm10, %v25646_v34  ;;  %17373 = vmatprep.subr.msk.bf16.mxu0 %vm19962_vm7, %v25646_v34 }
 0x50d   : > { %17437 = vmatprep.subr.msk.bf16.mxu1 %vm19975_vm4, %v25646_v34 }
 0x50f   : > { %17375 = vmatpush3.bf16.msk.msra.mxu0 %vm19962_vm7, %v25646_v34 }
 0x510   : > { %17439 = vmatpush3.bf16.msk.msra.mxu1 %vm19975_vm4, %v25646_v34  ;;  %17377 = vmatprep.subr.msk.bf16.mxu0 %vm19999_vm13, %v25646_v34 }
 0x511   : > { %17441 = vmatprep.subr.msk.bf16.mxu1 %vm20007_vm12, %v25646_v34 }
 0x513   : > { %17379 = vmatpush3.bf16.msk.msra.mxu0 %vm19999_vm13, %v25646_v34 }
 0x514   : > { %17443 = vmatpush3.bf16.msk.msra.mxu1 %vm20007_vm12, %v25646_v34  ;;  %17381 = vmatprep.subr.msk.bf16.mxu0 %vm25652_vm2, %v25646_v34 }
 0x515   : > { %17445 = vmatprep.subr.msk.bf16.mxu1 %vm25654_vm0, %v25646_v34 }
 0x517   : > { %17383 = vmatpush3.bf16.msk.msra.mxu0 %vm25652_vm2, %v25646_v34 }
 0x518   : > { %17447 = vmatpush3.bf16.msk.msra.mxu1 %vm25654_vm0, %v25646_v34  ;;  %17385 = vmatprep.subr.msk.bf16.mxu0 %vm25677_vm6, %v25646_v34 }
 0x519   : > { %17449 = vmatprep.subr.msk.bf16.mxu1 %vm25678_vm15, %v25646_v34 }
 0x51b   : > { %17387 = vmatpush3.bf16.msk.msra.mxu0 %vm25677_vm6, %v25646_v34 }
 0x51c   : > { %17451 = vmatpush3.bf16.msk.msra.mxu1 %vm25678_vm15, %v25646_v34  ;;  %17389 = vmatprep.subr.msk.bf16.mxu0 %vm25679_vm8, %v25646_v34 }
 0x51d   : > { %17453 = vmatprep.subr.msk.bf16.mxu1 %vm25680_vm9, %v25646_v34 }
 0x51f   : > { %17391 = vmatpush3.bf16.msk.msra.mxu0 %vm25679_vm8, %v25646_v34 }
 0x520   : > { %17455 = vmatpush3.bf16.msk.msra.mxu1 %vm25680_vm9, %v25646_v34  ;;  %17393 = vmatprep.subr.msk.bf16.mxu0 %vm25681_vm5, %v25646_v34 }
 0x521   : > { %17457 = vmatprep.subr.msk.bf16.mxu1 %vm25682_vm11, %v25646_v34 }
 0x523   : > { %17395 = vmatpush3.bf16.msk.msra.mxu0 %vm25681_vm5, %v25646_v34 }
 0x524   : > { %17459 = vmatpush3.bf16.msk.msra.mxu1 %vm25682_vm11, %v25646_v34  ;;  %17397 = vmatprep.subr.msk.bf16.mxu0 %vm19712_vm3, %v25646_v34 }
 0x525   : > { %17461 = vmatprep.subr.msk.bf16.mxu1 %vm25650_vm1, %v25646_v34 }
 0x526   : > { %14665 = vmatmul.mubr.f32.vlgmr.msra.gmra.mrb[30].mxu0 %v21308_v50 }
 0x527   : > { %14735 = vmatmul.mubr.f32.vlgmr.msra.gmra.mrb[30].mxu1 %v21308_v50  ;;  %17399 = vmatpush3.bf16.msk.msra.mxu0 %vm19712_vm3, %v25646_v34 }
 0x528   : > { %17463 = vmatpush3.bf16.msk.msra.mxu1 %vm25650_vm1, %v25646_v34  ;;  %17401 = vmatprep.subr.msk.bf16.mxu0 %vm19915_vm14, %v25646_v34 }
 0x529   : > { %17465 = vmatprep.subr.msk.bf16.mxu1 %vm25651_vm10, %v25646_v34  ;;  %14699 = vmatprep.mubr.f32.mxu0 %v21310_v40 }
 0x52a   : > { %14769 = vmatprep.mubr.f32.mxu1 %v21310_v40 }
 0x52b   : > { %17403 = vmatpush3.bf16.msk.msra.mxu0 %vm19915_vm14, %v25646_v34 }
 0x52c   : > { %17467 = vmatpush3.bf16.msk.msra.mxu1 %vm25651_vm10, %v25646_v34  ;;  %17405 = vmatprep.subr.msk.bf16.mxu0 %vm19962_vm7, %v25646_v34 }
 0x52d   : > { %17469 = vmatprep.subr.msk.bf16.mxu1 %vm19975_vm4, %v25646_v34 }
 0x52f   : > { %17407 = vmatpush3.bf16.msk.msra.mxu0 %vm19962_vm7, %v25646_v34 }
 0x530   : > { %17471 = vmatpush3.bf16.msk.msra.mxu1 %vm19975_vm4, %v25646_v34  ;;  %17409 = vmatprep.subr.msk.bf16.mxu0 %vm19999_vm13, %v25646_v34 }
 0x531   : > { %17473 = vmatprep.subr.msk.bf16.mxu1 %vm20007_vm12, %v25646_v34 }
 0x533   : > { %17411 = vmatpush3.bf16.msk.msra.mxu0 %vm19999_vm13, %v25646_v34 }
 0x534   : > { %17475 = vmatpush3.bf16.msk.msra.mxu1 %vm20007_vm12, %v25646_v34  ;;  %17413 = vmatprep.subr.msk.bf16.mxu0 %vm25652_vm2, %v25646_v34 }
 0x535   : > { %17477 = vmatprep.subr.msk.bf16.mxu1 %vm25654_vm0, %v25646_v34 }
 0x537   : > { %17415 = vmatpush3.bf16.msk.msra.mxu0 %vm25652_vm2, %v25646_v34 }
 0x538   : > { %17479 = vmatpush3.bf16.msk.msra.mxu1 %vm25654_vm0, %v25646_v34  ;;  %17417 = vmatprep.subr.msk.bf16.mxu0 %vm25677_vm6, %v25646_v34 }
 0x539   : > { %17481 = vmatprep.subr.msk.bf16.mxu1 %vm25678_vm15, %v25646_v34 }
 0x53b   : > { %17419 = vmatpush3.bf16.msk.msra.mxu0 %vm25677_vm6, %v25646_v34 }
 0x53c   : > { %17483 = vmatpush3.bf16.msk.msra.mxu1 %vm25678_vm15, %v25646_v34  ;;  %17421 = vmatprep.subr.msk.bf16.mxu0 %vm25679_vm8, %v25646_v34 }
 0x53d   : > { %17485 = vmatprep.subr.msk.bf16.mxu1 %vm25680_vm9, %v25646_v34 }
 0x53f   : > { %17423 = vmatpush3.bf16.msk.msra.mxu0 %vm25679_vm8, %v25646_v34 }
 0x540   : > { %17487 = vmatpush3.bf16.msk.msra.mxu1 %vm25680_vm9, %v25646_v34  ;;  %17425 = vmatprep.subr.msk.bf16.mxu0 %vm25681_vm5, %v25646_v34  ;;  %vm25683_vm9 = vcmask 130048  }
 0x541   : > { %17489 = vmatprep.subr.msk.bf16.mxu1 %vm25682_vm11, %v25646_v34  ;;  %vm25684_vm15 = vmmov %vm25683_vm9 }
 0x543   : > { %17427 = vmatpush3.bf16.msk.msra.mxu0 %vm25681_vm5, %v25646_v34 }
 0x544   : > { %17491 = vmatpush3.bf16.msk.msra.mxu1 %vm25682_vm11, %v25646_v34  ;;  %vm25687_vm11 = vmmov %vm25683_vm9 }
 0x546   : > { %14700 = vmatmul.mubr.f32.vlgmr.msra.gmra.mrb[30].mxu0 %v21303_v59 }
 0x547   : > { %14770 = vmatmul.mubr.f32.vlgmr.msra.gmra.mrb[30].mxu1 %v21303_v59  ;;  %14776 = vmatprep.mubr.msk.f32.mxu0 %vm25683_vm9, %v19604_v21 }
 0x548   : > { %14783 = vmatprep.mubr.msk.f32.mxu1 %vm25684_vm15, %v19604_v21  ;;  %vm25685_vm15 = vmmov %vm25683_vm9 }
 0x599   : > { %v14421_v15 = vpop.f32.mrb[26].mxu0  ;;  %v14491_v56 = vpop.f32.mrb[26].mxu1 }
 0x59a   : > { %v4580_v36 = vmul.f32 %v14421_v15, %v4578_v57  ;;  %v4584_v23 = vmul.f32 %v14421_v15, %v4582_v30  ;;  %v3814_v31 = vpop.f32.mrb[27].mxu0  ;;  %v4596_v44 = vmul.f32 %v14491_v56, %v4594_v11  ;;  %v4600_v63 = vmul.f32 %v14491_v56, %v4598_v8  ;;  %v3964_v58 = vpop.f32.mrb[27].mxu1 }
 0x59b   : > { %v4579_v39 = vmul.f32 %v4578_v57, %v3814_v31  ;;  %v4583_v53 = vmul.f32 %v4582_v30, %v3814_v31  ;;  %v4595_v59 = vmul.f32 %v4594_v11, %v3964_v58  ;;  %v4599_v50 = vmul.f32 %v4598_v8, %v3964_v58 }
 0x59c   : > { %v4658_v33 = vadd.f32 %v4580_v36, %v3361_v41  ;;  %v4692_v43 = vadd.f32 %v4584_v23, %v3365_v5  ;;  %v4660_v40 = vadd.f32 %v4596_v44, %v4588_v25  ;;  %v4694_v16 = vadd.f32 %v4600_v63, %v4592_v7 }
 0x59d   : > { %v4657_v22 = vadd.f32 %v4579_v39, %v3360_v2  ;;  %v4691_v17 = vadd.f32 %v4583_v53, %v3364_v42  ;;  %v4659_v12 = vadd.f32 %v4595_v59, %v4587_v55  ;;  %v4693_v24 = vadd.f32 %v4599_v50, %v4591_v26 }
 0x59e   : > { %v21821_v18 = vadd.f32 %v4660_v40, %v4658_v33  ;;  %v21823_v51 = vadd.f32 %v4694_v16, %v4692_v43  ;;  %v3974_v57 = vadd.f32 %v21132_v60, %v21110_v52  ;;  %v4606_v30 = vstv %s11212_s26  ;;  %s11430_s26 = sld [smem:[#allocation6 + $0x7b]] }
 0x59f   : > { %v21825_v15 = vadd.f32 %v4659_v12, %v4657_v22  ;;  %v21827_v56 = vadd.f32 %v4693_v24, %v4691_v17  ;;  %v4614_v41 = vstv %s11214_s11  ;;  %v3973_v5 = vadd.f32 %v21124_v28, %v21104_v32  ;;  %s11431_s11 = sld [smem:[#allocation6 + $0x7c]] }
 0x5a0   : > { %v4616_v2 = vmul.f32 %v4614_v41, %v3974_v57  ;;  %v4602_v32 = vstv %s11211_s30  ;;  %v4610_v52 = vstv %s11213_s8  ;;  %v4634_v28 = vstv %s11219_s13  ;;  %s11432_s30 = sld [smem:[#allocation6 + $0x7d]]  ;;  %s22651_s8 = sld [smem:[#allocation6 + $0x6a]] }
 0x5a1   : > { %v4615_v55 = vmul.f32 %v4614_v41, %v3973_v5  ;;  %v4638_v60 = vstv %s11220_s14  ;;  %v4612_v44 = vmul.f32 %v4610_v52, %v3974_v57  ;;  %v4618_v63 = vstv %s11215_s22  ;;  %s22653_s13 = sld [smem:[#allocation6 + $0x6b]]  ;;  %s22655_s14 = sld [smem:[#allocation6 + $0x6c]] }
 0x5a2   : > { %v4622_v39 = vstv %s11216_s25  ;;  %v4611_v58 = vmul.f32 %v4610_v52, %v3973_v5  ;;  %v4636_v33 = vmul.f32 %v4634_v28, %v21320_v54  ;;  %v4640_v43 = vmul.f32 %v4638_v60, %v21320_v54  ;;  %s22657_s22 = sld [smem:[#allocation6 + $0x6d]]  ;;  %s22671_s25 = sld [smem:[#allocation6 + $0x8a]] }
 0x5a3   : > { %v4626_v59 = vstv %s21833_s12  ;;  %v4630_v50 = vstv %s21835_s23  ;;  %v4635_v40 = vmul.f32 %v4634_v28, %v21329_v27  ;;  %v4639_v16 = vmul.f32 %v4638_v60, %v21329_v27  ;;  %s22673_s12 = sld [smem:[#allocation6 + $0x8b]]  ;;  %s22675_s23 = sld [smem:[#allocation6 + $0x8c]] }
 0x5a4   : > { %v4642_v22 = vstv %s21837_s5  ;;  %v4646_v17 = vstv %s21839_s10  ;;  %s22677_s5 = sld [smem:[#allocation6 + $0x8d]]  ;;  %s22679_s10 = sld [smem:[#allocation6 + $0x9a]] }
 0x5d9   : > { %v14561_v11 = vpop.f32.mrb[28].mxu0 }
 0x5da   : > { %v4608_v8 = vmul.f32 %v14561_v11, %v4606_v30  ;;  %v14631_v42 = vpop.f32.mrb[28].mxu1  ;;  %v4116_v25 = vpop.f32.mrb[29].mxu0  ;;  %v4604_v31 = vmul.f32 %v14561_v11, %v4602_v32 }
 0x5db   : > { %v4607_v7 = vmul.f32 %v4606_v30, %v4116_v25  ;;  %v4266_v26 = vpop.f32.mrb[29].mxu1  ;;  %v4603_v53 = vmul.f32 %v4602_v32, %v4116_v25  ;;  %v4620_v24 = vmul.f32 %v14631_v42, %v4618_v63  ;;  %v4624_v30 = vmul.f32 %v14631_v42, %v4622_v39 }
 0x5dc   : > { %v4696_v36 = vadd.f32 %v4616_v2, %v4608_v8  ;;  %v4662_v12 = vadd.f32 %v4612_v44, %v4604_v31  ;;  %v4619_v57 = vmul.f32 %v4618_v63, %v4266_v26  ;;  %v4623_v8 = vmul.f32 %v4622_v39, %v4266_v26 }
 0x5dd   : > { %v4695_v23 = vadd.f32 %v4615_v55, %v4607_v7  ;;  %v4661_v11 = vadd.f32 %v4611_v58, %v4603_v53 }
 0x619   : > { %v14701_v41 = vpop.f32.mrb[30].mxu0 }
 0x61a   : > { %v4628_v5 = vmul.f32 %v14701_v41, %v4626_v59  ;;  %v4632_v2 = vmul.f32 %v14701_v41, %v4630_v50  ;;  %v14771_v25 = vpop.f32.mrb[30].mxu1  ;;  %v4418_v7 = vpop.f32.mrb[31].mxu0 }
 0x61b   : > { %v4644_v54 = vmul.f32 %v14771_v25, %v4642_v22  ;;  %v4648_v55 = vmul.f32 %v14771_v25, %v4646_v17  ;;  %v4627_v27 = vmul.f32 %v4626_v59, %v4418_v7  ;;  %v4631_v32 = vmul.f32 %v4630_v50, %v4418_v7  ;;  %v4568_v52 = vpop.f32.mrb[31].mxu1 }
 0x61c   : > { %v4664_v28 = vadd.f32 %v4628_v5, %v4620_v24  ;;  %v4698_v60 = vadd.f32 %v4632_v2, %v4624_v30  ;;  %v4643_v42 = vmul.f32 %v4642_v22, %v4568_v52  ;;  %v4647_v31 = vmul.f32 %v4646_v17, %v4568_v52 }
 0x61d   : > { %v4666_v44 = vadd.f32 %v4644_v54, %v4636_v33  ;;  %v4700_v26 = vadd.f32 %v4648_v55, %v4640_v43  ;;  %v4663_v63 = vadd.f32 %v4627_v27, %v4619_v57  ;;  %v4697_v39 = vadd.f32 %v4631_v32, %v4623_v8  ;;  %v25686_v54 = vld [vmem:[#allocation16_spill] sm:$0xff] }
 0x61e   : > { %v4674_v53 = vadd.f32 %v4664_v28, %v4662_v12  ;;  %v4708_v58 = vadd.f32 %v4698_v60, %v4696_v36  ;;  %v4665_v41 = vadd.f32 %v4643_v42, %v4635_v40  ;;  %v4699_v25 = vadd.f32 %v4647_v31, %v4639_v16  ;;  %v25692_v55 = vld [vmem:[#allocation24_spill] sm:$0xff] }
 0x61f   : > { %v4673_v21 = vadd.f32 %v4663_v63, %v4661_v11  ;;  %v4707_v19 = vadd.f32 %v4697_v39, %v4695_v23  ;;  %v4718_v17 = vstv %s21849_s29  ;;  %v4724_v30 = vstv %s21851_s9  ;;  %s22681_s29 = sld [smem:[#allocation6 + $0x9b]]  ;;  %s22683_s9 = sld [smem:[#allocation6 + $0x9c]] }
 0x620   : > { %v4678_v59 = vadd.f32 %v4674_v53, %v21821_v18  ;;  %v4712_v50 = vadd.f32 %v4708_v58, %v21823_v51 }
 0x621   : > { %v4677_v24 = vadd.f32 %v4673_v21, %v21825_v15  ;;  %v4711_v22 = vadd.f32 %v4707_v19, %v21827_v56 }
 0x622   : > { %v4680_v33 = vadd.f32 %v4678_v59, %v21293_v10  ;;  %v4714_v43 = vadd.f32 %v4712_v50, %v21295_v13 }
 0x623   : > { %v4679_v36 = vadd.f32 %v4677_v24, %v21299_v3  ;;  %v4713_v40 = vadd.f32 %v4711_v22, %v21301_v37  ;;  %v25698_v24 = vld [vmem:[#allocation13_spill] sm:$0xff]  ;;  %v5957_v22 = vstv %s11429_s20  ;;  %s22685_s20 = sld [smem:[#allocation6 + $0x9d]] }
 0x624   : > { %v4682_v16 = vadd.f32 %v4680_v33, %v4666_v44  ;;  %v4716_v23 = vadd.f32 %v4714_v43, %v4700_v26  ;;  %v5961_v33 = vstv %s11430_s26  ;;  %v5965_v43 = vstv %s11431_s11  ;;  %s22715_s26 = sld [smem:[#allocation6 + $0xaa]]  ;;  %s22717_s11 = sld [smem:[#allocation6 + $0xab]] }
 0x625   : > { %v4681_v12 = vadd.f32 %v4679_v36, %v4665_v41  ;;  %v4715_v18 = vadd.f32 %v4713_v40, %v4699_v25  ;;  %v5945_v36 = vstv %s22653_s13  ;;  %v5949_v40 = vstv %s22655_s14  ;;  %s22723_s13 = sld [smem:[#allocation6 + $0xda]]  ;;  %s22725_s14 = sld [smem:[#allocation6 + $0xdb]] }
 0x626   : > { %v4720_v57 = vadd.f32 %v4718_v17, %v4682_v16  ;;  %v21863_v51 = vadd.f32 %v4724_v30, %v4716_v23  ;;  %v5953_v16 = vstv %s22657_s22  ;;  %s22727_s22 = sld [smem:[#allocation6 + $0xdc]] }
 0x627   : > { %v4719_v21 = vadd.f32 %v4718_v17, %v4681_v12  ;;  %v21865_v15 = vadd.f32 %v4724_v30, %v4715_v18  ;;  %v5969_v17 = vstv %s11432_s30  ;;  %v5941_v30 = vstv %s22651_s8  ;;  %s22719_s30 = sld [smem:[#allocation6 + $0xac]]  ;;  %s22721_s8 = sld [smem:[#allocation6 + $0xad]] }
 0x628   : > { %v4722_v19 = vmax.f32 %v4720_v57, 0.0  ;;  %v4728_v10 = vmax.f32 %v21863_v51, 0.0 }
 0x629   : > { %v4721_v13 = vmax.f32 %v4719_v21, 0.0  ;;  %v4727_v56 = vmax.f32 %v21865_v15, 0.0 }
 0x62b   : > { %v4729_v11 = vpack.c.bf16 %v4722_v19, %v4721_v13  ;;  %v21873_v3 = vpack.c.bf16 %v4728_v10, %v4727_v56 }
 0x62d   : > { %v21875_v37 = vunpack.c.l.bf16 %v4729_v11  ;;  %17493 = vmatprep.subr.bf16.mxu0 %v4729_v11  ;;  %v21877_v8 = vunpack.c.h.bf16 %v4729_v11  ;;  %v22480_v58 = vunpack.c.l.bf16 %v21873_v3  ;;  %v22486_v41 = vunpack.c.h.bf16 %v21873_v3 }
 0x62e   : > { %17495 = vmatpush3.bf16.msra.mxu0 %v4729_v11 }
 0x62f   : > { %v21880_v5 = vsub.f32 %v4721_v13, %v21875_v37  ;;  %17501 = vmatprep.subr.bf16.mxu0 %v4729_v11  ;;  %v21883_v2 = vsub.f32 %v4722_v19, %v21877_v8  ;;  %25694 = vst [vmem:[#allocation34_spill] sm:$0xff] %v22480_v58  ;;  %25695 = vst [vmem:[#allocation38_spill] sm:$0xff] %v22486_v41  ;;  %v22500_v25 = vsub.f32 %v4727_v56, %v22480_v58 }
 0x630   : > { %v22508_v59 = vsub.f32 %v4728_v10, %v22486_v41 }
 0x631   : > { %14777 = vmatmul.mubr.msk.f32.vlgmr.msra.gmra.mrb[32].mxu0 %vm25685_vm15, %v19642_v38  ;;  %v17496_v7 = vpack.c.bf16 %v21883_v2, %v21880_v5  ;;  %vm25688_vm15 = vmmov %vm25683_vm9  ;;  %25696 = vst [vmem:[#allocation39_spill] sm:$0xff] %v22500_v25 }
 0x632   : > { %17503 = vmatpush3.bf16.msra.mxu0 %v4729_v11  ;;  %14790 = vmatprep.mubr.msk.f32.mxu0 %vm25683_vm9, %v25672_v46  ;;  %25697 = vst [vmem:[#allocation40_spill] sm:$0xff] %v22508_v59  ;;  %v17896_v50 = vpack.c.bf16 %v22508_v59, %v22500_v25 }
 0x633   : > { %17497 = vmatprep.subr.bf16.mxu1 %v17496_v7  ;;  %17509 = vmatprep.subr.msk.bf16.mxu0 %vm19712_vm3, %v25646_v34 }
 0x634   : > { %17499 = vmatpush3.bf16.msra.mxu1 %v17496_v7 }
 0x635   : > { %17505 = vmatprep.subr.bf16.mxu1 %v17496_v7  ;;  %14791 = vmatmul.mubr.msk.f32.vlgmr.msra.gmra.mrb[34].mxu0 %vm25687_vm11, %v25686_v54  ;;  %vm25689_vm11 = vmmov %vm25683_vm9 }
 0x636   : > { %17511 = vmatpush3.bf16.msk.msra.mxu0 %vm19712_vm3, %v25646_v34 }
 0x637   : > { %14784 = vmatmul.mubr.msk.f32.vlgmr.msra.gmra.mrb[32].mxu1 %vm25688_vm15, %v19642_v38  ;;  %17513 = vmatprep.subr.msk.bf16.mxu0 %vm19915_vm14, %v25646_v34  ;;  %vm25690_vm15 = vnez %v25570_v29 }
 0x638   : > { %17507 = vmatpush3.bf16.msra.mxu1 %v17496_v7  ;;  %14797 = vmatprep.mubr.msk.f32.mxu1 %vm25683_vm9, %v25672_v46  ;;  %vm25691_vm9 = vnez %v25574_v9 }
 0x639   : > { %17573 = vmatprep.subr.msk.bf16.mxu1 %vm25650_vm1, %v25646_v34 }
 0x63a   : > { %17515 = vmatpush3.bf16.msk.msra.mxu0 %vm19915_vm14, %v25646_v34 }
 0x63b   : > { %14798 = vmatmul.mubr.msk.f32.vlgmr.msra.gmra.mrb[34].mxu1 %vm25689_vm11, %v25686_v54  ;;  %17517 = vmatprep.subr.msk.bf16.mxu0 %vm19962_vm7, %v25646_v34  ;;  %vm25693_vm11 = vnez %v25692_v55 }
 0x63c   : > { %17575 = vmatpush3.bf16.msk.msra.mxu1 %vm25650_vm1, %v25646_v34 }
 0x63d   : > { %17577 = vmatprep.subr.msk.bf16.mxu1 %vm25651_vm10, %v25646_v34 }
 0x63e   : > { %17519 = vmatpush3.bf16.msk.msra.mxu0 %vm19962_vm7, %v25646_v34 }
 0x63f   : > { %17521 = vmatprep.subr.msk.bf16.mxu0 %vm19999_vm13, %v25646_v34 }
 0x640   : > { %17579 = vmatpush3.bf16.msk.msra.mxu1 %vm25651_vm10, %v25646_v34 }
 0x641   : > { %17581 = vmatprep.subr.msk.bf16.mxu1 %vm19975_vm4, %v25646_v34 }
 0x642   : > { %17523 = vmatpush3.bf16.msk.msra.mxu0 %vm19999_vm13, %v25646_v34 }
 0x643   : > { %17525 = vmatprep.subr.msk.bf16.mxu0 %vm25652_vm2, %v25646_v34 }
 0x644   : > { %17583 = vmatpush3.bf16.msk.msra.mxu1 %vm19975_vm4, %v25646_v34 }
 0x645   : > { %17585 = vmatprep.subr.msk.bf16.mxu1 %vm20007_vm12, %v25646_v34 }
 0x646   : > { %17527 = vmatpush3.bf16.msk.msra.mxu0 %vm25652_vm2, %v25646_v34 }
 0x647   : > { %17529 = vmatprep.subr.msk.bf16.mxu0 %vm25677_vm6, %v25646_v34 }
 0x648   : > { %17587 = vmatpush3.bf16.msk.msra.mxu1 %vm20007_vm12, %v25646_v34 }
 0x649   : > { %17589 = vmatprep.subr.msk.bf16.mxu1 %vm25654_vm0, %v25646_v34 }
 0x64a   : > { %17531 = vmatpush3.bf16.msk.msra.mxu0 %vm25677_vm6, %v25646_v34 }
 0x64b   : > { %17533 = vmatprep.subr.msk.bf16.mxu0 %vm25679_vm8, %v25646_v34 }
 0x64c   : > { %17591 = vmatpush3.bf16.msk.msra.mxu1 %vm25654_vm0, %v25646_v34 }
 0x64d   : > { %17593 = vmatprep.subr.msk.bf16.mxu1 %vm25690_vm15, %v25646_v34 }
 0x64e   : > { %17535 = vmatpush3.bf16.msk.msra.mxu0 %vm25679_vm8, %v25646_v34 }
 0x64f   : > { %17537 = vmatprep.subr.msk.bf16.mxu0 %vm25681_vm5, %v25646_v34 }
 0x650   : > { %17595 = vmatpush3.bf16.msk.msra.mxu1 %vm25690_vm15, %v25646_v34 }
 0x651   : > { %17597 = vmatprep.subr.msk.bf16.mxu1 %vm25691_vm9, %v25646_v34 }
 0x652   : > { %17539 = vmatpush3.bf16.msk.msra.mxu0 %vm25681_vm5, %v25646_v34 }
 0x653   : > { %17541 = vmatprep.subr.msk.bf16.mxu0 %vm19712_vm3, %v25646_v34 }
 0x654   : > { %17599 = vmatpush3.bf16.msk.msra.mxu1 %vm25691_vm9, %v25646_v34 }
 0x655   : > { %17601 = vmatprep.subr.msk.bf16.mxu1 %vm25693_vm11, %v25646_v34 }
 0x658   : > { %17603 = vmatpush3.bf16.msk.msra.mxu1 %vm25693_vm11, %v25646_v34 }
 0x659   : > { %17605 = vmatprep.subr.msk.bf16.mxu1 %vm25650_vm1, %v25646_v34 }
 0x704   : > { %v14778_v27 = vpop.f32.mrb[32].mxu0 }
 0x705   : > { %v4800_v32 = vpop.f32.mrb[33].mxu0 }
 0x708   : > { %v22001_v52 = vpop.f32.mrb[34].mxu0 }
 0x709   : > { %v22005_v31 = vpop.f32.mrb[35].mxu0 }
 0x70a   : > { %v14785_v28 = vpop.f32.mrb[32].mxu1 }
 0x70b   : > { %v22003_v60 = vadd.f32 %v14785_v28, %v14778_v27  ;;  %v4875_v42 = vpop.f32.mrb[33].mxu1 }
 0x70c   : > { %v22007_v44 = vadd.f32 %v4875_v42, %v4800_v32  ;;  %14832 = vmatprep.mubr.f32.mxu0 %v4875_v42  ;;  %14902 = vmatprep.mubr.f32.mxu1 %v4875_v42 }
 0x70d   : > { %14833 = vmatmul.mubr.f32.vlgmr.msra.gmra.mrb[36].mxu0 %v14785_v28  ;;  %14903 = vmatmul.mubr.f32.vlgmr.msra.gmra.mrb[36].mxu1 %v14785_v28  ;;  %v5959_v12 = vmul.f32 %v5957_v22, %v22003_v60  ;;  %v5963_v18 = vmul.f32 %v5961_v33, %v22003_v60  ;;  %v5967_v57 = vmul.f32 %v5965_v43, %v22003_v60 }
 0x70e   : > { %17543 = vmatpush3.bf16.msk.msra.mxu0 %vm19712_vm3, %v25646_v34  ;;  %17607 = vmatpush3.bf16.msk.msra.mxu1 %vm25650_vm1, %v25646_v34  ;;  %v22015_v26 = vpop.f32.mrb[34].mxu1  ;;  %v5971_v51 = vmul.f32 %v5969_v17, %v22003_v60  ;;  %v5962_v7 = vmul.f32 %v5961_v33, %v22007_v44  ;;  %v5981_v33 = vstv %s22675_s23  ;;  %s22733_s23 = sld [smem:[#allocation6 + $0xbb]] }
 0x70f   : > { %17545 = vmatprep.subr.msk.bf16.mxu0 %vm19915_vm14, %v25646_v34  ;;  %17609 = vmatprep.subr.msk.bf16.mxu1 %vm25651_vm10, %v25646_v34  ;;  %v22025_v63 = vadd.f32 %v22015_v26, %v22001_v52  ;;  %v22027_v39 = vpop.f32.mrb[35].mxu1 }
 0x710   : > { %14867 = vmatprep.mubr.f32.mxu0 %v4800_v32  ;;  %14937 = vmatprep.mubr.f32.mxu1 %v4800_v32  ;;  %v22031_v53 = vadd.f32 %v22027_v39, %v22005_v31  ;;  %v5970_v32 = vmul.f32 %v5969_v17, %v22007_v44  ;;  %v5989_v17 = vstv %s22679_s10  ;;  %s22737_s10 = sld [smem:[#allocation6 + $0xbd]] }
 0x712   : > { %17547 = vmatpush3.bf16.msk.msra.mxu0 %vm19915_vm14, %v25646_v34  ;;  %17611 = vmatpush3.bf16.msk.msra.mxu1 %vm25651_vm10, %v25646_v34 }
 0x713   : > { %17549 = vmatprep.subr.msk.bf16.mxu0 %vm19962_vm7, %v25646_v34  ;;  %17613 = vmatprep.subr.msk.bf16.mxu1 %vm19975_vm4, %v25646_v34 }
 0x716   : > { %17551 = vmatpush3.bf16.msk.msra.mxu0 %vm19962_vm7, %v25646_v34  ;;  %17615 = vmatpush3.bf16.msk.msra.mxu1 %vm19975_vm4, %v25646_v34 }
 0x717   : > { %17553 = vmatprep.subr.msk.bf16.mxu0 %vm19999_vm13, %v25646_v34  ;;  %17617 = vmatprep.subr.msk.bf16.mxu1 %vm20007_vm12, %v25646_v34 }
 0x71a   : > { %17555 = vmatpush3.bf16.msk.msra.mxu0 %vm19999_vm13, %v25646_v34  ;;  %17619 = vmatpush3.bf16.msk.msra.mxu1 %vm20007_vm12, %v25646_v34 }
 0x71b   : > { %17557 = vmatprep.subr.msk.bf16.mxu0 %vm25652_vm2, %v25646_v34  ;;  %17621 = vmatprep.subr.msk.bf16.mxu1 %vm25654_vm0, %v25646_v34 }
 0x71e   : > { %17559 = vmatpush3.bf16.msk.msra.mxu0 %vm25652_vm2, %v25646_v34  ;;  %17623 = vmatpush3.bf16.msk.msra.mxu1 %vm25654_vm0, %v25646_v34 }
 0x71f   : > { %17561 = vmatprep.subr.msk.bf16.mxu0 %vm25677_vm6, %v25646_v34  ;;  %17625 = vmatprep.subr.msk.bf16.mxu1 %vm25690_vm15, %v25646_v34 }
 0x722   : > { %17563 = vmatpush3.bf16.msk.msra.mxu0 %vm25677_vm6, %v25646_v34  ;;  %17627 = vmatpush3.bf16.msk.msra.mxu1 %vm25690_vm15, %v25646_v34 }
 0x723   : > { %17565 = vmatprep.subr.msk.bf16.mxu0 %vm25679_vm8, %v25646_v34  ;;  %17629 = vmatprep.subr.msk.bf16.mxu1 %vm25691_vm9, %v25646_v34 }
 0x726   : > { %17567 = vmatpush3.bf16.msk.msra.mxu0 %vm25679_vm8, %v25646_v34  ;;  %17631 = vmatpush3.bf16.msk.msra.mxu1 %vm25691_vm9, %v25646_v34 }
 0x727   : > { %17569 = vmatprep.subr.msk.bf16.mxu0 %vm25681_vm5, %v25646_v34  ;;  %17633 = vmatprep.subr.msk.bf16.mxu1 %vm25693_vm11, %v25646_v34 }
 0x72a   : > { %17571 = vmatpush3.bf16.msk.msra.mxu0 %vm25681_vm5, %v25646_v34  ;;  %17635 = vmatpush3.bf16.msk.msra.mxu1 %vm25693_vm11, %v25646_v34 }
 0x72b   : > { %17637 = vmatprep.subr.msk.bf16.mxu0 %vm19712_vm3, %v25646_v34  ;;  %17701 = vmatprep.subr.msk.bf16.mxu1 %vm25650_vm1, %v25646_v34 }
 0x72d   : > { %14868 = vmatmul.mubr.f32.vlgmr.msra.gmra.mrb[36].mxu0 %v14778_v27  ;;  %14938 = vmatmul.mubr.f32.vlgmr.msra.gmra.mrb[36].mxu1 %v14778_v27  ;;  %v5966_v27 = vmul.f32 %v5965_v43, %v22007_v44  ;;  %v5985_v43 = vstv %s22677_s5  ;;  %s22735_s5 = sld [smem:[#allocation6 + $0xbc]] }
 0x72e   : > { %17639 = vmatpush3.bf16.msk.msra.mxu0 %vm19712_vm3, %v25646_v34  ;;  %14972 = vmatprep.mubr.f32.mxu0 %v21880_v5 }
 0x72f   : > { %17703 = vmatpush3.bf16.msk.msra.mxu1 %vm25650_vm1, %v25646_v34  ;;  %15042 = vmatprep.mubr.f32.mxu1 %v21880_v5 }
 0x730   : > { %17641 = vmatprep.subr.msk.bf16.mxu0 %vm19915_vm14, %v25646_v34  ;;  %17705 = vmatprep.subr.msk.bf16.mxu1 %vm25651_vm10, %v25646_v34 }
 0x732   : > { %17643 = vmatpush3.bf16.msk.msra.mxu0 %vm19915_vm14, %v25646_v34 }
 0x733   : > { %17707 = vmatpush3.bf16.msk.msra.mxu1 %vm25651_vm10, %v25646_v34  ;;  %17645 = vmatprep.subr.msk.bf16.mxu0 %vm19962_vm7, %v25646_v34 }
 0x734   : > { %17709 = vmatprep.subr.msk.bf16.mxu1 %vm19975_vm4, %v25646_v34 }
 0x736   : > { %17647 = vmatpush3.bf16.msk.msra.mxu0 %vm19962_vm7, %v25646_v34 }
 0x737   : > { %17711 = vmatpush3.bf16.msk.msra.mxu1 %vm19975_vm4, %v25646_v34  ;;  %17649 = vmatprep.subr.msk.bf16.mxu0 %vm19999_vm13, %v25646_v34 }
 0x738   : > { %17713 = vmatprep.subr.msk.bf16.mxu1 %vm20007_vm12, %v25646_v34 }
 0x73a   : > { %17651 = vmatpush3.bf16.msk.msra.mxu0 %vm19999_vm13, %v25646_v34 }
 0x73b   : > { %17715 = vmatpush3.bf16.msk.msra.mxu1 %vm20007_vm12, %v25646_v34  ;;  %17653 = vmatprep.subr.msk.bf16.mxu0 %vm25652_vm2, %v25646_v34 }
 0x73c   : > { %17717 = vmatprep.subr.msk.bf16.mxu1 %vm25654_vm0, %v25646_v34 }
 0x73e   : > { %17655 = vmatpush3.bf16.msk.msra.mxu0 %vm25652_vm2, %v25646_v34 }
 0x73f   : > { %17719 = vmatpush3.bf16.msk.msra.mxu1 %vm25654_vm0, %v25646_v34  ;;  %17657 = vmatprep.subr.msk.bf16.mxu0 %vm25677_vm6, %v25646_v34 }
 0x740   : > { %17721 = vmatprep.subr.msk.bf16.mxu1 %vm25690_vm15, %v25646_v34 }
 0x742   : > { %17659 = vmatpush3.bf16.msk.msra.mxu0 %vm25677_vm6, %v25646_v34 }
 0x743   : > { %17723 = vmatpush3.bf16.msk.msra.mxu1 %vm25690_vm15, %v25646_v34  ;;  %17661 = vmatprep.subr.msk.bf16.mxu0 %vm25679_vm8, %v25646_v34 }
 0x744   : > { %17725 = vmatprep.subr.msk.bf16.mxu1 %vm25691_vm9, %v25646_v34 }
 0x746   : > { %17663 = vmatpush3.bf16.msk.msra.mxu0 %vm25679_vm8, %v25646_v34 }
 0x747   : > { %17727 = vmatpush3.bf16.msk.msra.mxu1 %vm25691_vm9, %v25646_v34  ;;  %17665 = vmatprep.subr.msk.bf16.mxu0 %vm25681_vm5, %v25646_v34 }
 0x748   : > { %17729 = vmatprep.subr.msk.bf16.mxu1 %vm25693_vm11, %v25646_v34 }
 0x74a   : > { %17667 = vmatpush3.bf16.msk.msra.mxu0 %vm25681_vm5, %v25646_v34 }
 0x74b   : > { %17731 = vmatpush3.bf16.msk.msra.mxu1 %vm25693_vm11, %v25646_v34  ;;  %17669 = vmatprep.subr.msk.bf16.mxu0 %vm19712_vm3, %v25646_v34 }
 0x74c   : > { %17733 = vmatprep.subr.msk.bf16.mxu1 %vm25650_vm1, %v25646_v34 }
 0x74d   : > { %14973 = vmatmul.mubr.f32.vlgmr.msra.gmra.mrb[38].mxu0 %v21883_v2 }
 0x74e   : > { %15043 = vmatmul.mubr.f32.vlgmr.msra.gmra.mrb[38].mxu1 %v21883_v2  ;;  %17671 = vmatpush3.bf16.msk.msra.mxu0 %vm19712_vm3, %v25646_v34 }
 0x74f   : > { %15007 = vmatprep.mubr.f32.mxu0 %v21875_v37  ;;  %17735 = vmatpush3.bf16.msk.msra.mxu1 %vm25650_vm1, %v25646_v34 }
 0x750   : > { %15077 = vmatprep.mubr.f32.mxu1 %v21875_v37  ;;  %17673 = vmatprep.subr.msk.bf16.mxu0 %vm19915_vm14, %v25646_v34 }
 0x751   : > { %17737 = vmatprep.subr.msk.bf16.mxu1 %vm25651_vm10, %v25646_v34 }
 0x752   : > { %17675 = vmatpush3.bf16.msk.msra.mxu0 %vm19915_vm14, %v25646_v34 }
 0x753   : > { %17739 = vmatpush3.bf16.msk.msra.mxu1 %vm25651_vm10, %v25646_v34  ;;  %17677 = vmatprep.subr.msk.bf16.mxu0 %vm19962_vm7, %v25646_v34 }
 0x754   : > { %17741 = vmatprep.subr.msk.bf16.mxu1 %vm19975_vm4, %v25646_v34 }
 0x756   : > { %17679 = vmatpush3.bf16.msk.msra.mxu0 %vm19962_vm7, %v25646_v34 }
 0x757   : > { %17743 = vmatpush3.bf16.msk.msra.mxu1 %vm19975_vm4, %v25646_v34  ;;  %17681 = vmatprep.subr.msk.bf16.mxu0 %vm19999_vm13, %v25646_v34 }
 0x758   : > { %17745 = vmatprep.subr.msk.bf16.mxu1 %vm20007_vm12, %v25646_v34 }
 0x75a   : > { %17683 = vmatpush3.bf16.msk.msra.mxu0 %vm19999_vm13, %v25646_v34 }
 0x75b   : > { %17747 = vmatpush3.bf16.msk.msra.mxu1 %vm20007_vm12, %v25646_v34  ;;  %17685 = vmatprep.subr.msk.bf16.mxu0 %vm25652_vm2, %v25646_v34 }
 0x75c   : > { %17749 = vmatprep.subr.msk.bf16.mxu1 %vm25654_vm0, %v25646_v34 }
 0x75e   : > { %17687 = vmatpush3.bf16.msk.msra.mxu0 %vm25652_vm2, %v25646_v34 }
 0x75f   : > { %17751 = vmatpush3.bf16.msk.msra.mxu1 %vm25654_vm0, %v25646_v34  ;;  %17689 = vmatprep.subr.msk.bf16.mxu0 %vm25677_vm6, %v25646_v34 }
 0x760   : > { %17753 = vmatprep.subr.msk.bf16.mxu1 %vm25690_vm15, %v25646_v34 }
 0x762   : > { %17691 = vmatpush3.bf16.msk.msra.mxu0 %vm25677_vm6, %v25646_v34 }
 0x763   : > { %17755 = vmatpush3.bf16.msk.msra.mxu1 %vm25690_vm15, %v25646_v34  ;;  %17693 = vmatprep.subr.msk.bf16.mxu0 %vm25679_vm8, %v25646_v34 }
 0x764   : > { %17757 = vmatprep.subr.msk.bf16.mxu1 %vm25691_vm9, %v25646_v34 }
 0x766   : > { %17695 = vmatpush3.bf16.msk.msra.mxu0 %vm25679_vm8, %v25646_v34 }
 0x767   : > { %17759 = vmatpush3.bf16.msk.msra.mxu1 %vm25691_vm9, %v25646_v34  ;;  %17697 = vmatprep.subr.msk.bf16.mxu0 %vm25681_vm5, %v25646_v34 }
 0x768   : > { %17761 = vmatprep.subr.msk.bf16.mxu1 %vm25693_vm11, %v25646_v34 }
 0x76a   : > { %17699 = vmatpush3.bf16.msk.msra.mxu0 %vm25681_vm5, %v25646_v34 }
 0x76b   : > { %17763 = vmatpush3.bf16.msk.msra.mxu1 %vm25693_vm11, %v25646_v34  ;;  %17765 = vmatprep.subr.msk.bf16.mxu0 %vm19712_vm3, %v25646_v34 }
 0x76c   : > { %17829 = vmatprep.subr.msk.bf16.mxu1 %vm25650_vm1, %v25646_v34 }
 0x76d   : > { %15008 = vmatmul.mubr.f32.vlgmr.msra.gmra.mrb[38].mxu0 %v21877_v8 }
 0x76e   : > { %15078 = vmatmul.mubr.f32.vlgmr.msra.gmra.mrb[38].mxu1 %v21877_v8  ;;  %17767 = vmatpush3.bf16.msk.msra.mxu0 %vm19712_vm3, %v25646_v34 }
 0x76f   : > { %17831 = vmatpush3.bf16.msk.msra.mxu1 %vm25650_vm1, %v25646_v34  ;;  %17769 = vmatprep.subr.msk.bf16.mxu0 %vm19915_vm14, %v25646_v34 }
 0x770   : > { %17833 = vmatprep.subr.msk.bf16.mxu1 %vm25651_vm10, %v25646_v34  ;;  %15112 = vmatprep.mubr.f32.mxu0 %v22027_v39 }
 0x771   : > { %15182 = vmatprep.mubr.f32.mxu1 %v22027_v39 }
 0x772   : > { %17771 = vmatpush3.bf16.msk.msra.mxu0 %vm19915_vm14, %v25646_v34 }
 0x773   : > { %17835 = vmatpush3.bf16.msk.msra.mxu1 %vm25651_vm10, %v25646_v34  ;;  %17773 = vmatprep.subr.msk.bf16.mxu0 %vm19962_vm7, %v25646_v34 }
 0x774   : > { %17837 = vmatprep.subr.msk.bf16.mxu1 %vm19975_vm4, %v25646_v34 }
 0x776   : > { %17775 = vmatpush3.bf16.msk.msra.mxu0 %vm19962_vm7, %v25646_v34 }
 0x777   : > { %17839 = vmatpush3.bf16.msk.msra.mxu1 %vm19975_vm4, %v25646_v34  ;;  %17777 = vmatprep.subr.msk.bf16.mxu0 %vm19999_vm13, %v25646_v34 }
 0x778   : > { %17841 = vmatprep.subr.msk.bf16.mxu1 %vm20007_vm12, %v25646_v34 }
 0x77a   : > { %17779 = vmatpush3.bf16.msk.msra.mxu0 %vm19999_vm13, %v25646_v34 }
 0x77b   : > { %17843 = vmatpush3.bf16.msk.msra.mxu1 %vm20007_vm12, %v25646_v34  ;;  %17781 = vmatprep.subr.msk.bf16.mxu0 %vm25652_vm2, %v25646_v34 }
 0x77c   : > { %17845 = vmatprep.subr.msk.bf16.mxu1 %vm25654_vm0, %v25646_v34 }
 0x77e   : > { %17783 = vmatpush3.bf16.msk.msra.mxu0 %vm25652_vm2, %v25646_v34 }
 0x77f   : > { %17847 = vmatpush3.bf16.msk.msra.mxu1 %vm25654_vm0, %v25646_v34  ;;  %17785 = vmatprep.subr.msk.bf16.mxu0 %vm25677_vm6, %v25646_v34 }
 0x780   : > { %17849 = vmatprep.subr.msk.bf16.mxu1 %vm25690_vm15, %v25646_v34 }
 0x782   : > { %17787 = vmatpush3.bf16.msk.msra.mxu0 %vm25677_vm6, %v25646_v34 }
 0x783   : > { %17851 = vmatpush3.bf16.msk.msra.mxu1 %vm25690_vm15, %v25646_v34  ;;  %17789 = vmatprep.subr.msk.bf16.mxu0 %vm25679_vm8, %v25646_v34 }
 0x784   : > { %17853 = vmatprep.subr.msk.bf16.mxu1 %vm25691_vm9, %v25646_v34 }
 0x786   : > { %17791 = vmatpush3.bf16.msk.msra.mxu0 %vm25679_vm8, %v25646_v34 }
 0x787   : > { %17855 = vmatpush3.bf16.msk.msra.mxu1 %vm25691_vm9, %v25646_v34  ;;  %17793 = vmatprep.subr.msk.bf16.mxu0 %vm25681_vm5, %v25646_v34 }
 0x788   : > { %17857 = vmatprep.subr.msk.bf16.mxu1 %vm25693_vm11, %v25646_v34 }
 0x78a   : > { %17795 = vmatpush3.bf16.msk.msra.mxu0 %vm25681_vm5, %v25646_v34 }
 0x78b   : > { %17859 = vmatpush3.bf16.msk.msra.mxu1 %vm25693_vm11, %v25646_v34  ;;  %17797 = vmatprep.subr.msk.bf16.mxu0 %vm19712_vm3, %v25646_v34 }
 0x78c   : > { %17861 = vmatprep.subr.msk.bf16.mxu1 %vm25650_vm1, %v25646_v34 }
 0x78d   : > { %15113 = vmatmul.mubr.f32.vlgmr.msra.gmra.mrb[40].mxu0 %v22015_v26 }
 0x78e   : > { %15183 = vmatmul.mubr.f32.vlgmr.msra.gmra.mrb[40].mxu1 %v22015_v26  ;;  %17799 = vmatpush3.bf16.msk.msra.mxu0 %vm19712_vm3, %v25646_v34 }
 0x78f   : > { %17863 = vmatpush3.bf16.msk.msra.mxu1 %vm25650_vm1, %v25646_v34  ;;  %17801 = vmatprep.subr.msk.bf16.mxu0 %vm19915_vm14, %v25646_v34 }
 0x790   : > { %17865 = vmatprep.subr.msk.bf16.mxu1 %vm25651_vm10, %v25646_v34  ;;  %15147 = vmatprep.mubr.f32.mxu0 %v22005_v31 }
 0x791   : > { %15217 = vmatprep.mubr.f32.mxu1 %v22005_v31 }
 0x792   : > { %17803 = vmatpush3.bf16.msk.msra.mxu0 %vm19915_vm14, %v25646_v34 }
 0x793   : > { %17867 = vmatpush3.bf16.msk.msra.mxu1 %vm25651_vm10, %v25646_v34  ;;  %17805 = vmatprep.subr.msk.bf16.mxu0 %vm19962_vm7, %v25646_v34 }
 0x794   : > { %17869 = vmatprep.subr.msk.bf16.mxu1 %vm19975_vm4, %v25646_v34 }
 0x796   : > { %17807 = vmatpush3.bf16.msk.msra.mxu0 %vm19962_vm7, %v25646_v34 }
 0x797   : > { %17871 = vmatpush3.bf16.msk.msra.mxu1 %vm19975_vm4, %v25646_v34  ;;  %17809 = vmatprep.subr.msk.bf16.mxu0 %vm19999_vm13, %v25646_v34 }
 0x798   : > { %17873 = vmatprep.subr.msk.bf16.mxu1 %vm20007_vm12, %v25646_v34 }
 0x79a   : > { %17811 = vmatpush3.bf16.msk.msra.mxu0 %vm19999_vm13, %v25646_v34 }
 0x79b   : > { %17875 = vmatpush3.bf16.msk.msra.mxu1 %vm20007_vm12, %v25646_v34  ;;  %17813 = vmatprep.subr.msk.bf16.mxu0 %vm25652_vm2, %v25646_v34 }
 0x79c   : > { %17877 = vmatprep.subr.msk.bf16.mxu1 %vm25654_vm0, %v25646_v34 }
 0x79e   : > { %17815 = vmatpush3.bf16.msk.msra.mxu0 %vm25652_vm2, %v25646_v34 }
 0x79f   : > { %17879 = vmatpush3.bf16.msk.msra.mxu1 %vm25654_vm0, %v25646_v34  ;;  %17817 = vmatprep.subr.msk.bf16.mxu0 %vm25677_vm6, %v25646_v34 }
 0x7a0   : > { %17881 = vmatprep.subr.msk.bf16.mxu1 %vm25690_vm15, %v25646_v34 }
 0x7a2   : > { %17819 = vmatpush3.bf16.msk.msra.mxu0 %vm25677_vm6, %v25646_v34 }
 0x7a3   : > { %17883 = vmatpush3.bf16.msk.msra.mxu1 %vm25690_vm15, %v25646_v34  ;;  %17821 = vmatprep.subr.msk.bf16.mxu0 %vm25679_vm8, %v25646_v34 }
 0x7a4   : > { %17885 = vmatprep.subr.msk.bf16.mxu1 %vm25691_vm9, %v25646_v34 }
 0x7a6   : > { %17823 = vmatpush3.bf16.msk.msra.mxu0 %vm25679_vm8, %v25646_v34 }
 0x7a7   : > { %17887 = vmatpush3.bf16.msk.msra.mxu1 %vm25691_vm9, %v25646_v34  ;;  %17825 = vmatprep.subr.msk.bf16.mxu0 %vm25681_vm5, %v25646_v34 }
 0x7a8   : > { %17889 = vmatprep.subr.msk.bf16.mxu1 %vm25693_vm11, %v25646_v34 }
 0x7aa   : > { %17827 = vmatpush3.bf16.msk.msra.mxu0 %vm25681_vm5, %v25646_v34  ;;  %vm25699_vm5 = vcmask 130048  }
 0x7ab   : > { %17891 = vmatpush3.bf16.msk.msra.mxu1 %vm25693_vm11, %v25646_v34  ;;  %17893 = vmatprep.subr.bf16.mxu0 %v21873_v3  ;;  %vm25700_vm9 = vmmov %vm25699_vm5 }
 0x7ac   : > { %17897 = vmatprep.subr.bf16.mxu1 %v17896_v50  ;;  %vm25701_vm11 = vmmov %vm25699_vm5 }
 0x7ad   : > { %15148 = vmatmul.mubr.f32.vlgmr.msra.gmra.mrb[40].mxu0 %v22001_v52  ;;  %vm25702_vm8 = vmmov %vm25699_vm5 }
 0x7ae   : > { %15218 = vmatmul.mubr.f32.vlgmr.msra.gmra.mrb[40].mxu1 %v22001_v52  ;;  %17895 = vmatpush3.bf16.msra.mxu0 %v21873_v3  ;;  %vm25703_vm15 = vmmov %vm25699_vm5 }
 0x7af   : > { %17899 = vmatpush3.bf16.msra.mxu1 %v17896_v50  ;;  %17901 = vmatprep.subr.bf16.mxu0 %v21873_v3  ;;  %vm25704_vm6 = vmmov %vm25699_vm5 }
 0x7b0   : > { %17905 = vmatprep.subr.bf16.mxu1 %v17896_v50  ;;  %15224 = vmatprep.mubr.msk.f32.mxu0 %vm25699_vm5, %v25698_v24 }
 0x7b1   : > { %15231 = vmatprep.mubr.msk.f32.mxu1 %vm25700_vm9, %v25698_v24  ;;  %15225 = vmatmul.mubr.msk.f32.vlgmr.msra.gmra.mrb[42].mxu0 %vm25701_vm11, %v19642_v38  ;;  %vm25708_vm9 = vnez %v25556_v4  ;;  %vm25709_vm11 = vnez %v25574_v9 }
 0x7b2   : > { %15232 = vmatmul.mubr.msk.f32.vlgmr.msra.gmra.mrb[42].mxu1 %vm25702_vm8, %v19642_v38  ;;  %17903 = vmatpush3.bf16.msra.mxu0 %v21873_v3  ;;  %vm25705_vm8 = vmmov %vm25699_vm5  ;;  %v5958_v3 = vmul.f32 %v5957_v22, %v22007_v44  ;;  %v5973_v44 = vstv %s22671_s25  ;;  %v5977_v22 = vstv %s22673_s12  ;;  %s22729_s25 = sld [smem:[#allocation6 + $0xdd]]  ;;  %s22731_s12 = sld [smem:[#allocation6 + $0xba]] }
 0x7b3   : > { %17907 = vmatpush3.bf16.msra.mxu1 %v17896_v50  ;;  %15238 = vmatprep.mubr.msk.f32.mxu0 %vm25703_vm15, %v25672_v46  ;;  %vm25707_vm15 = vnez %v25570_v29 }
 0x7b4   : > { %15245 = vmatprep.mubr.msk.f32.mxu1 %vm25704_vm6, %v25672_v46  ;;  %17909 = vmatprep.subr.msk.bf16.mxu0 %vm19712_vm3, %v25646_v34  ;;  %vm25706_vm6 = vnez %v25553_v0 }
 0x7b5   : > { %15239 = vmatmul.mubr.msk.f32.vlgmr.msra.gmra.mrb[44].mxu0 %vm25699_vm5, %v25686_v54  ;;  %17973 = vmatprep.subr.msk.bf16.mxu1 %vm25650_vm1, %v25646_v34  ;;  %vm25710_vm5 = vnez %v25559_v6 }
 0x7b6   : > { %15246 = vmatmul.mubr.msk.f32.vlgmr.msra.gmra.mrb[44].mxu1 %vm25705_vm8, %v25686_v54  ;;  %17911 = vmatpush3.bf16.msk.msra.mxu0 %vm19712_vm3, %v25646_v34  ;;  %vm25711_vm8 = vnez %v25692_v55 }
 0x7b7   : > { %17975 = vmatpush3.bf16.msk.msra.mxu1 %vm25650_vm1, %v25646_v34  ;;  %17913 = vmatprep.subr.msk.bf16.mxu0 %vm19915_vm14, %v25646_v34 }
 0x7b8   : > { %17977 = vmatprep.subr.msk.bf16.mxu1 %vm25651_vm10, %v25646_v34 }
 0x7ba   : > { %17915 = vmatpush3.bf16.msk.msra.mxu0 %vm19915_vm14, %v25646_v34 }
 0x7bb   : > { %17979 = vmatpush3.bf16.msk.msra.mxu1 %vm25651_vm10, %v25646_v34  ;;  %17917 = vmatprep.subr.msk.bf16.mxu0 %vm19962_vm7, %v25646_v34 }
 0x7bc   : > { %17981 = vmatprep.subr.msk.bf16.mxu1 %vm19975_vm4, %v25646_v34 }
 0x7be   : > { %17919 = vmatpush3.bf16.msk.msra.mxu0 %vm19962_vm7, %v25646_v34 }
 0x7bf   : > { %17983 = vmatpush3.bf16.msk.msra.mxu1 %vm19975_vm4, %v25646_v34  ;;  %17921 = vmatprep.subr.msk.bf16.mxu0 %vm19999_vm13, %v25646_v34 }
 0x7c0   : > { %17985 = vmatprep.subr.msk.bf16.mxu1 %vm20007_vm12, %v25646_v34 }
 0x7c2   : > { %17923 = vmatpush3.bf16.msk.msra.mxu0 %vm19999_vm13, %v25646_v34 }
 0x7c3   : > { %17987 = vmatpush3.bf16.msk.msra.mxu1 %vm20007_vm12, %v25646_v34  ;;  %17925 = vmatprep.subr.msk.bf16.mxu0 %vm25652_vm2, %v25646_v34 }
 0x7c4   : > { %17989 = vmatprep.subr.msk.bf16.mxu1 %vm25654_vm0, %v25646_v34 }
 0x7c6   : > { %17927 = vmatpush3.bf16.msk.msra.mxu0 %vm25652_vm2, %v25646_v34 }
 0x7c7   : > { %17991 = vmatpush3.bf16.msk.msra.mxu1 %vm25654_vm0, %v25646_v34  ;;  %17929 = vmatprep.subr.msk.bf16.mxu0 %vm25706_vm6, %v25646_v34 }
 0x7c8   : > { %17993 = vmatprep.subr.msk.bf16.mxu1 %vm25707_vm15, %v25646_v34 }
 0x7ca   : > { %17931 = vmatpush3.bf16.msk.msra.mxu0 %vm25706_vm6, %v25646_v34 }
 0x7cb   : > { %17995 = vmatpush3.bf16.msk.msra.mxu1 %vm25707_vm15, %v25646_v34  ;;  %17933 = vmatprep.subr.msk.bf16.mxu0 %vm25708_vm9, %v25646_v34 }
 0x7cc   : > { %17997 = vmatprep.subr.msk.bf16.mxu1 %vm25709_vm11, %v25646_v34 }
 0x7ce   : > { %17935 = vmatpush3.bf16.msk.msra.mxu0 %vm25708_vm9, %v25646_v34 }
 0x7cf   : > { %17999 = vmatpush3.bf16.msk.msra.mxu1 %vm25709_vm11, %v25646_v34  ;;  %17937 = vmatprep.subr.msk.bf16.mxu0 %vm25710_vm5, %v25646_v34 }
 0x7d0   : > { %18001 = vmatprep.subr.msk.bf16.mxu1 %vm25711_vm8, %v25646_v34 }
 0x7d2   : > { %17939 = vmatpush3.bf16.msk.msra.mxu0 %vm25710_vm5, %v25646_v34 }
 0x7d3   : > { %18003 = vmatpush3.bf16.msk.msra.mxu1 %vm25711_vm8, %v25646_v34  ;;  %17941 = vmatprep.subr.msk.bf16.mxu0 %vm19712_vm3, %v25646_v34 }
 0x7d4   : > { %18005 = vmatprep.subr.msk.bf16.mxu1 %vm25650_vm1, %v25646_v34 }
 0x800   : > { %v14869_v23 = vpop.f32.mrb[36].mxu0  ;;  %v14939_v21 = vpop.f32.mrb[36].mxu1 }
 0x801   : > { %v5943_v15 = vmul.f32 %v14869_v23, %v5941_v30  ;;  %v5947_v19 = vmul.f32 %v14869_v23, %v5945_v36  ;;  %v5951_v10 = vmul.f32 %v14869_v23, %v5949_v40  ;;  %v5955_v13 = vmul.f32 %v14869_v23, %v5953_v16  ;;  %v5177_v56 = vpop.f32.mrb[37].mxu0  ;;  %v5327_v11 = vpop.f32.mrb[37].mxu1 }
 0x802   : > { %v5942_v60 = vmul.f32 %v5941_v30, %v5177_v56  ;;  %v5946_v26 = vmul.f32 %v5945_v36, %v5177_v56  ;;  %v5950_v39 = vmul.f32 %v5949_v40, %v5177_v56  ;;  %v5954_v50 = vmul.f32 %v5953_v16, %v5177_v56 }
 0x803   : > { %v7440_v52 = vadd.f32 %v5959_v12, %v5943_v15  ;;  %v7474_v28 = vadd.f32 %v5963_v18, %v5947_v19  ;;  %v7508_v42 = vadd.f32 %v5967_v57, %v5951_v10  ;;  %v7542_v31 = vadd.f32 %v5971_v51, %v5955_v13 }
 0x804   : > { %v7439_v54 = vadd.f32 %v5958_v3, %v5942_v60  ;;  %v7473_v23 = vadd.f32 %v5962_v7, %v5946_v26  ;;  %v7507_v46 = vadd.f32 %v5966_v27, %v5950_v39  ;;  %v7541_v38 = vadd.f32 %v5970_v32, %v5954_v50 }
 0x805   : > { %v5993_v30 = vstv %s22681_s29  ;;  %v5997_v36 = vstv %s22683_s9  ;;  %v6001_v40 = vstv %s22685_s20  ;;  %v5975_v16 = vmul.f32 %v14939_v21, %v5973_v44  ;;  %s22745_s29 = sld [smem:[#allocation6 + $0xca]]  ;;  %s22747_s9 = sld [smem:[#allocation6 + $0xcb]] }
 0x806   : > { %v5979_v12 = vmul.f32 %v14939_v21, %v5977_v22  ;;  %v5983_v18 = vmul.f32 %v14939_v21, %v5981_v33  ;;  %v5987_v57 = vmul.f32 %v14939_v21, %v5985_v43  ;;  %v5974_v39 = vmul.f32 %v5973_v44, %v5327_v11  ;;  %s22749_s20 = sld [smem:[#allocation6 + $0xcc]] }
 0x807   : > { %v5978_v50 = vmul.f32 %v5977_v22, %v5327_v11  ;;  %v5982_v24 = vmul.f32 %v5981_v33, %v5327_v11  ;;  %v5986_v41 = vmul.f32 %v5985_v43, %v5327_v11  ;;  %v6025_v33 = vstv %s22733_s23  ;;  %s23478_s23 = sld [smem:[#allocation6 + $0x70]] }
 0x808   : > { %v6029_v43 = vstv %s22735_s5  ;;  %s23480_s5 = sld [smem:[#allocation6 + $0x71]] }
 0x840   : > { %v15009_v51 = vpop.f32.mrb[38].mxu0 }
 0x841   : > { %v5991_v15 = vmul.f32 %v15009_v51, %v5989_v17  ;;  %v5995_v19 = vmul.f32 %v15009_v51, %v5993_v30  ;;  %v5999_v10 = vmul.f32 %v15009_v51, %v5997_v36  ;;  %v6003_v13 = vmul.f32 %v15009_v51, %v6001_v40  ;;  %v22695_v56 = vpop.f32.mrb[38].mxu1  ;;  %v5479_v3 = vpop.f32.mrb[39].mxu0 }
 0x842   : > { %v22697_v7 = vpop.f32.mrb[39].mxu1  ;;  %v5990_v25 = vmul.f32 %v5989_v17, %v5479_v3  ;;  %v5994_v55 = vmul.f32 %v5993_v30, %v5479_v3  ;;  %v5998_v6 = vmul.f32 %v5997_v36, %v5479_v3  ;;  %v6002_v9 = vmul.f32 %v6001_v40, %v5479_v3 }
 0x843   : > { %v7442_v27 = vadd.f32 %v5991_v15, %v5975_v16  ;;  %v7476_v32 = vadd.f32 %v5995_v19, %v5979_v12  ;;  %v7510_v60 = vadd.f32 %v5999_v10, %v5983_v18  ;;  %v7544_v26 = vadd.f32 %v6003_v13, %v5987_v57 }
 0x844   : > { %v7441_v16 = vadd.f32 %v5990_v25, %v5974_v39  ;;  %v7475_v12 = vadd.f32 %v5994_v55, %v5978_v50  ;;  %v7509_v18 = vadd.f32 %v5998_v6, %v5982_v24  ;;  %v7543_v57 = vadd.f32 %v6002_v9, %v5986_v41 }
 0x845   : > { %v22699_v58 = vadd.f32 %v7442_v27, %v7440_v52  ;;  %v22701_v21 = vadd.f32 %v7476_v32, %v7474_v28  ;;  %v22703_v59 = vadd.f32 %v7510_v60, %v7508_v42  ;;  %v22705_v51 = vadd.f32 %v7544_v26, %v7542_v31 }
 0x846   : > { %v22707_v44 = vadd.f32 %v7441_v16, %v7439_v54  ;;  %v22709_v22 = vadd.f32 %v7475_v12, %v7473_v23  ;;  %v22711_v11 = vadd.f32 %v7509_v18, %v7507_v46  ;;  %v22713_v52 = vadd.f32 %v7543_v57, %v7541_v38 }
 0x847   : > { %v5337_v38 = vadd.f32 %v21883_v2, %v21877_v8  ;;  %v6005_v6 = vstv %s22715_s26  ;;  %v6009_v9 = vstv %s22717_s11  ;;  %v6013_v46 = vstv %s22719_s30  ;;  %s11458_s26 = sld [smem:[#allocation6 + $0xeb]]  ;;  %s11459_s11 = sld [smem:[#allocation6 + $0xec]] }
 0x848   : > { %v6017_v54 = vstv %s22721_s8  ;;  %v5336_v8 = vadd.f32 %v21880_v5, %v21875_v37  ;;  %v6053_v24 = vstv %s22723_s13  ;;  %v6057_v28 = vstv %s22725_s14  ;;  %s11460_s30 = sld [smem:[#allocation6 + $0xed]]  ;;  %s23466_s8 = sld [smem:[#allocation6 + $0x7e]] }
 0x849   : > { %v6007_v2 = vmul.f32 %v6005_v6, %v5337_v38  ;;  %v6011_v55 = vmul.f32 %v6009_v9, %v5337_v38  ;;  %v6015_v41 = vmul.f32 %v6013_v46, %v5337_v38  ;;  %v6019_v25 = vmul.f32 %v6017_v54, %v5337_v38  ;;  %s23468_s13 = sld [smem:[#allocation6 + $0x7f]]  ;;  %s23470_s14 = sld [smem:[#allocation6 + $0x80]] }
 0x84a   : > { %v6061_v42 = vstv %s22727_s22  ;;  %v6065_v31 = vstv %s22729_s25  ;;  %v6021_v23 = vstv %s22731_s12  ;;  %v6033_v17 = vstv %s22737_s10  ;;  %s23472_s22 = sld [smem:[#allocation6 + $0x81]]  ;;  %s23474_s25 = sld [smem:[#allocation6 + $0x6e]] }
 0x84b   : > { %v6006_v30 = vmul.f32 %v6005_v6, %v5336_v8  ;;  %v6010_v36 = vmul.f32 %v6009_v9, %v5336_v8  ;;  %v6014_v40 = vmul.f32 %v6013_v46, %v5336_v8  ;;  %v6018_v37 = vmul.f32 %v6017_v54, %v5336_v8  ;;  %s23476_s12 = sld [smem:[#allocation6 + $0x6f]]  ;;  %s23482_s10 = sld [smem:[#allocation6 + $0x8e]] }
 0x84c   : > { %v6055_v5 = vmul.f32 %v6053_v24, %v22025_v63  ;;  %v6059_v15 = vmul.f32 %v6057_v28, %v22025_v63  ;;  %v6063_v19 = vmul.f32 %v6061_v42, %v22025_v63  ;;  %v6067_v10 = vmul.f32 %v6065_v31, %v22025_v63 }
 0x84d   : > { %v6023_v13 = vmul.f32 %v22695_v56, %v6021_v23  ;;  %v6027_v3 = vmul.f32 %v22695_v56, %v6025_v33  ;;  %v6031_v27 = vmul.f32 %v22695_v56, %v6029_v43  ;;  %v6035_v32 = vmul.f32 %v22695_v56, %v6033_v17 }
 0x84e   : > { %v6037_v60 = vstv %s22745_s29  ;;  %v6041_v26 = vstv %s22747_s9  ;;  %v6045_v39 = vstv %s22749_s20  ;;  %v6049_v50 = vstv %s22751_s7  ;;  %s11457_s7 = sld [smem:[#allocation6 + $0xea]]  ;;  %s23484_s29 = sld [smem:[#allocation6 + $0x8f]] }
 0x84f   : > { %v6022_v16 = vmul.f32 %v6021_v23, %v22697_v7  ;;  %v6026_v12 = vmul.f32 %v6025_v33, %v22697_v7  ;;  %v6030_v18 = vmul.f32 %v6029_v43, %v22697_v7  ;;  %v6034_v63 = vmul.f32 %v6033_v17, %v22697_v7  ;;  %s23486_s9 = sld [smem:[#allocation6 + $0x90]]  ;;  %s23488_s20 = sld [smem:[#allocation6 + $0x91]] }
 0x850   : > { %v6054_v57 = vmul.f32 %v6053_v24, %v22031_v53  ;;  %v6058_v38 = vmul.f32 %v6057_v28, %v22031_v53  ;;  %v6062_v6 = vmul.f32 %v6061_v42, %v22031_v53  ;;  %v6066_v56 = vmul.f32 %v6065_v31, %v22031_v53 }
 0x851   : > { %v7444_v9 = vadd.f32 %v6023_v13, %v6007_v2  ;;  %v7478_v46 = vadd.f32 %v6027_v3, %v6011_v55  ;;  %v7512_v54 = vadd.f32 %v6031_v27, %v6015_v41  ;;  %v7546_v8 = vadd.f32 %v6035_v32, %v6019_v25 }
 0x852   : > { %v7443_v17 = vadd.f32 %v6022_v16, %v6006_v30  ;;  %v7477_v24 = vadd.f32 %v6026_v12, %v6010_v36  ;;  %v7511_v20 = vadd.f32 %v6030_v18, %v6014_v40  ;;  %v7545_v28 = vadd.f32 %v6034_v63, %v6018_v37 }
 0x880   : > { %v15149_v4 = vpop.f32.mrb[40].mxu0 }
 0x881   : > { %v6039_v23 = vmul.f32 %v15149_v4, %v6037_v60  ;;  %v6043_v29 = vmul.f32 %v15149_v4, %v6041_v26  ;;  %v6047_v33 = vmul.f32 %v15149_v4, %v6045_v39  ;;  %v6051_v0 = vmul.f32 %v15149_v4, %v6049_v50  ;;  %v22783_v43 = vpop.f32.mrb[40].mxu1  ;;  %v5781_v7 = vpop.f32.mrb[41].mxu0 }
 0x882   : > { %25712 = vst [vmem:[#allocation41_spill] sm:$0xff] %v22783_v43  ;;  %v22785_v62 = vpop.f32.mrb[41].mxu1  ;;  %v6038_v41 = vmul.f32 %v6037_v60, %v5781_v7  ;;  %v6042_v25 = vmul.f32 %v6041_v26, %v5781_v7  ;;  %v6046_v31 = vmul.f32 %v6045_v39, %v5781_v7  ;;  %v6050_v13 = vmul.f32 %v6049_v50, %v5781_v7  ;;  %v25728_v7 = vld [vmem:[#allocation38_spill] sm:$0xff] }
 0x883   : > { %v7446_v42 = vadd.f32 %v6055_v5, %v6039_v23  ;;  %v7480_v53 = vadd.f32 %v6059_v15, %v6043_v29  ;;  %v7514_v2 = vadd.f32 %v6063_v19, %v6047_v33  ;;  %v7548_v55 = vadd.f32 %v6067_v10, %v6051_v0  ;;  %v25725_v23 = vld [vmem:[#allocation39_spill] sm:$0xff]  ;;  %v25726_v33 = vld [vmem:[#allocation40_spill] sm:$0xff] }
 0x884   : > { %v22787_v3 = vpop.f32.mrb[42].mxu0  ;;  %v7445_v40 = vadd.f32 %v6054_v57, %v6038_v41  ;;  %v7479_v37 = vadd.f32 %v6058_v38, %v6042_v25  ;;  %v7513_v16 = vadd.f32 %v6062_v6, %v6046_v31  ;;  %v7547_v12 = vadd.f32 %v6066_v56, %v6050_v13  ;;  %v25720_v56 = vld [vmem:[#allocation22_spill] sm:$0xff]  ;;  %v25738_v13 = vld [vmem:[#allocation13_spill] sm:$0xff] }
 0x885   : > { %v7460_v4 = vadd.f32 %v7446_v42, %v7444_v9  ;;  %v7494_v27 = vadd.f32 %v7480_v53, %v7478_v46  ;;  %v7528_v32 = vadd.f32 %v7514_v2, %v7512_v54  ;;  %v7562_v43 = vadd.f32 %v7548_v55, %v7546_v8  ;;  %v15233_v30 = vpop.f32.mrb[42].mxu1  ;;  %v6155_v36 = vpop.f32.mrb[43].mxu0  ;;  %v25721_v9 = vld [vmem:[#allocation19_spill] sm:$0xff]  ;;  %v25723_v54 = vld [vmem:[#allocation20_spill] sm:$0xff] }
 0x886   : > { %v6230_v5 = vpop.f32.mrb[43].mxu1  ;;  %v7459_v10 = vadd.f32 %v7445_v40, %v7443_v17  ;;  %v7493_v60 = vadd.f32 %v7479_v37, %v7477_v24  ;;  %v7527_v26 = vadd.f32 %v7513_v16, %v7511_v20  ;;  %v7561_v39 = vadd.f32 %v7547_v12, %v7545_v28  ;;  %v25722_v46 = vld [vmem:[#allocation23_spill] sm:$0xff]  ;;  %v25724_v8 = vld [vmem:[#allocation24_spill] sm:$0xff]  ;;  %v25729_v17 = vld [vmem:[#allocation37_spill] sm:$0xff] }
 0x887   : > { %v22790_v29 = vadd.f32 %v7460_v4, %v22699_v58  ;;  %v22793_v0 = vadd.f32 %v7494_v27, %v22701_v21  ;;  %v22796_v15 = vadd.f32 %v7528_v32, %v22703_v59  ;;  %v22799_v19 = vadd.f32 %v7562_v43, %v22705_v51  ;;  %15280 = vmatprep.mubr.f32.mxu0 %v6230_v5  ;;  %v25727_v43 = vld [vmem:[#allocation34_spill] sm:$0xff]  ;;  %v25732_v42 = vld [vmem:[#allocation36_spill] sm:$0xff]  ;;  %v25735_v55 = vld [vmem:[#allocation35_spill] sm:$0xff] }
 0x888   : > { %15350 = vmatprep.mubr.f32.mxu1 %v6230_v5  ;;  %v22801_v50 = vpop.f32.mrb[44].mxu0  ;;  %15281 = vmatmul.mubr.f32.vlgmr.msra.gmra.mrb[46].mxu0 %v15233_v30  ;;  %v22808_v21 = vadd.f32 %v7459_v10, %v22707_v44  ;;  %v22811_v59 = vadd.f32 %v7493_v60, %v22709_v22  ;;  %v22814_v51 = vadd.f32 %v7527_v26, %v22711_v11  ;;  %v23298_v24 = vunpack.c.l.bf16 %v25729_v17  ;;  %v25743_v4 = vld [vmem:[#allocation15_spill] sm:$0xff]  ;;  %v25747_v27 = vld [vmem:[#allocation16_spill] sm:$0xff] }
 0x889   : > { %v22803_v58 = vpop.f32.mrb[44].mxu1  ;;  %v22805_v18 = vpop.f32.mrb[45].mxu0  ;;  %v22817_v20 = vadd.f32 %v7561_v39, %v22713_v52  ;;  %17943 = vmatpush3.bf16.msk.msra.mxu0 %vm19712_vm3, %v25646_v34  ;;  %v22825_v57 = vadd.f32 %v15233_v30, %v22787_v3  ;;  %v22827_v44 = vadd.f32 %v6230_v5, %v6155_v36  ;;  %15351 = vmatmul.mubr.f32.vlgmr.msra.gmra.mrb[46].mxu1 %v15233_v30  ;;  %v23304_v28 = vunpack.c.h.bf16 %v25729_v17  ;;  %v25754_v10 = vld [vmem:[#allocation41_spill] sm:$0xff] }
 0x88a   : > { %25713 = vst [vmem:[#allocation42_spill] sm:$0xff] %v22808_v21  ;;  %25714 = vst [vmem:[#allocation43_spill] sm:$0xff] %v22811_v59  ;;  %v22822_v63 = vpop.f32.mrb[45].mxu1  ;;  %17945 = vmatprep.subr.msk.bf16.mxu0 %vm19915_vm14, %v25646_v34  ;;  %v22834_v22 = vadd.f32 %v22803_v58, %v22801_v50  ;;  %18007 = vmatpush3.bf16.msk.msra.mxu1 %vm25650_vm1, %v25646_v34  ;;  %v25733_v53 = vmax.f32 %v25732_v42, 0.0  ;;  %v25736_v41 = vmax.f32 %v25735_v55, 0.0  ;;  %v6069_v32 = vstv %s11457_s7  ;;  %s23542_s7 = sld [smem:[#allocation6 + $0xae]] }
 0x88b   : > { %25715 = vst [vmem:[#allocation44_spill] sm:$0xff] %v22814_v51  ;;  %25716 = vst [vmem:[#allocation45_spill] sm:$0xff] %v22817_v20  ;;  %15315 = vmatprep.mubr.f32.mxu0 %v6155_v36  ;;  %v22841_v11 = vadd.f32 %v22822_v63, %v22805_v18  ;;  %18009 = vmatprep.subr.msk.bf16.mxu1 %vm25651_vm10, %v25646_v34  ;;  %v6073_v30 = vstv %s11458_s26  ;;  %v6081_v40 = vstv %s11460_s30  ;;  %v7312_v37 = vstv %s23466_s8  ;;  %s23544_s26 = sld [smem:[#allocation6 + $0xaf]]  ;;  %s23548_s30 = sld [smem:[#allocation6 + $0xb1]] }
 0x88c   : > { %15385 = vmatprep.mubr.f32.mxu1 %v6155_v36  ;;  %25730 = vst [vmem:[#allocation39_spill] sm:$0xff] %v23298_v24  ;;  %25731 = vst [vmem:[#allocation40_spill] sm:$0xff] %v23304_v28  ;;  %v23318_v2 = vsub.f32 %v25733_v53, %v23298_v24  ;;  %v23326_v25 = vsub.f32 %v25736_v41, %v23304_v28  ;;  %v6077_v36 = vstv %s11459_s11  ;;  %v7316_v16 = vstv %s23468_s13  ;;  %s23546_s11 = sld [smem:[#allocation6 + $0xb0]]  ;;  %s23550_s8 = sld [smem:[#allocation6 + $0xde]] }
 0x88d   : > { %17947 = vmatpush3.bf16.msk.msra.mxu0 %vm19915_vm14, %v25646_v34  ;;  %v7320_v12 = vstv %s23470_s14  ;;  %v7324_v5 = vstv %s23472_s22  ;;  %v6071_v60 = vmul.f32 %v25754_v10, %v6069_v32  ;;  %v6075_v26 = vmul.f32 %v25754_v10, %v6073_v30  ;;  %s23552_s13 = sld [smem:[#allocation6 + $0xdf]]  ;;  %s23554_s14 = sld [smem:[#allocation6 + $0xe0]] }
 0x88e   : > { %17949 = vmatprep.subr.msk.bf16.mxu0 %vm19962_vm7, %v25646_v34  ;;  %18011 = vmatpush3.bf16.msk.msra.mxu1 %vm25651_vm10, %v25646_v34  ;;  %25734 = vst [vmem:[#allocation34_spill] sm:$0xff] %v23318_v2  ;;  %25737 = vst [vmem:[#allocation38_spill] sm:$0xff] %v23326_v25  ;;  %v18296_v31 = vpack.c.bf16 %v23326_v25, %v23318_v2  ;;  %v6079_v39 = vmul.f32 %v25754_v10, %v6077_v36  ;;  %v7336_v28 = vstv %s23486_s9  ;;  %s23556_s22 = sld [smem:[#allocation6 + $0xe1]]  ;;  %s23576_s9 = sld [smem:[#allocation6 + $0xc0]] }
 0x88f   : > { %18013 = vmatprep.subr.msk.bf16.mxu1 %vm19975_vm4, %v25646_v34  ;;  %v7314_v42 = vmul.f32 %v7312_v37, %v22825_v57  ;;  %v7318_v53 = vmul.f32 %v7316_v16, %v22825_v57  ;;  %v7322_v55 = vmul.f32 %v7320_v12, %v22825_v57  ;;  %v7326_v41 = vmul.f32 %v7324_v5, %v22825_v57 }
 0x890   : > { %v7340_v24 = vstv %s23488_s20  ;;  %s23578_s20 = sld [smem:[#allocation6 + $0xc1]] }
 0x891   : > { %17951 = vmatpush3.bf16.msk.msra.mxu0 %vm19962_vm7, %v25646_v34 }
 0x892   : > { %17953 = vmatprep.subr.msk.bf16.mxu0 %vm19999_vm13, %v25646_v34  ;;  %18015 = vmatpush3.bf16.msk.msra.mxu1 %vm19975_vm4, %v25646_v34 }
 0x893   : > { %18017 = vmatprep.subr.msk.bf16.mxu1 %vm20007_vm12, %v25646_v34 }
 0x895   : > { %17955 = vmatpush3.bf16.msk.msra.mxu0 %vm19999_vm13, %v25646_v34 }
 0x896   : > { %17957 = vmatprep.subr.msk.bf16.mxu0 %vm25652_vm2, %v25646_v34  ;;  %18019 = vmatpush3.bf16.msk.msra.mxu1 %vm20007_vm12, %v25646_v34 }
 0x897   : > { %18021 = vmatprep.subr.msk.bf16.mxu1 %vm25654_vm0, %v25646_v34 }
 0x899   : > { %17959 = vmatpush3.bf16.msk.msra.mxu0 %vm25652_vm2, %v25646_v34 }
 0x89a   : > { %17961 = vmatprep.subr.msk.bf16.mxu0 %vm25706_vm6, %v25646_v34  ;;  %18023 = vmatpush3.bf16.msk.msra.mxu1 %vm25654_vm0, %v25646_v34 }
 0x89b   : > { %18025 = vmatprep.subr.msk.bf16.mxu1 %vm25707_vm15, %v25646_v34 }
 0x89d   : > { %17963 = vmatpush3.bf16.msk.msra.mxu0 %vm25706_vm6, %v25646_v34 }
 0x89e   : > { %17965 = vmatprep.subr.msk.bf16.mxu0 %vm25708_vm9, %v25646_v34  ;;  %18027 = vmatpush3.bf16.msk.msra.mxu1 %vm25707_vm15, %v25646_v34 }
 0x89f   : > { %18029 = vmatprep.subr.msk.bf16.mxu1 %vm25709_vm11, %v25646_v34 }
 0x8a1   : > { %17967 = vmatpush3.bf16.msk.msra.mxu0 %vm25708_vm9, %v25646_v34 }
 0x8a2   : > { %17969 = vmatprep.subr.msk.bf16.mxu0 %vm25710_vm5, %v25646_v34  ;;  %18031 = vmatpush3.bf16.msk.msra.mxu1 %vm25709_vm11, %v25646_v34 }
 0x8a3   : > { %18033 = vmatprep.subr.msk.bf16.mxu1 %vm25711_vm8, %v25646_v34 }
 0x8a5   : > { %17971 = vmatpush3.bf16.msk.msra.mxu0 %vm25710_vm5, %v25646_v34 }
 0x8a6   : > { %18037 = vmatprep.subr.msk.bf16.mxu0 %vm19712_vm3, %v25646_v34  ;;  %18035 = vmatpush3.bf16.msk.msra.mxu1 %vm25711_vm8, %v25646_v34 }
 0x8a7   : > { %18101 = vmatprep.subr.msk.bf16.mxu1 %vm25650_vm1, %v25646_v34 }
 0x8a8   : > { %15316 = vmatmul.mubr.f32.vlgmr.msra.gmra.mrb[46].mxu0 %v22787_v3 }
 0x8a9   : > { %18039 = vmatpush3.bf16.msk.msra.mxu0 %vm19712_vm3, %v25646_v34  ;;  %15420 = vmatprep.mubr.f32.mxu0 %v25725_v23 }
 0x8aa   : > { %15386 = vmatmul.mubr.f32.vlgmr.msra.gmra.mrb[46].mxu1 %v22787_v3  ;;  %18041 = vmatprep.subr.msk.bf16.mxu0 %vm19915_vm14, %v25646_v34  ;;  %v25741_v3 = vld [vmem:[#allocation14_spill] sm:$0xff] }
 0x8ab   : > { %18103 = vmatpush3.bf16.msk.msra.mxu1 %vm25650_vm1, %v25646_v34  ;;  %15490 = vmatprep.mubr.f32.mxu1 %v25725_v23 }
 0x8ac   : > { %18105 = vmatprep.subr.msk.bf16.mxu1 %vm25651_vm10, %v25646_v34 }
 0x8ad   : > { %18043 = vmatpush3.bf16.msk.msra.mxu0 %vm19915_vm14, %v25646_v34 }
 0x8ae   : > { %18045 = vmatprep.subr.msk.bf16.mxu0 %vm19962_vm7, %v25646_v34 }
 0x8af   : > { %18107 = vmatpush3.bf16.msk.msra.mxu1 %vm25651_vm10, %v25646_v34 }
 0x8b0   : > { %18109 = vmatprep.subr.msk.bf16.mxu1 %vm19975_vm4, %v25646_v34 }
 0x8b1   : > { %18047 = vmatpush3.bf16.msk.msra.mxu0 %vm19962_vm7, %v25646_v34 }
 0x8b2   : > { %18049 = vmatprep.subr.msk.bf16.mxu0 %vm19999_vm13, %v25646_v34 }
 0x8b3   : > { %18111 = vmatpush3.bf16.msk.msra.mxu1 %vm19975_vm4, %v25646_v34 }
 0x8b4   : > { %18113 = vmatprep.subr.msk.bf16.mxu1 %vm20007_vm12, %v25646_v34 }
 0x8b5   : > { %18051 = vmatpush3.bf16.msk.msra.mxu0 %vm19999_vm13, %v25646_v34 }
 0x8b6   : > { %18053 = vmatprep.subr.msk.bf16.mxu0 %vm25652_vm2, %v25646_v34 }
 0x8b7   : > { %18115 = vmatpush3.bf16.msk.msra.mxu1 %vm20007_vm12, %v25646_v34 }
 0x8b8   : > { %18117 = vmatprep.subr.msk.bf16.mxu1 %vm25654_vm0, %v25646_v34 }
 0x8b9   : > { %18055 = vmatpush3.bf16.msk.msra.mxu0 %vm25652_vm2, %v25646_v34 }
 0x8ba   : > { %18057 = vmatprep.subr.msk.bf16.mxu0 %vm25706_vm6, %v25646_v34 }
 0x8bb   : > { %18119 = vmatpush3.bf16.msk.msra.mxu1 %vm25654_vm0, %v25646_v34 }
 0x8bc   : > { %18121 = vmatprep.subr.msk.bf16.mxu1 %vm25707_vm15, %v25646_v34 }
 0x8bd   : > { %18059 = vmatpush3.bf16.msk.msra.mxu0 %vm25706_vm6, %v25646_v34 }
 0x8be   : > { %18061 = vmatprep.subr.msk.bf16.mxu0 %vm25708_vm9, %v25646_v34 }
 0x8bf   : > { %18123 = vmatpush3.bf16.msk.msra.mxu1 %vm25707_vm15, %v25646_v34 }
 0x8c0   : > { %18125 = vmatprep.subr.msk.bf16.mxu1 %vm25709_vm11, %v25646_v34 }
 0x8c1   : > { %18063 = vmatpush3.bf16.msk.msra.mxu0 %vm25708_vm9, %v25646_v34 }
 0x8c2   : > { %18065 = vmatprep.subr.msk.bf16.mxu0 %vm25710_vm5, %v25646_v34 }
 0x8c3   : > { %18127 = vmatpush3.bf16.msk.msra.mxu1 %vm25709_vm11, %v25646_v34 }
 0x8c4   : > { %18129 = vmatprep.subr.msk.bf16.mxu1 %vm25711_vm8, %v25646_v34 }
 0x8c5   : > { %18067 = vmatpush3.bf16.msk.msra.mxu0 %vm25710_vm5, %v25646_v34 }
 0x8c6   : > { %18069 = vmatprep.subr.msk.bf16.mxu0 %vm19712_vm3, %v25646_v34 }
 0x8c7   : > { %18131 = vmatpush3.bf16.msk.msra.mxu1 %vm25711_vm8, %v25646_v34 }
 0x8c8   : > { %15421 = vmatmul.mubr.f32.vlgmr.msra.gmra.mrb[48].mxu0 %v25726_v33  ;;  %18133 = vmatprep.subr.msk.bf16.mxu1 %vm25650_vm1, %v25646_v34 }
 0x8c9   : > { %18071 = vmatpush3.bf16.msk.msra.mxu0 %vm19712_vm3, %v25646_v34  ;;  %15455 = vmatprep.mubr.f32.mxu0 %v25727_v43 }
 0x8ca   : > { %15491 = vmatmul.mubr.f32.vlgmr.msra.gmra.mrb[48].mxu1 %v25726_v33  ;;  %18073 = vmatprep.subr.msk.bf16.mxu0 %vm19915_vm14, %v25646_v34 }
 0x8cb   : > { %18135 = vmatpush3.bf16.msk.msra.mxu1 %vm25650_vm1, %v25646_v34  ;;  %15525 = vmatprep.mubr.f32.mxu1 %v25727_v43 }
 0x8cc   : > { %18137 = vmatprep.subr.msk.bf16.mxu1 %vm25651_vm10, %v25646_v34 }
 0x8cd   : > { %18075 = vmatpush3.bf16.msk.msra.mxu0 %vm19915_vm14, %v25646_v34 }
 0x8ce   : > { %18077 = vmatprep.subr.msk.bf16.mxu0 %vm19962_vm7, %v25646_v34 }
 0x8cf   : > { %18139 = vmatpush3.bf16.msk.msra.mxu1 %vm25651_vm10, %v25646_v34 }
 0x8d0   : > { %18141 = vmatprep.subr.msk.bf16.mxu1 %vm19975_vm4, %v25646_v34 }
 0x8d1   : > { %18079 = vmatpush3.bf16.msk.msra.mxu0 %vm19962_vm7, %v25646_v34 }
 0x8d2   : > { %18081 = vmatprep.subr.msk.bf16.mxu0 %vm19999_vm13, %v25646_v34 }
 0x8d3   : > { %18143 = vmatpush3.bf16.msk.msra.mxu1 %vm19975_vm4, %v25646_v34 }
 0x8d4   : > { %18145 = vmatprep.subr.msk.bf16.mxu1 %vm20007_vm12, %v25646_v34 }
 0x8d5   : > { %18083 = vmatpush3.bf16.msk.msra.mxu0 %vm19999_vm13, %v25646_v34 }
 0x8d6   : > { %18085 = vmatprep.subr.msk.bf16.mxu0 %vm25652_vm2, %v25646_v34 }
 0x8d7   : > { %18147 = vmatpush3.bf16.msk.msra.mxu1 %vm20007_vm12, %v25646_v34 }
 0x8d8   : > { %18149 = vmatprep.subr.msk.bf16.mxu1 %vm25654_vm0, %v25646_v34 }
 0x8d9   : > { %18087 = vmatpush3.bf16.msk.msra.mxu0 %vm25652_vm2, %v25646_v34 }
 0x8da   : > { %18089 = vmatprep.subr.msk.bf16.mxu0 %vm25706_vm6, %v25646_v34 }
 0x8db   : > { %18151 = vmatpush3.bf16.msk.msra.mxu1 %vm25654_vm0, %v25646_v34 }
 0x8dc   : > { %18153 = vmatprep.subr.msk.bf16.mxu1 %vm25707_vm15, %v25646_v34 }
 0x8dd   : > { %18091 = vmatpush3.bf16.msk.msra.mxu0 %vm25706_vm6, %v25646_v34 }
 0x8de   : > { %18093 = vmatprep.subr.msk.bf16.mxu0 %vm25708_vm9, %v25646_v34 }
 0x8df   : > { %18155 = vmatpush3.bf16.msk.msra.mxu1 %vm25707_vm15, %v25646_v34 }
 0x8e0   : > { %18157 = vmatprep.subr.msk.bf16.mxu1 %vm25709_vm11, %v25646_v34 }
 0x8e1   : > { %18095 = vmatpush3.bf16.msk.msra.mxu0 %vm25708_vm9, %v25646_v34 }
 0x8e2   : > { %18097 = vmatprep.subr.msk.bf16.mxu0 %vm25710_vm5, %v25646_v34 }
 0x8e3   : > { %18159 = vmatpush3.bf16.msk.msra.mxu1 %vm25709_vm11, %v25646_v34 }
 0x8e4   : > { %18161 = vmatprep.subr.msk.bf16.mxu1 %vm25711_vm8, %v25646_v34 }
 0x8e5   : > { %18099 = vmatpush3.bf16.msk.msra.mxu0 %vm25710_vm5, %v25646_v34 }
 0x8e6   : > { %18165 = vmatprep.subr.msk.bf16.mxu0 %vm19712_vm3, %v25646_v34 }
 0x8e7   : > { %18163 = vmatpush3.bf16.msk.msra.mxu1 %vm25711_vm8, %v25646_v34 }
 0x8e8   : > { %15456 = vmatmul.mubr.f32.vlgmr.msra.gmra.mrb[48].mxu0 %v25728_v7  ;;  %18229 = vmatprep.subr.msk.bf16.mxu1 %vm25650_vm1, %v25646_v34 }
 0x8e9   : > { %18167 = vmatpush3.bf16.msk.msra.mxu0 %vm19712_vm3, %v25646_v34  ;;  %15560 = vmatprep.mubr.f32.mxu0 %v22822_v63 }
 0x8ea   : > { %15526 = vmatmul.mubr.f32.vlgmr.msra.gmra.mrb[48].mxu1 %v25728_v7  ;;  %18169 = vmatprep.subr.msk.bf16.mxu0 %vm19915_vm14, %v25646_v34 }
 0x8eb   : > { %18231 = vmatpush3.bf16.msk.msra.mxu1 %vm25650_vm1, %v25646_v34  ;;  %15630 = vmatprep.mubr.f32.mxu1 %v22822_v63  ;;  %v6078_v63 = vmul.f32 %v6077_v36, %v22785_v62  ;;  %v7317_v36 = vmul.f32 %v7316_v16, %v22827_v44 }
 0x8ec   : > { %18233 = vmatprep.subr.msk.bf16.mxu1 %vm25651_vm10, %v25646_v34 }
 0x8ed   : > { %18171 = vmatpush3.bf16.msk.msra.mxu0 %vm19915_vm14, %v25646_v34 }
 0x8ee   : > { %18173 = vmatprep.subr.msk.bf16.mxu0 %vm19962_vm7, %v25646_v34 }
 0x8ef   : > { %18235 = vmatpush3.bf16.msk.msra.mxu1 %vm25651_vm10, %v25646_v34 }
 0x8f0   : > { %18237 = vmatprep.subr.msk.bf16.mxu1 %vm19975_vm4, %v25646_v34 }
 0x8f1   : > { %18175 = vmatpush3.bf16.msk.msra.mxu0 %vm19962_vm7, %v25646_v34 }
 0x8f2   : > { %18177 = vmatprep.subr.msk.bf16.mxu0 %vm19999_vm13, %v25646_v34 }
 0x8f3   : > { %18239 = vmatpush3.bf16.msk.msra.mxu1 %vm19975_vm4, %v25646_v34 }
 0x8f4   : > { %18241 = vmatprep.subr.msk.bf16.mxu1 %vm20007_vm12, %v25646_v34 }
 0x8f5   : > { %18179 = vmatpush3.bf16.msk.msra.mxu0 %vm19999_vm13, %v25646_v34 }
 0x8f6   : > { %18181 = vmatprep.subr.msk.bf16.mxu0 %vm25652_vm2, %v25646_v34 }
 0x8f7   : > { %18243 = vmatpush3.bf16.msk.msra.mxu1 %vm20007_vm12, %v25646_v34 }
 0x8f8   : > { %18245 = vmatprep.subr.msk.bf16.mxu1 %vm25654_vm0, %v25646_v34 }
 0x8f9   : > { %18183 = vmatpush3.bf16.msk.msra.mxu0 %vm25652_vm2, %v25646_v34 }
 0x8fa   : > { %18185 = vmatprep.subr.msk.bf16.mxu0 %vm25706_vm6, %v25646_v34 }
 0x8fb   : > { %18247 = vmatpush3.bf16.msk.msra.mxu1 %vm25654_vm0, %v25646_v34 }
 0x8fc   : > { %18249 = vmatprep.subr.msk.bf16.mxu1 %vm25707_vm15, %v25646_v34 }
 0x8fd   : > { %18187 = vmatpush3.bf16.msk.msra.mxu0 %vm25706_vm6, %v25646_v34 }
 0x8fe   : > { %18189 = vmatprep.subr.msk.bf16.mxu0 %vm25708_vm9, %v25646_v34 }
 0x8ff   : > { %18251 = vmatpush3.bf16.msk.msra.mxu1 %vm25707_vm15, %v25646_v34 }
 0x900   : > { %18253 = vmatprep.subr.msk.bf16.mxu1 %vm25709_vm11, %v25646_v34 }
 0x901   : > { %18191 = vmatpush3.bf16.msk.msra.mxu0 %vm25708_vm9, %v25646_v34 }
 0x902   : > { %18193 = vmatprep.subr.msk.bf16.mxu0 %vm25710_vm5, %v25646_v34 }
 0x903   : > { %18255 = vmatpush3.bf16.msk.msra.mxu1 %vm25709_vm11, %v25646_v34 }
 0x904   : > { %18257 = vmatprep.subr.msk.bf16.mxu1 %vm25711_vm8, %v25646_v34 }
 0x905   : > { %18195 = vmatpush3.bf16.msk.msra.mxu0 %vm25710_vm5, %v25646_v34 }
 0x906   : > { %18197 = vmatprep.subr.msk.bf16.mxu0 %vm19712_vm3, %v25646_v34 }
 0x907   : > { %18259 = vmatpush3.bf16.msk.msra.mxu1 %vm25711_vm8, %v25646_v34 }
 0x908   : > { %15561 = vmatmul.mubr.f32.vlgmr.msra.gmra.mrb[50].mxu0 %v22803_v58  ;;  %18261 = vmatprep.subr.msk.bf16.mxu1 %vm25650_vm1, %v25646_v34 }
 0x909   : > { %18199 = vmatpush3.bf16.msk.msra.mxu0 %vm19712_vm3, %v25646_v34  ;;  %15595 = vmatprep.mubr.f32.mxu0 %v22805_v18 }
 0x90a   : > { %15631 = vmatmul.mubr.f32.vlgmr.msra.gmra.mrb[50].mxu1 %v22803_v58  ;;  %18201 = vmatprep.subr.msk.bf16.mxu0 %vm19915_vm14, %v25646_v34  ;;  %v6070_v58 = vmul.f32 %v6069_v32, %v22785_v62  ;;  %v7300_v32 = vstv %s23476_s12  ;;  %s23560_s12 = sld [smem:[#allocation6 + $0x9f]] }
 0x90b   : > { %18263 = vmatpush3.bf16.msk.msra.mxu1 %vm25650_vm1, %v25646_v34  ;;  %15665 = vmatprep.mubr.f32.mxu1 %v22805_v18  ;;  %v6074_v18 = vmul.f32 %v6073_v30, %v22785_v62  ;;  %v7308_v30 = vstv %s23480_s5  ;;  %s23564_s5 = sld [smem:[#allocation6 + $0xa1]] }
 0x90c   : > { %18265 = vmatprep.subr.msk.bf16.mxu1 %vm25651_vm10, %v25646_v34 }
 0x90d   : > { %18203 = vmatpush3.bf16.msk.msra.mxu0 %vm19915_vm14, %v25646_v34 }
 0x90e   : > { %18205 = vmatprep.subr.msk.bf16.mxu0 %vm19962_vm7, %v25646_v34 }
 0x90f   : > { %18267 = vmatpush3.bf16.msk.msra.mxu1 %vm25651_vm10, %v25646_v34 }
 0x910   : > { %18269 = vmatprep.subr.msk.bf16.mxu1 %vm19975_vm4, %v25646_v34 }
 0x911   : > { %18207 = vmatpush3.bf16.msk.msra.mxu0 %vm19962_vm7, %v25646_v34 }
 0x912   : > { %18209 = vmatprep.subr.msk.bf16.mxu0 %vm19999_vm13, %v25646_v34 }
 0x913   : > { %18271 = vmatpush3.bf16.msk.msra.mxu1 %vm19975_vm4, %v25646_v34 }
 0x914   : > { %18273 = vmatprep.subr.msk.bf16.mxu1 %vm20007_vm12, %v25646_v34 }
 0x915   : > { %18211 = vmatpush3.bf16.msk.msra.mxu0 %vm19999_vm13, %v25646_v34 }
 0x916   : > { %18213 = vmatprep.subr.msk.bf16.mxu0 %vm25652_vm2, %v25646_v34 }
 0x917   : > { %18275 = vmatpush3.bf16.msk.msra.mxu1 %vm20007_vm12, %v25646_v34 }
 0x918   : > { %18277 = vmatprep.subr.msk.bf16.mxu1 %vm25654_vm0, %v25646_v34 }
 0x919   : > { %18215 = vmatpush3.bf16.msk.msra.mxu0 %vm25652_vm2, %v25646_v34 }
 0x91a   : > { %18217 = vmatprep.subr.msk.bf16.mxu0 %vm25706_vm6, %v25646_v34 }
 0x91b   : > { %18279 = vmatpush3.bf16.msk.msra.mxu1 %vm25654_vm0, %v25646_v34 }
 0x91c   : > { %18281 = vmatprep.subr.msk.bf16.mxu1 %vm25707_vm15, %v25646_v34 }
 0x91d   : > { %18219 = vmatpush3.bf16.msk.msra.mxu0 %vm25706_vm6, %v25646_v34 }
 0x91e   : > { %18221 = vmatprep.subr.msk.bf16.mxu0 %vm25708_vm9, %v25646_v34 }
 0x91f   : > { %18283 = vmatpush3.bf16.msk.msra.mxu1 %vm25707_vm15, %v25646_v34 }
 0x920   : > { %18285 = vmatprep.subr.msk.bf16.mxu1 %vm25709_vm11, %v25646_v34 }
 0x921   : > { %18223 = vmatpush3.bf16.msk.msra.mxu0 %vm25708_vm9, %v25646_v34 }
 0x922   : > { %18225 = vmatprep.subr.msk.bf16.mxu0 %vm25710_vm5, %v25646_v34 }
 0x923   : > { %18287 = vmatpush3.bf16.msk.msra.mxu1 %vm25709_vm11, %v25646_v34  ;;  %vm25739_vm11 = vcmask 130048  }
 0x924   : > { %18289 = vmatprep.subr.msk.bf16.mxu1 %vm25711_vm8, %v25646_v34 }
 0x925   : > { %18227 = vmatpush3.bf16.msk.msra.mxu0 %vm25710_vm5, %v25646_v34  ;;  %vm25740_vm5 = vmmov %vm25739_vm11 }
 0x926   : > { %18293 = vmatprep.subr.bf16.mxu0 %v25729_v17  ;;  %vm25742_vm9 = vmmov %vm25740_vm5 }
 0x927   : > { %18291 = vmatpush3.bf16.msk.msra.mxu1 %vm25711_vm8, %v25646_v34  ;;  %vm25744_vm8 = vmmov %vm25740_vm5 }
 0x928   : > { %18297 = vmatprep.subr.bf16.mxu1 %v18296_v31  ;;  %15596 = vmatmul.mubr.f32.vlgmr.msra.gmra.mrb[50].mxu0 %v22801_v50  ;;  %vm25745_vm15 = vmmov %vm25740_vm5 }
 0x929   : > { %18295 = vmatpush3.bf16.msra.mxu0 %v25729_v17  ;;  %15672 = vmatprep.mubr.msk.f32.mxu0 %vm25739_vm11, %v25738_v13  ;;  %vm25746_vm11 = vmmov %vm25740_vm5 }
 0x92a   : > { %15666 = vmatmul.mubr.f32.vlgmr.msra.gmra.mrb[50].mxu1 %v22801_v50  ;;  %18301 = vmatprep.subr.bf16.mxu0 %v25729_v17  ;;  %v6083_v50 = vmul.f32 %v25754_v10, %v6081_v40  ;;  %v7304_v10 = vstv %s23478_s23  ;;  %s23562_s23 = sld [smem:[#allocation6 + $0xa0]] }
 0x92b   : > { %18299 = vmatpush3.bf16.msra.mxu1 %v18296_v31  ;;  %15679 = vmatprep.mubr.msk.f32.mxu1 %vm25740_vm5, %v25738_v13  ;;  %v7332_v13 = vstv %s23484_s29  ;;  %s23571_s29 = sld [smem:[#allocation6 + $0xbf]] }
 0x92c   : > { %18305 = vmatprep.subr.bf16.mxu1 %v18296_v31  ;;  %15673 = vmatmul.mubr.msk.f32.vlgmr.msra.gmra.mrb[52].mxu0 %vm25742_vm9, %v25741_v3  ;;  %vm25749_vm9 = vnez %v25720_v56 }
 0x92d   : > { %18303 = vmatpush3.bf16.msra.mxu0 %v25729_v17  ;;  %15686 = vmatprep.mubr.msk.f32.mxu0 %vm25744_vm8, %v25743_v4  ;;  %vm25750_vm8 = vnez %v25721_v9  ;;  %v6082_v17 = vmul.f32 %v6081_v40, %v22785_v62  ;;  %v7321_v62 = vmul.f32 %v7320_v12, %v22827_v44  ;;  %v7325_v40 = vmul.f32 %v7324_v5, %v22827_v44 }
 0x92e   : > { %15680 = vmatmul.mubr.msk.f32.vlgmr.msra.gmra.mrb[52].mxu1 %vm25745_vm15, %v25741_v3  ;;  %18309 = vmatprep.subr.msk.bf16.mxu0 %vm19712_vm3, %v25646_v34  ;;  %vm25748_vm15 = vmmov %vm25740_vm5  ;;  %v7328_v3 = vstv %s23482_s10  ;;  %s23569_s10 = sld [smem:[#allocation6 + $0xbe]] }
 0x92f   : > { %18307 = vmatpush3.bf16.msra.mxu1 %v18296_v31  ;;  %15693 = vmatprep.mubr.msk.f32.mxu1 %vm25746_vm11, %v25743_v4  ;;  %vm25751_vm11 = vnez %v25722_v46  ;;  %v7296_v31 = vstv %s23474_s25  ;;  %s23558_s25 = sld [smem:[#allocation6 + $0x9e]] }
 0x930   : > { %15687 = vmatmul.mubr.msk.f32.vlgmr.msra.gmra.mrb[54].mxu0 %vm25740_vm5, %v25747_v27  ;;  %18373 = vmatprep.subr.msk.bf16.mxu1 %vm25650_vm1, %v25646_v34  ;;  %vm25752_vm5 = vnez %v25723_v54 }
 0x931   : > { %18311 = vmatpush3.bf16.msk.msra.mxu0 %vm19712_vm3, %v25646_v34 }
 0x932   : > { %15694 = vmatmul.mubr.msk.f32.vlgmr.msra.gmra.mrb[54].mxu1 %vm25748_vm15, %v25747_v27  ;;  %18313 = vmatprep.subr.msk.bf16.mxu0 %vm19915_vm14, %v25646_v34  ;;  %vm25753_vm15 = vnez %v25724_v8  ;;  %v7313_v27 = vmul.f32 %v7312_v37, %v22827_v44 }
 0x933   : > { %18375 = vmatpush3.bf16.msk.msra.mxu1 %vm25650_vm1, %v25646_v34 }
 0x934   : > { %18377 = vmatprep.subr.msk.bf16.mxu1 %vm25651_vm10, %v25646_v34 }
 0x935   : > { %18315 = vmatpush3.bf16.msk.msra.mxu0 %vm19915_vm14, %v25646_v34 }
 0x936   : > { %18317 = vmatprep.subr.msk.bf16.mxu0 %vm19962_vm7, %v25646_v34 }
 0x937   : > { %18379 = vmatpush3.bf16.msk.msra.mxu1 %vm25651_vm10, %v25646_v34 }
 0x938   : > { %18381 = vmatprep.subr.msk.bf16.mxu1 %vm19975_vm4, %v25646_v34 }
 0x939   : > { %18319 = vmatpush3.bf16.msk.msra.mxu0 %vm19962_vm7, %v25646_v34 }
 0x93a   : > { %18321 = vmatprep.subr.msk.bf16.mxu0 %vm19999_vm13, %v25646_v34 }
 0x93b   : > { %18383 = vmatpush3.bf16.msk.msra.mxu1 %vm19975_vm4, %v25646_v34 }
 0x93c   : > { %18385 = vmatprep.subr.msk.bf16.mxu1 %vm20007_vm12, %v25646_v34 }
 0x93d   : > { %18323 = vmatpush3.bf16.msk.msra.mxu0 %vm19999_vm13, %v25646_v34 }
 0x93e   : > { %18325 = vmatprep.subr.msk.bf16.mxu0 %vm25652_vm2, %v25646_v34 }
 0x93f   : > { %18387 = vmatpush3.bf16.msk.msra.mxu1 %vm20007_vm12, %v25646_v34 }
 0x940   : > { %18389 = vmatprep.subr.msk.bf16.mxu1 %vm25654_vm0, %v25646_v34 }
 0x941   : > { %18327 = vmatpush3.bf16.msk.msra.mxu0 %vm25652_vm2, %v25646_v34 }
 0x942   : > { %18329 = vmatprep.subr.msk.bf16.mxu0 %vm25706_vm6, %v25646_v34 }
 0x943   : > { %18391 = vmatpush3.bf16.msk.msra.mxu1 %vm25654_vm0, %v25646_v34 }
 0x944   : > { %18393 = vmatprep.subr.msk.bf16.mxu1 %vm25749_vm9, %v25646_v34 }
 0x945   : > { %18331 = vmatpush3.bf16.msk.msra.mxu0 %vm25706_vm6, %v25646_v34 }
 0x946   : > { %18333 = vmatprep.subr.msk.bf16.mxu0 %vm25750_vm8, %v25646_v34 }
 0x947   : > { %18395 = vmatpush3.bf16.msk.msra.mxu1 %vm25749_vm9, %v25646_v34 }
 0x948   : > { %18397 = vmatprep.subr.msk.bf16.mxu1 %vm25751_vm11, %v25646_v34 }
 0x949   : > { %18335 = vmatpush3.bf16.msk.msra.mxu0 %vm25750_vm8, %v25646_v34 }
 0x94a   : > { %18337 = vmatprep.subr.msk.bf16.mxu0 %vm25752_vm5, %v25646_v34 }
 0x94b   : > { %18399 = vmatpush3.bf16.msk.msra.mxu1 %vm25751_vm11, %v25646_v34 }
 0x94c   : > { %18401 = vmatprep.subr.msk.bf16.mxu1 %vm25753_vm15, %v25646_v34 }
 0x94d   : > { %18339 = vmatpush3.bf16.msk.msra.mxu0 %vm25752_vm5, %v25646_v34 }
 0x94e   : > { %18341 = vmatprep.subr.msk.bf16.mxu0 %vm19712_vm3, %v25646_v34 }
 0x94f   : > { %18403 = vmatpush3.bf16.msk.msra.mxu1 %vm25753_vm15, %v25646_v34 }
 0x950   : > { %18405 = vmatprep.subr.msk.bf16.mxu1 %vm25650_vm1, %v25646_v34 }
 0x97b   : > { %v15317_v4 = vpop.f32.mrb[46].mxu0 }
 0x97c   : > { %v7298_v25 = vmul.f32 %v15317_v4, %v7296_v31  ;;  %v7302_v2 = vmul.f32 %v15317_v4, %v7300_v32  ;;  %v7306_v57 = vmul.f32 %v15317_v4, %v7304_v10  ;;  %v7310_v8 = vmul.f32 %v15317_v4, %v7308_v30  ;;  %v6532_v54 = vpop.f32.mrb[47].mxu0 }
 0x97d   : > { %v15387_v46 = vpop.f32.mrb[46].mxu1  ;;  %v7297_v9 = vmul.f32 %v7296_v31, %v6532_v54  ;;  %v7301_v56 = vmul.f32 %v7300_v32, %v6532_v54  ;;  %v7305_v37 = vmul.f32 %v7304_v10, %v6532_v54  ;;  %v7309_v6 = vmul.f32 %v7308_v30, %v6532_v54 }
 0x97e   : > { %v7448_v16 = vadd.f32 %v7298_v25, %v6071_v60  ;;  %v7482_v38 = vadd.f32 %v7302_v2, %v6075_v26  ;;  %v7516_v12 = vadd.f32 %v7306_v57, %v6079_v39  ;;  %v7550_v52 = vadd.f32 %v7310_v8, %v6083_v50  ;;  %v6682_v44 = vpop.f32.mrb[47].mxu1 }
 0x97f   : > { %v7330_v5 = vmul.f32 %v15387_v46, %v7328_v3  ;;  %v7334_v49 = vmul.f32 %v15387_v46, %v7332_v13  ;;  %v7338_v48 = vmul.f32 %v15387_v46, %v7336_v28  ;;  %v7342_v47 = vmul.f32 %v15387_v46, %v7340_v24 }
 0x980   : > { %v7447_v45 = vadd.f32 %v7297_v9, %v6070_v58  ;;  %v7481_v1 = vadd.f32 %v7301_v56, %v6074_v18  ;;  %v7515_v35 = vadd.f32 %v7305_v37, %v6078_v63  ;;  %v7549_v20 = vadd.f32 %v7309_v6, %v6082_v17 }
 0x981   : > { %v7450_v4 = vadd.f32 %v7330_v5, %v7314_v42  ;;  %v7484_v51 = vadd.f32 %v7334_v49, %v7318_v53  ;;  %v7518_v59 = vadd.f32 %v7338_v48, %v7322_v55  ;;  %v7552_v31 = vadd.f32 %v7342_v47, %v7326_v41 }
 0x982   : > { %v7329_v32 = vmul.f32 %v7328_v3, %v6682_v44  ;;  %v7333_v10 = vmul.f32 %v7332_v13, %v6682_v44  ;;  %v7337_v54 = vmul.f32 %v7336_v28, %v6682_v44  ;;  %v7341_v25 = vmul.f32 %v7340_v24, %v6682_v44 }
 0x983   : > { %v23518_v2 = vadd.f32 %v7450_v4, %v7448_v16  ;;  %v23520_v8 = vadd.f32 %v7484_v51, %v7482_v38  ;;  %v23522_v60 = vadd.f32 %v7518_v59, %v7516_v12  ;;  %v23524_v26 = vadd.f32 %v7552_v31, %v7550_v52 }
 0x984   : > { %v7449_v9 = vadd.f32 %v7329_v32, %v7313_v27  ;;  %v7483_v56 = vadd.f32 %v7333_v10, %v7317_v36  ;;  %v7517_v46 = vadd.f32 %v7337_v54, %v7321_v62  ;;  %v7551_v6 = vadd.f32 %v7341_v25, %v7325_v40 }
 0x985   : > { %v7372_v38 = vstv %s23548_s30  ;;  %v6691_v28 = vadd.f32 %v25725_v23, %v25727_v43  ;;  %v7416_v13 = vstv %s23554_s14  ;;  %v7420_v3 = vstv %s23556_s22  ;;  %s23598_s30 = sld [smem:[#allocation6 + $0xf0]]  ;;  %s24374_s14 = sld [smem:[#allocation6 + $0x72]] }
 0x986   : > { %v23526_v39 = vadd.f32 %v7449_v9, %v7447_v45  ;;  %v23528_v48 = vadd.f32 %v7483_v56, %v7481_v1  ;;  %v23530_v47 = vadd.f32 %v7517_v46, %v7515_v35  ;;  %v23532_v49 = vadd.f32 %v7551_v6, %v7549_v20  ;;  %s24376_s22 = sld [smem:[#allocation6 + $0x73]] }
 0x987   : > { %v6692_v35 = vadd.f32 %v25726_v33, %v25728_v7  ;;  %v7360_v1 = vstv %s23542_s7  ;;  %v7364_v45 = vstv %s23544_s26  ;;  %v7368_v20 = vstv %s23546_s11  ;;  %s23586_s7 = sld [smem:[#allocation6 + $0xd0]]  ;;  %s23594_s26 = sld [smem:[#allocation6 + $0xee]] }
 0x988   : > { %v7408_v33 = vstv %s23550_s8  ;;  %v7412_v7 = vstv %s23552_s13  ;;  %s23596_s11 = sld [smem:[#allocation6 + $0xef]]  ;;  %v7361_v23 = vmul.f32 %v7360_v1, %v6691_v28  ;;  %v7365_v43 = vmul.f32 %v7364_v45, %v6691_v28  ;;  %s23600_s8 = sld [smem:[#allocation6 + $0xf1]] }
 0x989   : > { %v7362_v27 = vmul.f32 %v7360_v1, %v6692_v35  ;;  %v7366_v50 = vmul.f32 %v7364_v45, %v6692_v35  ;;  %v7370_v58 = vmul.f32 %v7368_v20, %v6692_v35  ;;  %v7374_v18 = vmul.f32 %v7372_v38, %v6692_v35  ;;  %s11904_s13 = sld [smem:[#allocation6 + $0x85]] }
 0x98a   : > { %v7369_v63 = vmul.f32 %v7368_v20, %v6691_v28  ;;  %v7373_v17 = vmul.f32 %v7372_v38, %v6691_v28  ;;  %v23603_v42 = vmul.f32 %v7408_v33, %v22834_v22  ;;  %v23606_v53 = vmul.f32 %v7412_v7, %v22834_v22 }
 0x98b   : > { %v23609_v55 = vmul.f32 %v7416_v13, %v22834_v22  ;;  %v23612_v41 = vmul.f32 %v7420_v3, %v22834_v22  ;;  %v7344_v30 = vstv %s23558_s25  ;;  %v7348_v36 = vstv %s23560_s12  ;;  %s24378_s25 = sld [smem:[#allocation6 + $0x74]]  ;;  %s24380_s12 = sld [smem:[#allocation6 + $0x75]] }
 0x98c   : > { %v7352_v62 = vstv %s23562_s23  ;;  %v7356_v40 = vstv %s23564_s5  ;;  %v23619_v57 = vmul.f32 %v7408_v33, %v22841_v11  ;;  %v23622_v37 = vmul.f32 %v7412_v7, %v22841_v11  ;;  %s24394_s23 = sld [smem:[#allocation6 + $0x92]]  ;;  %s24396_s5 = sld [smem:[#allocation6 + $0x93]] }
 0x98d   : > { %v23625_v16 = vmul.f32 %v7416_v13, %v22841_v11  ;;  %v23628_v22 = vmul.f32 %v7420_v3, %v22841_v11  ;;  %v7376_v12 = vstv %s23569_s10  ;;  %v7380_v44 = vstv %s23571_s29  ;;  %s24398_s10 = sld [smem:[#allocation6 + $0x94]]  ;;  %s24400_s29 = sld [smem:[#allocation6 + $0x95]] }
 0x98e   : > { %25755 = vst [vmem:[#allocation37_spill] sm:$0xff] %v23619_v57  ;;  %25756 = vst [vmem:[#allocation36_spill] sm:$0xff] %v23622_v37  ;;  %v7384_v5 = vstv %s23576_s9  ;;  %v7388_v4 = vstv %s23578_s20  ;;  %v7392_v25 = vstv %s23582_s0  ;;  %v7396_v9 = vstv %s23584_s1  ;;  %s11901_s0 = sld [smem:[#allocation6 + $0x82]]  ;;  %s11902_s1 = sld [smem:[#allocation6 + $0x83]] }
 0x98f   : > { %25757 = vst [vmem:[#allocation35_spill] sm:$0xff] %v23625_v16  ;;  %25758 = vst [vmem:[#allocation41_spill] sm:$0xff] %v23628_v22  ;;  %v7400_v11 = vstv %s23586_s7  ;;  %v7404_v56 = vstv %s23588_s2  ;;  %v7424_v45 = vstv %s23594_s26  ;;  %v7428_v20 = vstv %s23596_s11  ;;  %s11903_s2 = sld [smem:[#allocation6 + $0x84]]  ;;  %s24402_s9 = sld [smem:[#allocation6 + $0xa2]] }
 0x990   : > { %v7432_v38 = vstv %s23598_s30  ;;  %s24404_s20 = sld [smem:[#allocation6 + $0xa3]]  ;;  %s24406_s7 = sld [smem:[#allocation6 + $0xa4]] }
 0x991   : > { %s24408_s26 = sld [smem:[#allocation6 + $0xa5]]  ;;  %s11913_s11 = sld [smem:[#allocation6 + $0xb2]] }
 0x992   : > { %s24438_s30 = sld [smem:[#allocation6 + $0xb3]] }
 0x9bb   : > { %v23534_v24 = vpop.f32.mrb[48].mxu0 }
 0x9bc   : > { %v23536_v51 = vpop.f32.mrb[49].mxu0  ;;  %v7346_v31 = vmul.f32 %v23534_v24, %v7344_v30  ;;  %v7350_v32 = vmul.f32 %v23534_v24, %v7348_v36  ;;  %v7354_v10 = vmul.f32 %v23534_v24, %v7352_v62  ;;  %v7358_v54 = vmul.f32 %v23534_v24, %v7356_v40 }
 0x9bd   : > { %v23538_v59 = vpop.f32.mrb[48].mxu1  ;;  %v7345_v46 = vmul.f32 %v7344_v30, %v23536_v51  ;;  %v7349_v6 = vmul.f32 %v7348_v36, %v23536_v51  ;;  %v7353_v35 = vmul.f32 %v7352_v62, %v23536_v51  ;;  %v7357_v1 = vmul.f32 %v7356_v40, %v23536_v51 }
 0x9be   : > { %v23540_v52 = vpop.f32.mrb[49].mxu1  ;;  %v7452_v33 = vadd.f32 %v7362_v27, %v7346_v31  ;;  %v7486_v7 = vadd.f32 %v7366_v50, %v7350_v32  ;;  %v7520_v13 = vadd.f32 %v7370_v58, %v7354_v10  ;;  %v7554_v24 = vadd.f32 %v7374_v18, %v7358_v54 }
 0x9bf   : > { %v7378_v3 = vmul.f32 %v23538_v59, %v7376_v12  ;;  %v7382_v22 = vmul.f32 %v23538_v59, %v7380_v44  ;;  %v7386_v30 = vmul.f32 %v23538_v59, %v7384_v5  ;;  %v7390_v36 = vmul.f32 %v23538_v59, %v7388_v4 }
 0x9c0   : > { %v7451_v16 = vadd.f32 %v7361_v23, %v7345_v46  ;;  %v7485_v62 = vadd.f32 %v7365_v43, %v7349_v6  ;;  %v7519_v37 = vadd.f32 %v7369_v63, %v7353_v35  ;;  %v7553_v51 = vadd.f32 %v7373_v17, %v7357_v1 }
 0x9c1   : > { %v7377_v40 = vmul.f32 %v7376_v12, %v23540_v52  ;;  %v7381_v28 = vmul.f32 %v7380_v44, %v23540_v52  ;;  %v7385_v27 = vmul.f32 %v7384_v5, %v23540_v52  ;;  %v7389_v50 = vmul.f32 %v7388_v4, %v23540_v52 }
 0x9c2   : > { %v25759_v1 = vstv %s23600_s8  ;;  %s24440_s8 = sld [smem:[#allocation6 + $0xb4]] }
 0x9fb   : > { %v15597_v58 = vpop.f32.mrb[50].mxu0 }
 0x9fc   : > { %v7394_v18 = vmul.f32 %v15597_v58, %v7392_v25  ;;  %v7398_v31 = vmul.f32 %v15597_v58, %v7396_v9  ;;  %v7402_v32 = vmul.f32 %v15597_v58, %v7400_v11  ;;  %v7406_v59 = vmul.f32 %v15597_v58, %v7404_v56  ;;  %v7136_v23 = vpop.f32.mrb[51].mxu0 }
 0x9fd   : > { %v15667_v43 = vpop.f32.mrb[50].mxu1  ;;  %v7393_v63 = vmul.f32 %v7392_v25, %v7136_v23  ;;  %v7397_v17 = vmul.f32 %v7396_v9, %v7136_v23  ;;  %v7401_v12 = vmul.f32 %v7400_v11, %v7136_v23  ;;  %v7405_v10 = vmul.f32 %v7404_v56, %v7136_v23 }
 0x9fe   : > { %v7454_v44 = vadd.f32 %v7394_v18, %v7378_v3  ;;  %v7488_v54 = vadd.f32 %v7398_v31, %v7382_v22  ;;  %v7522_v5 = vadd.f32 %v7402_v32, %v7386_v30  ;;  %v7556_v46 = vadd.f32 %v7406_v59, %v7390_v36  ;;  %v7286_v52 = vpop.f32.mrb[51].mxu1 }
 0x9ff   : > { %v7426_v4 = vmul.f32 %v15667_v43, %v7424_v45  ;;  %v7430_v6 = vmul.f32 %v15667_v43, %v7428_v20  ;;  %v7434_v35 = vmul.f32 %v15667_v43, %v7432_v38  ;;  %v7438_v57 = vmul.f32 %v15667_v43, %v25759_v1  ;;  %v23666_v58 = vpop.f32.mrb[52].mxu0 }
 0xa00   : > { %v7464_v21 = vadd.f32 %v7454_v44, %v7452_v33  ;;  %v7498_v25 = vadd.f32 %v7488_v54, %v7486_v7  ;;  %v7532_v9 = vadd.f32 %v7522_v5, %v7520_v13  ;;  %v7566_v11 = vadd.f32 %v7556_v46, %v7554_v24  ;;  %v23668_v56 = vpop.f32.mrb[53].mxu0  ;;  %v25771_v46 = vld [vmem:[#allocation36_spill] sm:$0xff] }
 0xa01   : > { %v7456_v22 = vadd.f32 %v7426_v4, %v23603_v42  ;;  %v7490_v3 = vadd.f32 %v7430_v6, %v23606_v53  ;;  %v7524_v30 = vadd.f32 %v7434_v35, %v23609_v55  ;;  %v7558_v36 = vadd.f32 %v7438_v57, %v23612_v41  ;;  %v15681_v18 = vpop.f32.mrb[52].mxu1  ;;  %v25772_v4 = vld [vmem:[#allocation35_spill] sm:$0xff]  ;;  %v25773_v35 = vld [vmem:[#allocation41_spill] sm:$0xff] }
 0xa02   : > { %v7468_v31 = vadd.f32 %v7464_v21, %v23518_v2  ;;  %v7502_v32 = vadd.f32 %v7498_v25, %v23520_v8  ;;  %v7536_v33 = vadd.f32 %v7532_v9, %v23522_v60  ;;  %v7570_v7 = vadd.f32 %v7566_v11, %v23524_v26  ;;  %v7721_v13 = vpop.f32.mrb[53].mxu1 }
 0xa03   : > { %v7453_v24 = vadd.f32 %v7393_v63, %v7377_v40  ;;  %v7487_v59 = vadd.f32 %v7397_v17, %v7381_v28  ;;  %v7521_v23 = vadd.f32 %v7401_v12, %v7385_v27  ;;  %v7555_v42 = vadd.f32 %v7405_v10, %v7389_v50  ;;  %15728 = vmatprep.mubr.f32.mxu0 %v7721_v13  ;;  %v23678_v53 = vpop.f32.mrb[54].mxu0 }
 0xa04   : > { %v7470_v55 = vadd.f32 %v7468_v31, %v22790_v29  ;;  %v7504_v41 = vadd.f32 %v7502_v32, %v22793_v0  ;;  %v7538_v21 = vadd.f32 %v7536_v33, %v22796_v15  ;;  %v7572_v2 = vadd.f32 %v7570_v7, %v22799_v19  ;;  %15798 = vmatprep.mubr.f32.mxu1 %v7721_v13  ;;  %v23684_v8 = vpop.f32.mrb[55].mxu0 }
 0xa05   : > { %v7463_v60 = vadd.f32 %v7453_v24, %v7451_v16  ;;  %v7497_v26 = vadd.f32 %v7487_v59, %v7485_v62  ;;  %v7531_v57 = vadd.f32 %v7521_v23, %v7519_v37  ;;  %v7565_v28 = vadd.f32 %v7555_v42, %v7553_v51  ;;  %15729 = vmatmul.mubr.f32.vlgmr.msra.gmra.mrb[56].mxu0 %v15681_v18  ;;  %v23686_v40 = vpop.f32.mrb[54].mxu1  ;;  %v25785_v59 = vld [vmem:[#allocation18_spill] sm:$0xff]  ;;  %v25787_v42 = vld [vmem:[#allocation19_spill] sm:$0xff] }
 0xa06   : > { %v23688_v29 = vadd.f32 %v7470_v55, %v7456_v22  ;;  %v23690_v0 = vadd.f32 %v7504_v41, %v7490_v3  ;;  %v23692_v15 = vadd.f32 %v7538_v21, %v7524_v30  ;;  %v23694_v19 = vadd.f32 %v7572_v2, %v7558_v36  ;;  %18343 = vmatpush3.bf16.msk.msra.mxu0 %vm19712_vm3, %v25646_v34  ;;  %v23699_v37 = vpop.f32.mrb[55].mxu1  ;;  %v25786_v23 = vld [vmem:[#allocation22_spill] sm:$0xff]  ;;  %v25788_v55 = vld [vmem:[#allocation23_spill] sm:$0xff]  ;;  %v25789_v41 = vld [vmem:[#allocation20_spill] sm:$0xff] }
 0xa07   : > { %v7467_v16 = vadd.f32 %v7463_v60, %v23526_v39  ;;  %v7501_v62 = vadd.f32 %v7497_v26, %v23528_v48  ;;  %v7535_v51 = vadd.f32 %v7531_v57, %v23530_v47  ;;  %v7569_v27 = vadd.f32 %v7565_v28, %v23532_v49  ;;  %15799 = vmatmul.mubr.f32.vlgmr.msra.gmra.mrb[56].mxu1 %v15681_v18  ;;  %v25765_v39 = vld [vmem:[#allocation42_spill] sm:$0xff]  ;;  %v25766_v48 = vld [vmem:[#allocation43_spill] sm:$0xff]  ;;  %v25767_v47 = vld [vmem:[#allocation44_spill] sm:$0xff] }
 0xa08   : > { %25760 = vst [vmem:[#allocation46_spill] sm:$0xff] %v23688_v29  ;;  %25761 = vst [vmem:[#allocation47_spill] sm:$0xff] %v23690_v0  ;;  %v7425_v50 = vmul.f32 %v7424_v45, %v7286_v52  ;;  %v7429_v43 = vmul.f32 %v7428_v20, %v7286_v52  ;;  %v7433_v63 = vmul.f32 %v7432_v38, %v7286_v52  ;;  %v25764_v17 = vmov %v25759_v1  ;;  %v25768_v49 = vld [vmem:[#allocation45_spill] sm:$0xff]  ;;  %v25790_v21 = vld [vmem:[#allocation24_spill] sm:$0xff] }
 0xa09   : > { %25762 = vst [vmem:[#allocation48_spill] sm:$0xff] %v23692_v15  ;;  %25763 = vst [vmem:[#allocation49_spill] sm:$0xff] %v23694_v19  ;;  %v7437_v12 = vmul.f32 %v25764_v17, %v7286_v52  ;;  %18407 = vmatpush3.bf16.msk.msra.mxu1 %vm25650_vm1, %v25646_v34  ;;  %v7469_v10 = vadd.f32 %v7467_v16, %v25765_v39  ;;  %v7503_v44 = vadd.f32 %v7501_v62, %v25766_v48  ;;  %v25770_v20 = vld [vmem:[#allocation37_spill] sm:$0xff]  ;;  %v25791_v2 = vld [vmem:[#allocation34_spill] sm:$0xff] }
 0xa0a   : > { %v7537_v54 = vadd.f32 %v7535_v51, %v25767_v47  ;;  %v7571_v5 = vadd.f32 %v7569_v27, %v25768_v49  ;;  %18345 = vmatprep.subr.msk.bf16.mxu0 %vm19915_vm14, %v25646_v34  ;;  %v7455_v38 = vadd.f32 %v7425_v50, %v25770_v20  ;;  %v7489_v52 = vadd.f32 %v7429_v43, %v25771_v46  ;;  %v25793_v60 = vld [vmem:[#allocation39_spill] sm:$0xff]  ;;  %v25794_v26 = vld [vmem:[#allocation40_spill] sm:$0xff]  ;;  %v25804_v43 = vld [vmem:[#allocation13_spill] sm:$0xff] }
 0xa0b   : > { %v7523_v6 = vadd.f32 %v7433_v63, %v25772_v4  ;;  %v7557_v1 = vadd.f32 %v7437_v12, %v25773_v35  ;;  %18409 = vmatprep.subr.msk.bf16.mxu1 %vm25651_vm10, %v25646_v34  ;;  %v23731_v9 = vadd.f32 %v15681_v18, %v23666_v58  ;;  %v23734_v11 = vadd.f32 %v7721_v13, %v23668_v56  ;;  %v25801_v62 = vld [vmem:[#allocation31_spill] sm:$0xff]  ;;  %v25807_v63 = vld [vmem:[#allocation14_spill] sm:$0xff]  ;;  %v25813_v17 = vld [vmem:[#allocation16_spill] sm:$0xff] }
 0xa0c   : > { %18347 = vmatpush3.bf16.msk.msra.mxu0 %vm19915_vm14, %v25646_v34  ;;  %15763 = vmatprep.mubr.f32.mxu0 %v23668_v56  ;;  %v23742_v22 = vadd.f32 %v23686_v40, %v23678_v53  ;;  %v23744_v3 = vadd.f32 %v7469_v10, %v7455_v38  ;;  %v23746_v30 = vadd.f32 %v7503_v44, %v7489_v52  ;;  %v25802_v51 = vmax.f32 %v25801_v62, 0.0 }
 0xa0d   : > { %v23748_v36 = vadd.f32 %v7537_v54, %v7523_v6  ;;  %v23750_v18 = vadd.f32 %v7571_v5, %v7557_v1  ;;  %18411 = vmatpush3.bf16.msk.msra.mxu1 %vm25651_vm10, %v25646_v34  ;;  %18349 = vmatprep.subr.msk.bf16.mxu0 %vm19962_vm7, %v25646_v34  ;;  %v23763_v33 = vadd.f32 %v23699_v37, %v23684_v8  ;;  %v8803_v12 = vstv %s11901_s0  ;;  %s24442_s0 = sld [smem:[#allocation6 + $0xb5]] }
 0xa0e   : > { %25775 = vst [vmem:[#allocation42_spill] sm:$0xff] %v23744_v3  ;;  %25776 = vst [vmem:[#allocation43_spill] sm:$0xff] %v23746_v30  ;;  %18413 = vmatprep.subr.msk.bf16.mxu1 %vm19975_vm4, %v25646_v34  ;;  %15833 = vmatprep.mubr.f32.mxu1 %v23668_v56  ;;  %v8807_v39 = vstv %s11902_s1  ;;  %v8811_v10 = vstv %s11903_s2  ;;  %v8815_v48 = vstv %s11904_s13  ;;  %v8787_v44 = vstv %s24374_s14  ;;  %s24444_s1 = sld [smem:[#allocation6 + $0xe2]]  ;;  %s24446_s2 = sld [smem:[#allocation6 + $0xe3]] }
 0xa0f   : > { %25777 = vst [vmem:[#allocation44_spill] sm:$0xff] %v23748_v36  ;;  %25778 = vst [vmem:[#allocation45_spill] sm:$0xff] %v23750_v18  ;;  %v8791_v47 = vstv %s24376_s22  ;;  %v8795_v54 = vstv %s24378_s25  ;;  %v8799_v49 = vstv %s24380_s12  ;;  %v8805_v20 = vmul.f32 %v8803_v12, %v23731_v9  ;;  %s24448_s13 = sld [smem:[#allocation6 + $0xe4]]  ;;  %s24450_s14 = sld [smem:[#allocation6 + $0xc2]] }
 0xa10   : > { %18351 = vmatpush3.bf16.msk.msra.mxu0 %vm19962_vm7, %v25646_v34  ;;  %v8809_v38 = vmul.f32 %v8807_v39, %v23731_v9  ;;  %v8813_v46 = vmul.f32 %v8811_v10, %v23731_v9  ;;  %v8817_v52 = vmul.f32 %v8815_v48, %v23731_v9  ;;  %v8808_v62 = vmul.f32 %v8807_v39, %v23734_v11  ;;  %s24452_s22 = sld [smem:[#allocation6 + $0xc3]]  ;;  %s24454_s25 = sld [smem:[#allocation6 + $0xc4]] }
 0xa11   : > { %18415 = vmatpush3.bf16.msk.msra.mxu1 %vm19975_vm4, %v25646_v34  ;;  %18353 = vmatprep.subr.msk.bf16.mxu0 %vm19999_vm13, %v25646_v34  ;;  %v8839_v39 = vstv %s24404_s20  ;;  %s24456_s12 = sld [smem:[#allocation6 + $0xc5]]  ;;  %s11929_s20 = sld [smem:[#allocation6 + $0xf2]] }
 0xa12   : > { %18417 = vmatprep.subr.msk.bf16.mxu1 %vm20007_vm12, %v25646_v34 }
 0xa14   : > { %18355 = vmatpush3.bf16.msk.msra.mxu0 %vm19999_vm13, %v25646_v34 }
 0xa15   : > { %18419 = vmatpush3.bf16.msk.msra.mxu1 %vm20007_vm12, %v25646_v34  ;;  %18357 = vmatprep.subr.msk.bf16.mxu0 %vm25652_vm2, %v25646_v34 }
 0xa16   : > { %18421 = vmatprep.subr.msk.bf16.mxu1 %vm25654_vm0, %v25646_v34 }
 0xa17   : > { %v8915_v61 = vstv %s11929_s20  ;;  %s25128_s20 = sld [smem:[#allocation6 + $0xb9]] }
 0xa18   : > { %18359 = vmatpush3.bf16.msk.msra.mxu0 %vm25652_vm2, %v25646_v34 }
 0xa19   : > { %18423 = vmatpush3.bf16.msk.msra.mxu1 %vm25654_vm0, %v25646_v34  ;;  %18361 = vmatprep.subr.msk.bf16.mxu0 %vm25706_vm6, %v25646_v34 }
 0xa1a   : > { %18425 = vmatprep.subr.msk.bf16.mxu1 %vm25749_vm9, %v25646_v34 }
 0xa1c   : > { %18363 = vmatpush3.bf16.msk.msra.mxu0 %vm25706_vm6, %v25646_v34 }
 0xa1d   : > { %18427 = vmatpush3.bf16.msk.msra.mxu1 %vm25749_vm9, %v25646_v34  ;;  %18365 = vmatprep.subr.msk.bf16.mxu0 %vm25750_vm8, %v25646_v34 }
 0xa1e   : > { %18429 = vmatprep.subr.msk.bf16.mxu1 %vm25751_vm11, %v25646_v34 }
 0xa20   : > { %18367 = vmatpush3.bf16.msk.msra.mxu0 %vm25750_vm8, %v25646_v34 }
 0xa21   : > { %18431 = vmatpush3.bf16.msk.msra.mxu1 %vm25751_vm11, %v25646_v34  ;;  %18369 = vmatprep.subr.msk.bf16.mxu0 %vm25752_vm5, %v25646_v34 }
 0xa22   : > { %18433 = vmatprep.subr.msk.bf16.mxu1 %vm25753_vm15, %v25646_v34 }
 0xa24   : > { %18371 = vmatpush3.bf16.msk.msra.mxu0 %vm25752_vm5, %v25646_v34 }
 0xa25   : > { %18435 = vmatpush3.bf16.msk.msra.mxu1 %vm25753_vm15, %v25646_v34  ;;  %18437 = vmatprep.subr.msk.bf16.mxu0 %vm19712_vm3, %v25646_v34 }
 0xa26   : > { %18501 = vmatprep.subr.msk.bf16.mxu1 %vm25650_vm1, %v25646_v34 }
 0xa27   : > { %15764 = vmatmul.mubr.f32.vlgmr.msra.gmra.mrb[56].mxu0 %v23666_v58 }
 0xa28   : > { %15834 = vmatmul.mubr.f32.vlgmr.msra.gmra.mrb[56].mxu1 %v23666_v58  ;;  %18439 = vmatpush3.bf16.msk.msra.mxu0 %vm19712_vm3, %v25646_v34  ;;  %v25792_v58 = vld [vmem:[#allocation38_spill] sm:$0xff] }
 0xa29   : > { %15868 = vmatprep.mubr.f32.mxu0 %v25791_v2  ;;  %18503 = vmatpush3.bf16.msk.msra.mxu1 %vm25650_vm1, %v25646_v34 }
 0xa2a   : > { %15938 = vmatprep.mubr.f32.mxu1 %v25791_v2  ;;  %18441 = vmatprep.subr.msk.bf16.mxu0 %vm19915_vm14, %v25646_v34 }
 0xa2b   : > { %18505 = vmatprep.subr.msk.bf16.mxu1 %vm25651_vm10, %v25646_v34 }
 0xa2c   : > { %18443 = vmatpush3.bf16.msk.msra.mxu0 %vm19915_vm14, %v25646_v34 }
 0xa2d   : > { %18507 = vmatpush3.bf16.msk.msra.mxu1 %vm25651_vm10, %v25646_v34  ;;  %18445 = vmatprep.subr.msk.bf16.mxu0 %vm19962_vm7, %v25646_v34 }
 0xa2e   : > { %18509 = vmatprep.subr.msk.bf16.mxu1 %vm19975_vm4, %v25646_v34 }
 0xa30   : > { %18447 = vmatpush3.bf16.msk.msra.mxu0 %vm19962_vm7, %v25646_v34 }
 0xa31   : > { %18511 = vmatpush3.bf16.msk.msra.mxu1 %vm19975_vm4, %v25646_v34  ;;  %18449 = vmatprep.subr.msk.bf16.mxu0 %vm19999_vm13, %v25646_v34 }
 0xa32   : > { %18513 = vmatprep.subr.msk.bf16.mxu1 %vm20007_vm12, %v25646_v34 }
 0xa34   : > { %18451 = vmatpush3.bf16.msk.msra.mxu0 %vm19999_vm13, %v25646_v34 }
 0xa35   : > { %18515 = vmatpush3.bf16.msk.msra.mxu1 %vm20007_vm12, %v25646_v34  ;;  %18453 = vmatprep.subr.msk.bf16.mxu0 %vm25652_vm2, %v25646_v34 }
 0xa36   : > { %18517 = vmatprep.subr.msk.bf16.mxu1 %vm25654_vm0, %v25646_v34 }
 0xa38   : > { %18455 = vmatpush3.bf16.msk.msra.mxu0 %vm25652_vm2, %v25646_v34 }
 0xa39   : > { %18519 = vmatpush3.bf16.msk.msra.mxu1 %vm25654_vm0, %v25646_v34  ;;  %18457 = vmatprep.subr.msk.bf16.mxu0 %vm25706_vm6, %v25646_v34 }
 0xa3a   : > { %18521 = vmatprep.subr.msk.bf16.mxu1 %vm25749_vm9, %v25646_v34 }
 0xa3c   : > { %18459 = vmatpush3.bf16.msk.msra.mxu0 %vm25706_vm6, %v25646_v34 }
 0xa3d   : > { %18523 = vmatpush3.bf16.msk.msra.mxu1 %vm25749_vm9, %v25646_v34  ;;  %18461 = vmatprep.subr.msk.bf16.mxu0 %vm25750_vm8, %v25646_v34 }
 0xa3e   : > { %18525 = vmatprep.subr.msk.bf16.mxu1 %vm25751_vm11, %v25646_v34 }
 0xa40   : > { %18463 = vmatpush3.bf16.msk.msra.mxu0 %vm25750_vm8, %v25646_v34 }
 0xa41   : > { %18527 = vmatpush3.bf16.msk.msra.mxu1 %vm25751_vm11, %v25646_v34  ;;  %18465 = vmatprep.subr.msk.bf16.mxu0 %vm25752_vm5, %v25646_v34 }
 0xa42   : > { %18529 = vmatprep.subr.msk.bf16.mxu1 %vm25753_vm15, %v25646_v34 }
 0xa44   : > { %18467 = vmatpush3.bf16.msk.msra.mxu0 %vm25752_vm5, %v25646_v34 }
 0xa45   : > { %18531 = vmatpush3.bf16.msk.msra.mxu1 %vm25753_vm15, %v25646_v34  ;;  %18469 = vmatprep.subr.msk.bf16.mxu0 %vm19712_vm3, %v25646_v34 }
 0xa46   : > { %18533 = vmatprep.subr.msk.bf16.mxu1 %vm25650_vm1, %v25646_v34 }
 0xa47   : > { %15869 = vmatmul.mubr.f32.vlgmr.msra.gmra.mrb[58].mxu0 %v25792_v58 }
 0xa48   : > { %15939 = vmatmul.mubr.f32.vlgmr.msra.gmra.mrb[58].mxu1 %v25792_v58  ;;  %18471 = vmatpush3.bf16.msk.msra.mxu0 %vm19712_vm3, %v25646_v34 }
 0xa49   : > { %15903 = vmatprep.mubr.f32.mxu0 %v25793_v60  ;;  %18535 = vmatpush3.bf16.msk.msra.mxu1 %vm25650_vm1, %v25646_v34 }
 0xa4a   : > { %15973 = vmatprep.mubr.f32.mxu1 %v25793_v60  ;;  %18473 = vmatprep.subr.msk.bf16.mxu0 %vm19915_vm14, %v25646_v34 }
 0xa4b   : > { %18537 = vmatprep.subr.msk.bf16.mxu1 %vm25651_vm10, %v25646_v34 }
 0xa4c   : > { %18475 = vmatpush3.bf16.msk.msra.mxu0 %vm19915_vm14, %v25646_v34 }
 0xa4d   : > { %18539 = vmatpush3.bf16.msk.msra.mxu1 %vm25651_vm10, %v25646_v34  ;;  %18477 = vmatprep.subr.msk.bf16.mxu0 %vm19962_vm7, %v25646_v34 }
 0xa4e   : > { %18541 = vmatprep.subr.msk.bf16.mxu1 %vm19975_vm4, %v25646_v34 }
 0xa50   : > { %18479 = vmatpush3.bf16.msk.msra.mxu0 %vm19962_vm7, %v25646_v34 }
 0xa51   : > { %18543 = vmatpush3.bf16.msk.msra.mxu1 %vm19975_vm4, %v25646_v34  ;;  %18481 = vmatprep.subr.msk.bf16.mxu0 %vm19999_vm13, %v25646_v34 }
 0xa52   : > { %18545 = vmatprep.subr.msk.bf16.mxu1 %vm20007_vm12, %v25646_v34 }
 0xa54   : > { %18483 = vmatpush3.bf16.msk.msra.mxu0 %vm19999_vm13, %v25646_v34 }
 0xa55   : > { %18547 = vmatpush3.bf16.msk.msra.mxu1 %vm20007_vm12, %v25646_v34  ;;  %18485 = vmatprep.subr.msk.bf16.mxu0 %vm25652_vm2, %v25646_v34 }
 0xa56   : > { %18549 = vmatprep.subr.msk.bf16.mxu1 %vm25654_vm0, %v25646_v34 }
 0xa58   : > { %18487 = vmatpush3.bf16.msk.msra.mxu0 %vm25652_vm2, %v25646_v34 }
 0xa59   : > { %18551 = vmatpush3.bf16.msk.msra.mxu1 %vm25654_vm0, %v25646_v34  ;;  %18489 = vmatprep.subr.msk.bf16.mxu0 %vm25706_vm6, %v25646_v34 }
 0xa5a   : > { %18553 = vmatprep.subr.msk.bf16.mxu1 %vm25749_vm9, %v25646_v34 }
 0xa5c   : > { %18491 = vmatpush3.bf16.msk.msra.mxu0 %vm25706_vm6, %v25646_v34 }
 0xa5d   : > { %18555 = vmatpush3.bf16.msk.msra.mxu1 %vm25749_vm9, %v25646_v34  ;;  %18493 = vmatprep.subr.msk.bf16.mxu0 %vm25750_vm8, %v25646_v34 }
 0xa5e   : > { %18557 = vmatprep.subr.msk.bf16.mxu1 %vm25751_vm11, %v25646_v34 }
 0xa60   : > { %18495 = vmatpush3.bf16.msk.msra.mxu0 %vm25750_vm8, %v25646_v34 }
 0xa61   : > { %18559 = vmatpush3.bf16.msk.msra.mxu1 %vm25751_vm11, %v25646_v34  ;;  %18497 = vmatprep.subr.msk.bf16.mxu0 %vm25752_vm5, %v25646_v34 }
 0xa62   : > { %18561 = vmatprep.subr.msk.bf16.mxu1 %vm25753_vm15, %v25646_v34 }
 0xa64   : > { %18499 = vmatpush3.bf16.msk.msra.mxu0 %vm25752_vm5, %v25646_v34 }
 0xa65   : > { %18563 = vmatpush3.bf16.msk.msra.mxu1 %vm25753_vm15, %v25646_v34  ;;  %18565 = vmatprep.subr.msk.bf16.mxu0 %vm19712_vm3, %v25646_v34 }
 0xa66   : > { %18629 = vmatprep.subr.msk.bf16.mxu1 %vm25650_vm1, %v25646_v34 }
 0xa67   : > { %15904 = vmatmul.mubr.f32.vlgmr.msra.gmra.mrb[58].mxu0 %v25794_v26 }
 0xa68   : > { %15974 = vmatmul.mubr.f32.vlgmr.msra.gmra.mrb[58].mxu1 %v25794_v26  ;;  %18567 = vmatpush3.bf16.msk.msra.mxu0 %vm19712_vm3, %v25646_v34 }
 0xa69   : > { %18631 = vmatpush3.bf16.msk.msra.mxu1 %vm25650_vm1, %v25646_v34  ;;  %18569 = vmatprep.subr.msk.bf16.mxu0 %vm19915_vm14, %v25646_v34 }
 0xa6a   : > { %18633 = vmatprep.subr.msk.bf16.mxu1 %vm25651_vm10, %v25646_v34  ;;  %16008 = vmatprep.mubr.f32.mxu0 %v23699_v37 }
 0xa6b   : > { %16078 = vmatprep.mubr.f32.mxu1 %v23699_v37 }
 0xa6c   : > { %18571 = vmatpush3.bf16.msk.msra.mxu0 %vm19915_vm14, %v25646_v34 }
 0xa6d   : > { %18635 = vmatpush3.bf16.msk.msra.mxu1 %vm25651_vm10, %v25646_v34  ;;  %18573 = vmatprep.subr.msk.bf16.mxu0 %vm19962_vm7, %v25646_v34 }
 0xa6e   : > { %18637 = vmatprep.subr.msk.bf16.mxu1 %vm19975_vm4, %v25646_v34 }
 0xa70   : > { %18575 = vmatpush3.bf16.msk.msra.mxu0 %vm19962_vm7, %v25646_v34 }
 0xa71   : > { %18639 = vmatpush3.bf16.msk.msra.mxu1 %vm19975_vm4, %v25646_v34  ;;  %18577 = vmatprep.subr.msk.bf16.mxu0 %vm19999_vm13, %v25646_v34 }
 0xa72   : > { %18641 = vmatprep.subr.msk.bf16.mxu1 %vm20007_vm12, %v25646_v34 }
 0xa74   : > { %18579 = vmatpush3.bf16.msk.msra.mxu0 %vm19999_vm13, %v25646_v34 }
 0xa75   : > { %18643 = vmatpush3.bf16.msk.msra.mxu1 %vm20007_vm12, %v25646_v34  ;;  %18581 = vmatprep.subr.msk.bf16.mxu0 %vm25652_vm2, %v25646_v34 }
 0xa76   : > { %18645 = vmatprep.subr.msk.bf16.mxu1 %vm25654_vm0, %v25646_v34 }
 0xa78   : > { %18583 = vmatpush3.bf16.msk.msra.mxu0 %vm25652_vm2, %v25646_v34 }
 0xa79   : > { %18647 = vmatpush3.bf16.msk.msra.mxu1 %vm25654_vm0, %v25646_v34  ;;  %18585 = vmatprep.subr.msk.bf16.mxu0 %vm25706_vm6, %v25646_v34 }
 0xa7a   : > { %18649 = vmatprep.subr.msk.bf16.mxu1 %vm25749_vm9, %v25646_v34 }
 0xa7c   : > { %18587 = vmatpush3.bf16.msk.msra.mxu0 %vm25706_vm6, %v25646_v34 }
 0xa7d   : > { %18651 = vmatpush3.bf16.msk.msra.mxu1 %vm25749_vm9, %v25646_v34  ;;  %18589 = vmatprep.subr.msk.bf16.mxu0 %vm25750_vm8, %v25646_v34 }
 0xa7e   : > { %18653 = vmatprep.subr.msk.bf16.mxu1 %vm25751_vm11, %v25646_v34 }
 0xa80   : > { %18591 = vmatpush3.bf16.msk.msra.mxu0 %vm25750_vm8, %v25646_v34 }
 0xa81   : > { %18655 = vmatpush3.bf16.msk.msra.mxu1 %vm25751_vm11, %v25646_v34  ;;  %18593 = vmatprep.subr.msk.bf16.mxu0 %vm25752_vm5, %v25646_v34 }
 0xa82   : > { %18657 = vmatprep.subr.msk.bf16.mxu1 %vm25753_vm15, %v25646_v34 }
 0xa84   : > { %18595 = vmatpush3.bf16.msk.msra.mxu0 %vm25752_vm5, %v25646_v34 }
 0xa85   : > { %18659 = vmatpush3.bf16.msk.msra.mxu1 %vm25753_vm15, %v25646_v34  ;;  %18597 = vmatprep.subr.msk.bf16.mxu0 %vm19712_vm3, %v25646_v34 }
 0xa86   : > { %18661 = vmatprep.subr.msk.bf16.mxu1 %vm25650_vm1, %v25646_v34 }
 0xa87   : > { %16009 = vmatmul.mubr.f32.vlgmr.msra.gmra.mrb[60].mxu0 %v23686_v40 }
 0xa88   : > { %16079 = vmatmul.mubr.f32.vlgmr.msra.gmra.mrb[60].mxu1 %v23686_v40  ;;  %18599 = vmatpush3.bf16.msk.msra.mxu0 %vm19712_vm3, %v25646_v34  ;;  %v25798_v40 = vld [vmem:[#allocation32_spill] sm:$0xff] }
 0xa89   : > { %18663 = vmatpush3.bf16.msk.msra.mxu1 %vm25650_vm1, %v25646_v34  ;;  %18601 = vmatprep.subr.msk.bf16.mxu0 %vm19915_vm14, %v25646_v34  ;;  %v25799_v37 = vmax.f32 %v25798_v40, 0.0 }
 0xa8a   : > { %18665 = vmatprep.subr.msk.bf16.mxu1 %vm25651_vm10, %v25646_v34  ;;  %16043 = vmatprep.mubr.f32.mxu0 %v23684_v8 }
 0xa8b   : > { %16113 = vmatprep.mubr.f32.mxu1 %v23684_v8  ;;  %v25795_v8 = vld [vmem:[#allocation33_spill] sm:$0xff] }
 0xa8c   : > { %18603 = vmatpush3.bf16.msk.msra.mxu0 %vm19915_vm14, %v25646_v34  ;;  %v24203_v57 = vunpack.c.l.bf16 %v25795_v8  ;;  %v24209_v28 = vunpack.c.h.bf16 %v25795_v8 }
 0xa8d   : > { %18667 = vmatpush3.bf16.msk.msra.mxu1 %vm25651_vm10, %v25646_v34  ;;  %18605 = vmatprep.subr.msk.bf16.mxu0 %vm19962_vm7, %v25646_v34 }
 0xa8e   : > { %18669 = vmatprep.subr.msk.bf16.mxu1 %vm19975_vm4, %v25646_v34  ;;  %25796 = vst [vmem:[#allocation25_spill] sm:$0xff] %v24203_v57  ;;  %25797 = vst [vmem:[#allocation37_spill] sm:$0xff] %v24209_v28  ;;  %v24223_v16 = vsub.f32 %v25799_v37, %v24203_v57  ;;  %v24231_v27 = vsub.f32 %v25802_v51, %v24209_v28  ;;  %v8804_v37 = vmul.f32 %v8803_v12, %v23734_v11 }
 0xa8f   : > { %v8812_v51 = vmul.f32 %v8811_v10, %v23734_v11  ;;  %v8835_v12 = vstv %s24402_s9  ;;  %v8843_v10 = vstv %s24406_s7  ;;  %s24473_s9 = sld [smem:[#allocation6 + $0xd5]]  ;;  %s11930_s7 = sld [smem:[#allocation6 + $0xf3]] }
 0xa90   : > { %18607 = vmatpush3.bf16.msk.msra.mxu0 %vm19962_vm7, %v25646_v34  ;;  %25800 = vst [vmem:[#allocation36_spill] sm:$0xff] %v24223_v16  ;;  %25803 = vst [vmem:[#allocation35_spill] sm:$0xff] %v24231_v27  ;;  %v18696_v50 = vpack.c.bf16 %v24231_v27, %v24223_v16 }
 0xa91   : > { %18671 = vmatpush3.bf16.msk.msra.mxu1 %vm19975_vm4, %v25646_v34  ;;  %18609 = vmatprep.subr.msk.bf16.mxu0 %vm19999_vm13, %v25646_v34 }
 0xa92   : > { %18673 = vmatprep.subr.msk.bf16.mxu1 %vm20007_vm12, %v25646_v34 }
 0xa94   : > { %18611 = vmatpush3.bf16.msk.msra.mxu0 %vm19999_vm13, %v25646_v34 }
 0xa95   : > { %18675 = vmatpush3.bf16.msk.msra.mxu1 %vm20007_vm12, %v25646_v34  ;;  %18613 = vmatprep.subr.msk.bf16.mxu0 %vm25652_vm2, %v25646_v34  ;;  %v8919_v14 = vstv %s11930_s7  ;;  %s25130_s7 = sld [smem:[#allocation6 + $0xe6]] }
 0xa96   : > { %18677 = vmatprep.subr.msk.bf16.mxu1 %vm25654_vm0, %v25646_v34 }
 0xa98   : > { %18615 = vmatpush3.bf16.msk.msra.mxu0 %vm25652_vm2, %v25646_v34 }
 0xa99   : > { %18679 = vmatpush3.bf16.msk.msra.mxu1 %vm25654_vm0, %v25646_v34  ;;  %18617 = vmatprep.subr.msk.bf16.mxu0 %vm25706_vm6, %v25646_v34 }
 0xa9a   : > { %18681 = vmatprep.subr.msk.bf16.mxu1 %vm25749_vm9, %v25646_v34 }
 0xa9c   : > { %18619 = vmatpush3.bf16.msk.msra.mxu0 %vm25706_vm6, %v25646_v34 }
 0xa9d   : > { %18683 = vmatpush3.bf16.msk.msra.mxu1 %vm25749_vm9, %v25646_v34  ;;  %18621 = vmatprep.subr.msk.bf16.mxu0 %vm25750_vm8, %v25646_v34 }
 0xa9e   : > { %18685 = vmatprep.subr.msk.bf16.mxu1 %vm25751_vm11, %v25646_v34 }
 0xaa0   : > { %18623 = vmatpush3.bf16.msk.msra.mxu0 %vm25750_vm8, %v25646_v34 }
 0xaa1   : > { %18687 = vmatpush3.bf16.msk.msra.mxu1 %vm25751_vm11, %v25646_v34  ;;  %18625 = vmatprep.subr.msk.bf16.mxu0 %vm25752_vm5, %v25646_v34 }
 0xaa2   : > { %18689 = vmatprep.subr.msk.bf16.mxu1 %vm25753_vm15, %v25646_v34 }
 0xaa4   : > { %18627 = vmatpush3.bf16.msk.msra.mxu0 %vm25752_vm5, %v25646_v34  ;;  %vm25805_vm5 = vcmask 130048  }
 0xaa5   : > { %18691 = vmatpush3.bf16.msk.msra.mxu1 %vm25753_vm15, %v25646_v34  ;;  %18693 = vmatprep.subr.bf16.mxu0 %v25795_v8  ;;  %vm25806_vm11 = vmmov %vm25805_vm5 }
 0xaa6   : > { %18697 = vmatprep.subr.bf16.mxu1 %v18696_v50  ;;  %vm25808_vm15 = vmmov %vm25805_vm5 }
 0xaa7   : > { %16044 = vmatmul.mubr.f32.vlgmr.msra.gmra.mrb[60].mxu0 %v23678_v53  ;;  %vm25809_vm8 = vmmov %vm25805_vm5 }
 0xaa8   : > { %16114 = vmatmul.mubr.f32.vlgmr.msra.gmra.mrb[60].mxu1 %v23678_v53  ;;  %18695 = vmatpush3.bf16.msra.mxu0 %v25795_v8  ;;  %v25810_v53 = vld [vmem:[#allocation15_spill] sm:$0xff]  ;;  %vm25811_vm9 = vmmov %vm25805_vm5 }
 0xaa9   : > { %18699 = vmatpush3.bf16.msra.mxu1 %v18696_v50  ;;  %18701 = vmatprep.subr.bf16.mxu0 %v25795_v8  ;;  %vm25812_vm6 = vmmov %vm25805_vm5 }
 0xaaa   : > { %18705 = vmatprep.subr.bf16.mxu1 %v18696_v50  ;;  %16120 = vmatprep.mubr.msk.f32.mxu0 %vm25805_vm5, %v25804_v43 }
 0xaab   : > { %16127 = vmatprep.mubr.msk.f32.mxu1 %vm25806_vm11, %v25804_v43  ;;  %16121 = vmatmul.mubr.msk.f32.vlgmr.msra.gmra.mrb[62].mxu0 %vm25808_vm15, %v25807_v63  ;;  %vm25814_vm11 = vmmov %vm25805_vm5  ;;  %vm25819_vm15 = vnez %v25788_v55 }
 0xaac   : > { %16128 = vmatmul.mubr.msk.f32.vlgmr.msra.gmra.mrb[62].mxu1 %vm25809_vm8, %v25807_v63  ;;  %18703 = vmatpush3.bf16.msra.mxu0 %v25795_v8  ;;  %vm25815_vm8 = vmmov %vm25805_vm5  ;;  %vm25818_vm5 = vnez %v25787_v42 }
 0xaad   : > { %18707 = vmatpush3.bf16.msra.mxu1 %v18696_v50  ;;  %16141 = vmatprep.mubr.msk.f32.mxu1 %vm25811_vm9, %v25810_v53  ;;  %vm25817_vm9 = vnez %v25786_v23  ;;  %v8816_v50 = vmul.f32 %v8815_v48, %v23734_v11  ;;  %v8823_v11 = vstv %s24396_s5  ;;  %v8847_v48 = vstv %s24408_s26  ;;  %s24466_s5 = sld [smem:[#allocation6 + $0xd2]]  ;;  %s11931_s26 = sld [smem:[#allocation6 + $0xf4]] }
 0xaae   : > { %16134 = vmatprep.mubr.msk.f32.mxu0 %vm25812_vm6, %v25810_v53  ;;  %18709 = vmatprep.subr.msk.bf16.mxu0 %vm19712_vm3, %v25646_v34  ;;  %vm25816_vm6 = vnez %v25785_v59 }
 0xaaf   : > { %16135 = vmatmul.mubr.msk.f32.vlgmr.msra.gmra.mrb[64].mxu0 %vm25814_vm11, %v25813_v17  ;;  %18773 = vmatprep.subr.msk.bf16.mxu1 %vm25650_vm1, %v25646_v34  ;;  %vm25820_vm11 = vnez %v25789_v41 }
 0xab0   : > { %16142 = vmatmul.mubr.msk.f32.vlgmr.msra.gmra.mrb[64].mxu1 %vm25815_vm8, %v25813_v17  ;;  %18711 = vmatpush3.bf16.msk.msra.mxu0 %vm19712_vm3, %v25646_v34  ;;  %vm25821_vm8 = vnez %v25790_v21 }
 0xab1   : > { %18775 = vmatpush3.bf16.msk.msra.mxu1 %vm25650_vm1, %v25646_v34  ;;  %18713 = vmatprep.subr.msk.bf16.mxu0 %vm19915_vm14, %v25646_v34 }
 0xab2   : > { %18777 = vmatprep.subr.msk.bf16.mxu1 %vm25651_vm10, %v25646_v34 }
 0xab4   : > { %18715 = vmatpush3.bf16.msk.msra.mxu0 %vm19915_vm14, %v25646_v34 }
 0xab5   : > { %18779 = vmatpush3.bf16.msk.msra.mxu1 %vm25651_vm10, %v25646_v34  ;;  %18717 = vmatprep.subr.msk.bf16.mxu0 %vm19962_vm7, %v25646_v34 }
 0xab6   : > { %18781 = vmatprep.subr.msk.bf16.mxu1 %vm19975_vm4, %v25646_v34 }
 0xab8   : > { %18719 = vmatpush3.bf16.msk.msra.mxu0 %vm19962_vm7, %v25646_v34 }
 0xab9   : > { %18783 = vmatpush3.bf16.msk.msra.mxu1 %vm19975_vm4, %v25646_v34  ;;  %18721 = vmatprep.subr.msk.bf16.mxu0 %vm19999_vm13, %v25646_v34 }
 0xaba   : > { %18785 = vmatprep.subr.msk.bf16.mxu1 %vm20007_vm12, %v25646_v34 }
 0xabc   : > { %18723 = vmatpush3.bf16.msk.msra.mxu0 %vm19999_vm13, %v25646_v34 }
 0xabd   : > { %18787 = vmatpush3.bf16.msk.msra.mxu1 %vm20007_vm12, %v25646_v34  ;;  %18725 = vmatprep.subr.msk.bf16.mxu0 %vm25652_vm2, %v25646_v34 }
 0xabe   : > { %18789 = vmatprep.subr.msk.bf16.mxu1 %vm25654_vm0, %v25646_v34 }
 0xac0   : > { %18727 = vmatpush3.bf16.msk.msra.mxu0 %vm25652_vm2, %v25646_v34 }
 0xac1   : > { %18791 = vmatpush3.bf16.msk.msra.mxu1 %vm25654_vm0, %v25646_v34  ;;  %18729 = vmatprep.subr.msk.bf16.mxu0 %vm25816_vm6, %v25646_v34 }
 0xac2   : > { %18793 = vmatprep.subr.msk.bf16.mxu1 %vm25817_vm9, %v25646_v34 }
 0xac4   : > { %18731 = vmatpush3.bf16.msk.msra.mxu0 %vm25816_vm6, %v25646_v34 }
 0xac5   : > { %18795 = vmatpush3.bf16.msk.msra.mxu1 %vm25817_vm9, %v25646_v34  ;;  %18733 = vmatprep.subr.msk.bf16.mxu0 %vm25818_vm5, %v25646_v34 }
 0xac6   : > { %18797 = vmatprep.subr.msk.bf16.mxu1 %vm25819_vm15, %v25646_v34 }
 0xac8   : > { %18735 = vmatpush3.bf16.msk.msra.mxu0 %vm25818_vm5, %v25646_v34 }
 0xac9   : > { %18799 = vmatpush3.bf16.msk.msra.mxu1 %vm25819_vm15, %v25646_v34  ;;  %18737 = vmatprep.subr.msk.bf16.mxu0 %vm25820_vm11, %v25646_v34 }
 0xaca   : > { %18801 = vmatprep.subr.msk.bf16.mxu1 %vm25821_vm8, %v25646_v34 }
 0xacc   : > { %18739 = vmatpush3.bf16.msk.msra.mxu0 %vm25820_vm11, %v25646_v34 }
 0xacd   : > { %18803 = vmatpush3.bf16.msk.msra.mxu1 %vm25821_vm8, %v25646_v34  ;;  %18741 = vmatprep.subr.msk.bf16.mxu0 %vm19712_vm3, %v25646_v34 }
 0xace   : > { %18805 = vmatprep.subr.msk.bf16.mxu1 %vm25650_vm1, %v25646_v34 }
 0xafa   : > { %v15765_v5 = vpop.f32.mrb[56].mxu0 }
 0xafb   : > { %v8789_v4 = vmul.f32 %v15765_v5, %v8787_v44  ;;  %v8793_v6 = vmul.f32 %v15765_v5, %v8791_v47  ;;  %v8797_v35 = vmul.f32 %v15765_v5, %v8795_v54  ;;  %v8801_v1 = vmul.f32 %v15765_v5, %v8799_v49  ;;  %v15835_v8 = vpop.f32.mrb[56].mxu1  ;;  %v8023_v40 = vpop.f32.mrb[57].mxu0 }
 0xafc   : > { %v8173_v43 = vpop.f32.mrb[57].mxu1  ;;  %v8788_v9 = vmul.f32 %v8787_v44, %v8023_v40  ;;  %v8792_v18 = vmul.f32 %v8791_v47, %v8023_v40  ;;  %v8796_v15 = vmul.f32 %v8795_v54, %v8023_v40  ;;  %v8800_v36 = vmul.f32 %v8799_v49, %v8023_v40 }
 0xafd   : > { %v10286_v63 = vadd.f32 %v8805_v20, %v8789_v4  ;;  %v10320_v53 = vadd.f32 %v8809_v38, %v8793_v6  ;;  %v10354_v17 = vadd.f32 %v8813_v46, %v8797_v35  ;;  %v10388_v19 = vadd.f32 %v8817_v52, %v8801_v1 }
 0xafe   : > { %v10285_v5 = vadd.f32 %v8804_v37, %v8788_v9  ;;  %v10319_v0 = vadd.f32 %v8808_v62, %v8792_v18  ;;  %v10353_v30 = vadd.f32 %v8812_v51, %v8796_v15  ;;  %v10387_v29 = vadd.f32 %v8816_v50, %v8800_v36 }
 0xaff   : > { %v8819_v15 = vstv %s24394_s23  ;;  %v8827_v36 = vstv %s24398_s10  ;;  %v8831_v18 = vstv %s24400_s29  ;;  %v8825_v47 = vmul.f32 %v15835_v8, %v8823_v11  ;;  %s24460_s23 = sld [smem:[#allocation6 + $0xe5]]  ;;  %s24468_s10 = sld [smem:[#allocation6 + $0xd3]] }
 0xb00   : > { %v8821_v44 = vmul.f32 %v15835_v8, %v8819_v15  ;;  %v8829_v54 = vmul.f32 %v15835_v8, %v8827_v36  ;;  %v8833_v49 = vmul.f32 %v15835_v8, %v8831_v18  ;;  %v8820_v50 = vmul.f32 %v8819_v15, %v8173_v43  ;;  %s24471_s29 = sld [smem:[#allocation6 + $0xd4]] }
 0xb01   : > { %v8824_v9 = vmul.f32 %v8823_v11, %v8173_v43  ;;  %v8828_v3 = vmul.f32 %v8827_v36, %v8173_v43  ;;  %v8832_v28 = vmul.f32 %v8831_v18, %v8173_v43  ;;  %v8879_v36 = vstv %s24456_s12  ;;  %s25064_s12 = sld [smem:[#allocation6 + $0x97]] }
 0xb3a   : > { %v15905_v20 = vpop.f32.mrb[58].mxu0 }
 0xb3b   : > { %v8837_v38 = vmul.f32 %v15905_v20, %v8835_v12  ;;  %v8841_v46 = vmul.f32 %v15905_v20, %v8839_v39  ;;  %v8845_v52 = vmul.f32 %v15905_v20, %v8843_v10  ;;  %v8849_v4 = vmul.f32 %v15905_v20, %v8847_v48  ;;  %v24418_v6 = vpop.f32.mrb[58].mxu1  ;;  %v8325_v35 = vpop.f32.mrb[59].mxu0 }
 0xb3c   : > { %v24420_v1 = vpop.f32.mrb[59].mxu1  ;;  %v8836_v16 = vmul.f32 %v8835_v12, %v8325_v35  ;;  %v8840_v21 = vmul.f32 %v8839_v39, %v8325_v35  ;;  %v8844_v41 = vmul.f32 %v8843_v10, %v8325_v35  ;;  %v8848_v55 = vmul.f32 %v8847_v48, %v8325_v35 }
 0xb3d   : > { %v10288_v40 = vadd.f32 %v8837_v38, %v8821_v44  ;;  %v10322_v37 = vadd.f32 %v8841_v46, %v8825_v47  ;;  %v10356_v62 = vadd.f32 %v8845_v52, %v8829_v54  ;;  %v10390_v51 = vadd.f32 %v8849_v4, %v8833_v49 }
 0xb3e   : > { %v10287_v44 = vadd.f32 %v8836_v16, %v8820_v50  ;;  %v10321_v47 = vadd.f32 %v8840_v21, %v8824_v9  ;;  %v10355_v54 = vadd.f32 %v8844_v41, %v8828_v3  ;;  %v10389_v49 = vadd.f32 %v8848_v55, %v8832_v28 }
 0xb3f   : > { %v24422_v57 = vadd.f32 %v10288_v40, %v10286_v63  ;;  %v24424_v8 = vadd.f32 %v10322_v37, %v10320_v53  ;;  %v24426_v27 = vadd.f32 %v10356_v62, %v10354_v17  ;;  %v24428_v20 = vadd.f32 %v10390_v51, %v10388_v19 }
 0xb40   : > { %v24430_v15 = vadd.f32 %v10287_v44, %v10285_v5  ;;  %v24432_v11 = vadd.f32 %v10321_v47, %v10319_v0  ;;  %v24434_v43 = vadd.f32 %v10355_v54, %v10353_v30  ;;  %v24436_v63 = vadd.f32 %v10389_v49, %v10387_v29 }
 0xb41   : > { %v8183_v29 = vadd.f32 %v25792_v58, %v25794_v26  ;;  %v8851_v0 = vstv %s11913_s11  ;;  %v8855_v19 = vstv %s24438_s30  ;;  %v8859_v3 = vstv %s24440_s8  ;;  %s11932_s11 = sld [smem:[#allocation6 + $0xf5]]  ;;  %s25046_s30 = sld [smem:[#allocation6 + $0x86]] }
 0xb42   : > { %v8182_v30 = vadd.f32 %v25791_v2, %v25793_v60  ;;  %v8863_v55 = vstv %s24442_s0  ;;  %v8899_v26 = vstv %s24444_s1  ;;  %v8903_v53 = vstv %s24446_s2  ;;  %s25048_s8 = sld [smem:[#allocation6 + $0x87]]  ;;  %s25050_s0 = sld [smem:[#allocation6 + $0x88]] }
 0xb43   : > { %v8853_v41 = vmul.f32 %v8851_v0, %v8183_v29  ;;  %v8857_v21 = vmul.f32 %v8855_v19, %v8183_v29  ;;  %v8861_v58 = vmul.f32 %v8859_v3, %v8183_v29  ;;  %v8865_v28 = vmul.f32 %v8863_v55, %v8183_v29  ;;  %s25052_s1 = sld [smem:[#allocation6 + $0x89]]  ;;  %s25054_s2 = sld [smem:[#allocation6 + $0x76]] }
 0xb44   : > { %v8852_v16 = vmul.f32 %v8851_v0, %v8182_v30  ;;  %v8907_v2 = vstv %s24448_s13  ;;  %v8867_v60 = vstv %s24450_s14  ;;  %v8871_v17 = vstv %s24452_s22  ;;  %s25056_s13 = sld [smem:[#allocation6 + $0x77]]  ;;  %s25058_s14 = sld [smem:[#allocation6 + $0x78]] }
 0xb45   : > { %v8875_v5 = vstv %s24454_s25  ;;  %v8856_v18 = vmul.f32 %v8855_v19, %v8182_v30  ;;  %v8860_v12 = vmul.f32 %v8859_v3, %v8182_v30  ;;  %v8864_v39 = vmul.f32 %v8863_v55, %v8182_v30  ;;  %s25060_s22 = sld [smem:[#allocation6 + $0x79]]  ;;  %s25062_s25 = sld [smem:[#allocation6 + $0x96]] }
 0xb46   : > { %v8901_v10 = vmul.f32 %v8899_v26, %v23742_v22  ;;  %v8905_v48 = vmul.f32 %v8903_v53, %v23742_v22  ;;  %v8909_v38 = vmul.f32 %v8907_v2, %v23742_v22  ;;  %v8911_v46 = vstv %s24460_s23  ;;  %s25066_s23 = sld [smem:[#allocation6 + $0x98]] }
 0xb47   : > { %v8900_v52 = vmul.f32 %v8899_v26, %v23763_v33  ;;  %v8869_v4 = vmul.f32 %v24418_v6, %v8867_v60  ;;  %v8873_v35 = vmul.f32 %v24418_v6, %v8871_v17  ;;  %v8877_v40 = vmul.f32 %v24418_v6, %v8875_v5 }
 0xb48   : > { %v8881_v37 = vmul.f32 %v24418_v6, %v8879_v36  ;;  %v8883_v62 = vstv %s24466_s5  ;;  %v8887_v51 = vstv %s24468_s10  ;;  %v8891_v50 = vstv %s24471_s29  ;;  %s25068_s5 = sld [smem:[#allocation6 + $0x99]]  ;;  %s25122_s10 = sld [smem:[#allocation6 + $0xb6]] }
 0xb49   : > { %v8895_v9 = vstv %s24473_s9  ;;  %v8868_v44 = vmul.f32 %v8867_v60, %v24420_v1  ;;  %v8872_v47 = vmul.f32 %v8871_v17, %v24420_v1  ;;  %v8876_v54 = vmul.f32 %v8875_v5, %v24420_v1  ;;  %s25124_s29 = sld [smem:[#allocation6 + $0xb7]]  ;;  %s25126_s9 = sld [smem:[#allocation6 + $0xb8]] }
 0xb4a   : > { %v8880_v49 = vmul.f32 %v8879_v36, %v24420_v1  ;;  %v8913_v29 = vmul.f32 %v8911_v46, %v23742_v22  ;;  %v8904_v0 = vmul.f32 %v8903_v53, %v23763_v33  ;;  %v8908_v19 = vmul.f32 %v8907_v2, %v23763_v33 }
 0xb4b   : > { %v8912_v6 = vmul.f32 %v8911_v46, %v23763_v33  ;;  %v10290_v3 = vadd.f32 %v8869_v4, %v8853_v41  ;;  %v10324_v30 = vadd.f32 %v8873_v35, %v8857_v21  ;;  %v10358_v55 = vadd.f32 %v8877_v40, %v8861_v58 }
 0xb4c   : > { %v10392_v26 = vadd.f32 %v8881_v37, %v8865_v28  ;;  %v10289_v36 = vadd.f32 %v8868_v44, %v8852_v16  ;;  %v10323_v22 = vadd.f32 %v8872_v47, %v8856_v18  ;;  %v10357_v24 = vadd.f32 %v8876_v54, %v8860_v12 }
 0xb4d   : > { %v10391_v53 = vadd.f32 %v8880_v49, %v8864_v39  ;;  %v8927_v45 = vstv %s11932_s11  ;;  %v10158_v25 = vstv %s25046_s30  ;;  %v10162_v31 = vstv %s25048_s8  ;;  %s25134_s11 = sld [smem:[#allocation6 + $0xe8]]  ;;  %s25136_s30 = sld [smem:[#allocation6 + $0xe9]] }
 0xb4e   : > { %v10166_v32 = vstv %s25050_s0  ;;  %v10170_v7 = vstv %s25052_s1  ;;  %s25138_s8 = sld [smem:[#allocation6 + $0xa6]]  ;;  %s25140_s0 = sld [smem:[#allocation6 + $0xa7]] }
 0xb4f   : > { %s25142_s1 = sld [smem:[#allocation6 + $0xa8]] }
 0xb7a   : > { %v16045_v42 = vpop.f32.mrb[60].mxu0 }
 0xb7b   : > { %v8885_v60 = vmul.f32 %v16045_v42, %v8883_v62  ;;  %v8889_v23 = vmul.f32 %v16045_v42, %v8887_v51  ;;  %v8893_v17 = vmul.f32 %v16045_v42, %v8891_v50  ;;  %v8897_v59 = vmul.f32 %v16045_v42, %v8895_v9  ;;  %v24503_v5 = vpop.f32.mrb[60].mxu1  ;;  %v8627_v1 = vpop.f32.mrb[61].mxu0 }
 0xb7c   : > { %25822 = vst [vmem:[#allocation41_spill] sm:$0xff] %v24503_v5  ;;  %v24505_v56 = vpop.f32.mrb[61].mxu1  ;;  %v8884_v58 = vmul.f32 %v8883_v62, %v8627_v1  ;;  %v8888_v28 = vmul.f32 %v8887_v51, %v8627_v1  ;;  %v8892_v46 = vmul.f32 %v8891_v50, %v8627_v1  ;;  %v8896_v4 = vmul.f32 %v8895_v9, %v8627_v1  ;;  %v25837_v1 = vld [vmem:[#allocation37_spill] sm:$0xff] }
 0xb7d   : > { %v10292_v2 = vadd.f32 %v8901_v10, %v8885_v60  ;;  %v10326_v33 = vadd.f32 %v8905_v48, %v8889_v23  ;;  %v10360_v41 = vadd.f32 %v8909_v38, %v8893_v17  ;;  %v10394_v21 = vadd.f32 %v8913_v29, %v8897_v59  ;;  %v25834_v60 = vld [vmem:[#allocation36_spill] sm:$0xff]  ;;  %v25835_v17 = vld [vmem:[#allocation35_spill] sm:$0xff] }
 0xb7e   : > { %v24507_v35 = vpop.f32.mrb[62].mxu0  ;;  %v10291_v12 = vadd.f32 %v8900_v52, %v8884_v58  ;;  %v10325_v39 = vadd.f32 %v8904_v0, %v8888_v28  ;;  %v10359_v44 = vadd.f32 %v8908_v19, %v8892_v46  ;;  %v10393_v47 = vadd.f32 %v8912_v6, %v8896_v4 }
 0xb7f   : > { %v10306_v42 = vadd.f32 %v10292_v2, %v10290_v3  ;;  %v10340_v40 = vadd.f32 %v10326_v33, %v10324_v30  ;;  %v10374_v37 = vadd.f32 %v10360_v41, %v10358_v55  ;;  %v10408_v5 = vadd.f32 %v10394_v21, %v10392_v26  ;;  %v16129_v16 = vpop.f32.mrb[62].mxu1  ;;  %v9001_v18 = vpop.f32.mrb[63].mxu0 }
 0xb80   : > { %v9076_v10 = vpop.f32.mrb[63].mxu1  ;;  %v10305_v62 = vadd.f32 %v10291_v12, %v10289_v36  ;;  %v10339_v51 = vadd.f32 %v10325_v39, %v10323_v22  ;;  %v10373_v52 = vadd.f32 %v10359_v44, %v10357_v24  ;;  %v10407_v50 = vadd.f32 %v10393_v47, %v10391_v53 }
 0xb81   : > { %v24510_v23 = vadd.f32 %v10306_v42, %v24422_v57  ;;  %v24513_v59 = vadd.f32 %v10340_v40, %v24424_v8  ;;  %v24516_v48 = vadd.f32 %v10374_v37, %v24426_v27  ;;  %v24519_v38 = vadd.f32 %v10408_v5, %v24428_v20  ;;  %16176 = vmatprep.mubr.f32.mxu0 %v9076_v10  ;;  %v25836_v5 = vld [vmem:[#allocation25_spill] sm:$0xff] }
 0xb82   : > { %16246 = vmatprep.mubr.f32.mxu1 %v9076_v10  ;;  %v24521_v9 = vpop.f32.mrb[64].mxu0  ;;  %16177 = vmatmul.mubr.f32.vlgmr.msra.gmra.mrb[66].mxu0 %v16129_v16  ;;  %v24528_v8 = vadd.f32 %v16129_v16, %v24507_v35  ;;  %v24530_v27 = vadd.f32 %v9076_v10, %v9001_v18  ;;  %v24552_v29 = vadd.f32 %v10305_v62, %v24430_v15  ;;  %v10142_v42 = vstv %s25054_s2  ;;  %s25144_s2 = sld [smem:[#allocation6 + $0xa9]] }
 0xb83   : > { %25823 = vst [vmem:[#allocation26_spill] sm:$0xff] %v24516_v48  ;;  %25824 = vst [vmem:[#allocation27_spill] sm:$0xff] %v24519_v38  ;;  %v24523_v57 = vpop.f32.mrb[64].mxu1  ;;  %v24525_v54 = vpop.f32.mrb[65].mxu0  ;;  %18743 = vmatpush3.bf16.msk.msra.mxu0 %vm19712_vm3, %v25646_v34  ;;  %16247 = vmatmul.mubr.f32.vlgmr.msra.gmra.mrb[66].mxu1 %v16129_v16  ;;  %v24555_v0 = vadd.f32 %v10339_v51, %v24432_v11  ;;  %v24564_v19 = vadd.f32 %v10373_v52, %v24434_v43  ;;  %v25838_v13 = vld [vmem:[#allocation41_spill] sm:$0xff]  ;;  %v10146_v40 = vstv %s25056_s13  ;;  %s25146_s13 = sld [smem:[#allocation6 + $0xc6]] }
 0xb84   : > { %v24537_v24 = vadd.f32 %v24523_v57, %v24521_v9  ;;  %v24539_v20 = vpop.f32.mrb[65].mxu1  ;;  %18807 = vmatpush3.bf16.msk.msra.mxu1 %vm25650_vm1, %v25646_v34  ;;  %18745 = vmatprep.subr.msk.bf16.mxu0 %vm19915_vm14, %v25646_v34  ;;  %v24567_v6 = vadd.f32 %v10407_v50, %v24436_v63  ;;  %v8917_v36 = vmul.f32 %v25838_v13, %v8915_v61  ;;  %v10150_v37 = vstv %s25058_s14  ;;  %s25148_s14 = sld [smem:[#allocation6 + $0xc7]] }
 0xb85   : > { %v24549_v49 = vadd.f32 %v24539_v20, %v24525_v54  ;;  %18809 = vmatprep.subr.msk.bf16.mxu1 %vm25651_vm10, %v25646_v34  ;;  %16211 = vmatprep.mubr.f32.mxu0 %v9001_v18  ;;  %v8921_v22 = vmul.f32 %v25838_v13, %v8919_v14  ;;  %v8929_v2 = vmul.f32 %v25838_v13, %v8927_v45  ;;  %v10154_v16 = vstv %s25060_s22  ;;  %s25152_s22 = sld [smem:[#allocation6 + $0xc8]] }
 0xb86   : > { %16281 = vmatprep.mubr.f32.mxu1 %v9001_v18  ;;  %25825 = vst [vmem:[#allocation28_spill] sm:$0xff] %v24567_v6  ;;  %v8916_v33 = vmul.f32 %v8915_v61, %v24505_v56  ;;  %v8920_v41 = vmul.f32 %v8919_v14, %v24505_v56  ;;  %v8928_v58 = vmul.f32 %v8927_v45, %v24505_v56  ;;  %v10174_v18 = vstv %s25062_s25  ;;  %s25154_s25 = sld [smem:[#allocation6 + $0xc9]] }
 0xb87   : > { %18747 = vmatpush3.bf16.msk.msra.mxu0 %vm19915_vm14, %v25646_v34  ;;  %v10160_v28 = vmul.f32 %v10158_v25, %v24528_v8  ;;  %v10164_v46 = vmul.f32 %v10162_v31, %v24528_v8  ;;  %v10168_v4 = vmul.f32 %v10166_v32, %v24528_v8  ;;  %v10178_v12 = vstv %s25064_s12  ;;  %s25158_s12 = sld [smem:[#allocation6 + $0xd6]] }
 0xb88   : > { %18811 = vmatpush3.bf16.msk.msra.mxu1 %vm25651_vm10, %v25646_v34  ;;  %18749 = vmatprep.subr.msk.bf16.mxu0 %vm19962_vm7, %v25646_v34  ;;  %v10182_v39 = vstv %s25066_s23  ;;  %v10186_v44 = vstv %s25068_s5  ;;  %v10159_v10 = vmul.f32 %v10158_v25, %v24530_v27  ;;  %v10167_v62 = vmul.f32 %v10166_v32, %v24530_v27  ;;  %s25160_s23 = sld [smem:[#allocation6 + $0xd7]]  ;;  %s25166_s5 = sld [smem:[#allocation6 + $0xd8]] }
 0xb89   : > { %18813 = vmatprep.subr.msk.bf16.mxu1 %vm19975_vm4, %v25646_v34  ;;  %v10171_v51 = vmul.f32 %v10170_v7, %v24530_v27 }
 0xb8b   : > { %18751 = vmatpush3.bf16.msk.msra.mxu0 %vm19962_vm7, %v25646_v34 }
 0xb8c   : > { %18815 = vmatpush3.bf16.msk.msra.mxu1 %vm19975_vm4, %v25646_v34  ;;  %18753 = vmatprep.subr.msk.bf16.mxu0 %vm19999_vm13, %v25646_v34 }
 0xb8d   : > { %18817 = vmatprep.subr.msk.bf16.mxu1 %vm20007_vm12, %v25646_v34 }
 0xb8f   : > { %18755 = vmatpush3.bf16.msk.msra.mxu0 %vm19999_vm13, %v25646_v34 }
 0xb90   : > { %18819 = vmatpush3.bf16.msk.msra.mxu1 %vm20007_vm12, %v25646_v34  ;;  %18757 = vmatprep.subr.msk.bf16.mxu0 %vm25652_vm2, %v25646_v34 }
 0xb91   : > { %18821 = vmatprep.subr.msk.bf16.mxu1 %vm25654_vm0, %v25646_v34 }
 0xb93   : > { %18759 = vmatpush3.bf16.msk.msra.mxu0 %vm25652_vm2, %v25646_v34 }
 0xb94   : > { %18823 = vmatpush3.bf16.msk.msra.mxu1 %vm25654_vm0, %v25646_v34  ;;  %18761 = vmatprep.subr.msk.bf16.mxu0 %vm25816_vm6, %v25646_v34 }
 0xb95   : > { %18825 = vmatprep.subr.msk.bf16.mxu1 %vm25817_vm9, %v25646_v34 }
 0xb97   : > { %18763 = vmatpush3.bf16.msk.msra.mxu0 %vm25816_vm6, %v25646_v34 }
 0xb98   : > { %18827 = vmatpush3.bf16.msk.msra.mxu1 %vm25817_vm9, %v25646_v34  ;;  %18765 = vmatprep.subr.msk.bf16.mxu0 %vm25818_vm5, %v25646_v34 }
 0xb99   : > { %18829 = vmatprep.subr.msk.bf16.mxu1 %vm25819_vm15, %v25646_v34 }
 0xb9b   : > { %18767 = vmatpush3.bf16.msk.msra.mxu0 %vm25818_vm5, %v25646_v34 }
 0xb9c   : > { %18831 = vmatpush3.bf16.msk.msra.mxu1 %vm25819_vm15, %v25646_v34  ;;  %18769 = vmatprep.subr.msk.bf16.mxu0 %vm25820_vm11, %v25646_v34 }
 0xb9d   : > { %18833 = vmatprep.subr.msk.bf16.mxu1 %vm25821_vm8, %v25646_v34 }
 0xb9f   : > { %18771 = vmatpush3.bf16.msk.msra.mxu0 %vm25820_vm11, %v25646_v34 }
 0xba0   : > { %18835 = vmatpush3.bf16.msk.msra.mxu1 %vm25821_vm8, %v25646_v34  ;;  %18837 = vmatprep.subr.msk.bf16.mxu0 %vm19712_vm3, %v25646_v34 }
 0xba1   : > { %18901 = vmatprep.subr.msk.bf16.mxu1 %vm25650_vm1, %v25646_v34 }
 0xba2   : > { %16212 = vmatmul.mubr.f32.vlgmr.msra.gmra.mrb[66].mxu0 %v24507_v35 }
 0xba3   : > { %16282 = vmatmul.mubr.f32.vlgmr.msra.gmra.mrb[66].mxu1 %v24507_v35  ;;  %18839 = vmatpush3.bf16.msk.msra.mxu0 %vm19712_vm3, %v25646_v34  ;;  %v10172_v35 = vmul.f32 %v10170_v7, %v24528_v8 }
 0xba4   : > { %16316 = vmatprep.mubr.f32.mxu0 %v25834_v60  ;;  %18903 = vmatpush3.bf16.msk.msra.mxu1 %vm25650_vm1, %v25646_v34 }
 0xba5   : > { %16386 = vmatprep.mubr.f32.mxu1 %v25834_v60  ;;  %18841 = vmatprep.subr.msk.bf16.mxu0 %vm19915_vm14, %v25646_v34 }
 0xba6   : > { %18905 = vmatprep.subr.msk.bf16.mxu1 %vm25651_vm10, %v25646_v34 }
 0xba7   : > { %18843 = vmatpush3.bf16.msk.msra.mxu0 %vm19915_vm14, %v25646_v34 }
 0xba8   : > { %18907 = vmatpush3.bf16.msk.msra.mxu1 %vm25651_vm10, %v25646_v34  ;;  %18845 = vmatprep.subr.msk.bf16.mxu0 %vm19962_vm7, %v25646_v34 }
 0xba9   : > { %18909 = vmatprep.subr.msk.bf16.mxu1 %vm19975_vm4, %v25646_v34 }
 0xbab   : > { %18847 = vmatpush3.bf16.msk.msra.mxu0 %vm19962_vm7, %v25646_v34 }
 0xbac   : > { %18911 = vmatpush3.bf16.msk.msra.mxu1 %vm19975_vm4, %v25646_v34  ;;  %18849 = vmatprep.subr.msk.bf16.mxu0 %vm19999_vm13, %v25646_v34 }
 0xbad   : > { %18913 = vmatprep.subr.msk.bf16.mxu1 %vm20007_vm12, %v25646_v34 }
 0xbaf   : > { %18851 = vmatpush3.bf16.msk.msra.mxu0 %vm19999_vm13, %v25646_v34 }
 0xbb0   : > { %18915 = vmatpush3.bf16.msk.msra.mxu1 %vm20007_vm12, %v25646_v34  ;;  %18853 = vmatprep.subr.msk.bf16.mxu0 %vm25652_vm2, %v25646_v34 }
 0xbb1   : > { %18917 = vmatprep.subr.msk.bf16.mxu1 %vm25654_vm0, %v25646_v34 }
 0xbb3   : > { %18855 = vmatpush3.bf16.msk.msra.mxu0 %vm25652_vm2, %v25646_v34 }
 0xbb4   : > { %18919 = vmatpush3.bf16.msk.msra.mxu1 %vm25654_vm0, %v25646_v34  ;;  %18857 = vmatprep.subr.msk.bf16.mxu0 %vm25816_vm6, %v25646_v34 }
 0xbb5   : > { %18921 = vmatprep.subr.msk.bf16.mxu1 %vm25817_vm9, %v25646_v34 }
 0xbb7   : > { %18859 = vmatpush3.bf16.msk.msra.mxu0 %vm25816_vm6, %v25646_v34 }
 0xbb8   : > { %18923 = vmatpush3.bf16.msk.msra.mxu1 %vm25817_vm9, %v25646_v34  ;;  %18861 = vmatprep.subr.msk.bf16.mxu0 %vm25818_vm5, %v25646_v34 }
 0xbb9   : > { %18925 = vmatprep.subr.msk.bf16.mxu1 %vm25819_vm15, %v25646_v34 }
 0xbbb   : > { %18863 = vmatpush3.bf16.msk.msra.mxu0 %vm25818_vm5, %v25646_v34 }
 0xbbc   : > { %18927 = vmatpush3.bf16.msk.msra.mxu1 %vm25819_vm15, %v25646_v34  ;;  %18865 = vmatprep.subr.msk.bf16.mxu0 %vm25820_vm11, %v25646_v34 }
 0xbbd   : > { %18929 = vmatprep.subr.msk.bf16.mxu1 %vm25821_vm8, %v25646_v34 }
 0xbbf   : > { %18867 = vmatpush3.bf16.msk.msra.mxu0 %vm25820_vm11, %v25646_v34 }
 0xbc0   : > { %18931 = vmatpush3.bf16.msk.msra.mxu1 %vm25821_vm8, %v25646_v34  ;;  %18869 = vmatprep.subr.msk.bf16.mxu0 %vm19712_vm3, %v25646_v34 }
 0xbc1   : > { %18933 = vmatprep.subr.msk.bf16.mxu1 %vm25650_vm1, %v25646_v34 }
 0xbc2   : > { %16317 = vmatmul.mubr.f32.vlgmr.msra.gmra.mrb[68].mxu0 %v25835_v17 }
 0xbc3   : > { %16387 = vmatmul.mubr.f32.vlgmr.msra.gmra.mrb[68].mxu1 %v25835_v17  ;;  %18871 = vmatpush3.bf16.msk.msra.mxu0 %vm19712_vm3, %v25646_v34 }
 0xbc4   : > { %16351 = vmatprep.mubr.f32.mxu0 %v25836_v5  ;;  %18935 = vmatpush3.bf16.msk.msra.mxu1 %vm25650_vm1, %v25646_v34 }
 0xbc5   : > { %16421 = vmatprep.mubr.f32.mxu1 %v25836_v5  ;;  %18873 = vmatprep.subr.msk.bf16.mxu0 %vm19915_vm14, %v25646_v34 }
 0xbc6   : > { %18937 = vmatprep.subr.msk.bf16.mxu1 %vm25651_vm10, %v25646_v34 }
 0xbc7   : > { %18875 = vmatpush3.bf16.msk.msra.mxu0 %vm19915_vm14, %v25646_v34 }
 0xbc8   : > { %18939 = vmatpush3.bf16.msk.msra.mxu1 %vm25651_vm10, %v25646_v34  ;;  %18877 = vmatprep.subr.msk.bf16.mxu0 %vm19962_vm7, %v25646_v34 }
 0xbc9   : > { %18941 = vmatprep.subr.msk.bf16.mxu1 %vm19975_vm4, %v25646_v34 }
 0xbcb   : > { %18879 = vmatpush3.bf16.msk.msra.mxu0 %vm19962_vm7, %v25646_v34 }
 0xbcc   : > { %18943 = vmatpush3.bf16.msk.msra.mxu1 %vm19975_vm4, %v25646_v34  ;;  %18881 = vmatprep.subr.msk.bf16.mxu0 %vm19999_vm13, %v25646_v34 }
 0xbcd   : > { %18945 = vmatprep.subr.msk.bf16.mxu1 %vm20007_vm12, %v25646_v34 }
 0xbcf   : > { %18883 = vmatpush3.bf16.msk.msra.mxu0 %vm19999_vm13, %v25646_v34 }
 0xbd0   : > { %18947 = vmatpush3.bf16.msk.msra.mxu1 %vm20007_vm12, %v25646_v34  ;;  %18885 = vmatprep.subr.msk.bf16.mxu0 %vm25652_vm2, %v25646_v34 }
 0xbd1   : > { %18949 = vmatprep.subr.msk.bf16.mxu1 %vm25654_vm0, %v25646_v34 }
 0xbd3   : > { %18887 = vmatpush3.bf16.msk.msra.mxu0 %vm25652_vm2, %v25646_v34 }
 0xbd4   : > { %18951 = vmatpush3.bf16.msk.msra.mxu1 %vm25654_vm0, %v25646_v34  ;;  %18889 = vmatprep.subr.msk.bf16.mxu0 %vm25816_vm6, %v25646_v34 }
 0xbd5   : > { %18953 = vmatprep.subr.msk.bf16.mxu1 %vm25817_vm9, %v25646_v34 }
 0xbd7   : > { %18891 = vmatpush3.bf16.msk.msra.mxu0 %vm25816_vm6, %v25646_v34 }
 0xbd8   : > { %18955 = vmatpush3.bf16.msk.msra.mxu1 %vm25817_vm9, %v25646_v34  ;;  %18893 = vmatprep.subr.msk.bf16.mxu0 %vm25818_vm5, %v25646_v34 }
 0xbd9   : > { %18957 = vmatprep.subr.msk.bf16.mxu1 %vm25819_vm15, %v25646_v34 }
 0xbdb   : > { %18895 = vmatpush3.bf16.msk.msra.mxu0 %vm25818_vm5, %v25646_v34 }
 0xbdc   : > { %18959 = vmatpush3.bf16.msk.msra.mxu1 %vm25819_vm15, %v25646_v34  ;;  %18897 = vmatprep.subr.msk.bf16.mxu0 %vm25820_vm11, %v25646_v34 }
 0xbdd   : > { %18961 = vmatprep.subr.msk.bf16.mxu1 %vm25821_vm8, %v25646_v34 }
 0xbdf   : > { %18899 = vmatpush3.bf16.msk.msra.mxu0 %vm25820_vm11, %v25646_v34 }
 0xbe0   : > { %18963 = vmatpush3.bf16.msk.msra.mxu1 %vm25821_vm8, %v25646_v34  ;;  %18965 = vmatprep.subr.msk.bf16.mxu0 %vm19712_vm3, %v25646_v34 }
 0xbe1   : > { %19029 = vmatprep.subr.msk.bf16.mxu1 %vm25650_vm1, %v25646_v34 }
 0xbe2   : > { %16352 = vmatmul.mubr.f32.vlgmr.msra.gmra.mrb[68].mxu0 %v25837_v1 }
 0xbe3   : > { %16422 = vmatmul.mubr.f32.vlgmr.msra.gmra.mrb[68].mxu1 %v25837_v1  ;;  %18967 = vmatpush3.bf16.msk.msra.mxu0 %vm19712_vm3, %v25646_v34 }
 0xbe4   : > { %19031 = vmatpush3.bf16.msk.msra.mxu1 %vm25650_vm1, %v25646_v34  ;;  %18969 = vmatprep.subr.msk.bf16.mxu0 %vm19915_vm14, %v25646_v34 }
 0xbe5   : > { %19033 = vmatprep.subr.msk.bf16.mxu1 %vm25651_vm10, %v25646_v34  ;;  %16456 = vmatprep.mubr.f32.mxu0 %v24539_v20 }
 0xbe6   : > { %16526 = vmatprep.mubr.f32.mxu1 %v24539_v20 }
 0xbe7   : > { %18971 = vmatpush3.bf16.msk.msra.mxu0 %vm19915_vm14, %v25646_v34 }
 0xbe8   : > { %19035 = vmatpush3.bf16.msk.msra.mxu1 %vm25651_vm10, %v25646_v34  ;;  %18973 = vmatprep.subr.msk.bf16.mxu0 %vm19962_vm7, %v25646_v34 }
 0xbe9   : > { %19037 = vmatprep.subr.msk.bf16.mxu1 %vm19975_vm4, %v25646_v34 }
 0xbeb   : > { %18975 = vmatpush3.bf16.msk.msra.mxu0 %vm19962_vm7, %v25646_v34 }
 0xbec   : > { %19039 = vmatpush3.bf16.msk.msra.mxu1 %vm19975_vm4, %v25646_v34  ;;  %18977 = vmatprep.subr.msk.bf16.mxu0 %vm19999_vm13, %v25646_v34 }
 0xbed   : > { %19041 = vmatprep.subr.msk.bf16.mxu1 %vm20007_vm12, %v25646_v34 }
 0xbef   : > { %18979 = vmatpush3.bf16.msk.msra.mxu0 %vm19999_vm13, %v25646_v34 }
 0xbf0   : > { %19043 = vmatpush3.bf16.msk.msra.mxu1 %vm20007_vm12, %v25646_v34  ;;  %18981 = vmatprep.subr.msk.bf16.mxu0 %vm25652_vm2, %v25646_v34 }
 0xbf1   : > { %19045 = vmatprep.subr.msk.bf16.mxu1 %vm25654_vm0, %v25646_v34 }
 0xbf3   : > { %18983 = vmatpush3.bf16.msk.msra.mxu0 %vm25652_vm2, %v25646_v34 }
 0xbf4   : > { %19047 = vmatpush3.bf16.msk.msra.mxu1 %vm25654_vm0, %v25646_v34  ;;  %18985 = vmatprep.subr.msk.bf16.mxu0 %vm25816_vm6, %v25646_v34 }
 0xbf5   : > { %19049 = vmatprep.subr.msk.bf16.mxu1 %vm25817_vm9, %v25646_v34 }
 0xbf7   : > { %18987 = vmatpush3.bf16.msk.msra.mxu0 %vm25816_vm6, %v25646_v34 }
 0xbf8   : > { %19051 = vmatpush3.bf16.msk.msra.mxu1 %vm25817_vm9, %v25646_v34  ;;  %18989 = vmatprep.subr.msk.bf16.mxu0 %vm25818_vm5, %v25646_v34 }
 0xbf9   : > { %19053 = vmatprep.subr.msk.bf16.mxu1 %vm25819_vm15, %v25646_v34 }
 0xbfb   : > { %18991 = vmatpush3.bf16.msk.msra.mxu0 %vm25818_vm5, %v25646_v34 }
 0xbfc   : > { %19055 = vmatpush3.bf16.msk.msra.mxu1 %vm25819_vm15, %v25646_v34  ;;  %18993 = vmatprep.subr.msk.bf16.mxu0 %vm25820_vm11, %v25646_v34 }
 0xbfd   : > { %19057 = vmatprep.subr.msk.bf16.mxu1 %vm25821_vm8, %v25646_v34 }
 0xbff   : > { %18995 = vmatpush3.bf16.msk.msra.mxu0 %vm25820_vm11, %v25646_v34 }
 0xc00   : > { %19059 = vmatpush3.bf16.msk.msra.mxu1 %vm25821_vm8, %v25646_v34  ;;  %18997 = vmatprep.subr.msk.bf16.mxu0 %vm19712_vm3, %v25646_v34 }
 0xc01   : > { %19061 = vmatprep.subr.msk.bf16.mxu1 %vm25650_vm1, %v25646_v34 }
 0xc02   : > { %16457 = vmatmul.mubr.f32.vlgmr.msra.gmra.mrb[70].mxu0 %v24523_v57 }
 0xc03   : > { %16527 = vmatmul.mubr.f32.vlgmr.msra.gmra.mrb[70].mxu1 %v24523_v57  ;;  %18999 = vmatpush3.bf16.msk.msra.mxu0 %vm19712_vm3, %v25646_v34 }
 0xc04   : > { %19063 = vmatpush3.bf16.msk.msra.mxu1 %vm25650_vm1, %v25646_v34  ;;  %19001 = vmatprep.subr.msk.bf16.mxu0 %vm19915_vm14, %v25646_v34 }
 0xc05   : > { %19065 = vmatprep.subr.msk.bf16.mxu1 %vm25651_vm10, %v25646_v34  ;;  %16491 = vmatprep.mubr.f32.mxu0 %v24525_v54 }
 0xc06   : > { %16561 = vmatprep.mubr.f32.mxu1 %v24525_v54 }
 0xc07   : > { %19003 = vmatpush3.bf16.msk.msra.mxu0 %vm19915_vm14, %v25646_v34 }
 0xc08   : > { %19067 = vmatpush3.bf16.msk.msra.mxu1 %vm25651_vm10, %v25646_v34  ;;  %19005 = vmatprep.subr.msk.bf16.mxu0 %vm19962_vm7, %v25646_v34 }
 0xc09   : > { %19069 = vmatprep.subr.msk.bf16.mxu1 %vm19975_vm4, %v25646_v34 }
 0xc0b   : > { %19007 = vmatpush3.bf16.msk.msra.mxu0 %vm19962_vm7, %v25646_v34 }
 0xc0c   : > { %19071 = vmatpush3.bf16.msk.msra.mxu1 %vm19975_vm4, %v25646_v34  ;;  %19009 = vmatprep.subr.msk.bf16.mxu0 %vm19999_vm13, %v25646_v34 }
 0xc0d   : > { %19073 = vmatprep.subr.msk.bf16.mxu1 %vm20007_vm12, %v25646_v34 }
 0xc0f   : > { %19011 = vmatpush3.bf16.msk.msra.mxu0 %vm19999_vm13, %v25646_v34 }
 0xc10   : > { %19075 = vmatpush3.bf16.msk.msra.mxu1 %vm20007_vm12, %v25646_v34  ;;  %19013 = vmatprep.subr.msk.bf16.mxu0 %vm25652_vm2, %v25646_v34 }
 0xc11   : > { %19077 = vmatprep.subr.msk.bf16.mxu1 %vm25654_vm0, %v25646_v34 }
 0xc13   : > { %19015 = vmatpush3.bf16.msk.msra.mxu0 %vm25652_vm2, %v25646_v34 }
 0xc14   : > { %19079 = vmatpush3.bf16.msk.msra.mxu1 %vm25654_vm0, %v25646_v34  ;;  %19017 = vmatprep.subr.msk.bf16.mxu0 %vm25816_vm6, %v25646_v34 }
 0xc15   : > { %19081 = vmatprep.subr.msk.bf16.mxu1 %vm25817_vm9, %v25646_v34 }
 0xc17   : > { %19019 = vmatpush3.bf16.msk.msra.mxu0 %vm25816_vm6, %v25646_v34 }
 0xc18   : > { %19083 = vmatpush3.bf16.msk.msra.mxu1 %vm25817_vm9, %v25646_v34  ;;  %19021 = vmatprep.subr.msk.bf16.mxu0 %vm25818_vm5, %v25646_v34 }
 0xc19   : > { %19085 = vmatprep.subr.msk.bf16.mxu1 %vm25819_vm15, %v25646_v34 }
 0xc1b   : > { %19023 = vmatpush3.bf16.msk.msra.mxu0 %vm25818_vm5, %v25646_v34 }
 0xc1c   : > { %19087 = vmatpush3.bf16.msk.msra.mxu1 %vm25819_vm15, %v25646_v34  ;;  %19025 = vmatprep.subr.msk.bf16.mxu0 %vm25820_vm11, %v25646_v34 }
 0xc1d   : > { %19089 = vmatprep.subr.msk.bf16.mxu1 %vm25821_vm8, %v25646_v34 }
 0xc1f   : > { %19027 = vmatpush3.bf16.msk.msra.mxu0 %vm25820_vm11, %v25646_v34 }
 0xc20   : > { %19091 = vmatpush3.bf16.msk.msra.mxu1 %vm25821_vm8, %v25646_v34  ;;  %v8923_v34 = vstv %s11931_s26  ;;  %s25132_s26 = sld [smem:[#allocation6 + $0xe7]] }
 0xc21   : > { %v8925_v53 = vmul.f32 %v25838_v13, %v8923_v34  ;;  %v8924_v21 = vmul.f32 %v8923_v34, %v24505_v56  ;;  %v10163_v56 = vmul.f32 %v10162_v31, %v24530_v27 }
 0xc22   : > { %16492 = vmatmul.mubr.f32.vlgmr.msra.gmra.mrb[70].mxu0 %v24521_v9 }
 0xc23   : > { %16562 = vmatmul.mubr.f32.vlgmr.msra.gmra.mrb[70].mxu1 %v24521_v9 }
 0xc75   : > { %v16213_v47 = vpop.f32.mrb[66].mxu0 }
 0xc76   : > { %v10144_v52 = vmul.f32 %v16213_v47, %v10142_v42  ;;  %v10148_v50 = vmul.f32 %v16213_v47, %v10146_v40  ;;  %v10152_v9 = vmul.f32 %v16213_v47, %v10150_v37  ;;  %v10156_v57 = vmul.f32 %v16213_v47, %v10154_v16  ;;  %v16283_v54 = vpop.f32.mrb[66].mxu1  ;;  %v9378_v8 = vpop.f32.mrb[67].mxu0 }
 0xc77   : > { %v10176_v20 = vmul.f32 %v16283_v54, %v10174_v18  ;;  %v10180_v15 = vmul.f32 %v16283_v54, %v10178_v12  ;;  %v10184_v11 = vmul.f32 %v16283_v54, %v10182_v39  ;;  %v10188_v43 = vmul.f32 %v16283_v54, %v10186_v44  ;;  %v9528_v63 = vpop.f32.mrb[67].mxu1 }
 0xc78   : > { %v10294_v3 = vadd.f32 %v10144_v52, %v8917_v36  ;;  %v10328_v30 = vadd.f32 %v10148_v50, %v8921_v22  ;;  %v10362_v55 = vadd.f32 %v10152_v9, %v8925_v53  ;;  %v10396_v26 = vadd.f32 %v10156_v57, %v8929_v2 }
 0xc79   : > { %v10296_v61 = vadd.f32 %v10176_v20, %v10160_v28  ;;  %v10330_v14 = vadd.f32 %v10180_v15, %v10164_v46  ;;  %v10364_v34 = vadd.f32 %v10184_v11, %v10168_v4  ;;  %v10398_v45 = vadd.f32 %v10188_v43, %v10172_v35 }
 0xc7a   : > { %v10143_v27 = vmul.f32 %v10142_v42, %v9378_v8  ;;  %v10147_v25 = vmul.f32 %v10146_v40, %v9378_v8  ;;  %v10151_v31 = vmul.f32 %v10150_v37, %v9378_v8  ;;  %v10155_v32 = vmul.f32 %v10154_v16, %v9378_v8 }
 0xc7b   : > { %v25098_v7 = vadd.f32 %v10296_v61, %v10294_v3  ;;  %v25100_v13 = vadd.f32 %v10330_v14, %v10328_v30  ;;  %v25102_v47 = vadd.f32 %v10364_v34, %v10362_v55  ;;  %v25104_v54 = vadd.f32 %v10398_v45, %v10396_v26 }
 0xc7c   : > { %v10293_v36 = vadd.f32 %v10143_v27, %v8916_v33  ;;  %v10327_v22 = vadd.f32 %v10147_v25, %v8920_v41  ;;  %v10361_v53 = vadd.f32 %v10151_v31, %v8924_v21  ;;  %v10395_v2 = vadd.f32 %v10155_v32, %v8928_v58 }
 0xc7d   : > { %v10175_v28 = vmul.f32 %v10174_v18, %v9528_v63  ;;  %v10179_v46 = vmul.f32 %v10178_v12, %v9528_v63  ;;  %v10183_v4 = vmul.f32 %v10182_v39, %v9528_v63  ;;  %v10187_v35 = vmul.f32 %v10186_v44, %v9528_v63 }
 0xc7e   : > { %v9538_v18 = vadd.f32 %v25835_v17, %v25837_v1  ;;  %v10206_v12 = vstv %s25122_s10  ;;  %v10210_v39 = vstv %s25124_s29  ;;  %v10214_v44 = vstv %s25126_s9  ;;  %s25176_s10 = sld [smem:[#allocation6 + $0xf8]]  ;;  %s25178_s29 = sld [smem:[#allocation6 + $0xf9]] }
 0xc7f   : > { %v10295_v42 = vadd.f32 %v10175_v28, %v10159_v10  ;;  %v10329_v40 = vadd.f32 %v10179_v46, %v10163_v56  ;;  %v10363_v37 = vadd.f32 %v10183_v4, %v10167_v62  ;;  %v10397_v16 = vadd.f32 %v10187_v35, %v10171_v51  ;;  %s25182_s9 = sld [smem:[#allocation6 + $0xfa]] }
 0xc80   : > { %v10218_v10 = vstv %s25128_s20  ;;  %v9537_v56 = vadd.f32 %v25834_v60, %v25836_v5  ;;  %v10208_v17 = vmul.f32 %v10206_v12, %v9538_v18  ;;  %v10212_v1 = vmul.f32 %v10210_v39, %v9538_v18  ;;  %s25184_s20 = sld [smem:[#allocation6 + $0xfb]] }
 0xc81   : > { %v25106_v52 = vadd.f32 %v10295_v42, %v10293_v36  ;;  %v25108_v50 = vadd.f32 %v10329_v40, %v10327_v22  ;;  %v25110_v9 = vadd.f32 %v10363_v37, %v10361_v53  ;;  %v25112_v57 = vadd.f32 %v10397_v16, %v10395_v2 }
 0xc82   : > { %v10254_v62 = vstv %s25130_s7  ;;  %v10258_v51 = vstv %s25132_s26  ;;  %v10216_v8 = vmul.f32 %v10214_v44, %v9538_v18  ;;  %v10220_v20 = vmul.f32 %v10218_v10, %v9538_v18  ;;  %s25186_s7 = sld [smem:[#allocation6 + $0xfc]]  ;;  %s25188_s26 = sld [smem:[#allocation6 + $0xfd]] }
 0xc83   : > { %v10262_v15 = vstv %s25134_s11  ;;  %v10266_v60 = vstv %s25136_s30  ;;  %v10207_v5 = vmul.f32 %v10206_v12, %v9537_v56  ;;  %v10211_v11 = vmul.f32 %v10210_v39, %v9537_v56 }
 0xc84   : > { %v10215_v43 = vmul.f32 %v10214_v44, %v9537_v56  ;;  %v10219_v63 = vmul.f32 %v10218_v10, %v9537_v56  ;;  %v25191_v3 = vmul.f32 %v10254_v62, %v24549_v49  ;;  %v25194_v30 = vmul.f32 %v10254_v62, %v24537_v24 }
 0xc85   : > { %v25197_v55 = vmul.f32 %v10258_v51, %v24549_v49  ;;  %v25200_v26 = vmul.f32 %v10258_v51, %v24537_v24  ;;  %v25203_v61 = vmul.f32 %v10262_v15, %v24549_v49  ;;  %v25206_v14 = vmul.f32 %v10262_v15, %v24537_v24 }
 0xc86   : > { %v25209_v34 = vmul.f32 %v10266_v60, %v24549_v49  ;;  %v25212_v45 = vmul.f32 %v10266_v60, %v24537_v24  ;;  %v10190_v27 = vstv %s25138_s8  ;;  %v10194_v25 = vstv %s25140_s0  ;;  %s10465_s0 = scalar_lea.sflag [#allocation4], %s19513_s6 }
 0xc87   : > { %v10198_v31 = vstv %s25142_s1  ;;  %v10202_v32 = vstv %s25144_s2  ;;  %v10222_v36 = vstv %s25146_s13  ;;  %v10226_v22 = vstv %s25148_s14  ;;  %s19358_s2 = smov [#allocation7]  }
 0xc88   : > { %25839 = vst [vmem:[#allocation29_spill] sm:$0xff] %v25209_v34  ;;  %25840 = vst [vmem:[#allocation30_spill] sm:$0xff] %v25212_v45  ;;  %v10230_v53 = vstv %s25152_s22  ;;  %v10234_v2 = vstv %s25154_s25  ;;  %v10238_v28 = vstv %s25158_s12  ;;  %v10242_v49 = vstv %s25160_s23  ;;  %s19284_s13 = sshll.u32 %s19358_s2, 4  ;;  %s19285_s13 = int_to_ptr.vmem [resolvable:$false] %s19284_s13 }
 0xc89   : > { %v10246_v46 = vstv %s25166_s5  ;;  %v10250_v4 = vstv %s25168_s3  ;;  %s12187_s3 = sshll.u32 %s19407_s19, 10  ;;  %s19286_s14 = scalar_lea.vmem %s19285_s13, 2048 }
 0xc8a   : > { %s25320_s8 = scalar_lea.hbm %s25370_s4, %s12187_s3 }
 0xcb5   : > { %v25114_v33 = vpop.f32.mrb[68].mxu0 }
 0xcb6   : > { %v25116_v41 = vpop.f32.mrb[68].mxu1  ;;  %v25118_v21 = vpop.f32.mrb[69].mxu0  ;;  %v10192_v37 = vmul.f32 %v25114_v33, %v10190_v27  ;;  %v10196_v16 = vmul.f32 %v25114_v33, %v10194_v25  ;;  %v10200_v18 = vmul.f32 %v25114_v33, %v10198_v31  ;;  %v10204_v12 = vmul.f32 %v25114_v33, %v10202_v32 }
 0xcb7   : > { %v25120_v58 = vpop.f32.mrb[69].mxu1  ;;  %v10191_v62 = vmul.f32 %v10190_v27, %v25118_v21  ;;  %v10195_v51 = vmul.f32 %v10194_v25, %v25118_v21  ;;  %v10199_v15 = vmul.f32 %v10198_v31, %v25118_v21  ;;  %v10203_v60 = vmul.f32 %v10202_v32, %v25118_v21 }
 0xcb8   : > { %v10224_v40 = vmul.f32 %v25116_v41, %v10222_v36  ;;  %v10228_v42 = vmul.f32 %v25116_v41, %v10226_v22  ;;  %v10232_v24 = vmul.f32 %v25116_v41, %v10230_v53  ;;  %v10236_v33 = vmul.f32 %v25116_v41, %v10234_v2 }
 0xcb9   : > { %v10298_v39 = vadd.f32 %v10208_v17, %v10192_v37  ;;  %v10332_v44 = vadd.f32 %v10212_v1, %v10196_v16  ;;  %v10366_v10 = vadd.f32 %v10216_v8, %v10200_v18  ;;  %v10400_v56 = vadd.f32 %v10220_v20, %v10204_v12 }
 0xcba   : > { %v10223_v27 = vmul.f32 %v10222_v36, %v25120_v58  ;;  %v10227_v25 = vmul.f32 %v10226_v22, %v25120_v58  ;;  %v10231_v31 = vmul.f32 %v10230_v53, %v25120_v58  ;;  %v10235_v21 = vmul.f32 %v10234_v2, %v25120_v58 }
 0xcbb   : > { %v10297_v32 = vadd.f32 %v10207_v5, %v10191_v62  ;;  %v10331_v35 = vadd.f32 %v10211_v11, %v10195_v51  ;;  %v10365_v38 = vadd.f32 %v10215_v43, %v10199_v15  ;;  %v10399_v6 = vadd.f32 %v10219_v63, %v10203_v60 }
 0xcbc   : > { %v25843_v60 = vstv %s25172_s17  ;;  %s25866_s17 = sshll.u32 %s19513_s6, 6 }
 0xcf5   : > { %v16493_v45 = vpop.f32.mrb[70].mxu0 }
 0xcf6   : > { %v16563_v34 = vpop.f32.mrb[70].mxu1  ;;  %v9982_v48 = vpop.f32.mrb[71].mxu0  ;;  %v10240_v41 = vmul.f32 %v16493_v45, %v10238_v28  ;;  %v10244_v17 = vmul.f32 %v16493_v45, %v10242_v49  ;;  %v10248_v1 = vmul.f32 %v16493_v45, %v10246_v46  ;;  %v10252_v8 = vmul.f32 %v16493_v45, %v10250_v4 }
 0xcf7   : > { %v10239_v20 = vmul.f32 %v10238_v28, %v9982_v48  ;;  %v10243_v37 = vmul.f32 %v10242_v49, %v9982_v48  ;;  %v10247_v36 = vmul.f32 %v10246_v46, %v9982_v48  ;;  %v10251_v16 = vmul.f32 %v10250_v4, %v9982_v48  ;;  %v10132_v22 = vpop.f32.mrb[71].mxu1 }
 0xcf8   : > { %v10300_v18 = vadd.f32 %v10240_v41, %v10224_v40  ;;  %v10334_v53 = vadd.f32 %v10244_v17, %v10228_v42  ;;  %v10368_v12 = vadd.f32 %v10248_v1, %v10232_v24  ;;  %v10402_v58 = vadd.f32 %v10252_v8, %v10236_v33 }
 0xcf9   : > { %v10299_v5 = vadd.f32 %v10239_v20, %v10223_v27  ;;  %v10333_v11 = vadd.f32 %v10243_v37, %v10227_v25  ;;  %v10367_v43 = vadd.f32 %v10247_v36, %v10231_v31  ;;  %v10401_v63 = vadd.f32 %v10251_v16, %v10235_v21 }
 0xcfa   : > { %v10310_v2 = vadd.f32 %v10300_v18, %v10298_v39  ;;  %v10344_v62 = vadd.f32 %v10334_v53, %v10332_v44  ;;  %v10378_v51 = vadd.f32 %v10368_v12, %v10366_v10  ;;  %v10412_v45 = vadd.f32 %v10402_v58, %v10400_v56  ;;  %v25851_v18 = vld [vmem:[#allocation30_spill] sm:$0xff]  ;;  %v25853_v12 = vld [vmem:[#allocation27_spill] sm:$0xff] }
 0xcfb   : > { %v10309_v28 = vadd.f32 %v10299_v5, %v10297_v32  ;;  %v10343_v48 = vadd.f32 %v10333_v11, %v10331_v35  ;;  %v10377_v49 = vadd.f32 %v10367_v43, %v10365_v38  ;;  %v10411_v46 = vadd.f32 %v10401_v63, %v10399_v6  ;;  %v25854_v5 = vld [vmem:[#allocation42_spill] sm:$0xff] }
 0xcfc   : > { %v10314_v4 = vadd.f32 %v10310_v2, %v25098_v7  ;;  %v10348_v24 = vadd.f32 %v10344_v62, %v25100_v13  ;;  %v10382_v42 = vadd.f32 %v10378_v51, %v25102_v47  ;;  %v10416_v40 = vadd.f32 %v10412_v45, %v25104_v54  ;;  %v25855_v43 = vld [vmem:[#allocation46_spill] sm:$0xff]  ;;  %v25856_v62 = vld [vmem:[#allocation43_spill] sm:$0xff] }
 0xcfd   : > { %v10313_v39 = vadd.f32 %v10309_v28, %v25106_v52  ;;  %v10347_v44 = vadd.f32 %v10343_v48, %v25108_v50  ;;  %v10381_v10 = vadd.f32 %v10377_v49, %v25110_v9  ;;  %v10415_v35 = vadd.f32 %v10411_v46, %v25112_v57  ;;  %v25857_v45 = vld [vmem:[#allocation47_spill] sm:$0xff] }
 0xcfe   : > { %v25841_v38 = vstv %s25170_s24  ;;  %v10275_v7 = vmul.f32 %v25843_v60, %v10132_v22  ;;  %v25844_v33 = vmov %v25843_v60  ;;  %v25845_v27 = vstv %s25176_s10  ;;  %s259_s24 = scalar_lea.vmem [#allocation7], %s25866_s17 }
 0xcff   : > { %v10271_v56 = vmul.f32 %v25841_v38, %v10132_v22  ;;  %v25842_v6 = vmov %v25841_v38  ;;  %v10276_v13 = vmul.f32 %v16563_v34, %v25844_v33  ;;  %v10279_v47 = vmul.f32 %v25845_v27, %v10132_v22  ;;  %s10478_s11 = sshll.u32 %s259_s24, 4  ;;  %s25322_s11 = int_to_ptr.vmem [resolvable:$true] %s10478_s11 }
 0xd00   : > { %v10272_v15 = vmul.f32 %v16563_v34, %v25842_v6  ;;  %v25846_v25 = vmov %v25845_v27  ;;  %v25847_v31 = vstv %s25178_s29  ;;  %v10315_v32 = vadd.f32 %v10313_v39, %v24552_v29  ;;  %v25849_v29 = vld [vmem:[#allocation26_spill] sm:$0xff]  ;;  %s19280_s1 = scalar_lea.vmem %s25322_s11, 1024  ;;  %p19287_p1 = scmp.lt.s32.totalorder %s25322_s11, %s19285_s13 }
 0xd01   : > { %v10280_v54 = vmul.f32 %v16563_v34, %v25846_v25  ;;  %v10283_v52 = vmul.f32 %v25847_v31, %v10132_v22  ;;  %v25848_v21 = vmov %v25847_v31  ;;  %v10301_v9 = vadd.f32 %v10271_v56, %v25191_v3  ;;  %v25850_v22 = vld [vmem:[#allocation29_spill] sm:$0xff]  ;;  %p19281_p12 = scmp.ne.s32.totalorder %s25322_s11, %s19280_s1  ;;  %p19288_p4 = scmp.lt.s32.totalorder %s19286_s14, %s19280_s1 }
 0xd02   : > { %v10284_v50 = vmul.f32 %v16563_v34, %v25848_v21  ;;  %v10302_v57 = vadd.f32 %v10272_v15, %v25194_v30  ;;  %v10316_v41 = vadd.f32 %v10314_v4, %v24510_v23  ;;  %v10335_v17 = vadd.f32 %v10275_v7, %v25197_v55  ;;  %v25864_v56 = vld [vmem:[#allocation45_spill] sm:$0xff] }
 0xd03   : > { %v10336_v1 = vadd.f32 %v10276_v13, %v25200_v26  ;;  %v10349_v8 = vadd.f32 %v10347_v44, %v24555_v0  ;;  %v10350_v20 = vadd.f32 %v10348_v24, %v24513_v59  ;;  %v10317_v37 = vadd.f32 %v10315_v32, %v10301_v9  ;;  %v25852_v59 = vld [vmem:[#allocation28_spill] sm:$0xff]  ;;  %v25865_v15 = vld [vmem:[#allocation49_spill] sm:$0xff]  ;;  %p19282_p9 = pnand %p19281_p12, %p25871_p8  ;;  %p19289_p11 = por %p19288_p4, %p19287_p1 }
 0xd04   : > { %v10318_v36 = vadd.f32 %v10316_v41, %v10302_v57  ;;  %v10369_v34 = vadd.f32 %v10279_v47, %v25203_v61  ;;  %v10370_v3 = vadd.f32 %v10280_v54, %v25206_v14  ;;  %v10383_v23 = vadd.f32 %v10381_v10, %v24564_v19  ;;  %v25860_v24 = vld [vmem:[#allocation44_spill] sm:$0xff] }
 0xd05   : > { %v10351_v16 = vadd.f32 %v10349_v8, %v10335_v17  ;;  %v10352_v30 = vadd.f32 %v10350_v20, %v10336_v1  ;;  %v10384_v55 = vadd.f32 %v10382_v42, %v25849_v29  ;;  %v10403_v26 = vadd.f32 %v10283_v52, %v25850_v22  ;;  %p19283_p10 = pneg %p19282_p9 }
 0xd06   : > { %v10404_v0 = vadd.f32 %v10284_v50, %v25851_v18  ;;  %v10417_v53 = vadd.f32 %v10415_v35, %v25852_v59  ;;  %v10418_v61 = vadd.f32 %v10416_v40, %v25853_v12  ;;  %v10385_v58 = vadd.f32 %v10383_v23, %v10369_v34  ;;  %v25861_v40 = vld [vmem:[#allocation48_spill] sm:$0xff] }
 0xd07   : > { %v10386_v14 = vadd.f32 %v10384_v55, %v10370_v3  ;;  %v10421_v11 = vadd.f32 %v10317_v37, %v25854_v5  ;;  %v10422_v19 = vadd.f32 %v10318_v36, %v25855_v43  ;;  %v10431_v51 = vadd.f32 %v10351_v16, %v25856_v62  ;;  %p19290_p0 = pnand %p19289_p11, %p19283_p10 }
 0xd08   : > { %v10419_v63 = vadd.f32 %v10417_v53, %v10403_v26  ;;  %v10420_v2 = vadd.f32 %v10418_v61, %v10404_v0  ;;  %v10432_v28 = vadd.f32 %v10352_v30, %v25857_v45  ;;  %v25858_v48 = vstv %s25182_s9 }
 0xd09   : > { %v10425_v49 = vadd.f32 %v25858_v48, %v10421_v11  ;;  %v25859_v46 = vmov %v25858_v48  ;;  %v10442_v42 = vadd.f32 %v10385_v58, %v25860_v24  ;;  %v10443_v39 = vadd.f32 %v10386_v14, %v25861_v40 }
 0xd0a   : > { %v10426_v4 = vadd.f32 %v25859_v46, %v10422_v19  ;;  %v25862_v44 = vstv %s25184_s20  ;;  %v10453_v6 = vadd.f32 %v10419_v63, %v25864_v56  ;;  %v10454_v60 = vadd.f32 %v10420_v2, %v25865_v15 }
 0xd0b   : > { %v10435_v10 = vadd.f32 %v25862_v44, %v10431_v51  ;;  %v25863_v35 = vmov %v25862_v44  ;;  %v10427_v7 = vmax.f32 %v10425_v49, 0.0  ;;  %v25867_v13 = vstv %s25186_s7 }
 0xd0c   : > { %v10436_v38 = vadd.f32 %v25863_v35, %v10432_v28  ;;  %v10428_v33 = vmax.f32 %v10426_v4, 0.0  ;;  %v10446_v27 = vadd.f32 %v25867_v13, %v10442_v42  ;;  %v25868_v47 = vmov %v25867_v13 }
 0xd0d   : > { %v10447_v25 = vadd.f32 %v25868_v47, %v10443_v39  ;;  %v10437_v54 = vmax.f32 %v10435_v10, 0.0  ;;  %v25869_v52 = vstv %s25188_s26  ;;  %10429 = vst [vmem:[%s259_s24] sm:$0xff] %v10427_v7 }
 0xd0e   : > { %v10438_v31 = vmax.f32 %v10436_v38, 0.0  ;;  %v10457_v21 = vadd.f32 %v25869_v52, %v10453_v6  ;;  %v25870_v50 = vmov %v25869_v52  ;;  %10430 = vst [vmem:[%s259_s24 + $0x8] sm:$0xff] %v10428_v33  ;;  %v10448_v57 = vmax.f32 %v10446_v27, 0.0 }
 0xd0f   : > { %v10458_v9 = vadd.f32 %v25870_v50, %v10454_v60  ;;  %v10449_v32 = vmax.f32 %v10447_v25, 0.0  ;;  %12171 = vst [vmem:[%s259_s24 + $0x10] sm:$0xff] %v10437_v54 }
 0xd10   : > { %12172 = vst [vmem:[%s259_s24 + $0x18] sm:$0xff] %v10438_v31  ;;  %v10459_v41 = vmax.f32 %v10457_v21, 0.0  ;;  %12174 = vst [vmem:[%s259_s24 + $0x20] sm:$0xff] %v10448_v57 }
 0xd11   : > { %v10460_v17 = vmax.f32 %v10458_v9, 0.0  ;;  %12175 = vst [vmem:[%s259_s24 + $0x28] sm:$0xff] %v10449_v32 }
 0xd12   : > { %12177 = vst [vmem:[%s259_s24 + $0x30] sm:$0xff] %v10459_v41 }
 0xd13   : > { %12178 = vst [vmem:[%s259_s24 + $0x38] sm:$0xff] %v10460_v17 }
 0xd14   : > { %19293 = shalt.err (!%p19290_p0)
}
 0xd15   : > { %s19294_s22 = scalar_lea.hbm %s25320_s8, 1024  ;;  %s19298_s23 = scalar_lea.hbm %s25370_s4, 2048 }
 0xd16   : > { %p19295_p2 = scmp.ne.s32.totalorder %s25320_s8, %s19294_s22  ;;  %p19299_p3 = scmp.lt.u32.totalorder %s25320_s8, %s25370_s4 }
 0xd17   : > { %p19300_p13 = scmp.lt.u32.totalorder %s19298_s23, %s19294_s22  ;;  %p19302_p12 = scmp.lt.u32.totalorder %s19294_s22, %s25320_s8 }
 0xd18   : > { %p19296_p7 = pnand %p19295_p2, %p25871_p8 }
 0xd19   : > { %p19301_p5 = por %p19300_p13, %p19299_p3 }
 0xd1a   : > { %p19297_p6 = pneg %p19296_p7 }
 0xd1b   : > { %p19303_p9 = por %p19302_p12, %p19301_p5 }
 0xd1d   : > { %p19304_p10 = pnand %p19303_p9, %p19297_p6 }
 0xd1f   : > { %19307 = shalt.err (!%p19304_p10)
}
 0xd20   : > { %s19359_s29 = smov 128   ;;  %s19360_s9 = smov 8  }
 0xd21   : > { %19178 = dma.vmem_to_hbm [thread:$0]  (%p25871_p8), %s25322_s11, 1024, %s25320_s8, %s10465_s0, %s19359_s29, %s19359_s29, %s19360_s9  }
 0xd22 PF: > { %s10493_s20 = sand.u32 1, %s19338_s15   ;;  %p25872_p1 = scmp.ne.s32.totalorder %s25531_s28, 0 }
 0xd23   : > { %p25873_p4 = scmp.ge.s32.totalorder %s19350_s18, 2  ;;  %s10494_s7 = scalar_lea.sflag [#allocation4], %s10493_s20 }
 0xd25   : > { %p19189_p11 = pnand %p25873_p4, %p25872_p1 }
 0xd27   : > { %19333 = dma.done.wait (!%p19189_p11), %s10494_s7, 1024  }
 0xd28   : > { %19335 = vsyncadd (!%p19189_p11), %s10494_s7, 4294966272  ;;  %s25874_s26 = sld [smem:[#allocation11_spill]]  ;;  %s25875_s17 = sld [smem:[#allocation12_spill]] }
 0xd29   : > { %p18_p0 = scmp.ge.s32.totalorder %s19411_s21, 4   ;;  %s25876_s15 = smov %s19342_s16 }
 0xd2a   : > { %s25878_s18 = smov %s19411_s21 }
 0xd2b   :  { %20 = sbr.rel (!%p18_p0) target bundleno = 11 (0xb), region = 108 }
 0xd2e   : > { %s25877_s16 = smov %s25874_s26 }
 0xd32   :  { %10499 = vsyncpa [#allocation3], 1 }
 0xd33   :  { %10501 = vsyncpa [#allocation3 + $0x1], 1 }
 0xd34   :  { %10502 = vsyncpa [#allocation4], 1 }
 0xd35   :  { %10504 = vsyncpa [#allocation4 + $0x1], 1 }
 0xd36   :  { %10505 = vsyncpa [#allocation5], 1 }
 0xd37   :  { %10507 = vsyncpa [#allocation5 + $0x1], 1 }

</bundles_post_ra>
